<compile_context>
chip_gen: v5e
topology: v5e:2x2
jax: 0.10.0
libtpu: 0.0.40
codegen_flags: <defaults>
</compile_context>

<pallas_src>
import functools

import jax
import jax.numpy as jnp
from jax import lax
from jax.experimental import pallas as pl
from jax.experimental.pallas import tpu as pltpu

NEG_SLOPE = 0.2
BN_EPS = 1e-5


# ---------------------------------------------------------------------------
# Conv kernel: VALID KxK stride-1 conv on a row-flattened padded NHWC image,
# with (optionally) the previous layer's BN affine + LeakyReLU fused on the
# input path and the bias fused on the output path.
# ---------------------------------------------------------------------------
def _conv_rows_kernel(x_ref, sc_ref, sh_ref, w_ref, b_ref, o_ref, xs_ref, acc_ref,
                      *, wp, in_act):
    """One (batch, Cout-tile) grid step.

    x_ref : (1, hp*wp, cin) f32   row-flattened padded input
    sc/sh : (1, cin)        f32   per-input-channel BN scale / shift
    w_ref : (kh, kw, cin, TC) bf16
    b_ref : (1, TC)         f32
    o_ref : (1, ho*wp, TC)  f32   W-strided output rows (columns >= wo are junk)
    xs_ref: (hp*wp, cin)    f32   scratch: transformed input, read per tap
    acc_ref:(ho*wp, TC)     f32   scratch accumulator
    """
    kh, kw, _, _ = w_ref.shape
    rows = x_ref.shape[1]
    hp = rows // wp
    ho, wo = hp - kh + 1, wp - kw + 1
    nvalid = (ho - 1) * wp + wo          # strided output rows actually computed

    x = x_ref[0]                                           # (rows, cin) f32
    if in_act:
        x = x * sc_ref[...] + sh_ref[...]                  # BN affine  (f32 VPU)
        x = jnp.where(x >= 0.0, x, NEG_SLOPE * x)          # LeakyReLU  (f32 VPU)
    xs_ref[...] = x                                        # transform applied once

    acc_ref[...] = jnp.zeros_like(acc_ref)
    for ky in range(kh):                                   # static, unrolled taps
        for kx in range(kw):
            off = ky * wp + kx
            lhs = xs_ref[off:off + nvalid, :].astype(jnp.bfloat16)   # bf16 MXU operand
            acc_ref[0:nvalid, :] += jnp.dot(
                lhs, w_ref[ky, kx], preferred_element_type=jnp.float32)
    o_ref[0] = (acc_ref[...] + b_ref[...]).astype(o_ref.dtype)


def _conv_rows(x_rows, hp, wp, w_hwio, bias, scale, shift, *, in_act):
    """Run one conv layer.  Returns (y_rows, (ho, wp, wo)); y_rows is W-strided."""
    n, rows, cin = x_rows.shape
    kh, kw, wcin, cout = w_hwio.shape
    assert wcin == cin and rows == hp * wp
    ho, wo = hp - kh + 1, wp - kw + 1
    out_rows = ho * wp

    # Cout tile: match the 256-wide MXU on v6e/v7x where possible, else 128, else full.
    if cout % 256 == 0:
        tc = 256
    elif cout % 128 == 0:
        tc = 128
    else:
        tc = cout
    nj = cout // tc

    bias = (jnp.zeros((cout,), jnp.float32) if bias is None else bias).reshape(1, cout)
    scale = (jnp.ones((cin,), jnp.float32) if scale is None else scale).reshape(1, cin)
    shift = (jnp.zeros((cin,), jnp.float32) if shift is None else shift).reshape(1, cin)

    # Per-step VMEM estimate: double-buffered in/out/weight blocks + scratch, with headroom.
    est = (2 * rows * cin * 4 + 2 * kh * kw * cin * tc * 2 + 2 * out_rows * tc * 4
           + rows * cin * 4 + out_rows * tc * 4)
    vmem_limit = int(min(max(3 * est // 2 + (4 << 20), 16 << 20), 64 << 20))

    y = pl.pallas_call(
        functools.partial(_conv_rows_kernel, wp=wp, in_act=in_act),
        out_shape=jax.ShapeDtypeStruct((n, out_rows, cout), jnp.float32),
        grid_spec=pltpu.PrefetchScalarGridSpec(
            num_scalar_prefetch=0,
            grid=(n, nj),                 # Cout axis innermost: image block stays resident
            in_specs=[
                pl.BlockSpec((1, rows, cin), lambda i, j: (i, 0, 0)),
                pl.BlockSpec((1, cin), lambda i, j: (0, 0)),
                pl.BlockSpec((1, cin), lambda i, j: (0, 0)),
                pl.BlockSpec((kh, kw, cin, tc), lambda i, j: (0, 0, 0, j)),
                pl.BlockSpec((1, tc), lambda i, j: (0, j)),
            ],
            out_specs=pl.BlockSpec((1, out_rows, tc), lambda i, j: (i, 0, j)),
            scratch_shapes=[
                pltpu.VMEM((rows, cin), jnp.float32),      # transformed input
                pltpu.VMEM((out_rows, tc), jnp.float32),   # f32 accumulator
            ],
        ),
        compiler_params=pltpu.CompilerParams(
            dimension_semantics=("parallel", "parallel"),
            vmem_limit_bytes=vmem_limit),
    )(x_rows, scale, shift, w_hwio, bias)
    return y, (ho, wp, wo)


# ---------------------------------------------------------------------------
# Wrapper-side layout plumbing (pure XLA metadata / single-pass ops)
# ---------------------------------------------------------------------------
def _pad_hw(x, fill):
    """Pad H and W by 1 with a per-channel constant `fill` (single write pass)."""
    n, h, w, c = x.shape
    base = jnp.broadcast_to(fill.astype(x.dtype).reshape(1, 1, 1, c), (n, h + 2, w + 2, c))
    return lax.dynamic_update_slice(base, x, (0, 1, 1, 0))


def _space_to_depth2(x):
    """(N, H, W, C) -> (N, H//2, W//2, 4C); channel order (dy*2 + dx)*C + c."""
    n, h, w, c = x.shape
    x = x.reshape(n, h // 2, 2, w // 2, 2, c)
    x = x.transpose(0, 1, 3, 2, 4, 5)
    return x.reshape(n, h // 2, w // 2, 4 * c)


def _space_to_depth2_weights(w):
    """HWIO (4,4,Cin,Cout) -> (2,2,4*Cin,Cout) matching _space_to_depth2 ordering."""
    kh, kw, cin, cout = w.shape
    w = w.reshape(2, 2, 2, 2, cin, cout)          # (a, dy, b, dx, cin, cout)
    w = w.transpose(0, 2, 1, 3, 4, 5)             # (a, b, dy, dx, cin, cout)
    return w.reshape(2, 2, 4 * cin, cout)


def _im2col_4x4_s2(xp):
    """4x4 patches at stride 2 of a padded NHWC image -> (N, Ho, Wo, 16*C).
    Channel order (ky*4 + kx)*C + c matches w.reshape(16*C, Cout) of HWIO weights."""
    n, hp, wp, c = xp.shape
    ho, wo = (hp - 4) // 2 + 1, (wp - 4) // 2 + 1
    cols = [xp[:, ky:ky + 2 * ho:2, kx:kx + 2 * wo:2, :]
            for ky in range(4) for kx in range(4)]
    return jnp.concatenate(cols, axis=-1)


def _prep(y_rows, geom, fill, *, s2d):
    """Strided conv output rows -> next conv's row-flattened, padded (+s2d) input."""
    ho, wp, wo = geom
    n, _, c = y_rows.shape
    a = y_rows.reshape(n, ho, wp, c)[:, :, :wo, :]   # drop W-strided junk columns
    a = _pad_hw(a, fill)
    if s2d:
        a = _space_to_depth2(a)
    hp2, wp2, c2 = a.shape[1:]
    return a.reshape(n, hp2 * wp2, c2), hp2, wp2


def _bn_affine(y_rows, geom, gamma, beta):
    """Train-mode BatchNorm2d statistics -> per-channel (scale, shift, pad-fill)."""
    ho, wp, wo = geom
    n, _, c = y_rows.shape
    yv = y_rows.reshape(n, ho, wp, c)[:, :, :wo, :]          # fused single read pass
    m1 = jnp.mean(yv, axis=(0, 1, 2))
    m2 = jnp.mean(jnp.square(yv), axis=(0, 1, 2))
    var = jnp.maximum(m2 - jnp.square(m1), 0.0)              # biased (train-mode) variance
    scale = gamma * lax.rsqrt(var + BN_EPS)
    shift = beta - m1 * scale
    safe = jnp.where(scale == 0.0, 1.0, scale)
    fill = jnp.where(scale == 0.0, 0.0, -shift / safe)       # lrelu(fill*scale+shift) == 0
    return scale, shift, fill


# ---------------------------------------------------------------------------
# Forward pass
# ---------------------------------------------------------------------------
def discriminator_forward(x_nchw, params):
    """NLayerDiscriminator(input_nc, ndf, n_layers=3, norm=BatchNorm2d) forward."""
    (w1, b1, w2, g2, be2, w3, g3, be3, w4, g4, be4, w5) = params
    ndf = w1.shape[3]
    cin = w1.shape[2]

    # MXU operands are bf16 (f32 accumulation); pre-cast / pre-layout weights once.
    w1k = w1.reshape(1, 1, 16 * cin, ndf).astype(jnp.bfloat16)             # im2col'd layer 1
    w2k = _space_to_depth2_weights(w2).astype(jnp.bfloat16)
    w3k = _space_to_depth2_weights(w3).astype(jnp.bfloat16)
    w4k = w4.astype(jnp.bfloat16)
    w5k = jnp.pad(w5, ((0, 0), (0, 0), (0, 0), (0, 127))).astype(jnp.bfloat16)  # cout 1->128

    x = jnp.transpose(x_nchw, (0, 2, 3, 1))                                # NCHW -> NHWC
    n = x.shape[0]

    # ---- layer 1: 4x4 stride-2 conv as ONE matmul via wrapper im2col (cin=3 is lane-starved)
    xp = _pad_hw(x, jnp.zeros((cin,), x.dtype))
    cols = _im2col_4x4_s2(xp)                                              # (N, H/2, W/2, 48)
    h1, w1s = cols.shape[1], cols.shape[2]
    y, g = _conv_rows(cols.reshape(n, h1 * w1s, 16 * cin), h1, w1s,
                      w1k, b1, None, None, in_act=False)

    # ---- layer 2 (stride 2): LeakyReLU(conv1) fused into this kernel's input path
    xr, hp, wp = _prep(y, g, jnp.zeros((ndf,), jnp.float32), s2d=True)
    y, g = _conv_rows(xr, hp, wp, w2k, None,
                      jnp.ones((4 * ndf,), jnp.float32),
                      jnp.zeros((4 * ndf,), jnp.float32), in_act=True)

    # ---- layer 3 (stride 2): BN2 + LeakyReLU fused into this kernel's input path
    sc, sh, fl = _bn_affine(y, g, g2, be2)
    xr, hp, wp = _prep(y, g, fl, s2d=True)
    y, g = _conv_rows(xr, hp, wp, w3k, None,
                      jnp.tile(sc, 4), jnp.tile(sh, 4), in_act=True)

    # ---- layer 4 (stride 1): BN3 + LeakyReLU fused
    sc, sh, fl = _bn_affine(y, g, g3, be3)
    xr, hp, wp = _prep(y, g, fl, s2d=False)
    y, g = _conv_rows(xr, hp, wp, w4k, None, sc, sh, in_act=True)

    # ---- layer 5 (stride 1, cout padded 1->128 for lane-dense stores): BN4 + LeakyReLU fused
    sc, sh, fl = _bn_affine(y, g, g4, be4)
    xr, hp, wp = _prep(y, g, fl, s2d=False)
    y, g = _conv_rows(xr, hp, wp, w5k, None, sc, sh, in_act=True)

    ho, wp_o, wo = g
    out = y.reshape(n, ho, wp_o, 128)[:, :, :wo, 0:1]     # drop junk cols + zero-padded cout
    return jnp.transpose(out, (0, 3, 1, 2))               # NHWC -> NCHW


# ---------------------------------------------------------------------------
# Parameters (deterministic synthetic, matching nn.Module shapes/bias flags)
# ---------------------------------------------------------------------------
def make_params(key, input_nc, ndf):
    ks = jax.random.split(key, 12)

    def conv_w(k, cout, cin):
        # nn.Conv2d weight is (Cout, Cin, kh, kw); convert to HWIO for the kernels.
        w = jax.random.normal(k, (cout, cin, 4, 4), jnp.float32) * 0.02
        return jnp.transpose(w, (2, 3, 1, 0))

    w1 = conv_w(ks[0], ndf, input_nc)
    b1 = jax.random.normal(ks[1], (ndf,), jnp.float32) * 0.02     # only conv1 has bias
    w2 = conv_w(ks[2], ndf * 2, ndf)                              # use_bias=False (BatchNorm)
    w3 = conv_w(ks[3], ndf * 4, ndf * 2)
    w4 = conv_w(ks[4], ndf * 8, ndf * 4)
    w5 = conv_w(ks[5], 1, ndf * 8)

    g2 = 1.0 + 0.1 * jax.random.normal(ks[6], (ndf * 2,), jnp.float32)
    be2 = 0.1 * jax.random.normal(ks[7], (ndf * 2,), jnp.float32)
    g3 = 1.0 + 0.1 * jax.random.normal(ks[8], (ndf * 4,), jnp.float32)
    be3 = 0.1 * jax.random.normal(ks[9], (ndf * 4,), jnp.float32)
    g4 = 1.0 + 0.1 * jax.random.normal(ks[10], (ndf * 8,), jnp.float32)
    be4 = 0.1 * jax.random.normal(ks[11], (ndf * 8,), jnp.float32)

    return (w1, b1, w2, g2, be2, w3, g3, be3, w4, g4, be4, w5)


# ---------------------------------------------------------------------------
# Pure-JAX reference (matches PyTorch semantics; train-mode BatchNorm, f32)
# ---------------------------------------------------------------------------
def reference_forward(x_nchw, params):
    (w1, b1, w2, g2, be2, w3, g3, be3, w4, g4, be4, w5) = params
    lrelu = lambda v: jnp.where(v >= 0.0, v, NEG_SLOPE * v)

    def conv(x, w, stride, b=None):
        y = lax.conv_general_dilated(
            x, w, (stride, stride), ((1, 1), (1, 1)),
            dimension_numbers=('NHWC', 'HWIO', 'NHWC'),
            precision=lax.Precision.HIGHEST)
        return y if b is None else y + b

    def bn(x, g, b):
        mean = jnp.mean(x, axis=(0, 1, 2), keepdims=True)
        var = jnp.mean(jnp.square(x - mean), axis=(0, 1, 2), keepdims=True)
        return (x - mean) / jnp.sqrt(var + BN_EPS) * g + b

    x = jnp.transpose(x_nchw, (0, 2, 3, 1))
    x = lrelu(conv(x, w1, 2, b1))
    x = lrelu(bn(conv(x, w2, 2), g2, be2))
    x = lrelu(bn(conv(x, w3, 2), g3, be3))
    x = lrelu(bn(conv(x, w4, 1), g4, be4))
    x = conv(x, w5, 1)
    return jnp.transpose(x, (0, 3, 1, 2))


if __name__ == "__main__":
    # Smallest power-of-two spatial size that keeps every layer non-degenerate
    # (16x16 would shrink to a 0x0 output after the last two k=4,p=1 convs).
    N, C_IN, H, W = 2, 3, 32, 32
    NDF = 32

    key = jax.random.PRNGKey(0)
    kx, kp = jax.random.split(key)
    x = jax.random.normal(kx, (N, C_IN, H, W), jnp.float32)
    params = make_params(kp, C_IN, NDF)

    fwd = jax.jit(discriminator_forward)
    out = jax.block_until_ready(fwd(x, params))
    assert out.shape == (N, 1, 2, 2), out.shape

    ref = reference_forward(x, params)
    err = float(jnp.max(jnp.abs(out - ref)))
    # bf16 MXU operands vs an f32 HIGHEST-precision reference: tolerance relaxed accordingly.
    tol = 5e-2 * float(jnp.max(jnp.abs(ref))) + 2e-2
    assert err < tol, (err, tol)

    print("KERNEL_OK")
</pallas_src>

<mosaic_0001>
module attributes {stable_mosaic.version = 11 : i64} {
  func.func @_conv_rows_kernel(%arg0: i32, %arg1: i32, %arg2: memref<1x256x48xf32, #tpu.memory_space<vmem>>, %arg3: memref<1x48xf32, #tpu.memory_space<vmem>>, %arg4: memref<1x48xf32, #tpu.memory_space<vmem>>, %arg5: memref<1x1x48x32xbf16, #tpu.memory_space<vmem>>, %arg6: memref<1x32xf32, #tpu.memory_space<vmem>>, %arg7: memref<1x256x32xf32, #tpu.memory_space<vmem>>, %arg8: memref<256x48xf32, #tpu.memory_space<vmem>>, %arg9: memref<256x32xf32, #tpu.memory_space<vmem>>) attributes {dimension_semantics = [#tpu.dimension_semantics<parallel>, #tpu.dimension_semantics<parallel>], iteration_bounds = array<i64: 2, 1>, scalar_prefetch = 0 : i64, scratch_operands = 2 : i64, tpu.core_type = #tpu.core_type<tc>, window_params = [{transform_indices = @transform_0, window_bounds = array<i64: 1, 256, 48>}, {pipeline_mode = #tpu.pipeline_mode<synchronous>, transform_indices = @transform_1, window_bounds = array<i64: 1, 48>}, {pipeline_mode = #tpu.pipeline_mode<synchronous>, transform_indices = @transform_2, window_bounds = array<i64: 1, 48>}, {transform_indices = @transform_3, window_bounds = array<i64: 1, 1, 48, 32>}, {transform_indices = @transform_4, window_bounds = array<i64: 1, 32>}, {transform_indices = @transform_5, window_bounds = array<i64: 1, 256, 32>}]} {
    %c0 = arith.constant 0 : index
    %c0_0 = arith.constant 0 : index
    %c0_1 = arith.constant 0 : index
    %0 = vector.load %arg2[%c0, %c0_0, %c0_1] : memref<1x256x48xf32, #tpu.memory_space<vmem>>, vector<1x256x48xf32>
    %1 = vector.shape_cast %0 : vector<1x256x48xf32> to vector<256x48xf32>
    %c0_2 = arith.constant 0 : index
    %c0_3 = arith.constant 0 : index
    %2 = vector.load %arg8[%c0_2, %c0_3] : memref<256x48xf32, #tpu.memory_space<vmem>>, vector<256x48xf32>
    tpu.vector_store %arg8[%c0_2, %c0_3], %1 {strides = array<i32>} : memref<256x48xf32, #tpu.memory_space<vmem>>, vector<256x48xf32>,
    %cst = arith.constant 0.000000e+00 : f32
    %3 = vector.broadcast %cst : f32 to vector<256x32xf32>
    %c0_4 = arith.constant 0 : index
    %c0_5 = arith.constant 0 : index
    %4 = vector.load %arg9[%c0_4, %c0_5] : memref<256x32xf32, #tpu.memory_space<vmem>>, vector<256x32xf32>
    tpu.vector_store %arg9[%c0_4, %c0_5], %3 {strides = array<i32>} : memref<256x32xf32, #tpu.memory_space<vmem>>, vector<256x32xf32>,
    %c0_6 = arith.constant 0 : index
    %c0_7 = arith.constant 0 : index
    %5 = vector.load %arg8[%c0_6, %c0_7] : memref<256x48xf32, #tpu.memory_space<vmem>>, vector<256x48xf32>
    %6 = arith.truncf %5 : vector<256x48xf32> to vector<256x48xbf16>
    %c0_8 = arith.constant 0 : index
    %c0_9 = arith.constant 0 : index
    %7 = vector.load %arg9[%c0_8, %c0_9] : memref<256x32xf32, #tpu.memory_space<vmem>>, vector<256x32xf32>
    %c0_10 = arith.constant 0 : index
    %c0_11 = arith.constant 0 : index
    %c0_12 = arith.constant 0 : index
    %c0_13 = arith.constant 0 : index
    %8 = vector.load %arg5[%c0_10, %c0_11, %c0_12, %c0_13] : memref<1x1x48x32xbf16, #tpu.memory_space<vmem>>, vector<1x1x48x32xbf16>
    %9 = vector.shape_cast %8 : vector<1x1x48x32xbf16> to vector<48x32xbf16>
    %cst_14 = arith.constant dense<0.000000e+00> : vector<256x32xf32>
    %10 = tpu.matmul %6, %9, %cst_14 {dimension_numbers = #tpu.dot_dimension_numbers<[1], [0], [0], [1], [0, 0, 1, 1], [], []>} : vector<256x48xbf16>, vector<48x32xbf16>, vector<256x32xf32> -> vector<256x32xf32>
    %11 = arith.addf %7, %10 : vector<256x32xf32>
    %c0_15 = arith.constant 0 : index
    %c0_16 = arith.constant 0 : index
    %12 = vector.load %arg9[%c0_15, %c0_16] : memref<256x32xf32, #tpu.memory_space<vmem>>, vector<256x32xf32>
    tpu.vector_store %arg9[%c0_15, %c0_16], %11 {strides = array<i32>} : memref<256x32xf32, #tpu.memory_space<vmem>>, vector<256x32xf32>,
    %c0_17 = arith.constant 0 : index
    %c0_18 = arith.constant 0 : index
    %13 = vector.load %arg9[%c0_17, %c0_18] : memref<256x32xf32, #tpu.memory_space<vmem>>, vector<256x32xf32>
    %c0_19 = arith.constant 0 : index
    %c0_20 = arith.constant 0 : index
    %14 = vector.load %arg6[%c0_19, %c0_20] : memref<1x32xf32, #tpu.memory_space<vmem>>, vector<1x32xf32>
    %15 = vector.broadcast %14 : vector<1x32xf32> to vector<256x32xf32>
    %16 = arith.addf %13, %15 : vector<256x32xf32>
    %c0_21 = arith.constant 0 : index
    %c0_22 = arith.constant 0 : index
    %c0_23 = arith.constant 0 : index
    %17 = vector.load %arg7[%c0_21, %c0_22, %c0_23] : memref<1x256x32xf32, #tpu.memory_space<vmem>>, vector<1x256x32xf32>
    %18 = vector.shape_cast %17 : vector<1x256x32xf32> to vector<256x32xf32>
    %19 = vector.shape_cast %16 : vector<256x32xf32> to vector<1x256x32xf32>
    tpu.vector_store %arg7[%c0_21, %c0_22, %c0_23], %19 {strides = array<i32>} : memref<1x256x32xf32, #tpu.memory_space<vmem>>, vector<1x256x32xf32>,
    return
  }
  func.func @transform_0(%arg0: i32, %arg1: i32) -> (i32, i32, i32) {
    %c0_i32 = arith.constant 0 : i32
    %c0_i32_0 = arith.constant 0 : i32
    %c0_i32_1 = arith.constant 0 : i32
    return %arg0, %c0_i32, %c0_i32_0 : i32, i32, i32
  }
  func.func @transform_1(%arg0: i32, %arg1: i32) -> (i32, i32) {
    %c0_i32 = arith.constant 0 : i32
    %c0_i32_0 = arith.constant 0 : i32
    %c0_i32_1 = arith.constant 0 : i32
    return %c0_i32, %c0_i32_0 : i32, i32
  }
  func.func @transform_2(%arg0: i32, %arg1: i32) -> (i32, i32) {
    %c0_i32 = arith.constant 0 : i32
    %c0_i32_0 = arith.constant 0 : i32
    %c0_i32_1 = arith.constant 0 : i32
    return %c0_i32, %c0_i32_0 : i32, i32
  }
  func.func @transform_3(%arg0: i32, %arg1: i32) -> (i32, i32, i32, i32) {
    %c0_i32 = arith.constant 0 : i32
    %c0_i32_0 = arith.constant 0 : i32
    %c0_i32_1 = arith.constant 0 : i32
    %c0_i32_2 = arith.constant 0 : i32
    return %c0_i32, %c0_i32_0, %c0_i32_1, %arg1 : i32, i32, i32, i32
  }
  func.func @transform_4(%arg0: i32, %arg1: i32) -> (i32, i32) {
    %c0_i32 = arith.constant 0 : i32
    %c0_i32_0 = arith.constant 0 : i32
    return %c0_i32, %arg1 : i32, i32
  }
  func.func @transform_5(%arg0: i32, %arg1: i32) -> (i32, i32, i32) {
    %c0_i32 = arith.constant 0 : i32
    %c0_i32_0 = arith.constant 0 : i32
    return %arg0, %c0_i32, %arg1 : i32, i32, i32
  }
}

module attributes {stable_mosaic.version = 11 : i64} {
  func.func @_conv_rows_kernel(%arg0: i32, %arg1: i32, %arg2: memref<1x81x128xf32, #tpu.memory_space<vmem>>, %arg3: memref<1x128xf32, #tpu.memory_space<vmem>>, %arg4: memref<1x128xf32, #tpu.memory_space<vmem>>, %arg5: memref<2x2x128x64xbf16, #tpu.memory_space<vmem>>, %arg6: memref<1x64xf32, #tpu.memory_space<vmem>>, %arg7: memref<1x72x64xf32, #tpu.memory_space<vmem>>, %arg8: memref<81x128xf32, #tpu.memory_space<vmem>>, %arg9: memref<72x64xf32, #tpu.memory_space<vmem>>) attributes {dimension_semantics = [#tpu.dimension_semantics<parallel>, #tpu.dimension_semantics<parallel>], iteration_bounds = array<i64: 2, 1>, scalar_prefetch = 0 : i64, scratch_operands = 2 : i64, tpu.core_type = #tpu.core_type<tc>, window_params = [{transform_indices = @transform_0, window_bounds = array<i64: 1, 81, 128>}, {pipeline_mode = #tpu.pipeline_mode<synchronous>, transform_indices = @transform_1, window_bounds = array<i64: 1, 128>}, {pipeline_mode = #tpu.pipeline_mode<synchronous>, transform_indices = @transform_2, window_bounds = array<i64: 1, 128>}, {transform_indices = @transform_3, window_bounds = array<i64: 2, 2, 128, 64>}, {transform_indices = @transform_4, window_bounds = array<i64: 1, 64>}, {transform_indices = @transform_5, window_bounds = array<i64: 1, 72, 64>}]} {
    %c0 = arith.constant 0 : index
    %c0_0 = arith.constant 0 : index
    %c0_1 = arith.constant 0 : index
    %0 = vector.load %arg2[%c0, %c0_0, %c0_1] : memref<1x81x128xf32, #tpu.memory_space<vmem>>, vector<1x81x128xf32>
    %1 = vector.shape_cast %0 : vector<1x81x128xf32> to vector<81x128xf32>
    %c0_2 = arith.constant 0 : index
    %c0_3 = arith.constant 0 : index
    %2 = vector.load %arg3[%c0_2, %c0_3] : memref<1x128xf32, #tpu.memory_space<vmem>>, vector<1x128xf32>
    %3 = vector.broadcast %2 : vector<1x128xf32> to vector<81x128xf32>
    %4 = arith.mulf %1, %3 : vector<81x128xf32>
    %c0_4 = arith.constant 0 : index
    %c0_5 = arith.constant 0 : index
    %5 = vector.load %arg4[%c0_4, %c0_5] : memref<1x128xf32, #tpu.memory_space<vmem>>, vector<1x128xf32>
    %6 = vector.broadcast %5 : vector<1x128xf32> to vector<81x128xf32>
    %7 = arith.addf %4, %6 : vector<81x128xf32>
    %cst = arith.constant 0.000000e+00 : f32
    %8 = vector.broadcast %cst : f32 to vector<81x128xf32>
    %9 = arith.cmpf oge, %7, %8 : vector<81x128xf32>
    %cst_6 = arith.constant 2.000000e-01 : f32
    %10 = vector.broadcast %cst_6 : f32 to vector<81x128xf32>
    %11 = arith.mulf %10, %7 : vector<81x128xf32>
    %12 = arith.select %9, %7, %11 : vector<81x128xi1>, vector<81x128xf32>
    %c0_7 = arith.constant 0 : index
    %c0_8 = arith.constant 0 : index
    %13 = vector.load %arg8[%c0_7, %c0_8] : memref<81x128xf32, #tpu.memory_space<vmem>>, vector<81x128xf32>
    tpu.vector_store %arg8[%c0_7, %c0_8], %12 {strides = array<i32>} : memref<81x128xf32, #tpu.memory_space<vmem>>, vector<81x128xf32>,
    %cst_9 = arith.constant 0.000000e+00 : f32
    %14 = vector.broadcast %cst_9 : f32 to vector<72x64xf32>
    %c0_10 = arith.constant 0 : index
    %c0_11 = arith.constant 0 : index
    %15 = vector.load %arg9[%c0_10, %c0_11] : memref<72x64xf32, #tpu.memory_space<vmem>>, vector<72x64xf32>
    tpu.vector_store %arg9[%c0_10, %c0_11], %14 {strides = array<i32>} : memref<72x64xf32, #tpu.memory_space<vmem>>, vector<72x64xf32>,
    %c0_12 = arith.constant 0 : index
    %c0_13 = arith.constant 0 : index
    %16 = vector.load %arg8[%c0_12, %c0_13] : memref<81x128xf32, #tpu.memory_space<vmem>>, vector<71x128xf32>
    %17 = arith.truncf %16 : vector<71x128xf32> to vector<71x128xbf16>
    %c0_14 = arith.constant 0 : index
    %c0_15 = arith.constant 0 : index
    %18 = vector.load %arg9[%c0_14, %c0_15] : memref<72x64xf32, #tpu.memory_space<vmem>>, vector<71x64xf32>
    %c0_16 = arith.constant 0 : index
    %c0_17 = arith.constant 0 : index
    %c0_18 = arith.constant 0 : index
    %c0_19 = arith.constant 0 : index
    %19 = vector.load %arg5[%c0_16, %c0_17, %c0_18, %c0_19] : memref<2x2x128x64xbf16, #tpu.memory_space<vmem>>, vector<1x1x128x64xbf16>
    %20 = vector.shape_cast %19 : vector<1x1x128x64xbf16> to vector<128x64xbf16>
    %cst_20 = arith.constant dense<0.000000e+00> : vector<71x64xf32>
    %21 = tpu.matmul %17, %20, %cst_20 {dimension_numbers = #tpu.dot_dimension_numbers<[1], [0], [0], [1], [0, 0, 1, 1], [], []>} : vector<71x128xbf16>, vector<128x64xbf16>, vector<71x64xf32> -> vector<71x64xf32>
    %22 = arith.addf %18, %21 : vector<71x64xf32>
    %c0_21 = arith.constant 0 : index
    %c0_22 = arith.constant 0 : index
    %23 = vector.load %arg9[%c0_21, %c0_22] : memref<72x64xf32, #tpu.memory_space<vmem>>, vector<71x64xf32>
    tpu.vector_store %arg9[%c0_21, %c0_22], %22 {strides = array<i32>} : memref<72x64xf32, #tpu.memory_space<vmem>>, vector<71x64xf32>,
    %c1 = arith.constant 1 : index
    %c0_23 = arith.constant 0 : index
    %24 = vector.load %arg8[%c1, %c0_23] : memref<81x128xf32, #tpu.memory_space<vmem>>, vector<71x128xf32>
    %25 = arith.truncf %24 : vector<71x128xf32> to vector<71x128xbf16>
    %c0_24 = arith.constant 0 : index
    %c0_25 = arith.constant 0 : index
    %26 = vector.load %arg9[%c0_24, %c0_25] : memref<72x64xf32, #tpu.memory_space<vmem>>, vector<71x64xf32>
    %c0_26 = arith.constant 0 : index
    %c1_27 = arith.constant 1 : index
    %c0_28 = arith.constant 0 : index
    %c0_29 = arith.constant 0 : index
    %27 = vector.load %arg5[%c0_26, %c1_27, %c0_28, %c0_29] : memref<2x2x128x64xbf16, #tpu.memory_space<vmem>>, vector<1x1x128x64xbf16>
    %28 = vector.shape_cast %27 : vector<1x1x128x64xbf16> to vector<128x64xbf16>
    %cst_30 = arith.constant dense<0.000000e+00> : vector<71x64xf32>
    %29 = tpu.matmul %25, %28, %cst_30 {dimension_numbers = #tpu.dot_dimension_numbers<[1], [0], [0], [1], [0, 0, 1, 1], [], []>} : vector<71x128xbf16>, vector<128x64xbf16>, vector<71x64xf32> -> vector<71x64xf32>
    %30 = arith.addf %26, %29 : vector<71x64xf32>
    %c0_31 = arith.constant 0 : index
    %c0_32 = arith.constant 0 : index
    %31 = vector.load %arg9[%c0_31, %c0_32] : memref<72x64xf32, #tpu.memory_space<vmem>>, vector<71x64xf32>
    tpu.vector_store %arg9[%c0_31, %c0_32], %30 {strides = array<i32>} : memref<72x64xf32, #tpu.memory_space<vmem>>, vector<71x64xf32>,
    %c9 = arith.constant 9 : index
    %c0_33 = arith.constant 0 : index
    %32 = vector.load %arg8[%c9, %c0_33] : memref<81x128xf32, #tpu.memory_space<vmem>>, vector<71x128xf32>
    %33 = arith.truncf %32 : vector<71x128xf32> to vector<71x128xbf16>
    %c0_34 = arith.constant 0 : index
    %c0_35 = arith.constant 0 : index
    %34 = vector.load %arg9[%c0_34, %c0_35] : memref<72x64xf32, #tpu.memory_space<vmem>>, vector<71x64xf32>
    %c1_36 = arith.constant 1 : index
    %c0_37 = arith.constant 0 : index
    %c0_38 = arith.constant 0 : index
    %c0_39 = arith.constant 0 : index
    %35 = vector.load %arg5[%c1_36, %c0_37, %c0_38, %c0_39] : memref<2x2x128x64xbf16, #tpu.memory_space<vmem>>, vector<1x1x128x64xbf16>
    %36 = vector.shape_cast %35 : vector<1x1x128x64xbf16> to vector<128x64xbf16>
    %cst_40 = arith.constant dense<0.000000e+00> : vector<71x64xf32>
    %37 = tpu.matmul %33, %36, %cst_40 {dimension_numbers = #tpu.dot_dimension_numbers<[1], [0], [0], [1], [0, 0, 1, 1], [], []>} : vector<71x128xbf16>, vector<128x64xbf16>, vector<71x64xf32> -> vector<71x64xf32>
    %38 = arith.addf %34, %37 : vector<71x64xf32>
    %c0_41 = arith.constant 0 : index
    %c0_42 = arith.constant 0 : index
    %39 = vector.load %arg9[%c0_41, %c0_42] : memref<72x64xf32, #tpu.memory_space<vmem>>, vector<71x64xf32>
    tpu.vector_store %arg9[%c0_41, %c0_42], %38 {strides = array<i32>} : memref<72x64xf32, #tpu.memory_space<vmem>>, vector<71x64xf32>,
    %c10 = arith.constant 10 : index
    %c0_43 = arith.constant 0 : index
    %40 = vector.load %arg8[%c10, %c0_43] : memref<81x128xf32, #tpu.memory_space<vmem>>, vector<71x128xf32>
    %41 = arith.truncf %40 : vector<71x128xf32> to vector<71x128xbf16>
    %c0_44 = arith.constant 0 : index
    %c0_45 = arith.constant 0 : index
    %42 = vector.load %arg9[%c0_44, %c0_45] : memref<72x64xf32, #tpu.memory_space<vmem>>, vector<71x64xf32>
    %c1_46 = arith.constant 1 : index
    %c1_47 = arith.constant 1 : index
    %c0_48 = arith.constant 0 : index
    %c0_49 = arith.constant 0 : index
    %43 = vector.load %arg5[%c1_46, %c1_47, %c0_48, %c0_49] : memref<2x2x128x64xbf16, #tpu.memory_space<vmem>>, vector<1x1x128x64xbf16>
    %44 = vector.shape_cast %43 : vector<1x1x128x64xbf16> to vector<128x64xbf16>
    %cst_50 = arith.constant dense<0.000000e+00> : vector<71x64xf32>
    %45 = tpu.matmul %41, %44, %cst_50 {dimension_numbers = #tpu.dot_dimension_numbers<[1], [0], [0], [1], [0, 0, 1, 1], [], []>} : vector<71x128xbf16>, vector<128x64xbf16>, vector<71x64xf32> -> vector<71x64xf32>
    %46 = arith.addf %42, %45 : vector<71x64xf32>
    %c0_51 = arith.constant 0 : index
    %c0_52 = arith.constant 0 : index
    %47 = vector.load %arg9[%c0_51, %c0_52] : memref<72x64xf32, #tpu.memory_space<vmem>>, vector<71x64xf32>
    tpu.vector_store %arg9[%c0_51, %c0_52], %46 {strides = array<i32>} : memref<72x64xf32, #tpu.memory_space<vmem>>, vector<71x64xf32>,
    %c0_53 = arith.constant 0 : index
    %c0_54 = arith.constant 0 : index
    %48 = vector.load %arg9[%c0_53, %c0_54] : memref<72x64xf32, #tpu.memory_space<vmem>>, vector<72x64xf32>
    %c0_55 = arith.constant 0 : index
    %c0_56 = arith.constant 0 : index
    %49 = vector.load %arg6[%c0_55, %c0_56] : memref<1x64xf32, #tpu.memory_space<vmem>>, vector<1x64xf32>
    %50 = vector.broadcast %49 : vector<1x64xf32> to vector<72x64xf32>
    %51 = arith.addf %48, %50 : vector<72x64xf32>
    %c0_57 = arith.constant 0 : index
    %c0_58 = arith.constant 0 : index
    %c0_59 = arith.constant 0 : index
    %52 = vector.load %arg7[%c0_57, %c0_58, %c0_59] : memref<1x72x64xf32, #tpu.memory_space<vmem>>, vector<1x72x64xf32>
    %53 = vector.shape_cast %52 : vector<1x72x64xf32> to vector<72x64xf32>
    %54 = vector.shape_cast %51 : vector<72x64xf32> to vector<1x72x64xf32>
    tpu.vector_store %arg7[%c0_57, %c0_58, %c0_59], %54 {strides = array<i32>} : memref<1x72x64xf32, #tpu.memory_space<vmem>>, vector<1x72x64xf32>,
    return
  }
  func.func @transform_0(%arg0: i32, %arg1: i32) -> (i32, i32, i32) {
    %c0_i32 = arith.constant 0 : i32
    %c0_i32_0 = arith.constant 0 : i32
    %c0_i32_1 = arith.constant 0 : i32
    return %arg0, %c0_i32, %c0_i32_0 : i32, i32, i32
  }
  func.func @transform_1(%arg0: i32, %arg1: i32) -> (i32, i32) {
    %c0_i32 = arith.constant 0 : i32
    %c0_i32_0 = arith.constant 0 : i32
    %c0_i32_1 = arith.constant 0 : i32
    return %c0_i32, %c0_i32_0 : i32, i32
  }
  func.func @transform_2(%arg0: i32, %arg1: i32) -> (i32, i32) {
    %c0_i32 = arith.constant 0 : i32
    %c0_i32_0 = arith.constant 0 : i32
    %c0_i32_1 = arith.constant 0 : i32
    return %c0_i32, %c0_i32_0 : i32, i32
  }
  func.func @transform_3(%arg0: i32, %arg1: i32) -> (i32, i32, i32, i32) {
    %c0_i32 = arith.constant 0 : i32
    %c0_i32_0 = arith.constant 0 : i32
    %c0_i32_1 = arith.constant 0 : i32
    %c0_i32_2 = arith.constant 0 : i32
    return %c0_i32, %c0_i32_0, %c0_i32_1, %arg1 : i32, i32, i32, i32
  }
  func.func @transform_4(%arg0: i32, %arg1: i32) -> (i32, i32) {
    %c0_i32 = arith.constant 0 : i32
    %c0_i32_0 = arith.constant 0 : i32
    return %c0_i32, %arg1 : i32, i32
  }
  func.func @transform_5(%arg0: i32, %arg1: i32) -> (i32, i32, i32) {
    %c0_i32 = arith.constant 0 : i32
    %c0_i32_0 = arith.constant 0 : i32
    return %arg0, %c0_i32, %arg1 : i32, i32, i32
  }
}

module attributes {stable_mosaic.version = 11 : i64} {
  func.func @_conv_rows_kernel(%arg0: i32, %arg1: i32, %arg2: memref<1x25x256xf32, #tpu.memory_space<vmem>>, %arg3: memref<1x256xf32, #tpu.memory_space<vmem>>, %arg4: memref<1x256xf32, #tpu.memory_space<vmem>>, %arg5: memref<2x2x256x128xbf16, #tpu.memory_space<vmem>>, %arg6: memref<1x128xf32, #tpu.memory_space<vmem>>, %arg7: memref<1x20x128xf32, #tpu.memory_space<vmem>>, %arg8: memref<25x256xf32, #tpu.memory_space<vmem>>, %arg9: memref<20x128xf32, #tpu.memory_space<vmem>>) attributes {dimension_semantics = [#tpu.dimension_semantics<parallel>, #tpu.dimension_semantics<parallel>], iteration_bounds = array<i64: 2, 1>, scalar_prefetch = 0 : i64, scratch_operands = 2 : i64, tpu.core_type = #tpu.core_type<tc>, window_params = [{transform_indices = @transform_0, window_bounds = array<i64: 1, 25, 256>}, {pipeline_mode = #tpu.pipeline_mode<synchronous>, transform_indices = @transform_1, window_bounds = array<i64: 1, 256>}, {pipeline_mode = #tpu.pipeline_mode<synchronous>, transform_indices = @transform_2, window_bounds = array<i64: 1, 256>}, {transform_indices = @transform_3, window_bounds = array<i64: 2, 2, 256, 128>}, {transform_indices = @transform_4, window_bounds = array<i64: 1, 128>}, {transform_indices = @transform_5, window_bounds = array<i64: 1, 20, 128>}]} {
    %c0 = arith.constant 0 : index
    %c0_0 = arith.constant 0 : index
    %c0_1 = arith.constant 0 : index
    %0 = vector.load %arg2[%c0, %c0_0, %c0_1] : memref<1x25x256xf32, #tpu.memory_space<vmem>>, vector<1x25x256xf32>
    %1 = vector.shape_cast %0 : vector<1x25x256xf32> to vector<25x256xf32>
    %c0_2 = arith.constant 0 : index
    %c0_3 = arith.constant 0 : index
    %2 = vector.load %arg3[%c0_2, %c0_3] : memref<1x256xf32, #tpu.memory_space<vmem>>, vector<1x256xf32>
    %3 = vector.broadcast %2 : vector<1x256xf32> to vector<25x256xf32>
    %4 = arith.mulf %1, %3 : vector<25x256xf32>
    %c0_4 = arith.constant 0 : index
    %c0_5 = arith.constant 0 : index
    %5 = vector.load %arg4[%c0_4, %c0_5] : memref<1x256xf32, #tpu.memory_space<vmem>>, vector<1x256xf32>
    %6 = vector.broadcast %5 : vector<1x256xf32> to vector<25x256xf32>
    %7 = arith.addf %4, %6 : vector<25x256xf32>
    %cst = arith.constant 0.000000e+00 : f32
    %8 = vector.broadcast %cst : f32 to vector<25x256xf32>
    %9 = arith.cmpf oge, %7, %8 : vector<25x256xf32>
    %cst_6 = arith.constant 2.000000e-01 : f32
    %10 = vector.broadcast %cst_6 : f32 to vector<25x256xf32>
    %11 = arith.mulf %10, %7 : vector<25x256xf32>
    %12 = arith.select %9, %7, %11 : vector<25x256xi1>, vector<25x256xf32>
    %c0_7 = arith.constant 0 : index
    %c0_8 = arith.constant 0 : index
    %13 = vector.load %arg8[%c0_7, %c0_8] : memref<25x256xf32, #tpu.memory_space<vmem>>, vector<25x256xf32>
    tpu.vector_store %arg8[%c0_7, %c0_8], %12 {strides = array<i32>} : memref<25x256xf32, #tpu.memory_space<vmem>>, vector<25x256xf32>,
    %cst_9 = arith.constant 0.000000e+00 : f32
    %14 = vector.broadcast %cst_9 : f32 to vector<20x128xf32>
    %c0_10 = arith.constant 0 : index
    %c0_11 = arith.constant 0 : index
    %15 = vector.load %arg9[%c0_10, %c0_11] : memref<20x128xf32, #tpu.memory_space<vmem>>, vector<20x128xf32>
    tpu.vector_store %arg9[%c0_10, %c0_11], %14 {strides = array<i32>} : memref<20x128xf32, #tpu.memory_space<vmem>>, vector<20x128xf32>,
    %c0_12 = arith.constant 0 : index
    %c0_13 = arith.constant 0 : index
    %16 = vector.load %arg8[%c0_12, %c0_13] : memref<25x256xf32, #tpu.memory_space<vmem>>, vector<19x256xf32>
    %17 = arith.truncf %16 : vector<19x256xf32> to vector<19x256xbf16>
    %c0_14 = arith.constant 0 : index
    %c0_15 = arith.constant 0 : index
    %18 = vector.load %arg9[%c0_14, %c0_15] : memref<20x128xf32, #tpu.memory_space<vmem>>, vector<19x128xf32>
    %c0_16 = arith.constant 0 : index
    %c0_17 = arith.constant 0 : index
    %c0_18 = arith.constant 0 : index
    %c0_19 = arith.constant 0 : index
    %19 = vector.load %arg5[%c0_16, %c0_17, %c0_18, %c0_19] : memref<2x2x256x128xbf16, #tpu.memory_space<vmem>>, vector<1x1x256x128xbf16>
    %20 = vector.shape_cast %19 : vector<1x1x256x128xbf16> to vector<256x128xbf16>
    %cst_20 = arith.constant dense<0.000000e+00> : vector<19x128xf32>
    %21 = tpu.matmul %17, %20, %cst_20 {dimension_numbers = #tpu.dot_dimension_numbers<[1], [0], [0], [1], [0, 0, 1, 1], [], []>} : vector<19x256xbf16>, vector<256x128xbf16>, vector<19x128xf32> -> vector<19x128xf32>
    %22 = arith.addf %18, %21 : vector<19x128xf32>
    %c0_21 = arith.constant 0 : index
    %c0_22 = arith.constant 0 : index
    %23 = vector.load %arg9[%c0_21, %c0_22] : memref<20x128xf32, #tpu.memory_space<vmem>>, vector<19x128xf32>
    tpu.vector_store %arg9[%c0_21, %c0_22], %22 {strides = array<i32>} : memref<20x128xf32, #tpu.memory_space<vmem>>, vector<19x128xf32>,
    %c1 = arith.constant 1 : index
    %c0_23 = arith.constant 0 : index
    %24 = vector.load %arg8[%c1, %c0_23] : memref<25x256xf32, #tpu.memory_space<vmem>>, vector<19x256xf32>
    %25 = arith.truncf %24 : vector<19x256xf32> to vector<19x256xbf16>
    %c0_24 = arith.constant 0 : index
    %c0_25 = arith.constant 0 : index
    %26 = vector.load %arg9[%c0_24, %c0_25] : memref<20x128xf32, #tpu.memory_space<vmem>>, vector<19x128xf32>
    %c0_26 = arith.constant 0 : index
    %c1_27 = arith.constant 1 : index
    %c0_28 = arith.constant 0 : index
    %c0_29 = arith.constant 0 : index
    %27 = vector.load %arg5[%c0_26, %c1_27, %c0_28, %c0_29] : memref<2x2x256x128xbf16, #tpu.memory_space<vmem>>, vector<1x1x256x128xbf16>
    %28 = vector.shape_cast %27 : vector<1x1x256x128xbf16> to vector<256x128xbf16>
    %cst_30 = arith.constant dense<0.000000e+00> : vector<19x128xf32>
    %29 = tpu.matmul %25, %28, %cst_30 {dimension_numbers = #tpu.dot_dimension_numbers<[1], [0], [0], [1], [0, 0, 1, 1], [], []>} : vector<19x256xbf16>, vector<256x128xbf16>, vector<19x128xf32> -> vector<19x128xf32>
    %30 = arith.addf %26, %29 : vector<19x128xf32>
    %c0_31 = arith.constant 0 : index
    %c0_32 = arith.constant 0 : index
    %31 = vector.load %arg9[%c0_31, %c0_32] : memref<20x128xf32, #tpu.memory_space<vmem>>, vector<19x128xf32>
    tpu.vector_store %arg9[%c0_31, %c0_32], %30 {strides = array<i32>} : memref<20x128xf32, #tpu.memory_space<vmem>>, vector<19x128xf32>,
    %c5 = arith.constant 5 : index
    %c0_33 = arith.constant 0 : index
    %32 = vector.load %arg8[%c5, %c0_33] : memref<25x256xf32, #tpu.memory_space<vmem>>, vector<19x256xf32>
    %33 = arith.truncf %32 : vector<19x256xf32> to vector<19x256xbf16>
    %c0_34 = arith.constant 0 : index
    %c0_35 = arith.constant 0 : index
    %34 = vector.load %arg9[%c0_34, %c0_35] : memref<20x128xf32, #tpu.memory_space<vmem>>, vector<19x128xf32>
    %c1_36 = arith.constant 1 : index
    %c0_37 = arith.constant 0 : index
    %c0_38 = arith.constant 0 : index
    %c0_39 = arith.constant 0 : index
    %35 = vector.load %arg5[%c1_36, %c0_37, %c0_38, %c0_39] : memref<2x2x256x128xbf16, #tpu.memory_space<vmem>>, vector<1x1x256x128xbf16>
    %36 = vector.shape_cast %35 : vector<1x1x256x128xbf16> to vector<256x128xbf16>
    %cst_40 = arith.constant dense<0.000000e+00> : vector<19x128xf32>
    %37 = tpu.matmul %33, %36, %cst_40 {dimension_numbers = #tpu.dot_dimension_numbers<[1], [0], [0], [1], [0, 0, 1, 1], [], []>} : vector<19x256xbf16>, vector<256x128xbf16>, vector<19x128xf32> -> vector<19x128xf32>
    %38 = arith.addf %34, %37 : vector<19x128xf32>
    %c0_41 = arith.constant 0 : index
    %c0_42 = arith.constant 0 : index
    %39 = vector.load %arg9[%c0_41, %c0_42] : memref<20x128xf32, #tpu.memory_space<vmem>>, vector<19x128xf32>
    tpu.vector_store %arg9[%c0_41, %c0_42], %38 {strides = array<i32>} : memref<20x128xf32, #tpu.memory_space<vmem>>, vector<19x128xf32>,
    %c6 = arith.constant 6 : index
    %c0_43 = arith.constant 0 : index
    %40 = vector.load %arg8[%c6, %c0_43] : memref<25x256xf32, #tpu.memory_space<vmem>>, vector<19x256xf32>
    %41 = arith.truncf %40 : vector<19x256xf32> to vector<19x256xbf16>
    %c0_44 = arith.constant 0 : index
    %c0_45 = arith.constant 0 : index
    %42 = vector.load %arg9[%c0_44, %c0_45] : memref<20x128xf32, #tpu.memory_space<vmem>>, vector<19x128xf32>
    %c1_46 = arith.constant 1 : index
    %c1_47 = arith.constant 1 : index
    %c0_48 = arith.constant 0 : index
    %c0_49 = arith.constant 0 : index
    %43 = vector.load %arg5[%c1_46, %c1_47, %c0_48, %c0_49] : memref<2x2x256x128xbf16, #tpu.memory_space<vmem>>, vector<1x1x256x128xbf16>
    %44 = vector.shape_cast %43 : vector<1x1x256x128xbf16> to vector<256x128xbf16>
    %cst_50 = arith.constant dense<0.000000e+00> : vector<19x128xf32>
    %45 = tpu.matmul %41, %44, %cst_50 {dimension_numbers = #tpu.dot_dimension_numbers<[1], [0], [0], [1], [0, 0, 1, 1], [], []>} : vector<19x256xbf16>, vector<256x128xbf16>, vector<19x128xf32> -> vector<19x128xf32>
    %46 = arith.addf %42, %45 : vector<19x128xf32>
    %c0_51 = arith.constant 0 : index
    %c0_52 = arith.constant 0 : index
    %47 = vector.load %arg9[%c0_51, %c0_52] : memref<20x128xf32, #tpu.memory_space<vmem>>, vector<19x128xf32>
    tpu.vector_store %arg9[%c0_51, %c0_52], %46 {strides = array<i32>} : memref<20x128xf32, #tpu.memory_space<vmem>>, vector<19x128xf32>,
    %c0_53 = arith.constant 0 : index
    %c0_54 = arith.constant 0 : index
    %48 = vector.load %arg9[%c0_53, %c0_54] : memref<20x128xf32, #tpu.memory_space<vmem>>, vector<20x128xf32>
    %c0_55 = arith.constant 0 : index
    %c0_56 = arith.constant 0 : index
    %49 = vector.load %arg6[%c0_55, %c0_56] : memref<1x128xf32, #tpu.memory_space<vmem>>, vector<1x128xf32>
    %50 = vector.broadcast %49 : vector<1x128xf32> to vector<20x128xf32>
    %51 = arith.addf %48, %50 : vector<20x128xf32>
    %c0_57 = arith.constant 0 : index
    %c0_58 = arith.constant 0 : index
    %c0_59 = arith.constant 0 : index
    %52 = vector.load %arg7[%c0_57, %c0_58, %c0_59] : memref<1x20x128xf32, #tpu.memory_space<vmem>>, vector<1x20x128xf32>
    %53 = vector.shape_cast %52 : vector<1x20x128xf32> to vector<20x128xf32>
    %54 = vector.shape_cast %51 : vector<20x128xf32> to vector<1x20x128xf32>
    tpu.vector_store %arg7[%c0_57, %c0_58, %c0_59], %54 {strides = array<i32>} : memref<1x20x128xf32, #tpu.memory_space<vmem>>, vector<1x20x128xf32>,
    return
  }
  func.func @transform_0(%arg0: i32, %arg1: i32) -> (i32, i32, i32) {
    %c0_i32 = arith.constant 0 : i32
    %c0_i32_0 = arith.constant 0 : i32
    %c0_i32_1 = arith.constant 0 : i32
    return %arg0, %c0_i32, %c0_i32_0 : i32, i32, i32
  }
  func.func @transform_1(%arg0: i32, %arg1: i32) -> (i32, i32) {
    %c0_i32 = arith.constant 0 : i32
    %c0_i32_0 = arith.constant 0 : i32
    %c0_i32_1 = arith.constant 0 : i32
    return %c0_i32, %c0_i32_0 : i32, i32
  }
  func.func @transform_2(%arg0: i32, %arg1: i32) -> (i32, i32) {
    %c0_i32 = arith.constant 0 : i32
    %c0_i32_0 = arith.constant 0 : i32
    %c0_i32_1 = arith.constant 0 : i32
    return %c0_i32, %c0_i32_0 : i32, i32
  }
  func.func @transform_3(%arg0: i32, %arg1: i32) -> (i32, i32, i32, i32) {
    %c0_i32 = arith.constant 0 : i32
    %c0_i32_0 = arith.constant 0 : i32
    %c0_i32_1 = arith.constant 0 : i32
    %c0_i32_2 = arith.constant 0 : i32
    return %c0_i32, %c0_i32_0, %c0_i32_1, %arg1 : i32, i32, i32, i32
  }
  func.func @transform_4(%arg0: i32, %arg1: i32) -> (i32, i32) {
    %c0_i32 = arith.constant 0 : i32
    %c0_i32_0 = arith.constant 0 : i32
    return %c0_i32, %arg1 : i32, i32
  }
  func.func @transform_5(%arg0: i32, %arg1: i32) -> (i32, i32, i32) {
    %c0_i32 = arith.constant 0 : i32
    %c0_i32_0 = arith.constant 0 : i32
    return %arg0, %c0_i32, %arg1 : i32, i32, i32
  }
}

module attributes {stable_mosaic.version = 11 : i64} {
  func.func @_conv_rows_kernel(%arg0: i32, %arg1: i32, %arg2: memref<1x36x128xf32, #tpu.memory_space<vmem>>, %arg3: memref<1x128xf32, #tpu.memory_space<vmem>>, %arg4: memref<1x128xf32, #tpu.memory_space<vmem>>, %arg5: memref<4x4x128x256xbf16, #tpu.memory_space<vmem>>, %arg6: memref<1x256xf32, #tpu.memory_space<vmem>>, %arg7: memref<1x18x256xf32, #tpu.memory_space<vmem>>, %arg8: memref<36x128xf32, #tpu.memory_space<vmem>>, %arg9: memref<18x256xf32, #tpu.memory_space<vmem>>) attributes {dimension_semantics = [#tpu.dimension_semantics<parallel>, #tpu.dimension_semantics<parallel>], iteration_bounds = array<i64: 2, 1>, scalar_prefetch = 0 : i64, scratch_operands = 2 : i64, tpu.core_type = #tpu.core_type<tc>, window_params = [{transform_indices = @transform_0, window_bounds = array<i64: 1, 36, 128>}, {pipeline_mode = #tpu.pipeline_mode<synchronous>, transform_indices = @transform_1, window_bounds = array<i64: 1, 128>}, {pipeline_mode = #tpu.pipeline_mode<synchronous>, transform_indices = @transform_2, window_bounds = array<i64: 1, 128>}, {transform_indices = @transform_3, window_bounds = array<i64: 4, 4, 128, 256>}, {transform_indices = @transform_4, window_bounds = array<i64: 1, 256>}, {transform_indices = @transform_5, window_bounds = array<i64: 1, 18, 256>}]} {
    %c0 = arith.constant 0 : index
    %c0_0 = arith.constant 0 : index
    %c0_1 = arith.constant 0 : index
    %0 = vector.load %arg2[%c0, %c0_0, %c0_1] : memref<1x36x128xf32, #tpu.memory_space<vmem>>, vector<1x36x128xf32>
    %1 = vector.shape_cast %0 : vector<1x36x128xf32> to vector<36x128xf32>
    %c0_2 = arith.constant 0 : index
    %c0_3 = arith.constant 0 : index
    %2 = vector.load %arg3[%c0_2, %c0_3] : memref<1x128xf32, #tpu.memory_space<vmem>>, vector<1x128xf32>
    %3 = vector.broadcast %2 : vector<1x128xf32> to vector<36x128xf32>
    %4 = arith.mulf %1, %3 : vector<36x128xf32>
    %c0_4 = arith.constant 0 : index
    %c0_5 = arith.constant 0 : index
    %5 = vector.load %arg4[%c0_4, %c0_5] : memref<1x128xf32, #tpu.memory_space<vmem>>, vector<1x128xf32>
    %6 = vector.broadcast %5 : vector<1x128xf32> to vector<36x128xf32>
    %7 = arith.addf %4, %6 : vector<36x128xf32>
    %cst = arith.constant 0.000000e+00 : f32
    %8 = vector.broadcast %cst : f32 to vector<36x128xf32>
    %9 = arith.cmpf oge, %7, %8 : vector<36x128xf32>
    %cst_6 = arith.constant 2.000000e-01 : f32
    %10 = vector.broadcast %cst_6 : f32 to vector<36x128xf32>
    %11 = arith.mulf %10, %7 : vector<36x128xf32>
    %12 = arith.select %9, %7, %11 : vector<36x128xi1>, vector<36x128xf32>
    %c0_7 = arith.constant 0 : index
    %c0_8 = arith.constant 0 : index
    %13 = vector.load %arg8[%c0_7, %c0_8] : memref<36x128xf32, #tpu.memory_space<vmem>>, vector<36x128xf32>
    tpu.vector_store %arg8[%c0_7, %c0_8], %12 {strides = array<i32>} : memref<36x128xf32, #tpu.memory_space<vmem>>, vector<36x128xf32>,
    %cst_9 = arith.constant 0.000000e+00 : f32
    %14 = vector.broadcast %cst_9 : f32 to vector<18x256xf32>
    %c0_10 = arith.constant 0 : index
    %c0_11 = arith.constant 0 : index
    %15 = vector.load %arg9[%c0_10, %c0_11] : memref<18x256xf32, #tpu.memory_space<vmem>>, vector<18x256xf32>
    tpu.vector_store %arg9[%c0_10, %c0_11], %14 {strides = array<i32>} : memref<18x256xf32, #tpu.memory_space<vmem>>, vector<18x256xf32>,
    %c0_12 = arith.constant 0 : index
    %c0_13 = arith.constant 0 : index
    %16 = vector.load %arg8[%c0_12, %c0_13] : memref<36x128xf32, #tpu.memory_space<vmem>>, vector<15x128xf32>
    %17 = arith.truncf %16 : vector<15x128xf32> to vector<15x128xbf16>
    %c0_14 = arith.constant 0 : index
    %c0_15 = arith.constant 0 : index
    %18 = vector.load %arg9[%c0_14, %c0_15] : memref<18x256xf32, #tpu.memory_space<vmem>>, vector<15x256xf32>
    %c0_16 = arith.constant 0 : index
    %c0_17 = arith.constant 0 : index
    %c0_18 = arith.constant 0 : index
    %c0_19 = arith.constant 0 : index
    %19 = vector.load %arg5[%c0_16, %c0_17, %c0_18, %c0_19] : memref<4x4x128x256xbf16, #tpu.memory_space<vmem>>, vector<1x1x128x256xbf16>
    %20 = vector.shape_cast %19 : vector<1x1x128x256xbf16> to vector<128x256xbf16>
    %cst_20 = arith.constant dense<0.000000e+00> : vector<15x256xf32>
    %21 = tpu.matmul %17, %20, %cst_20 {dimension_numbers = #tpu.dot_dimension_numbers<[1], [0], [0], [1], [0, 0, 1, 1], [], []>} : vector<15x128xbf16>, vector<128x256xbf16>, vector<15x256xf32> -> vector<15x256xf32>
    %22 = arith.addf %18, %21 : vector<15x256xf32>
    %c0_21 = arith.constant 0 : index
    %c0_22 = arith.constant 0 : index
    %23 = vector.load %arg9[%c0_21, %c0_22] : memref<18x256xf32, #tpu.memory_space<vmem>>, vector<15x256xf32>
    tpu.vector_store %arg9[%c0_21, %c0_22], %22 {strides = array<i32>} : memref<18x256xf32, #tpu.memory_space<vmem>>, vector<15x256xf32>,
    %c1 = arith.constant 1 : index
    %c0_23 = arith.constant 0 : index
    %24 = vector.load %arg8[%c1, %c0_23] : memref<36x128xf32, #tpu.memory_space<vmem>>, vector<15x128xf32>
    %25 = arith.truncf %24 : vector<15x128xf32> to vector<15x128xbf16>
    %c0_24 = arith.constant 0 : index
    %c0_25 = arith.constant 0 : index
    %26 = vector.load %arg9[%c0_24, %c0_25] : memref<18x256xf32, #tpu.memory_space<vmem>>, vector<15x256xf32>
    %c0_26 = arith.constant 0 : index
    %c1_27 = arith.constant 1 : index
    %c0_28 = arith.constant 0 : index
    %c0_29 = arith.constant 0 : index
    %27 = vector.load %arg5[%c0_26, %c1_27, %c0_28, %c0_29] : memref<4x4x128x256xbf16, #tpu.memory_space<vmem>>, vector<1x1x128x256xbf16>
    %28 = vector.shape_cast %27 : vector<1x1x128x256xbf16> to vector<128x256xbf16>
    %cst_30 = arith.constant dense<0.000000e+00> : vector<15x256xf32>
    %29 = tpu.matmul %25, %28, %cst_30 {dimension_numbers = #tpu.dot_dimension_numbers<[1], [0], [0], [1], [0, 0, 1, 1], [], []>} : vector<15x128xbf16>, vector<128x256xbf16>, vector<15x256xf32> -> vector<15x256xf32>
    %30 = arith.addf %26, %29 : vector<15x256xf32>
    %c0_31 = arith.constant 0 : index
    %c0_32 = arith.constant 0 : index
    %31 = vector.load %arg9[%c0_31, %c0_32] : memref<18x256xf32, #tpu.memory_space<vmem>>, vector<15x256xf32>
    tpu.vector_store %arg9[%c0_31, %c0_32], %30 {strides = array<i32>} : memref<18x256xf32, #tpu.memory_space<vmem>>, vector<15x256xf32>,
    %c2 = arith.constant 2 : index
    %c0_33 = arith.constant 0 : index
    %32 = vector.load %arg8[%c2, %c0_33] : memref<36x128xf32, #tpu.memory_space<vmem>>, vector<15x128xf32>
    %33 = arith.truncf %32 : vector<15x128xf32> to vector<15x128xbf16>
    %c0_34 = arith.constant 0 : index
    %c0_35 = arith.constant 0 : index
    %34 = vector.load %arg9[%c0_34, %c0_35] : memref<18x256xf32, #tpu.memory_space<vmem>>, vector<15x256xf32>
    %c0_36 = arith.constant 0 : index
    %c2_37 = arith.constant 2 : index
    %c0_38 = arith.constant 0 : index
    %c0_39 = arith.constant 0 : index
    %35 = vector.load %arg5[%c0_36, %c2_37, %c0_38, %c0_39] : memref<4x4x128x256xbf16, #tpu.memory_space<vmem>>, vector<1x1x128x256xbf16>
    %36 = vector.shape_cast %35 : vector<1x1x128x256xbf16> to vector<128x256xbf16>
    %cst_40 = arith.constant dense<0.000000e+00> : vector<15x256xf32>
    %37 = tpu.matmul %33, %36, %cst_40 {dimension_numbers = #tpu.dot_dimension_numbers<[1], [0], [0], [1], [0, 0, 1, 1], [], []>} : vector<15x128xbf16>, vector<128x256xbf16>, vector<15x256xf32> -> vector<15x256xf32>
    %38 = arith.addf %34, %37 : vector<15x256xf32>
    %c0_41 = arith.constant 0 : index
    %c0_42 = arith.constant 0 : index
    %39 = vector.load %arg9[%c0_41, %c0_42] : memref<18x256xf32, #tpu.memory_space<vmem>>, vector<15x256xf32>
    tpu.vector_store %arg9[%c0_41, %c0_42], %38 {strides = array<i32>} : memref<18x256xf32, #tpu.memory_space<vmem>>, vector<15x256xf32>,
    %c3 = arith.constant 3 : index
    %c0_43 = arith.constant 0 : index
    %40 = vector.load %arg8[%c3, %c0_43] : memref<36x128xf32, #tpu.memory_space<vmem>>, vector<15x128xf32>
    %41 = arith.truncf %40 : vector<15x128xf32> to vector<15x128xbf16>
    %c0_44 = arith.constant 0 : index
    %c0_45 = arith.constant 0 : index
    %42 = vector.load %arg9[%c0_44, %c0_45] : memref<18x256xf32, #tpu.memory_space<vmem>>, vector<15x256xf32>
    %c0_46 = arith.constant 0 : index
    %c3_47 = arith.constant 3 : index
    %c0_48 = arith.constant 0 : index
    %c0_49 = arith.constant 0 : index
    %43 = vector.load %arg5[%c0_46, %c3_47, %c0_48, %c0_49] : memref<4x4x128x256xbf16, #tpu.memory_space<vmem>>, vector<1x1x128x256xbf16>
    %44 = vector.shape_cast %43 : vector<1x1x128x256xbf16> to vector<128x256xbf16>
    %cst_50 = arith.constant dense<0.000000e+00> : vector<15x256xf32>
    %45 = tpu.matmul %41, %44, %cst_50 {dimension_numbers = #tpu.dot_dimension_numbers<[1], [0], [0], [1], [0, 0, 1, 1], [], []>} : vector<15x128xbf16>, vector<128x256xbf16>, vector<15x256xf32> -> vector<15x256xf32>
    %46 = arith.addf %42, %45 : vector<15x256xf32>
    %c0_51 = arith.constant 0 : index
    %c0_52 = arith.constant 0 : index
    %47 = vector.load %arg9[%c0_51, %c0_52] : memref<18x256xf32, #tpu.memory_space<vmem>>, vector<15x256xf32>
    tpu.vector_store %arg9[%c0_51, %c0_52], %46 {strides = array<i32>} : memref<18x256xf32, #tpu.memory_space<vmem>>, vector<15x256xf32>,
    %c6 = arith.constant 6 : index
    %c0_53 = arith.constant 0 : index
    %48 = vector.load %arg8[%c6, %c0_53] : memref<36x128xf32, #tpu.memory_space<vmem>>, vector<15x128xf32>
    %49 = arith.truncf %48 : vector<15x128xf32> to vector<15x128xbf16>
    %c0_54 = arith.constant 0 : index
    %c0_55 = arith.constant 0 : index
    %50 = vector.load %arg9[%c0_54, %c0_55] : memref<18x256xf32, #tpu.memory_space<vmem>>, vector<15x256xf32>
    %c1_56 = arith.constant 1 : index
    %c0_57 = arith.constant 0 : index
    %c0_58 = arith.constant 0 : index
    %c0_59 = arith.constant 0 : index
    %51 = vector.load %arg5[%c1_56, %c0_57, %c0_58, %c0_59] : memref<4x4x128x256xbf16, #tpu.memory_space<vmem>>, vector<1x1x128x256xbf16>
    %52 = vector.shape_cast %51 : vector<1x1x128x256xbf16> to vector<128x256xbf16>
    %cst_60 = arith.constant dense<0.000000e+00> : vector<15x256xf32>
    %53 = tpu.matmul %49, %52, %cst_60 {dimension_numbers = #tpu.dot_dimension_numbers<[1], [0], [0], [1], [0, 0, 1, 1], [], []>} : vector<15x128xbf16>, vector<128x256xbf16>, vector<15x256xf32> -> vector<15x256xf32>
    %54 = arith.addf %50, %53 : vector<15x256xf32>
    %c0_61 = arith.constant 0 : index
    %c0_62 = arith.constant 0 : index
    %55 = vector.load %arg9[%c0_61, %c0_62] : memref<18x256xf32, #tpu.memory_space<vmem>>, vector<15x256xf32>
    tpu.vector_store %arg9[%c0_61, %c0_62], %54 {strides = array<i32>} : memref<18x256xf32, #tpu.memory_space<vmem>>, vector<15x256xf32>,
    %c7 = arith.constant 7 : index
    %c0_63 = arith.constant 0 : index
    %56 = vector.load %arg8[%c7, %c0_63] : memref<36x128xf32, #tpu.memory_space<vmem>>, vector<15x128xf32>
    %57 = arith.truncf %56 : vector<15x128xf32> to vector<15x128xbf16>
    %c0_64 = arith.constant 0 : index
    %c0_65 = arith.constant 0 : index
    %58 = vector.load %arg9[%c0_64, %c0_65] : memref<18x256xf32, #tpu.memory_space<vmem>>, vector<15x256xf32>
    %c1_66 = arith.constant 1 : index
    %c1_67 = arith.constant 1 : index
    %c0_68 = arith.constant 0 : index
    %c0_69 = arith.constant 0 : index
    %59 = vector.load %arg5[%c1_66, %c1_67, %c0_68, %c0_69] : memref<4x4x128x256xbf16, #tpu.memory_space<vmem>>, vector<1x1x128x256xbf16>
    %60 = vector.shape_cast %59 : vector<1x1x128x256xbf16> to vector<128x256xbf16>
    %cst_70 = arith.constant dense<0.000000e+00> : vector<15x256xf32>
    %61 = tpu.matmul %57, %60, %cst_70 {dimension_numbers = #tpu.dot_dimension_numbers<[1], [0], [0], [1], [0, 0, 1, 1], [], []>} : vector<15x128xbf16>, vector<128x256xbf16>, vector<15x256xf32> -> vector<15x256xf32>
    %62 = arith.addf %58, %61 : vector<15x256xf32>
    %c0_71 = arith.constant 0 : index
    %c0_72 = arith.constant 0 : index
    %63 = vector.load %arg9[%c0_71, %c0_72] : memref<18x256xf32, #tpu.memory_space<vmem>>, vector<15x256xf32>
    tpu.vector_store %arg9[%c0_71, %c0_72], %62 {strides = array<i32>} : memref<18x256xf32, #tpu.memory_space<vmem>>, vector<15x256xf32>,
    %c8 = arith.constant 8 : index
    %c0_73 = arith.constant 0 : index
    %64 = vector.load %arg8[%c8, %c0_73] : memref<36x128xf32, #tpu.memory_space<vmem>>, vector<15x128xf32>
    %65 = arith.truncf %64 : vector<15x128xf32> to vector<15x128xbf16>
    %c0_74 = arith.constant 0 : index
    %c0_75 = arith.constant 0 : index
    %66 = vector.load %arg9[%c0_74, %c0_75] : memref<18x256xf32, #tpu.memory_space<vmem>>, vector<15x256xf32>
    %c1_76 = arith.constant 1 : index
    %c2_77 = arith.constant 2 : index
    %c0_78 = arith.constant 0 : index
    %c0_79 = arith.constant 0 : index
    %67 = vector.load %arg5[%c1_76, %c2_77, %c0_78, %c0_79] : memref<4x4x128x256xbf16, #tpu.memory_space<vmem>>, vector<1x1x128x256xbf16>
    %68 = vector.shape_cast %67 : vector<1x1x128x256xbf16> to vector<128x256xbf16>
    %cst_80 = arith.constant dense<0.000000e+00> : vector<15x256xf32>
    %69 = tpu.matmul %65, %68, %cst_80 {dimension_numbers = #tpu.dot_dimension_numbers<[1], [0], [0], [1], [0, 0, 1, 1], [], []>} : vector<15x128xbf16>, vector<128x256xbf16>, vector<15x256xf32> -> vector<15x256xf32>
    %70 = arith.addf %66, %69 : vector<15x256xf32>
    %c0_81 = arith.constant 0 : index
    %c0_82 = arith.constant 0 : index
    %71 = vector.load %arg9[%c0_81, %c0_82] : memref<18x256xf32, #tpu.memory_space<vmem>>, vector<15x256xf32>
    tpu.vector_store %arg9[%c0_81, %c0_82], %70 {strides = array<i32>} : memref<18x256xf32, #tpu.memory_space<vmem>>, vector<15x256xf32>,
    %c9 = arith.constant 9 : index
    %c0_83 = arith.constant 0 : index
    %72 = vector.load %arg8[%c9, %c0_83] : memref<36x128xf32, #tpu.memory_space<vmem>>, vector<15x128xf32>
    %73 = arith.truncf %72 : vector<15x128xf32> to vector<15x128xbf16>
    %c0_84 = arith.constant 0 : index
    %c0_85 = arith.constant 0 : index
    %74 = vector.load %arg9[%c0_84, %c0_85] : memref<18x256xf32, #tpu.memory_space<vmem>>, vector<15x256xf32>
    %c1_86 = arith.constant 1 : index
    %c3_87 = arith.constant 3 : index
    %c0_88 = arith.constant 0 : index
    %c0_89 = arith.constant 0 : index
    %75 = vector.load %arg5[%c1_86, %c3_87, %c0_88, %c0_89] : memref<4x4x128x256xbf16, #tpu.memory_space<vmem>>, vector<1x1x128x256xbf16>
    %76 = vector.shape_cast %75 : vector<1x1x128x256xbf16> to vector<128x256xbf16>
    %cst_90 = arith.constant dense<0.000000e+00> : vector<15x256xf32>
    %77 = tpu.matmul %73, %76, %cst_90 {dimension_numbers = #tpu.dot_dimension_numbers<[1], [0], [0], [1], [0, 0, 1, 1], [], []>} : vector<15x128xbf16>, vector<128x256xbf16>, vector<15x256xf32> -> vector<15x256xf32>
    %78 = arith.addf %74, %77 : vector<15x256xf32>
    %c0_91 = arith.constant 0 : index
    %c0_92 = arith.constant 0 : index
    %79 = vector.load %arg9[%c0_91, %c0_92] : memref<18x256xf32, #tpu.memory_space<vmem>>, vector<15x256xf32>
    tpu.vector_store %arg9[%c0_91, %c0_92], %78 {strides = array<i32>} : memref<18x256xf32, #tpu.memory_space<vmem>>, vector<15x256xf32>,
    %c12 = arith.constant 12 : index
    %c0_93 = arith.constant 0 : index
    %80 = vector.load %arg8[%c12, %c0_93] : memref<36x128xf32, #tpu.memory_space<vmem>>, vector<15x128xf32>
    %81 = arith.truncf %80 : vector<15x128xf32> to vector<15x128xbf16>
    %c0_94 = arith.constant 0 : index
    %c0_95 = arith.constant 0 : index
    %82 = vector.load %arg9[%c0_94, %c0_95] : memref<18x256xf32, #tpu.memory_space<vmem>>, vector<15x256xf32>
    %c2_96 = arith.constant 2 : index
    %c0_97 = arith.constant 0 : index
    %c0_98 = arith.constant 0 : index
    %c0_99 = arith.constant 0 : index
    %83 = vector.load %arg5[%c2_96, %c0_97, %c0_98, %c0_99] : memref<4x4x128x256xbf16, #tpu.memory_space<vmem>>, vector<1x1x128x256xbf16>
    %84 = vector.shape_cast %83 : vector<1x1x128x256xbf16> to vector<128x256xbf16>
    %cst_100 = arith.constant dense<0.000000e+00> : vector<15x256xf32>
    %85 = tpu.matmul %81, %84, %cst_100 {dimension_numbers = #tpu.dot_dimension_numbers<[1], [0], [0], [1], [0, 0, 1, 1], [], []>} : vector<15x128xbf16>, vector<128x256xbf16>, vector<15x256xf32> -> vector<15x256xf32>
    %86 = arith.addf %82, %85 : vector<15x256xf32>
    %c0_101 = arith.constant 0 : index
    %c0_102 = arith.constant 0 : index
    %87 = vector.load %arg9[%c0_101, %c0_102] : memref<18x256xf32, #tpu.memory_space<vmem>>, vector<15x256xf32>
    tpu.vector_store %arg9[%c0_101, %c0_102], %86 {strides = array<i32>} : memref<18x256xf32, #tpu.memory_space<vmem>>, vector<15x256xf32>,
    %c13 = arith.constant 13 : index
    %c0_103 = arith.constant 0 : index
    %88 = vector.load %arg8[%c13, %c0_103] : memref<36x128xf32, #tpu.memory_space<vmem>>, vector<15x128xf32>
    %89 = arith.truncf %88 : vector<15x128xf32> to vector<15x128xbf16>
    %c0_104 = arith.constant 0 : index
    %c0_105 = arith.constant 0 : index
    %90 = vector.load %arg9[%c0_104, %c0_105] : memref<18x256xf32, #tpu.memory_space<vmem>>, vector<15x256xf32>
    %c2_106 = arith.constant 2 : index
    %c1_107 = arith.constant 1 : index
    %c0_108 = arith.constant 0 : index
    %c0_109 = arith.constant 0 : index
    %91 = vector.load %arg5[%c2_106, %c1_107, %c0_108, %c0_109] : memref<4x4x128x256xbf16, #tpu.memory_space<vmem>>, vector<1x1x128x256xbf16>
    %92 = vector.shape_cast %91 : vector<1x1x128x256xbf16> to vector<128x256xbf16>
    %cst_110 = arith.constant dense<0.000000e+00> : vector<15x256xf32>
    %93 = tpu.matmul %89, %92, %cst_110 {dimension_numbers = #tpu.dot_dimension_numbers<[1], [0], [0], [1], [0, 0, 1, 1], [], []>} : vector<15x128xbf16>, vector<128x256xbf16>, vector<15x256xf32> -> vector<15x256xf32>
    %94 = arith.addf %90, %93 : vector<15x256xf32>
    %c0_111 = arith.constant 0 : index
    %c0_112 = arith.constant 0 : index
    %95 = vector.load %arg9[%c0_111, %c0_112] : memref<18x256xf32, #tpu.memory_space<vmem>>, vector<15x256xf32>
    tpu.vector_store %arg9[%c0_111, %c0_112], %94 {strides = array<i32>} : memref<18x256xf32, #tpu.memory_space<vmem>>, vector<15x256xf32>,
    %c14 = arith.constant 14 : index
    %c0_113 = arith.constant 0 : index
    %96 = vector.load %arg8[%c14, %c0_113] : memref<36x128xf32, #tpu.memory_space<vmem>>, vector<15x128xf32>
    %97 = arith.truncf %96 : vector<15x128xf32> to vector<15x128xbf16>
    %c0_114 = arith.constant 0 : index
    %c0_115 = arith.constant 0 : index
    %98 = vector.load %arg9[%c0_114, %c0_115] : memref<18x256xf32, #tpu.memory_space<vmem>>, vector<15x256xf32>
    %c2_116 = arith.constant 2 : index
    %c2_117 = arith.constant 2 : index
    %c0_118 = arith.constant 0 : index
    %c0_119 = arith.constant 0 : index
    %99 = vector.load %arg5[%c2_116, %c2_117, %c0_118, %c0_119] : memref<4x4x128x256xbf16, #tpu.memory_space<vmem>>, vector<1x1x128x256xbf16>
    %100 = vector.shape_cast %99 : vector<1x1x128x256xbf16> to vector<128x256xbf16>
    %cst_120 = arith.constant dense<0.000000e+00> : vector<15x256xf32>
    %101 = tpu.matmul %97, %100, %cst_120 {dimension_numbers = #tpu.dot_dimension_numbers<[1], [0], [0], [1], [0, 0, 1, 1], [], []>} : vector<15x128xbf16>, vector<128x256xbf16>, vector<15x256xf32> -> vector<15x256xf32>
    %102 = arith.addf %98, %101 : vector<15x256xf32>
    %c0_121 = arith.constant 0 : index
    %c0_122 = arith.constant 0 : index
    %103 = vector.load %arg9[%c0_121, %c0_122] : memref<18x256xf32, #tpu.memory_space<vmem>>, vector<15x256xf32>
    tpu.vector_store %arg9[%c0_121, %c0_122], %102 {strides = array<i32>} : memref<18x256xf32, #tpu.memory_space<vmem>>, vector<15x256xf32>,
    %c15 = arith.constant 15 : index
    %c0_123 = arith.constant 0 : index
    %104 = vector.load %arg8[%c15, %c0_123] : memref<36x128xf32, #tpu.memory_space<vmem>>, vector<15x128xf32>
    %105 = arith.truncf %104 : vector<15x128xf32> to vector<15x128xbf16>
    %c0_124 = arith.constant 0 : index
    %c0_125 = arith.constant 0 : index
    %106 = vector.load %arg9[%c0_124, %c0_125] : memref<18x256xf32, #tpu.memory_space<vmem>>, vector<15x256xf32>
    %c2_126 = arith.constant 2 : index
    %c3_127 = arith.constant 3 : index
    %c0_128 = arith.constant 0 : index
    %c0_129 = arith.constant 0 : index
    %107 = vector.load %arg5[%c2_126, %c3_127, %c0_128, %c0_129] : memref<4x4x128x256xbf16, #tpu.memory_space<vmem>>, vector<1x1x128x256xbf16>
    %108 = vector.shape_cast %107 : vector<1x1x128x256xbf16> to vector<128x256xbf16>
    %cst_130 = arith.constant dense<0.000000e+00> : vector<15x256xf32>
    %109 = tpu.matmul %105, %108, %cst_130 {dimension_numbers = #tpu.dot_dimension_numbers<[1], [0], [0], [1], [0, 0, 1, 1], [], []>} : vector<15x128xbf16>, vector<128x256xbf16>, vector<15x256xf32> -> vector<15x256xf32>
    %110 = arith.addf %106, %109 : vector<15x256xf32>
    %c0_131 = arith.constant 0 : index
    %c0_132 = arith.constant 0 : index
    %111 = vector.load %arg9[%c0_131, %c0_132] : memref<18x256xf32, #tpu.memory_space<vmem>>, vector<15x256xf32>
    tpu.vector_store %arg9[%c0_131, %c0_132], %110 {strides = array<i32>} : memref<18x256xf32, #tpu.memory_space<vmem>>, vector<15x256xf32>,
    %c18 = arith.constant 18 : index
    %c0_133 = arith.constant 0 : index
    %112 = vector.load %arg8[%c18, %c0_133] : memref<36x128xf32, #tpu.memory_space<vmem>>, vector<15x128xf32>
    %113 = arith.truncf %112 : vector<15x128xf32> to vector<15x128xbf16>
    %c0_134 = arith.constant 0 : index
    %c0_135 = arith.constant 0 : index
    %114 = vector.load %arg9[%c0_134, %c0_135] : memref<18x256xf32, #tpu.memory_space<vmem>>, vector<15x256xf32>
    %c3_136 = arith.constant 3 : index
    %c0_137 = arith.constant 0 : index
    %c0_138 = arith.constant 0 : index
    %c0_139 = arith.constant 0 : index
    %115 = vector.load %arg5[%c3_136, %c0_137, %c0_138, %c0_139] : memref<4x4x128x256xbf16, #tpu.memory_space<vmem>>, vector<1x1x128x256xbf16>
    %116 = vector.shape_cast %115 : vector<1x1x128x256xbf16> to vector<128x256xbf16>
    %cst_140 = arith.constant dense<0.000000e+00> : vector<15x256xf32>
    %117 = tpu.matmul %113, %116, %cst_140 {dimension_numbers = #tpu.dot_dimension_numbers<[1], [0], [0], [1], [0, 0, 1, 1], [], []>} : vector<15x128xbf16>, vector<128x256xbf16>, vector<15x256xf32> -> vector<15x256xf32>
    %118 = arith.addf %114, %117 : vector<15x256xf32>
    %c0_141 = arith.constant 0 : index
    %c0_142 = arith.constant 0 : index
    %119 = vector.load %arg9[%c0_141, %c0_142] : memref<18x256xf32, #tpu.memory_space<vmem>>, vector<15x256xf32>
    tpu.vector_store %arg9[%c0_141, %c0_142], %118 {strides = array<i32>} : memref<18x256xf32, #tpu.memory_space<vmem>>, vector<15x256xf32>,
    %c19 = arith.constant 19 : index
    %c0_143 = arith.constant 0 : index
    %120 = vector.load %arg8[%c19, %c0_143] : memref<36x128xf32, #tpu.memory_space<vmem>>, vector<15x128xf32>
    %121 = arith.truncf %120 : vector<15x128xf32> to vector<15x128xbf16>
    %c0_144 = arith.constant 0 : index
    %c0_145 = arith.constant 0 : index
    %122 = vector.load %arg9[%c0_144, %c0_145] : memref<18x256xf32, #tpu.memory_space<vmem>>, vector<15x256xf32>
    %c3_146 = arith.constant 3 : index
    %c1_147 = arith.constant 1 : index
    %c0_148 = arith.constant 0 : index
    %c0_149 = arith.constant 0 : index
    %123 = vector.load %arg5[%c3_146, %c1_147, %c0_148, %c0_149] : memref<4x4x128x256xbf16, #tpu.memory_space<vmem>>, vector<1x1x128x256xbf16>
    %124 = vector.shape_cast %123 : vector<1x1x128x256xbf16> to vector<128x256xbf16>
    %cst_150 = arith.constant dense<0.000000e+00> : vector<15x256xf32>
    %125 = tpu.matmul %121, %124, %cst_150 {dimension_numbers = #tpu.dot_dimension_numbers<[1], [0], [0], [1], [0, 0, 1, 1], [], []>} : vector<15x128xbf16>, vector<128x256xbf16>, vector<15x256xf32> -> vector<15x256xf32>
    %126 = arith.addf %122, %125 : vector<15x256xf32>
    %c0_151 = arith.constant 0 : index
    %c0_152 = arith.constant 0 : index
    %127 = vector.load %arg9[%c0_151, %c0_152] : memref<18x256xf32, #tpu.memory_space<vmem>>, vector<15x256xf32>
    tpu.vector_store %arg9[%c0_151, %c0_152], %126 {strides = array<i32>} : memref<18x256xf32, #tpu.memory_space<vmem>>, vector<15x256xf32>,
    %c20 = arith.constant 20 : index
    %c0_153 = arith.constant 0 : index
    %128 = vector.load %arg8[%c20, %c0_153] : memref<36x128xf32, #tpu.memory_space<vmem>>, vector<15x128xf32>
    %129 = arith.truncf %128 : vector<15x128xf32> to vector<15x128xbf16>
    %c0_154 = arith.constant 0 : index
    %c0_155 = arith.constant 0 : index
    %130 = vector.load %arg9[%c0_154, %c0_155] : memref<18x256xf32, #tpu.memory_space<vmem>>, vector<15x256xf32>
    %c3_156 = arith.constant 3 : index
    %c2_157 = arith.constant 2 : index
    %c0_158 = arith.constant 0 : index
    %c0_159 = arith.constant 0 : index
    %131 = vector.load %arg5[%c3_156, %c2_157, %c0_158, %c0_159] : memref<4x4x128x256xbf16, #tpu.memory_space<vmem>>, vector<1x1x128x256xbf16>
    %132 = vector.shape_cast %131 : vector<1x1x128x256xbf16> to vector<128x256xbf16>
    %cst_160 = arith.constant dense<0.000000e+00> : vector<15x256xf32>
    %133 = tpu.matmul %129, %132, %cst_160 {dimension_numbers = #tpu.dot_dimension_numbers<[1], [0], [0], [1], [0, 0, 1, 1], [], []>} : vector<15x128xbf16>, vector<128x256xbf16>, vector<15x256xf32> -> vector<15x256xf32>
    %134 = arith.addf %130, %133 : vector<15x256xf32>
    %c0_161 = arith.constant 0 : index
    %c0_162 = arith.constant 0 : index
    %135 = vector.load %arg9[%c0_161, %c0_162] : memref<18x256xf32, #tpu.memory_space<vmem>>, vector<15x256xf32>
    tpu.vector_store %arg9[%c0_161, %c0_162], %134 {strides = array<i32>} : memref<18x256xf32, #tpu.memory_space<vmem>>, vector<15x256xf32>,
    %c21 = arith.constant 21 : index
    %c0_163 = arith.constant 0 : index
    %136 = vector.load %arg8[%c21, %c0_163] : memref<36x128xf32, #tpu.memory_space<vmem>>, vector<15x128xf32>
    %137 = arith.truncf %136 : vector<15x128xf32> to vector<15x128xbf16>
    %c0_164 = arith.constant 0 : index
    %c0_165 = arith.constant 0 : index
    %138 = vector.load %arg9[%c0_164, %c0_165] : memref<18x256xf32, #tpu.memory_space<vmem>>, vector<15x256xf32>
    %c3_166 = arith.constant 3 : index
    %c3_167 = arith.constant 3 : index
    %c0_168 = arith.constant 0 : index
    %c0_169 = arith.constant 0 : index
    %139 = vector.load %arg5[%c3_166, %c3_167, %c0_168, %c0_169] : memref<4x4x128x256xbf16, #tpu.memory_space<vmem>>, vector<1x1x128x256xbf16>
    %140 = vector.shape_cast %139 : vector<1x1x128x256xbf16> to vector<128x256xbf16>
    %cst_170 = arith.constant dense<0.000000e+00> : vector<15x256xf32>
    %141 = tpu.matmul %137, %140, %cst_170 {dimension_numbers = #tpu.dot_dimension_numbers<[1], [0], [0], [1], [0, 0, 1, 1], [], []>} : vector<15x128xbf16>, vector<128x256xbf16>, vector<15x256xf32> -> vector<15x256xf32>
    %142 = arith.addf %138, %141 : vector<15x256xf32>
    %c0_171 = arith.constant 0 : index
    %c0_172 = arith.constant 0 : index
    %143 = vector.load %arg9[%c0_171, %c0_172] : memref<18x256xf32, #tpu.memory_space<vmem>>, vector<15x256xf32>
    tpu.vector_store %arg9[%c0_171, %c0_172], %142 {strides = array<i32>} : memref<18x256xf32, #tpu.memory_space<vmem>>, vector<15x256xf32>,
    %c0_173 = arith.constant 0 : index
    %c0_174 = arith.constant 0 : index
    %144 = vector.load %arg9[%c0_173, %c0_174] : memref<18x256xf32, #tpu.memory_space<vmem>>, vector<18x256xf32>
    %c0_175 = arith.constant 0 : index
    %c0_176 = arith.constant 0 : index
    %145 = vector.load %arg6[%c0_175, %c0_176] : memref<1x256xf32, #tpu.memory_space<vmem>>, vector<1x256xf32>
    %146 = vector.broadcast %145 : vector<1x256xf32> to vector<18x256xf32>
    %147 = arith.addf %144, %146 : vector<18x256xf32>
    %c0_177 = arith.constant 0 : index
    %c0_178 = arith.constant 0 : index
    %c0_179 = arith.constant 0 : index
    %148 = vector.load %arg7[%c0_177, %c0_178, %c0_179] : memref<1x18x256xf32, #tpu.memory_space<vmem>>, vector<1x18x256xf32>
    %149 = vector.shape_cast %148 : vector<1x18x256xf32> to vector<18x256xf32>
    %150 = vector.shape_cast %147 : vector<18x256xf32> to vector<1x18x256xf32>
    tpu.vector_store %arg7[%c0_177, %c0_178, %c0_179], %150 {strides = array<i32>} : memref<1x18x256xf32, #tpu.memory_space<vmem>>, vector<1x18x256xf32>,
    return
  }
  func.func @transform_0(%arg0: i32, %arg1: i32) -> (i32, i32, i32) {
    %c0_i32 = arith.constant 0 : i32
    %c0_i32_0 = arith.constant 0 : i32
    %c0_i32_1 = arith.constant 0 : i32
    return %arg0, %c0_i32, %c0_i32_0 : i32, i32, i32
  }
  func.func @transform_1(%arg0: i32, %arg1: i32) -> (i32, i32) {
    %c0_i32 = arith.constant 0 : i32
    %c0_i32_0 = arith.constant 0 : i32
    %c0_i32_1 = arith.constant 0 : i32
    return %c0_i32, %c0_i32_0 : i32, i32
  }
  func.func @transform_2(%arg0: i32, %arg1: i32) -> (i32, i32) {
    %c0_i32 = arith.constant 0 : i32
    %c0_i32_0 = arith.constant 0 : i32
    %c0_i32_1 = arith.constant 0 : i32
    return %c0_i32, %c0_i32_0 : i32, i32
  }
  func.func @transform_3(%arg0: i32, %arg1: i32) -> (i32, i32, i32, i32) {
    %c0_i32 = arith.constant 0 : i32
    %c0_i32_0 = arith.constant 0 : i32
    %c0_i32_1 = arith.constant 0 : i32
    %c0_i32_2 = arith.constant 0 : i32
    return %c0_i32, %c0_i32_0, %c0_i32_1, %arg1 : i32, i32, i32, i32
  }
  func.func @transform_4(%arg0: i32, %arg1: i32) -> (i32, i32) {
    %c0_i32 = arith.constant 0 : i32
    %c0_i32_0 = arith.constant 0 : i32
    return %c0_i32, %arg1 : i32, i32
  }
  func.func @transform_5(%arg0: i32, %arg1: i32) -> (i32, i32, i32) {
    %c0_i32 = arith.constant 0 : i32
    %c0_i32_0 = arith.constant 0 : i32
    return %arg0, %c0_i32, %arg1 : i32, i32, i32
  }
}

module attributes {stable_mosaic.version = 11 : i64} {
  func.func @_conv_rows_kernel(%arg0: i32, %arg1: i32, %arg2: memref<1x25x256xf32, #tpu.memory_space<vmem>>, %arg3: memref<1x256xf32, #tpu.memory_space<vmem>>, %arg4: memref<1x256xf32, #tpu.memory_space<vmem>>, %arg5: memref<4x4x256x128xbf16, #tpu.memory_space<vmem>>, %arg6: memref<1x128xf32, #tpu.memory_space<vmem>>, %arg7: memref<1x10x128xf32, #tpu.memory_space<vmem>>, %arg8: memref<25x256xf32, #tpu.memory_space<vmem>>, %arg9: memref<10x128xf32, #tpu.memory_space<vmem>>) attributes {dimension_semantics = [#tpu.dimension_semantics<parallel>, #tpu.dimension_semantics<parallel>], iteration_bounds = array<i64: 2, 1>, scalar_prefetch = 0 : i64, scratch_operands = 2 : i64, tpu.core_type = #tpu.core_type<tc>, window_params = [{transform_indices = @transform_0, window_bounds = array<i64: 1, 25, 256>}, {pipeline_mode = #tpu.pipeline_mode<synchronous>, transform_indices = @transform_1, window_bounds = array<i64: 1, 256>}, {pipeline_mode = #tpu.pipeline_mode<synchronous>, transform_indices = @transform_2, window_bounds = array<i64: 1, 256>}, {transform_indices = @transform_3, window_bounds = array<i64: 4, 4, 256, 128>}, {transform_indices = @transform_4, window_bounds = array<i64: 1, 128>}, {transform_indices = @transform_5, window_bounds = array<i64: 1, 10, 128>}]} {
    %c0 = arith.constant 0 : index
    %c0_0 = arith.constant 0 : index
    %c0_1 = arith.constant 0 : index
    %0 = vector.load %arg2[%c0, %c0_0, %c0_1] : memref<1x25x256xf32, #tpu.memory_space<vmem>>, vector<1x25x256xf32>
    %1 = vector.shape_cast %0 : vector<1x25x256xf32> to vector<25x256xf32>
    %c0_2 = arith.constant 0 : index
    %c0_3 = arith.constant 0 : index
    %2 = vector.load %arg3[%c0_2, %c0_3] : memref<1x256xf32, #tpu.memory_space<vmem>>, vector<1x256xf32>
    %3 = vector.broadcast %2 : vector<1x256xf32> to vector<25x256xf32>
    %4 = arith.mulf %1, %3 : vector<25x256xf32>
    %c0_4 = arith.constant 0 : index
    %c0_5 = arith.constant 0 : index
    %5 = vector.load %arg4[%c0_4, %c0_5] : memref<1x256xf32, #tpu.memory_space<vmem>>, vector<1x256xf32>
    %6 = vector.broadcast %5 : vector<1x256xf32> to vector<25x256xf32>
    %7 = arith.addf %4, %6 : vector<25x256xf32>
    %cst = arith.constant 0.000000e+00 : f32
    %8 = vector.broadcast %cst : f32 to vector<25x256xf32>
    %9 = arith.cmpf oge, %7, %8 : vector<25x256xf32>
    %cst_6 = arith.constant 2.000000e-01 : f32
    %10 = vector.broadcast %cst_6 : f32 to vector<25x256xf32>
    %11 = arith.mulf %10, %7 : vector<25x256xf32>
    %12 = arith.select %9, %7, %11 : vector<25x256xi1>, vector<25x256xf32>
    %c0_7 = arith.constant 0 : index
    %c0_8 = arith.constant 0 : index
    %13 = vector.load %arg8[%c0_7, %c0_8] : memref<25x256xf32, #tpu.memory_space<vmem>>, vector<25x256xf32>
    tpu.vector_store %arg8[%c0_7, %c0_8], %12 {strides = array<i32>} : memref<25x256xf32, #tpu.memory_space<vmem>>, vector<25x256xf32>,
    %cst_9 = arith.constant 0.000000e+00 : f32
    %14 = vector.broadcast %cst_9 : f32 to vector<10x128xf32>
    %c0_10 = arith.constant 0 : index
    %c0_11 = arith.constant 0 : index
    %15 = vector.load %arg9[%c0_10, %c0_11] : memref<10x128xf32, #tpu.memory_space<vmem>>, vector<10x128xf32>
    tpu.vector_store %arg9[%c0_10, %c0_11], %14 {strides = array<i32>} : memref<10x128xf32, #tpu.memory_space<vmem>>, vector<10x128xf32>,
    %c0_12 = arith.constant 0 : index
    %c0_13 = arith.constant 0 : index
    %16 = vector.load %arg8[%c0_12, %c0_13] : memref<25x256xf32, #tpu.memory_space<vmem>>, vector<7x256xf32>
    %17 = arith.truncf %16 : vector<7x256xf32> to vector<7x256xbf16>
    %c0_14 = arith.constant 0 : index
    %c0_15 = arith.constant 0 : index
    %18 = vector.load %arg9[%c0_14, %c0_15] : memref<10x128xf32, #tpu.memory_space<vmem>>, vector<7x128xf32>
    %c0_16 = arith.constant 0 : index
    %c0_17 = arith.constant 0 : index
    %c0_18 = arith.constant 0 : index
    %c0_19 = arith.constant 0 : index
    %19 = vector.load %arg5[%c0_16, %c0_17, %c0_18, %c0_19] : memref<4x4x256x128xbf16, #tpu.memory_space<vmem>>, vector<1x1x256x128xbf16>
    %20 = vector.shape_cast %19 : vector<1x1x256x128xbf16> to vector<256x128xbf16>
    %cst_20 = arith.constant dense<0.000000e+00> : vector<7x128xf32>
    %21 = tpu.matmul %17, %20, %cst_20 {dimension_numbers = #tpu.dot_dimension_numbers<[1], [0], [0], [1], [0, 0, 1, 1], [], []>} : vector<7x256xbf16>, vector<256x128xbf16>, vector<7x128xf32> -> vector<7x128xf32>
    %22 = arith.addf %18, %21 : vector<7x128xf32>
    %c0_21 = arith.constant 0 : index
    %c0_22 = arith.constant 0 : index
    %23 = vector.load %arg9[%c0_21, %c0_22] : memref<10x128xf32, #tpu.memory_space<vmem>>, vector<7x128xf32>
    tpu.vector_store %arg9[%c0_21, %c0_22], %22 {strides = array<i32>} : memref<10x128xf32, #tpu.memory_space<vmem>>, vector<7x128xf32>,
    %c1 = arith.constant 1 : index
    %c0_23 = arith.constant 0 : index
    %24 = vector.load %arg8[%c1, %c0_23] : memref<25x256xf32, #tpu.memory_space<vmem>>, vector<7x256xf32>
    %25 = arith.truncf %24 : vector<7x256xf32> to vector<7x256xbf16>
    %c0_24 = arith.constant 0 : index
    %c0_25 = arith.constant 0 : index
    %26 = vector.load %arg9[%c0_24, %c0_25] : memref<10x128xf32, #tpu.memory_space<vmem>>, vector<7x128xf32>
    %c0_26 = arith.constant 0 : index
    %c1_27 = arith.constant 1 : index
    %c0_28 = arith.constant 0 : index
    %c0_29 = arith.constant 0 : index
    %27 = vector.load %arg5[%c0_26, %c1_27, %c0_28, %c0_29] : memref<4x4x256x128xbf16, #tpu.memory_space<vmem>>, vector<1x1x256x128xbf16>
    %28 = vector.shape_cast %27 : vector<1x1x256x128xbf16> to vector<256x128xbf16>
    %cst_30 = arith.constant dense<0.000000e+00> : vector<7x128xf32>
    %29 = tpu.matmul %25, %28, %cst_30 {dimension_numbers = #tpu.dot_dimension_numbers<[1], [0], [0], [1], [0, 0, 1, 1], [], []>} : vector<7x256xbf16>, vector<256x128xbf16>, vector<7x128xf32> -> vector<7x128xf32>
    %30 = arith.addf %26, %29 : vector<7x128xf32>
    %c0_31 = arith.constant 0 : index
    %c0_32 = arith.constant 0 : index
    %31 = vector.load %arg9[%c0_31, %c0_32] : memref<10x128xf32, #tpu.memory_space<vmem>>, vector<7x128xf32>
    tpu.vector_store %arg9[%c0_31, %c0_32], %30 {strides = array<i32>} : memref<10x128xf32, #tpu.memory_space<vmem>>, vector<7x128xf32>,
    %c2 = arith.constant 2 : index
    %c0_33 = arith.constant 0 : index
    %32 = vector.load %arg8[%c2, %c0_33] : memref<25x256xf32, #tpu.memory_space<vmem>>, vector<7x256xf32>
    %33 = arith.truncf %32 : vector<7x256xf32> to vector<7x256xbf16>
    %c0_34 = arith.constant 0 : index
    %c0_35 = arith.constant 0 : index
    %34 = vector.load %arg9[%c0_34, %c0_35] : memref<10x128xf32, #tpu.memory_space<vmem>>, vector<7x128xf32>
    %c0_36 = arith.constant 0 : index
    %c2_37 = arith.constant 2 : index
    %c0_38 = arith.constant 0 : index
    %c0_39 = arith.constant 0 : index
    %35 = vector.load %arg5[%c0_36, %c2_37, %c0_38, %c0_39] : memref<4x4x256x128xbf16, #tpu.memory_space<vmem>>, vector<1x1x256x128xbf16>
    %36 = vector.shape_cast %35 : vector<1x1x256x128xbf16> to vector<256x128xbf16>
    %cst_40 = arith.constant dense<0.000000e+00> : vector<7x128xf32>
    %37 = tpu.matmul %33, %36, %cst_40 {dimension_numbers = #tpu.dot_dimension_numbers<[1], [0], [0], [1], [0, 0, 1, 1], [], []>} : vector<7x256xbf16>, vector<256x128xbf16>, vector<7x128xf32> -> vector<7x128xf32>
    %38 = arith.addf %34, %37 : vector<7x128xf32>
    %c0_41 = arith.constant 0 : index
    %c0_42 = arith.constant 0 : index
    %39 = vector.load %arg9[%c0_41, %c0_42] : memref<10x128xf32, #tpu.memory_space<vmem>>, vector<7x128xf32>
    tpu.vector_store %arg9[%c0_41, %c0_42], %38 {strides = array<i32>} : memref<10x128xf32, #tpu.memory_space<vmem>>, vector<7x128xf32>,
    %c3 = arith.constant 3 : index
    %c0_43 = arith.constant 0 : index
    %40 = vector.load %arg8[%c3, %c0_43] : memref<25x256xf32, #tpu.memory_space<vmem>>, vector<7x256xf32>
    %41 = arith.truncf %40 : vector<7x256xf32> to vector<7x256xbf16>
    %c0_44 = arith.constant 0 : index
    %c0_45 = arith.constant 0 : index
    %42 = vector.load %arg9[%c0_44, %c0_45] : memref<10x128xf32, #tpu.memory_space<vmem>>, vector<7x128xf32>
    %c0_46 = arith.constant 0 : index
    %c3_47 = arith.constant 3 : index
    %c0_48 = arith.constant 0 : index
    %c0_49 = arith.constant 0 : index
    %43 = vector.load %arg5[%c0_46, %c3_47, %c0_48, %c0_49] : memref<4x4x256x128xbf16, #tpu.memory_space<vmem>>, vector<1x1x256x128xbf16>
    %44 = vector.shape_cast %43 : vector<1x1x256x128xbf16> to vector<256x128xbf16>
    %cst_50 = arith.constant dense<0.000000e+00> : vector<7x128xf32>
    %45 = tpu.matmul %41, %44, %cst_50 {dimension_numbers = #tpu.dot_dimension_numbers<[1], [0], [0], [1], [0, 0, 1, 1], [], []>} : vector<7x256xbf16>, vector<256x128xbf16>, vector<7x128xf32> -> vector<7x128xf32>
    %46 = arith.addf %42, %45 : vector<7x128xf32>
    %c0_51 = arith.constant 0 : index
    %c0_52 = arith.constant 0 : index
    %47 = vector.load %arg9[%c0_51, %c0_52] : memref<10x128xf32, #tpu.memory_space<vmem>>, vector<7x128xf32>
    tpu.vector_store %arg9[%c0_51, %c0_52], %46 {strides = array<i32>} : memref<10x128xf32, #tpu.memory_space<vmem>>, vector<7x128xf32>,
    %c5 = arith.constant 5 : index
    %c0_53 = arith.constant 0 : index
    %48 = vector.load %arg8[%c5, %c0_53] : memref<25x256xf32, #tpu.memory_space<vmem>>, vector<7x256xf32>
    %49 = arith.truncf %48 : vector<7x256xf32> to vector<7x256xbf16>
    %c0_54 = arith.constant 0 : index
    %c0_55 = arith.constant 0 : index
    %50 = vector.load %arg9[%c0_54, %c0_55] : memref<10x128xf32, #tpu.memory_space<vmem>>, vector<7x128xf32>
    %c1_56 = arith.constant 1 : index
    %c0_57 = arith.constant 0 : index
    %c0_58 = arith.constant 0 : index
    %c0_59 = arith.constant 0 : index
    %51 = vector.load %arg5[%c1_56, %c0_57, %c0_58, %c0_59] : memref<4x4x256x128xbf16, #tpu.memory_space<vmem>>, vector<1x1x256x128xbf16>
    %52 = vector.shape_cast %51 : vector<1x1x256x128xbf16> to vector<256x128xbf16>
    %cst_60 = arith.constant dense<0.000000e+00> : vector<7x128xf32>
    %53 = tpu.matmul %49, %52, %cst_60 {dimension_numbers = #tpu.dot_dimension_numbers<[1], [0], [0], [1], [0, 0, 1, 1], [], []>} : vector<7x256xbf16>, vector<256x128xbf16>, vector<7x128xf32> -> vector<7x128xf32>
    %54 = arith.addf %50, %53 : vector<7x128xf32>
    %c0_61 = arith.constant 0 : index
    %c0_62 = arith.constant 0 : index
    %55 = vector.load %arg9[%c0_61, %c0_62] : memref<10x128xf32, #tpu.memory_space<vmem>>, vector<7x128xf32>
    tpu.vector_store %arg9[%c0_61, %c0_62], %54 {strides = array<i32>} : memref<10x128xf32, #tpu.memory_space<vmem>>, vector<7x128xf32>,
    %c6 = arith.constant 6 : index
    %c0_63 = arith.constant 0 : index
    %56 = vector.load %arg8[%c6, %c0_63] : memref<25x256xf32, #tpu.memory_space<vmem>>, vector<7x256xf32>
    %57 = arith.truncf %56 : vector<7x256xf32> to vector<7x256xbf16>
    %c0_64 = arith.constant 0 : index
    %c0_65 = arith.constant 0 : index
    %58 = vector.load %arg9[%c0_64, %c0_65] : memref<10x128xf32, #tpu.memory_space<vmem>>, vector<7x128xf32>
    %c1_66 = arith.constant 1 : index
    %c1_67 = arith.constant 1 : index
    %c0_68 = arith.constant 0 : index
    %c0_69 = arith.constant 0 : index
    %59 = vector.load %arg5[%c1_66, %c1_67, %c0_68, %c0_69] : memref<4x4x256x128xbf16, #tpu.memory_space<vmem>>, vector<1x1x256x128xbf16>
    %60 = vector.shape_cast %59 : vector<1x1x256x128xbf16> to vector<256x128xbf16>
    %cst_70 = arith.constant dense<0.000000e+00> : vector<7x128xf32>
    %61 = tpu.matmul %57, %60, %cst_70 {dimension_numbers = #tpu.dot_dimension_numbers<[1], [0], [0], [1], [0, 0, 1, 1], [], []>} : vector<7x256xbf16>, vector<256x128xbf16>, vector<7x128xf32> -> vector<7x128xf32>
    %62 = arith.addf %58, %61 : vector<7x128xf32>
    %c0_71 = arith.constant 0 : index
    %c0_72 = arith.constant 0 : index
    %63 = vector.load %arg9[%c0_71, %c0_72] : memref<10x128xf32, #tpu.memory_space<vmem>>, vector<7x128xf32>
    tpu.vector_store %arg9[%c0_71, %c0_72], %62 {strides = array<i32>} : memref<10x128xf32, #tpu.memory_space<vmem>>, vector<7x128xf32>,
    %c7 = arith.constant 7 : index
    %c0_73 = arith.constant 0 : index
    %64 = vector.load %arg8[%c7, %c0_73] : memref<25x256xf32, #tpu.memory_space<vmem>>, vector<7x256xf32>
    %65 = arith.truncf %64 : vector<7x256xf32> to vector<7x256xbf16>
    %c0_74 = arith.constant 0 : index
    %c0_75 = arith.constant 0 : index
    %66 = vector.load %arg9[%c0_74, %c0_75] : memref<10x128xf32, #tpu.memory_space<vmem>>, vector<7x128xf32>
    %c1_76 = arith.constant 1 : index
    %c2_77 = arith.constant 2 : index
    %c0_78 = arith.constant 0 : index
    %c0_79 = arith.constant 0 : index
    %67 = vector.load %arg5[%c1_76, %c2_77, %c0_78, %c0_79] : memref<4x4x256x128xbf16, #tpu.memory_space<vmem>>, vector<1x1x256x128xbf16>
    %68 = vector.shape_cast %67 : vector<1x1x256x128xbf16> to vector<256x128xbf16>
    %cst_80 = arith.constant dense<0.000000e+00> : vector<7x128xf32>
    %69 = tpu.matmul %65, %68, %cst_80 {dimension_numbers = #tpu.dot_dimension_numbers<[1], [0], [0], [1], [0, 0, 1, 1], [], []>} : vector<7x256xbf16>, vector<256x128xbf16>, vector<7x128xf32> -> vector<7x128xf32>
    %70 = arith.addf %66, %69 : vector<7x128xf32>
    %c0_81 = arith.constant 0 : index
    %c0_82 = arith.constant 0 : index
    %71 = vector.load %arg9[%c0_81, %c0_82] : memref<10x128xf32, #tpu.memory_space<vmem>>, vector<7x128xf32>
    tpu.vector_store %arg9[%c0_81, %c0_82], %70 {strides = array<i32>} : memref<10x128xf32, #tpu.memory_space<vmem>>, vector<7x128xf32>,
    %c8 = arith.constant 8 : index
    %c0_83 = arith.constant 0 : index
    %72 = vector.load %arg8[%c8, %c0_83] : memref<25x256xf32, #tpu.memory_space<vmem>>, vector<7x256xf32>
    %73 = arith.truncf %72 : vector<7x256xf32> to vector<7x256xbf16>
    %c0_84 = arith.constant 0 : index
    %c0_85 = arith.constant 0 : index
    %74 = vector.load %arg9[%c0_84, %c0_85] : memref<10x128xf32, #tpu.memory_space<vmem>>, vector<7x128xf32>
    %c1_86 = arith.constant 1 : index
    %c3_87 = arith.constant 3 : index
    %c0_88 = arith.constant 0 : index
    %c0_89 = arith.constant 0 : index
    %75 = vector.load %arg5[%c1_86, %c3_87, %c0_88, %c0_89] : memref<4x4x256x128xbf16, #tpu.memory_space<vmem>>, vector<1x1x256x128xbf16>
    %76 = vector.shape_cast %75 : vector<1x1x256x128xbf16> to vector<256x128xbf16>
    %cst_90 = arith.constant dense<0.000000e+00> : vector<7x128xf32>
    %77 = tpu.matmul %73, %76, %cst_90 {dimension_numbers = #tpu.dot_dimension_numbers<[1], [0], [0], [1], [0, 0, 1, 1], [], []>} : vector<7x256xbf16>, vector<256x128xbf16>, vector<7x128xf32> -> vector<7x128xf32>
    %78 = arith.addf %74, %77 : vector<7x128xf32>
    %c0_91 = arith.constant 0 : index
    %c0_92 = arith.constant 0 : index
    %79 = vector.load %arg9[%c0_91, %c0_92] : memref<10x128xf32, #tpu.memory_space<vmem>>, vector<7x128xf32>
    tpu.vector_store %arg9[%c0_91, %c0_92], %78 {strides = array<i32>} : memref<10x128xf32, #tpu.memory_space<vmem>>, vector<7x128xf32>,
    %c10 = arith.constant 10 : index
    %c0_93 = arith.constant 0 : index
    %80 = vector.load %arg8[%c10, %c0_93] : memref<25x256xf32, #tpu.memory_space<vmem>>, vector<7x256xf32>
    %81 = arith.truncf %80 : vector<7x256xf32> to vector<7x256xbf16>
    %c0_94 = arith.constant 0 : index
    %c0_95 = arith.constant 0 : index
    %82 = vector.load %arg9[%c0_94, %c0_95] : memref<10x128xf32, #tpu.memory_space<vmem>>, vector<7x128xf32>
    %c2_96 = arith.constant 2 : index
    %c0_97 = arith.constant 0 : index
    %c0_98 = arith.constant 0 : index
    %c0_99 = arith.constant 0 : index
    %83 = vector.load %arg5[%c2_96, %c0_97, %c0_98, %c0_99] : memref<4x4x256x128xbf16, #tpu.memory_space<vmem>>, vector<1x1x256x128xbf16>
    %84 = vector.shape_cast %83 : vector<1x1x256x128xbf16> to vector<256x128xbf16>
    %cst_100 = arith.constant dense<0.000000e+00> : vector<7x128xf32>
    %85 = tpu.matmul %81, %84, %cst_100 {dimension_numbers = #tpu.dot_dimension_numbers<[1], [0], [0], [1], [0, 0, 1, 1], [], []>} : vector<7x256xbf16>, vector<256x128xbf16>, vector<7x128xf32> -> vector<7x128xf32>
    %86 = arith.addf %82, %85 : vector<7x128xf32>
    %c0_101 = arith.constant 0 : index
    %c0_102 = arith.constant 0 : index
    %87 = vector.load %arg9[%c0_101, %c0_102] : memref<10x128xf32, #tpu.memory_space<vmem>>, vector<7x128xf32>
    tpu.vector_store %arg9[%c0_101, %c0_102], %86 {strides = array<i32>} : memref<10x128xf32, #tpu.memory_space<vmem>>, vector<7x128xf32>,
    %c11 = arith.constant 11 : index
    %c0_103 = arith.constant 0 : index
    %88 = vector.load %arg8[%c11, %c0_103] : memref<25x256xf32, #tpu.memory_space<vmem>>, vector<7x256xf32>
    %89 = arith.truncf %88 : vector<7x256xf32> to vector<7x256xbf16>
    %c0_104 = arith.constant 0 : index
    %c0_105 = arith.constant 0 : index
    %90 = vector.load %arg9[%c0_104, %c0_105] : memref<10x128xf32, #tpu.memory_space<vmem>>, vector<7x128xf32>
    %c2_106 = arith.constant 2 : index
    %c1_107 = arith.constant 1 : index
    %c0_108 = arith.constant 0 : index
    %c0_109 = arith.constant 0 : index
    %91 = vector.load %arg5[%c2_106, %c1_107, %c0_108, %c0_109] : memref<4x4x256x128xbf16, #tpu.memory_space<vmem>>, vector<1x1x256x128xbf16>
    %92 = vector.shape_cast %91 : vector<1x1x256x128xbf16> to vector<256x128xbf16>
    %cst_110 = arith.constant dense<0.000000e+00> : vector<7x128xf32>
    %93 = tpu.matmul %89, %92, %cst_110 {dimension_numbers = #tpu.dot_dimension_numbers<[1], [0], [0], [1], [0, 0, 1, 1], [], []>} : vector<7x256xbf16>, vector<256x128xbf16>, vector<7x128xf32> -> vector<7x128xf32>
    %94 = arith.addf %90, %93 : vector<7x128xf32>
    %c0_111 = arith.constant 0 : index
    %c0_112 = arith.constant 0 : index
    %95 = vector.load %arg9[%c0_111, %c0_112] : memref<10x128xf32, #tpu.memory_space<vmem>>, vector<7x128xf32>
    tpu.vector_store %arg9[%c0_111, %c0_112], %94 {strides = array<i32>} : memref<10x128xf32, #tpu.memory_space<vmem>>, vector<7x128xf32>,
    %c12 = arith.constant 12 : index
    %c0_113 = arith.constant 0 : index
    %96 = vector.load %arg8[%c12, %c0_113] : memref<25x256xf32, #tpu.memory_space<vmem>>, vector<7x256xf32>
    %97 = arith.truncf %96 : vector<7x256xf32> to vector<7x256xbf16>
    %c0_114 = arith.constant 0 : index
    %c0_115 = arith.constant 0 : index
    %98 = vector.load %arg9[%c0_114, %c0_115] : memref<10x128xf32, #tpu.memory_space<vmem>>, vector<7x128xf32>
    %c2_116 = arith.constant 2 : index
    %c2_117 = arith.constant 2 : index
    %c0_118 = arith.constant 0 : index
    %c0_119 = arith.constant 0 : index
    %99 = vector.load %arg5[%c2_116, %c2_117, %c0_118, %c0_119] : memref<4x4x256x128xbf16, #tpu.memory_space<vmem>>, vector<1x1x256x128xbf16>
    %100 = vector.shape_cast %99 : vector<1x1x256x128xbf16> to vector<256x128xbf16>
    %cst_120 = arith.constant dense<0.000000e+00> : vector<7x128xf32>
    %101 = tpu.matmul %97, %100, %cst_120 {dimension_numbers = #tpu.dot_dimension_numbers<[1], [0], [0], [1], [0, 0, 1, 1], [], []>} : vector<7x256xbf16>, vector<256x128xbf16>, vector<7x128xf32> -> vector<7x128xf32>
    %102 = arith.addf %98, %101 : vector<7x128xf32>
    %c0_121 = arith.constant 0 : index
    %c0_122 = arith.constant 0 : index
    %103 = vector.load %arg9[%c0_121, %c0_122] : memref<10x128xf32, #tpu.memory_space<vmem>>, vector<7x128xf32>
    tpu.vector_store %arg9[%c0_121, %c0_122], %102 {strides = array<i32>} : memref<10x128xf32, #tpu.memory_space<vmem>>, vector<7x128xf32>,
    %c13 = arith.constant 13 : index
    %c0_123 = arith.constant 0 : index
    %104 = vector.load %arg8[%c13, %c0_123] : memref<25x256xf32, #tpu.memory_space<vmem>>, vector<7x256xf32>
    %105 = arith.truncf %104 : vector<7x256xf32> to vector<7x256xbf16>
    %c0_124 = arith.constant 0 : index
    %c0_125 = arith.constant 0 : index
    %106 = vector.load %arg9[%c0_124, %c0_125] : memref<10x128xf32, #tpu.memory_space<vmem>>, vector<7x128xf32>
    %c2_126 = arith.constant 2 : index
    %c3_127 = arith.constant 3 : index
    %c0_128 = arith.constant 0 : index
    %c0_129 = arith.constant 0 : index
    %107 = vector.load %arg5[%c2_126, %c3_127, %c0_128, %c0_129] : memref<4x4x256x128xbf16, #tpu.memory_space<vmem>>, vector<1x1x256x128xbf16>
    %108 = vector.shape_cast %107 : vector<1x1x256x128xbf16> to vector<256x128xbf16>
    %cst_130 = arith.constant dense<0.000000e+00> : vector<7x128xf32>
    %109 = tpu.matmul %105, %108, %cst_130 {dimension_numbers = #tpu.dot_dimension_numbers<[1], [0], [0], [1], [0, 0, 1, 1], [], []>} : vector<7x256xbf16>, vector<256x128xbf16>, vector<7x128xf32> -> vector<7x128xf32>
    %110 = arith.addf %106, %109 : vector<7x128xf32>
    %c0_131 = arith.constant 0 : index
    %c0_132 = arith.constant 0 : index
    %111 = vector.load %arg9[%c0_131, %c0_132] : memref<10x128xf32, #tpu.memory_space<vmem>>, vector<7x128xf32>
    tpu.vector_store %arg9[%c0_131, %c0_132], %110 {strides = array<i32>} : memref<10x128xf32, #tpu.memory_space<vmem>>, vector<7x128xf32>,
    %c15 = arith.constant 15 : index
    %c0_133 = arith.constant 0 : index
    %112 = vector.load %arg8[%c15, %c0_133] : memref<25x256xf32, #tpu.memory_space<vmem>>, vector<7x256xf32>
    %113 = arith.truncf %112 : vector<7x256xf32> to vector<7x256xbf16>
    %c0_134 = arith.constant 0 : index
    %c0_135 = arith.constant 0 : index
    %114 = vector.load %arg9[%c0_134, %c0_135] : memref<10x128xf32, #tpu.memory_space<vmem>>, vector<7x128xf32>
    %c3_136 = arith.constant 3 : index
    %c0_137 = arith.constant 0 : index
    %c0_138 = arith.constant 0 : index
    %c0_139 = arith.constant 0 : index
    %115 = vector.load %arg5[%c3_136, %c0_137, %c0_138, %c0_139] : memref<4x4x256x128xbf16, #tpu.memory_space<vmem>>, vector<1x1x256x128xbf16>
    %116 = vector.shape_cast %115 : vector<1x1x256x128xbf16> to vector<256x128xbf16>
    %cst_140 = arith.constant dense<0.000000e+00> : vector<7x128xf32>
    %117 = tpu.matmul %113, %116, %cst_140 {dimension_numbers = #tpu.dot_dimension_numbers<[1], [0], [0], [1], [0, 0, 1, 1], [], []>} : vector<7x256xbf16>, vector<256x128xbf16>, vector<7x128xf32> -> vector<7x128xf32>
    %118 = arith.addf %114, %117 : vector<7x128xf32>
    %c0_141 = arith.constant 0 : index
    %c0_142 = arith.constant 0 : index
    %119 = vector.load %arg9[%c0_141, %c0_142] : memref<10x128xf32, #tpu.memory_space<vmem>>, vector<7x128xf32>
    tpu.vector_store %arg9[%c0_141, %c0_142], %118 {strides = array<i32>} : memref<10x128xf32, #tpu.memory_space<vmem>>, vector<7x128xf32>,
    %c16 = arith.constant 16 : index
    %c0_143 = arith.constant 0 : index
    %120 = vector.load %arg8[%c16, %c0_143] : memref<25x256xf32, #tpu.memory_space<vmem>>, vector<7x256xf32>
    %121 = arith.truncf %120 : vector<7x256xf32> to vector<7x256xbf16>
    %c0_144 = arith.constant 0 : index
    %c0_145 = arith.constant 0 : index
    %122 = vector.load %arg9[%c0_144, %c0_145] : memref<10x128xf32, #tpu.memory_space<vmem>>, vector<7x128xf32>
    %c3_146 = arith.constant 3 : index
    %c1_147 = arith.constant 1 : index
    %c0_148 = arith.constant 0 : index
    %c0_149 = arith.constant 0 : index
    %123 = vector.load %arg5[%c3_146, %c1_147, %c0_148, %c0_149] : memref<4x4x256x128xbf16, #tpu.memory_space<vmem>>, vector<1x1x256x128xbf16>
    %124 = vector.shape_cast %123 : vector<1x1x256x128xbf16> to vector<256x128xbf16>
    %cst_150 = arith.constant dense<0.000000e+00> : vector<7x128xf32>
    %125 = tpu.matmul %121, %124, %cst_150 {dimension_numbers = #tpu.dot_dimension_numbers<[1], [0], [0], [1], [0, 0, 1, 1], [], []>} : vector<7x256xbf16>, vector<256x128xbf16>, vector<7x128xf32> -> vector<7x128xf32>
    %126 = arith.addf %122, %125 : vector<7x128xf32>
    %c0_151 = arith.constant 0 : index
    %c0_152 = arith.constant 0 : index
    %127 = vector.load %arg9[%c0_151, %c0_152] : memref<10x128xf32, #tpu.memory_space<vmem>>, vector<7x128xf32>
    tpu.vector_store %arg9[%c0_151, %c0_152], %126 {strides = array<i32>} : memref<10x128xf32, #tpu.memory_space<vmem>>, vector<7x128xf32>,
    %c17 = arith.constant 17 : index
    %c0_153 = arith.constant 0 : index
    %128 = vector.load %arg8[%c17, %c0_153] : memref<25x256xf32, #tpu.memory_space<vmem>>, vector<7x256xf32>
    %129 = arith.truncf %128 : vector<7x256xf32> to vector<7x256xbf16>
    %c0_154 = arith.constant 0 : index
    %c0_155 = arith.constant 0 : index
    %130 = vector.load %arg9[%c0_154, %c0_155] : memref<10x128xf32, #tpu.memory_space<vmem>>, vector<7x128xf32>
    %c3_156 = arith.constant 3 : index
    %c2_157 = arith.constant 2 : index
    %c0_158 = arith.constant 0 : index
    %c0_159 = arith.constant 0 : index
    %131 = vector.load %arg5[%c3_156, %c2_157, %c0_158, %c0_159] : memref<4x4x256x128xbf16, #tpu.memory_space<vmem>>, vector<1x1x256x128xbf16>
    %132 = vector.shape_cast %131 : vector<1x1x256x128xbf16> to vector<256x128xbf16>
    %cst_160 = arith.constant dense<0.000000e+00> : vector<7x128xf32>
    %133 = tpu.matmul %129, %132, %cst_160 {dimension_numbers = #tpu.dot_dimension_numbers<[1], [0], [0], [1], [0, 0, 1, 1], [], []>} : vector<7x256xbf16>, vector<256x128xbf16>, vector<7x128xf32> -> vector<7x128xf32>
    %134 = arith.addf %130, %133 : vector<7x128xf32>
    %c0_161 = arith.constant 0 : index
    %c0_162 = arith.constant 0 : index
    %135 = vector.load %arg9[%c0_161, %c0_162] : memref<10x128xf32, #tpu.memory_space<vmem>>, vector<7x128xf32>
    tpu.vector_store %arg9[%c0_161, %c0_162], %134 {strides = array<i32>} : memref<10x128xf32, #tpu.memory_space<vmem>>, vector<7x128xf32>,
    %c18 = arith.constant 18 : index
    %c0_163 = arith.constant 0 : index
    %136 = vector.load %arg8[%c18, %c0_163] : memref<25x256xf32, #tpu.memory_space<vmem>>, vector<7x256xf32>
    %137 = arith.truncf %136 : vector<7x256xf32> to vector<7x256xbf16>
    %c0_164 = arith.constant 0 : index
    %c0_165 = arith.constant 0 : index
    %138 = vector.load %arg9[%c0_164, %c0_165] : memref<10x128xf32, #tpu.memory_space<vmem>>, vector<7x128xf32>
    %c3_166 = arith.constant 3 : index
    %c3_167 = arith.constant 3 : index
    %c0_168 = arith.constant 0 : index
    %c0_169 = arith.constant 0 : index
    %139 = vector.load %arg5[%c3_166, %c3_167, %c0_168, %c0_169] : memref<4x4x256x128xbf16, #tpu.memory_space<vmem>>, vector<1x1x256x128xbf16>
    %140 = vector.shape_cast %139 : vector<1x1x256x128xbf16> to vector<256x128xbf16>
    %cst_170 = arith.constant dense<0.000000e+00> : vector<7x128xf32>
    %141 = tpu.matmul %137, %140, %cst_170 {dimension_numbers = #tpu.dot_dimension_numbers<[1], [0], [0], [1], [0, 0, 1, 1], [], []>} : vector<7x256xbf16>, vector<256x128xbf16>, vector<7x128xf32> -> vector<7x128xf32>
    %142 = arith.addf %138, %141 : vector<7x128xf32>
    %c0_171 = arith.constant 0 : index
    %c0_172 = arith.constant 0 : index
    %143 = vector.load %arg9[%c0_171, %c0_172] : memref<10x128xf32, #tpu.memory_space<vmem>>, vector<7x128xf32>
    tpu.vector_store %arg9[%c0_171, %c0_172], %142 {strides = array<i32>} : memref<10x128xf32, #tpu.memory_space<vmem>>, vector<7x128xf32>,
    %c0_173 = arith.constant 0 : index
    %c0_174 = arith.constant 0 : index
    %144 = vector.load %arg9[%c0_173, %c0_174] : memref<10x128xf32, #tpu.memory_space<vmem>>, vector<10x128xf32>
    %c0_175 = arith.constant 0 : index
    %c0_176 = arith.constant 0 : index
    %145 = vector.load %arg6[%c0_175, %c0_176] : memref<1x128xf32, #tpu.memory_space<vmem>>, vector<1x128xf32>
    %146 = vector.broadcast %145 : vector<1x128xf32> to vector<10x128xf32>
    %147 = arith.addf %144, %146 : vector<10x128xf32>
    %c0_177 = arith.constant 0 : index
    %c0_178 = arith.constant 0 : index
    %c0_179 = arith.constant 0 : index
    %148 = vector.load %arg7[%c0_177, %c0_178, %c0_179] : memref<1x10x128xf32, #tpu.memory_space<vmem>>, vector<1x10x128xf32>
    %149 = vector.shape_cast %148 : vector<1x10x128xf32> to vector<10x128xf32>
    %150 = vector.shape_cast %147 : vector<10x128xf32> to vector<1x10x128xf32>
    tpu.vector_store %arg7[%c0_177, %c0_178, %c0_179], %150 {strides = array<i32>} : memref<1x10x128xf32, #tpu.memory_space<vmem>>, vector<1x10x128xf32>,
    return
  }
  func.func @transform_0(%arg0: i32, %arg1: i32) -> (i32, i32, i32) {
    %c0_i32 = arith.constant 0 : i32
    %c0_i32_0 = arith.constant 0 : i32
    %c0_i32_1 = arith.constant 0 : i32
    return %arg0, %c0_i32, %c0_i32_0 : i32, i32, i32
  }
  func.func @transform_1(%arg0: i32, %arg1: i32) -> (i32, i32) {
    %c0_i32 = arith.constant 0 : i32
    %c0_i32_0 = arith.constant 0 : i32
    %c0_i32_1 = arith.constant 0 : i32
    return %c0_i32, %c0_i32_0 : i32, i32
  }
  func.func @transform_2(%arg0: i32, %arg1: i32) -> (i32, i32) {
    %c0_i32 = arith.constant 0 : i32
    %c0_i32_0 = arith.constant 0 : i32
    %c0_i32_1 = arith.constant 0 : i32
    return %c0_i32, %c0_i32_0 : i32, i32
  }
  func.func @transform_3(%arg0: i32, %arg1: i32) -> (i32, i32, i32, i32) {
    %c0_i32 = arith.constant 0 : i32
    %c0_i32_0 = arith.constant 0 : i32
    %c0_i32_1 = arith.constant 0 : i32
    %c0_i32_2 = arith.constant 0 : i32
    return %c0_i32, %c0_i32_0, %c0_i32_1, %arg1 : i32, i32, i32, i32
  }
  func.func @transform_4(%arg0: i32, %arg1: i32) -> (i32, i32) {
    %c0_i32 = arith.constant 0 : i32
    %c0_i32_0 = arith.constant 0 : i32
    return %c0_i32, %arg1 : i32, i32
  }
  func.func @transform_5(%arg0: i32, %arg1: i32) -> (i32, i32, i32) {
    %c0_i32 = arith.constant 0 : i32
    %c0_i32_0 = arith.constant 0 : i32
    return %arg0, %c0_i32, %arg1 : i32, i32, i32
  }
}

</mosaic_0001>

<bundles_post_ra>
// kernel: discriminator_forward.5
= control target key start
LH: loop header
LB: loop body
LE: loop exit
PB: predicated region body
PF: predicated region fallthrough
CT: control target
= control target key end

     0   :  { %s1021_s18 = smov 0   ;;  %s1023_s19 = smov 0   ;;  %s1351_s0 = inlined_call_operand.vmem [shape: f32[2,256,48], index: 0, kind: input, shape index: {}]   ;;  %s1352_s1 = inlined_call_operand.vmem [shape: f32[1,48], index: 1, kind: input, shape index: {}]   ;;  %s1353_s2 = inlined_call_operand.vmem [shape: f32[1,48], index: 2, kind: input, shape index: {}]   ;;  %s1354_s3 = inlined_call_operand.vmem [shape: bf16[1,1,48,32], index: 3, kind: input, shape index: {}]   ;;  %s1355_s4 = inlined_call_operand.vmem [shape: f32[1,32], index: 4, kind: input, shape index: {}]   ;;  %s1356_s5 = inlined_call_operand.vmem [shape: f32[2,256,32], index: 5, kind: output, shape index: {}]  }
   0x1   :  { %s1025_s20 = smov 0  }
   0x2 LB: > { %s27_s1 = sadd.s32 1, %s984_s19  ;;  %p891_p0 = scmp.ge.s32.totalorder %s988_s20, 1  ;;  %s988_s20 = sphi %s1025_s20, %s15_s20   ;;  %s984_s19 = sphi %s1023_s19, %s1358_s19   ;;  %s980_s18 = sphi %s1021_s18, %s1357_s18  }
   0x3   : > { %p29_p1 = scmp.ge.s32.totalorder %s27_s1, 2  ;;  %p218_p2 = scmp.lt.s32.totalorder %s988_s20, 3 }
   0x5   : > { %s1360_s1 = smov (%p29_p1, %s27_s1), 0  ;;  %p219_p3 = pnand %p891_p0, %p218_p2 }
   0x6   : > { %p256_p4 = scmp.lt.s32.totalorder (!%p219_p3), %s980_s18, 1 }
   0x7   : > { %222 = sbr.rel (%p219_p3) target bundleno = 234 (0xea), region = 40 }
   0xc   : > { %v930_v0 = vld [vmem:[%s1354_s3 + $0x10] sm:$0xff]  ;;  %v929_v1 = vld [vmem:[%s1354_s3 + $0x8] sm:$0xff]  ;;  %s1362_s18 = smov (!%p256_p4, %s980_s18), 1  ;;  %vm309_vm0 = vcmask 392192   ;;  %v928_v2 = vld [vmem:[%s1354_s3] sm:$0xff]  ;;  %vm342_vm1 = vcmask 261120  }
   0xd   : > { %532 = vmatpush.bf16.msra.mxu0 %v930_v0  ;;  %931 = vmatpush.bf16.msra.mxu1 %v930_v0  ;;  %s926_s24 = sshll.u32 %s1362_s18, 8  ;;  %v990_v59 = vmov 0.0  }
   0xe   : > { %932 = vmatpush.bf16.msra.mxu2 %v930_v0  ;;  %933 = vmatpush.bf16.msra.mxu3 %v930_v0  ;;  %s1056_s29 = scalar_lea.vmem %s1351_s0, %s926_s24  ;;  %343 = vst.msk [vmem:[#allocation3] sm:$0xff] %vm342_vm1, %v990_v59  ;;  %s1214_s9 = scalar_lea.vmem %s1356_s5, %s926_s24 }
   0xf   : > { %v277_v3 = vld [vmem:[%s1056_s29] sm:$0xff]  ;;  %v278_v4 = vld [vmem:[%s1056_s29 + $0x8] sm:$0xff]  ;;  %v279_v11 = vld [vmem:[%s1056_s29 + $0x10] sm:$0xff]  ;;  %344 = vst.msk [vmem:[#allocation3 + $0x8] sm:$0xff] %vm342_vm1, %v990_v59 }
  0x10   : > { %v285_v5 = vld [vmem:[%s1056_s29 + $0x40] sm:$0xff]  ;;  %310 = vst.msk [vmem:[#allocation2] sm:$0xff] %vm309_vm0, %v277_v3  ;;  %v286_v6 = vld [vmem:[%s1056_s29 + $0x48] sm:$0xff]  ;;  %v280_v12 = vld [vmem:[%s1056_s29 + $0x18] sm:$0xff] }
  0x11   : > { %533 = vmatpush.bf16.msra.mxu0 %v929_v1  ;;  %934 = vmatpush.bf16.msra.mxu1 %v929_v1  ;;  %311 = vst.msk [vmem:[#allocation2 + $0x8] sm:$0xff] %vm309_vm0, %v278_v4  ;;  %v293_v7 = vld [vmem:[%s1056_s29 + $0x80] sm:$0xff]  ;;  %v294_v8 = vld [vmem:[%s1056_s29 + $0x88] sm:$0xff]  ;;  %v287_v14 = vld [vmem:[%s1056_s29 + $0x50] sm:$0xff] }
  0x12   : > { %935 = vmatpush.bf16.msra.mxu2 %v929_v1  ;;  %936 = vmatpush.bf16.msra.mxu3 %v929_v1  ;;  %318 = vst.msk [vmem:[#allocation2 + $0x40] sm:$0xff] %vm309_vm0, %v285_v5  ;;  %v301_v9 = vld [vmem:[%s1056_s29 + $0xc0] sm:$0xff]  ;;  %v302_v10 = vld [vmem:[%s1056_s29 + $0xc8] sm:$0xff]  ;;  %v288_v16 = vld [vmem:[%s1056_s29 + $0x58] sm:$0xff] }
  0x13   : > { %319 = vst.msk [vmem:[#allocation2 + $0x48] sm:$0xff] %vm309_vm0, %v286_v6  ;;  %v295_v19 = vld [vmem:[%s1056_s29 + $0x90] sm:$0xff]  ;;  %v296_v21 = vld [vmem:[%s1056_s29 + $0x98] sm:$0xff]  ;;  %v281_v29 = vld [vmem:[%s1056_s29 + $0x20] sm:$0xff] }
  0x14   : > { %326 = vst.msk [vmem:[#allocation2 + $0x80] sm:$0xff] %vm309_vm0, %v293_v7  ;;  %v303_v24 = vld [vmem:[%s1056_s29 + $0xd0] sm:$0xff]  ;;  %v304_v26 = vld [vmem:[%s1056_s29 + $0xd8] sm:$0xff]  ;;  %v282_v31 = vld [vmem:[%s1056_s29 + $0x28] sm:$0xff] }
  0x15   : > { %534 = vmatpush.bf16.msra.mxu0 %v928_v2  ;;  %937 = vmatpush.bf16.msra.mxu1 %v928_v2  ;;  %327 = vst.msk [vmem:[#allocation2 + $0x88] sm:$0xff] %vm309_vm0, %v294_v8  ;;  %v289_v33 = vld [vmem:[%s1056_s29 + $0x60] sm:$0xff]  ;;  %v290_v34 = vld [vmem:[%s1056_s29 + $0x68] sm:$0xff]  ;;  %v283_v41 = vld [vmem:[%s1056_s29 + $0x30] sm:$0xff] }
  0x16   : > { %938 = vmatpush.bf16.msra.mxu2 %v928_v2  ;;  %939 = vmatpush.bf16.msra.mxu3 %v928_v2  ;;  %334 = vst.msk [vmem:[#allocation2 + $0xc0] sm:$0xff] %vm309_vm0, %v301_v9  ;;  %v297_v35 = vld [vmem:[%s1056_s29 + $0xa0] sm:$0xff]  ;;  %v298_v36 = vld [vmem:[%s1056_s29 + $0xa8] sm:$0xff]  ;;  %v284_v44 = vld [vmem:[%s1056_s29 + $0x38] sm:$0xff] }
  0x17   : > { %v375_v13 = vld [vmem:[#allocation2] sm:$0xff]  ;;  %335 = vst.msk [vmem:[#allocation2 + $0xc8] sm:$0xff] %vm309_vm0, %v302_v10  ;;  %v306_v40 = vld [vmem:[%s1056_s29 + $0xe8] sm:$0xff]  ;;  %v291_v46 = vld [vmem:[%s1056_s29 + $0x70] sm:$0xff] }
  0x18   : > { %v376_v15 = vld [vmem:[#allocation2 + $0x8] sm:$0xff]  ;;  %312 = vst.msk [vmem:[#allocation2 + $0x10] sm:$0xff] %vm309_vm0, %v279_v11  ;;  %v305_v37 = vld [vmem:[%s1056_s29 + $0xe0] sm:$0xff]  ;;  %v292_v49 = vld [vmem:[%s1056_s29 + $0x78] sm:$0xff] }
  0x19   : > { %v407_v17 = vpack.c.bf16 %v376_v15, %v375_v13  ;;  %v383_v18 = vld [vmem:[#allocation2 + $0x40] sm:$0xff]  ;;  %313 = vst.msk [vmem:[#allocation2 + $0x18] sm:$0xff] %vm309_vm0, %v280_v12  ;;  %v299_v51 = vld [vmem:[%s1056_s29 + $0xb0] sm:$0xff]  ;;  %v300_v54 = vld [vmem:[%s1056_s29 + $0xb8] sm:$0xff] }
  0x1a   : > { %v384_v20 = vld [vmem:[#allocation2 + $0x48] sm:$0xff]  ;;  %320 = vst.msk [vmem:[#allocation2 + $0x50] sm:$0xff] %vm309_vm0, %v287_v14  ;;  %v307_v56 = vld [vmem:[%s1056_s29 + $0xf0] sm:$0xff]  ;;  %v308_v57 = vld [vmem:[%s1056_s29 + $0xf8] sm:$0xff] }
  0x1b   : > { %908 = vmatmul.msk.bf16.vlgmr.msra.gmra.mxu0 %vm309_vm0, %v407_v17  ;;  %v411_v22 = vpack.c.bf16 %v384_v20, %v383_v18  ;;  %v391_v23 = vld [vmem:[#allocation2 + $0x80] sm:$0xff]  ;;  %321 = vst.msk [vmem:[#allocation2 + $0x58] sm:$0xff] %vm309_vm0, %v288_v16 }
  0x1c   : > { %v392_v25 = vld [vmem:[#allocation2 + $0x88] sm:$0xff]  ;;  %328 = vst.msk [vmem:[#allocation2 + $0x90] sm:$0xff] %vm309_vm0, %v295_v19  ;;  %v423_v20 = vld [vmem:[#allocation3] sm:$0xff] }
  0x1d   : > { %912 = vmatmul.msk.bf16.vlgmr.msra.gmra.mxu1 %vm309_vm0, %v411_v22  ;;  %v415_v27 = vpack.c.bf16 %v392_v25, %v391_v23  ;;  %v399_v28 = vld [vmem:[#allocation2 + $0xc0] sm:$0xff]  ;;  %329 = vst.msk [vmem:[#allocation2 + $0x98] sm:$0xff] %vm309_vm0, %v296_v21 }
  0x1e   : > { %v400_v30 = vld [vmem:[#allocation2 + $0xc8] sm:$0xff]  ;;  %336 = vst.msk [vmem:[#allocation2 + $0xd0] sm:$0xff] %vm309_vm0, %v303_v24 }
  0x1f   : > { %916 = vmatmul.msk.bf16.vlgmr.msra.gmra.mxu2 %vm309_vm0, %v415_v27  ;;  %v419_v32 = vpack.c.bf16 %v400_v30, %v399_v28  ;;  %337 = vst.msk [vmem:[#allocation2 + $0xd8] sm:$0xff] %vm309_vm0, %v304_v26  ;;  %v377_v38 = vld [vmem:[#allocation2 + $0x10] sm:$0xff]  ;;  %v424_v26 = vld [vmem:[#allocation3 + $0x8] sm:$0xff]  ;;  %v1207_v27 = vld [vmem:[%s1355_s4] ss:$0 sm:$0xff] }
  0x20   : > { %314 = vst.msk [vmem:[#allocation2 + $0x20] sm:$0xff] %vm309_vm0, %v281_v29  ;;  %v378_v39 = vld [vmem:[#allocation2 + $0x18] sm:$0xff] }
  0x21   : > { %920 = vmatmul.msk.bf16.vlgmr.msra.gmra.mxu3 %vm309_vm0, %v419_v32  ;;  %315 = vst.msk [vmem:[#allocation2 + $0x28] sm:$0xff] %vm309_vm0, %v282_v31  ;;  %v385_v42 = vld [vmem:[#allocation2 + $0x50] sm:$0xff]  ;;  %v408_v45 = vpack.c.bf16 %v378_v39, %v377_v38 }
  0x22   : > { %322 = vst.msk [vmem:[#allocation2 + $0x60] sm:$0xff] %vm309_vm0, %v289_v33  ;;  %v386_v43 = vld [vmem:[#allocation2 + $0x58] sm:$0xff] }
  0x23   : > { %323 = vst.msk [vmem:[#allocation2 + $0x68] sm:$0xff] %vm309_vm0, %v290_v34  ;;  %v393_v47 = vld [vmem:[#allocation2 + $0x90] sm:$0xff]  ;;  %v412_v50 = vpack.c.bf16 %v386_v43, %v385_v42 }
  0x24   : > { %330 = vst.msk [vmem:[#allocation2 + $0xa0] sm:$0xff] %vm309_vm0, %v297_v35  ;;  %v394_v48 = vld [vmem:[#allocation2 + $0x98] sm:$0xff] }
  0x25   : > { %331 = vst.msk [vmem:[#allocation2 + $0xa8] sm:$0xff] %vm309_vm0, %v298_v36  ;;  %v401_v52 = vld [vmem:[#allocation2 + $0xd0] sm:$0xff]  ;;  %v416_v55 = vpack.c.bf16 %v394_v48, %v393_v47 }
  0x26   : > { %338 = vst.msk [vmem:[#allocation2 + $0xe0] sm:$0xff] %vm309_vm0, %v305_v37  ;;  %v402_v53 = vld [vmem:[#allocation2 + $0xd8] sm:$0xff] }
  0x27   : > { %339 = vst.msk [vmem:[#allocation2 + $0xe8] sm:$0xff] %vm309_vm0, %v306_v40  ;;  %v420_v58 = vpack.c.bf16 %v402_v53, %v401_v52  ;;  %v379_v60 = vld [vmem:[#allocation2 + $0x20] sm:$0xff] }
  0x28   : > { %316 = vst.msk [vmem:[#allocation2 + $0x30] sm:$0xff] %vm309_vm0, %v283_v41  ;;  %v380_v61 = vld [vmem:[#allocation2 + $0x28] sm:$0xff] }
  0x29   : > { %317 = vst.msk [vmem:[#allocation2 + $0x38] sm:$0xff] %vm309_vm0, %v284_v44  ;;  %v387_v62 = vld [vmem:[#allocation2 + $0x60] sm:$0xff]  ;;  %v409_v0 = vpack.c.bf16 %v380_v61, %v379_v60 }
  0x2a   : > { %324 = vst.msk [vmem:[#allocation2 + $0x70] sm:$0xff] %vm309_vm0, %v291_v46  ;;  %v388_v63 = vld [vmem:[#allocation2 + $0x68] sm:$0xff] }
  0x2b   : > { %909 = vmatmul.msk.bf16.gmra.mxu0 %vm309_vm0, %v408_v45  ;;  %325 = vst.msk [vmem:[#allocation2 + $0x78] sm:$0xff] %vm309_vm0, %v292_v49  ;;  %v395_v1 = vld [vmem:[#allocation2 + $0xa0] sm:$0xff]  ;;  %v413_v3 = vpack.c.bf16 %v388_v63, %v387_v62 }
  0x2c   : > { %332 = vst.msk [vmem:[#allocation2 + $0xb0] sm:$0xff] %vm309_vm0, %v299_v51  ;;  %v396_v2 = vld [vmem:[#allocation2 + $0xa8] sm:$0xff] }
  0x2d   : > { %913 = vmatmul.msk.bf16.gmra.mxu1 %vm309_vm0, %v412_v50  ;;  %333 = vst.msk [vmem:[#allocation2 + $0xb8] sm:$0xff] %vm309_vm0, %v300_v54  ;;  %v403_v4 = vld [vmem:[#allocation2 + $0xe0] sm:$0xff]  ;;  %v417_v6 = vpack.c.bf16 %v396_v2, %v395_v1 }
  0x2e   : > { %340 = vst.msk [vmem:[#allocation2 + $0xf0] sm:$0xff] %vm309_vm0, %v307_v56  ;;  %v404_v5 = vld [vmem:[#allocation2 + $0xe8] sm:$0xff] }
  0x2f   : > { %917 = vmatmul.msk.bf16.gmra.mxu2 %vm309_vm0, %v416_v55  ;;  %341 = vst.msk [vmem:[#allocation2 + $0xf8] sm:$0xff] %vm309_vm0, %v308_v57  ;;  %v421_v7 = vpack.c.bf16 %v404_v5, %v403_v4  ;;  %v381_v8 = vld [vmem:[#allocation2 + $0x30] sm:$0xff] }
  0x30   : > { %345 = vst.msk [vmem:[#allocation3 + $0x10] sm:$0xff] %vm342_vm1, %v990_v59  ;;  %v382_v9 = vld [vmem:[#allocation2 + $0x38] sm:$0xff] }
  0x31   : > { %921 = vmatmul.msk.bf16.gmra.mxu3 %vm309_vm0, %v420_v58  ;;  %346 = vst.msk [vmem:[#allocation3 + $0x18] sm:$0xff] %vm342_vm1, %v990_v59  ;;  %v389_v10 = vld [vmem:[#allocation2 + $0x70] sm:$0xff]  ;;  %v410_v12 = vpack.c.bf16 %v382_v9, %v381_v8 }
  0x32   : > { %347 = vst.msk [vmem:[#allocation3 + $0x20] sm:$0xff] %vm342_vm1, %v990_v59  ;;  %v390_v11 = vld [vmem:[#allocation2 + $0x78] sm:$0xff] }
  0x33   : > { %348 = vst.msk [vmem:[#allocation3 + $0x28] sm:$0xff] %vm342_vm1, %v990_v59  ;;  %v397_v13 = vld [vmem:[#allocation2 + $0xb0] sm:$0xff]  ;;  %v414_v15 = vpack.c.bf16 %v390_v11, %v389_v10 }
  0x34   : > { %349 = vst.msk [vmem:[#allocation3 + $0x30] sm:$0xff] %vm342_vm1, %v990_v59  ;;  %v398_v14 = vld [vmem:[#allocation2 + $0xb8] sm:$0xff] }
  0x35   : > { %350 = vst.msk [vmem:[#allocation3 + $0x38] sm:$0xff] %vm342_vm1, %v990_v59  ;;  %v405_v16 = vld [vmem:[#allocation2 + $0xf0] sm:$0xff]  ;;  %v418_v18 = vpack.c.bf16 %v398_v14, %v397_v13 }
  0x36   : > { %351 = vst.msk [vmem:[#allocation3 + $0x40] sm:$0xff] %vm342_vm1, %v990_v59  ;;  %v406_v17 = vld [vmem:[#allocation2 + $0xf8] sm:$0xff] }
  0x37   : > { %352 = vst.msk [vmem:[#allocation3 + $0x48] sm:$0xff] %vm342_vm1, %v990_v59  ;;  %v422_v19 = vpack.c.bf16 %v406_v17, %v405_v16  ;;  %v425_v43 = vld [vmem:[#allocation3 + $0x10] sm:$0xff] }
  0x38   : > { %353 = vst.msk [vmem:[#allocation3 + $0x50] sm:$0xff] %vm342_vm1, %v990_v59 }
  0x39   : > { %354 = vst.msk [vmem:[#allocation3 + $0x58] sm:$0xff] %vm342_vm1, %v990_v59  ;;  %v427_v16 = vld [vmem:[#allocation3 + $0x20] sm:$0xff] }
  0x3a   : > { %355 = vst.msk [vmem:[#allocation3 + $0x60] sm:$0xff] %vm342_vm1, %v990_v59 }
  0x3b   : > { %910 = vmatmul.msk.bf16.gmra.mxu0 %vm309_vm0, %v409_v0  ;;  %356 = vst.msk [vmem:[#allocation3 + $0x68] sm:$0xff] %vm342_vm1, %v990_v59 }
  0x3c   : > { %357 = vst.msk [vmem:[#allocation3 + $0x70] sm:$0xff] %vm342_vm1, %v990_v59 }
  0x3d   : > { %914 = vmatmul.msk.bf16.gmra.mxu1 %vm309_vm0, %v413_v3  ;;  %358 = vst.msk [vmem:[#allocation3 + $0x78] sm:$0xff] %vm342_vm1, %v990_v59  ;;  %v431_v22 = vld [vmem:[#allocation3 + $0x40] sm:$0xff] }
  0x3e   : > { %359 = vst.msk [vmem:[#allocation3 + $0x80] sm:$0xff] %vm342_vm1, %v990_v59  ;;  %v432_v34 = vld [vmem:[#allocation3 + $0x48] sm:$0xff] }
  0x3f   : > { %918 = vmatmul.msk.bf16.gmra.mxu2 %vm309_vm0, %v417_v6  ;;  %360 = vst.msk [vmem:[#allocation3 + $0x88] sm:$0xff] %vm342_vm1, %v990_v59  ;;  %v433_v50 = vld [vmem:[#allocation3 + $0x50] sm:$0xff] }
  0x40   : > { %361 = vst.msk [vmem:[#allocation3 + $0x90] sm:$0xff] %vm342_vm1, %v990_v59  ;;  %v434_v9 = vld [vmem:[#allocation3 + $0x58] sm:$0xff] }
  0x41   : > { %922 = vmatmul.msk.bf16.gmra.mxu3 %vm309_vm0, %v421_v7  ;;  %362 = vst.msk [vmem:[#allocation3 + $0x98] sm:$0xff] %vm342_vm1, %v990_v59 }
  0x42   : > { %363 = vst.msk [vmem:[#allocation3 + $0xa0] sm:$0xff] %vm342_vm1, %v990_v59 }
  0x43   : > { %364 = vst.msk [vmem:[#allocation3 + $0xa8] sm:$0xff] %vm342_vm1, %v990_v59 }
  0x44   : > { %365 = vst.msk [vmem:[#allocation3 + $0xb0] sm:$0xff] %vm342_vm1, %v990_v59 }
  0x45   : > { %366 = vst.msk [vmem:[#allocation3 + $0xb8] sm:$0xff] %vm342_vm1, %v990_v59  ;;  %v439_v28 = vld [vmem:[#allocation3 + $0x80] sm:$0xff] }
  0x46   : > { %367 = vst.msk [vmem:[#allocation3 + $0xc0] sm:$0xff] %vm342_vm1, %v990_v59  ;;  %v440_v44 = vld [vmem:[#allocation3 + $0x88] sm:$0xff] }
  0x47   : > { %368 = vst.msk [vmem:[#allocation3 + $0xc8] sm:$0xff] %vm342_vm1, %v990_v59  ;;  %v441_v63 = vld [vmem:[#allocation3 + $0x90] sm:$0xff] }
  0x48   : > { %369 = vst.msk [vmem:[#allocation3 + $0xd0] sm:$0xff] %vm342_vm1, %v990_v59 }
  0x49   : > { %370 = vst.msk [vmem:[#allocation3 + $0xd8] sm:$0xff] %vm342_vm1, %v990_v59 }
  0x4a   : > { %371 = vst.msk [vmem:[#allocation3 + $0xe0] sm:$0xff] %vm342_vm1, %v990_v59 }
  0x4b   : > { %911 = vmatmul.msk.bf16.gmra.mxu0 %vm309_vm0, %v410_v12  ;;  %372 = vst.msk [vmem:[#allocation3 + $0xe8] sm:$0xff] %vm342_vm1, %v990_v59 }
  0x4c   : > { %373 = vst.msk [vmem:[#allocation3 + $0xf0] sm:$0xff] %vm342_vm1, %v990_v59 }
  0x4d   : > { %915 = vmatmul.msk.bf16.gmra.mxu1 %vm309_vm0, %v414_v15  ;;  %374 = vst.msk [vmem:[#allocation3 + $0xf8] sm:$0xff] %vm342_vm1, %v990_v59  ;;  %v447_v33 = vld [vmem:[#allocation3 + $0xc0] sm:$0xff]  ;;  %v426_v59 = vld [vmem:[#allocation3 + $0x18] sm:$0xff] }
  0x4e   : > { %v448_v49 = vld [vmem:[#allocation3 + $0xc8] sm:$0xff] }
  0x4f   : > { %919 = vmatmul.msk.bf16.gmra.mxu2 %vm309_vm0, %v418_v18  ;;  %v449_v5 = vld [vmem:[#allocation3 + $0xd0] sm:$0xff] }
  0x51   : > { %923 = vmatmul.msk.bf16.gmra.mxu3 %vm309_vm0, %v422_v19  ;;  %v442_v19 = vld [vmem:[#allocation3 + $0x98] sm:$0xff] }
  0x98   : > { %v536_v21 = vpop.f32.mrf.mxu0 }
  0x99   : > { %v616_v23 = vadd.f32 %v536_v21, %v423_v20 }
  0x9a   : > { %v556_v24 = vpop.f32.mrf.mxu1 }
  0x9b   : > { %648 = vst.msk [vmem:[#allocation3] sm:$0xff] %vm342_vm1, %v616_v23  ;;  %v624_v25 = vadd.f32 %v556_v24, %v431_v22  ;;  %v450_v24 = vld [vmem:[#allocation3 + $0xd8] sm:$0xff] }
  0x9d   : > { %656 = vst.msk [vmem:[#allocation3 + $0x40] sm:$0xff] %vm342_vm1, %v624_v25 }
  0xa0   : > { %v538_v29 = vpop.f32.mrf.mxu0 }
  0xa1   : > { %v617_v30 = vadd.f32 %v538_v29, %v424_v26  ;;  %v435_v29 = vld [vmem:[#allocation3 + $0x60] sm:$0xff] }
  0xa2   : > { %v680_v31 = vld [vmem:[#allocation3] sm:$0xff]  ;;  %v576_v32 = vpop.f32.mrf.mxu2  ;;  %v558_v35 = vpop.f32.mrf.mxu1 }
  0xa3   : > { %v716_v36 = vadd.f32 %v1207_v27, %v680_v31  ;;  %v632_v37 = vadd.f32 %v576_v32, %v439_v28  ;;  %649 = vst.msk [vmem:[#allocation3 + $0x8] sm:$0xff] %vm342_vm1, %v617_v30  ;;  %v625_v42 = vadd.f32 %v558_v35, %v432_v34 }
  0xa4   : > { %v688_v38 = vld [vmem:[#allocation3 + $0x40] sm:$0xff]  ;;  %v596_v39 = vpop.f32.mrf.mxu3 }
  0xa5   : > { %748 = vst.msk [vmem:[%s1214_s9] sm:$0xff] %vm342_vm1, %v716_v36  ;;  %v724_v40 = vadd.f32 %v1207_v27, %v688_v38  ;;  %v640_v41 = vadd.f32 %v596_v39, %v447_v33  ;;  %v443_v39 = vld [vmem:[#allocation3 + $0xa0] sm:$0xff] }
  0xa6   : > { %664 = vst.msk [vmem:[#allocation3 + $0x80] sm:$0xff] %vm342_vm1, %v632_v37  ;;  %v428_v37 = vld [vmem:[#allocation3 + $0x28] sm:$0xff] }
  0xa7   : > { %756 = vst.msk [vmem:[%s1214_s9 + $0x40] sm:$0xff] %vm342_vm1, %v724_v40 }
  0xa8   : > { %672 = vst.msk [vmem:[#allocation3 + $0xc0] sm:$0xff] %vm342_vm1, %v640_v41  ;;  %v541_v45 = vpop.f32.mrf.mxu0 }
  0xa9   : > { %657 = vst.msk [vmem:[#allocation3 + $0x48] sm:$0xff] %vm342_vm1, %v625_v42  ;;  %v618_v46 = vadd.f32 %v541_v45, %v425_v43  ;;  %v451_v45 = vld [vmem:[#allocation3 + $0xe0] sm:$0xff] }
  0xaa   : > { %v681_v47 = vld [vmem:[#allocation3 + $0x8] sm:$0xff]  ;;  %v578_v48 = vpop.f32.mrf.mxu2  ;;  %v561_v51 = vpop.f32.mrf.mxu1 }
  0xab   : > { %v717_v52 = vadd.f32 %v1207_v27, %v681_v47  ;;  %v633_v53 = vadd.f32 %v578_v48, %v440_v44  ;;  %650 = vst.msk [vmem:[#allocation3 + $0x10] sm:$0xff] %vm342_vm1, %v618_v46  ;;  %v626_v57 = vadd.f32 %v561_v51, %v433_v50 }
  0xac   : > { %v598_v54 = vpop.f32.mrf.mxu3 }
  0xad   : > { %v696_v55 = vld [vmem:[#allocation3 + $0x80] sm:$0xff]  ;;  %749 = vst.msk [vmem:[%s1214_s9 + $0x8] sm:$0xff] %vm342_vm1, %v717_v52  ;;  %v641_v56 = vadd.f32 %v598_v54, %v448_v49  ;;  %v436_v49 = vld [vmem:[#allocation3 + $0x68] sm:$0xff] }
  0xae   : > { %v732_v58 = vadd.f32 %v1207_v27, %v696_v55  ;;  %665 = vst.msk [vmem:[#allocation3 + $0x88] sm:$0xff] %vm342_vm1, %v633_v53 }
  0xaf   : > { %v704_v60 = vld [vmem:[#allocation3 + $0xc0] sm:$0xff]  ;;  %673 = vst.msk [vmem:[#allocation3 + $0xc8] sm:$0xff] %vm342_vm1, %v641_v56 }
  0xb0   : > { %764 = vst.msk [vmem:[%s1214_s9 + $0x80] sm:$0xff] %vm342_vm1, %v732_v58  ;;  %v740_v61 = vadd.f32 %v1207_v27, %v704_v60  ;;  %v689_v62 = vld [vmem:[#allocation3 + $0x48] sm:$0xff]  ;;  %v543_v0 = vpop.f32.mrf.mxu0 }
  0xb1   : > { %v725_v1 = vadd.f32 %v1207_v27, %v689_v62  ;;  %658 = vst.msk [vmem:[#allocation3 + $0x50] sm:$0xff] %vm342_vm1, %v626_v57  ;;  %v619_v2 = vadd.f32 %v543_v0, %v426_v59  ;;  %v429_v57 = vld [vmem:[#allocation3 + $0x30] sm:$0xff]  ;;  %v444_v59 = vld [vmem:[#allocation3 + $0xa8] sm:$0xff] }
  0xb2   : > { %772 = vst.msk [vmem:[%s1214_s9 + $0xc0] sm:$0xff] %vm342_vm1, %v740_v61  ;;  %v682_v3 = vld [vmem:[#allocation3 + $0x10] sm:$0xff]  ;;  %v581_v4 = vpop.f32.mrf.mxu2  ;;  %v563_v6 = vpop.f32.mrf.mxu1 }
  0xb3   : > { %757 = vst.msk [vmem:[%s1214_s9 + $0x48] sm:$0xff] %vm342_vm1, %v725_v1  ;;  %v718_v7 = vadd.f32 %v1207_v27, %v682_v3  ;;  %v634_v8 = vadd.f32 %v581_v4, %v441_v63  ;;  %v627_v15 = vadd.f32 %v563_v6, %v434_v9  ;;  %v437_v3 = vld [vmem:[#allocation3 + $0x70] sm:$0xff] }
  0xb4   : > { %v601_v10 = vpop.f32.mrf.mxu3  ;;  %651 = vst.msk [vmem:[#allocation3 + $0x18] sm:$0xff] %vm342_vm1, %v619_v2  ;;  %v452_v2 = vld [vmem:[#allocation3 + $0xe8] sm:$0xff] }
  0xb5   : > { %v697_v11 = vld [vmem:[#allocation3 + $0x88] sm:$0xff]  ;;  %750 = vst.msk [vmem:[%s1214_s9 + $0x10] sm:$0xff] %vm342_vm1, %v718_v7  ;;  %v642_v12 = vadd.f32 %v601_v10, %v449_v5 }
  0xb6   : > { %v733_v13 = vadd.f32 %v1207_v27, %v697_v11  ;;  %v705_v14 = vld [vmem:[#allocation3 + $0xc8] sm:$0xff]  ;;  %666 = vst.msk [vmem:[#allocation3 + $0x90] sm:$0xff] %vm342_vm1, %v634_v8 }
  0xb7   : > { %v741_v17 = vadd.f32 %v1207_v27, %v705_v14  ;;  %674 = vst.msk [vmem:[#allocation3 + $0xd0] sm:$0xff] %vm342_vm1, %v642_v12  ;;  %v430_v12 = vld [vmem:[#allocation3 + $0x38] sm:$0xff] }
  0xb8   : > { %765 = vst.msk [vmem:[%s1214_s9 + $0x88] sm:$0xff] %vm342_vm1, %v733_v13  ;;  %v690_v18 = vld [vmem:[#allocation3 + $0x50] sm:$0xff]  ;;  %v546_v20 = vpop.f32.mrf.mxu0 }
  0xb9   : > { %773 = vst.msk [vmem:[%s1214_s9 + $0xc8] sm:$0xff] %vm342_vm1, %v741_v17  ;;  %v726_v21 = vadd.f32 %v1207_v27, %v690_v18  ;;  %v620_v22 = vadd.f32 %v546_v20, %v427_v16 }
  0xba   : > { %659 = vst.msk [vmem:[#allocation3 + $0x58] sm:$0xff] %vm342_vm1, %v627_v15  ;;  %v583_v23 = vpop.f32.mrf.mxu2  ;;  %v566_v25 = vpop.f32.mrf.mxu1  ;;  %v445_v15 = vld [vmem:[#allocation3 + $0xb0] sm:$0xff] }
  0xbb   : > { %758 = vst.msk [vmem:[%s1214_s9 + $0x50] sm:$0xff] %vm342_vm1, %v726_v21  ;;  %v683_v26 = vld [vmem:[#allocation3 + $0x18] sm:$0xff]  ;;  %v635_v28 = vadd.f32 %v583_v23, %v442_v19  ;;  %v628_v36 = vadd.f32 %v566_v25, %v435_v29 }
  0xbc   : > { %v719_v30 = vadd.f32 %v1207_v27, %v683_v26  ;;  %v603_v31 = vpop.f32.mrf.mxu3  ;;  %652 = vst.msk [vmem:[#allocation3 + $0x20] sm:$0xff] %vm342_vm1, %v620_v22  ;;  %v453_v22 = vld [vmem:[#allocation3 + $0xf0] sm:$0xff]  ;;  %v438_v23 = vld [vmem:[#allocation3 + $0x78] sm:$0xff] }
  0xbd   : > { %v698_v32 = vld [vmem:[#allocation3 + $0x90] sm:$0xff]  ;;  %667 = vst.msk [vmem:[#allocation3 + $0x98] sm:$0xff] %vm342_vm1, %v635_v28  ;;  %v643_v33 = vadd.f32 %v603_v31, %v450_v24 }
  0xbe   : > { %v734_v34 = vadd.f32 %v1207_v27, %v698_v32  ;;  %v706_v35 = vld [vmem:[#allocation3 + $0xd0] sm:$0xff]  ;;  %751 = vst.msk [vmem:[%s1214_s9 + $0x18] sm:$0xff] %vm342_vm1, %v719_v30 }
  0xbf   : > { %v742_v38 = vadd.f32 %v1207_v27, %v706_v35  ;;  %675 = vst.msk [vmem:[#allocation3 + $0xd8] sm:$0xff] %vm342_vm1, %v643_v33 }
  0xc0   : > { %766 = vst.msk [vmem:[%s1214_s9 + $0x90] sm:$0xff] %vm342_vm1, %v734_v34  ;;  %v548_v40 = vpop.f32.mrf.mxu0 }
  0xc1   : > { %774 = vst.msk [vmem:[%s1214_s9 + $0xd0] sm:$0xff] %vm342_vm1, %v742_v38  ;;  %v691_v41 = vld [vmem:[#allocation3 + $0x58] sm:$0xff]  ;;  %v621_v42 = vadd.f32 %v548_v40, %v428_v37 }
  0xc2   : > { %v727_v43 = vadd.f32 %v1207_v27, %v691_v41  ;;  %660 = vst.msk [vmem:[#allocation3 + $0x60] sm:$0xff] %vm342_vm1, %v628_v36  ;;  %v586_v44 = vpop.f32.mrf.mxu2  ;;  %v568_v46 = vpop.f32.mrf.mxu1  ;;  %v446_v36 = vld [vmem:[#allocation3 + $0xb8] sm:$0xff] }
  0xc3   : > { %v684_v47 = vld [vmem:[#allocation3 + $0x20] sm:$0xff]  ;;  %v636_v48 = vadd.f32 %v586_v44, %v443_v39  ;;  %653 = vst.msk [vmem:[#allocation3 + $0x28] sm:$0xff] %vm342_vm1, %v621_v42  ;;  %v629_v56 = vadd.f32 %v568_v46, %v436_v49  ;;  %v454_v40 = vld [vmem:[#allocation3 + $0xf8] sm:$0xff] }
  0xc4   : > { %759 = vst.msk [vmem:[%s1214_s9 + $0x58] sm:$0xff] %vm342_vm1, %v727_v43  ;;  %v699_v50 = vld [vmem:[#allocation3 + $0x98] sm:$0xff]  ;;  %v720_v51 = vadd.f32 %v1207_v27, %v684_v47  ;;  %v606_v52 = vpop.f32.mrf.mxu3 }
  0xc5   : > { %v735_v53 = vadd.f32 %v1207_v27, %v699_v50  ;;  %668 = vst.msk [vmem:[#allocation3 + $0xa0] sm:$0xff] %vm342_vm1, %v636_v48  ;;  %v644_v54 = vadd.f32 %v606_v52, %v451_v45 }
  0xc6   : > { %v707_v55 = vld [vmem:[#allocation3 + $0xd8] sm:$0xff]  ;;  %752 = vst.msk [vmem:[%s1214_s9 + $0x20] sm:$0xff] %vm342_vm1, %v720_v51 }
  0xc7   : > { %767 = vst.msk [vmem:[%s1214_s9 + $0x98] sm:$0xff] %vm342_vm1, %v735_v53  ;;  %v743_v58 = vadd.f32 %v1207_v27, %v707_v55 }
  0xc8   : > { %676 = vst.msk [vmem:[#allocation3 + $0xe0] sm:$0xff] %vm342_vm1, %v644_v54  ;;  %v551_v60 = vpop.f32.mrf.mxu0 }
  0xc9   : > { %775 = vst.msk [vmem:[%s1214_s9 + $0xd8] sm:$0xff] %vm342_vm1, %v743_v58  ;;  %v692_v61 = vld [vmem:[#allocation3 + $0x60] sm:$0xff]  ;;  %v622_v62 = vadd.f32 %v551_v60, %v429_v57 }
  0xca   : > { %v728_v63 = vadd.f32 %v1207_v27, %v692_v61  ;;  %v685_v0 = vld [vmem:[#allocation3 + $0x28] sm:$0xff]  ;;  %661 = vst.msk [vmem:[#allocation3 + $0x68] sm:$0xff] %vm342_vm1, %v629_v56  ;;  %v588_v1 = vpop.f32.mrf.mxu2  ;;  %v571_v4 = vpop.f32.mrf.mxu1 }
  0xcb   : > { %v721_v5 = vadd.f32 %v1207_v27, %v685_v0  ;;  %v637_v6 = vadd.f32 %v588_v1, %v444_v59  ;;  %654 = vst.msk [vmem:[#allocation3 + $0x30] sm:$0xff] %vm342_vm1, %v622_v62  ;;  %v630_v11 = vadd.f32 %v571_v4, %v437_v3 }
  0xcc   : > { %760 = vst.msk [vmem:[%s1214_s9 + $0x60] sm:$0xff] %vm342_vm1, %v728_v63  ;;  %v700_v7 = vld [vmem:[#allocation3 + $0xa0] sm:$0xff]  ;;  %v608_v8 = vpop.f32.mrf.mxu3 }
  0xcd   : > { %v736_v9 = vadd.f32 %v1207_v27, %v700_v7  ;;  %753 = vst.msk [vmem:[%s1214_s9 + $0x28] sm:$0xff] %vm342_vm1, %v721_v5  ;;  %v645_v10 = vadd.f32 %v608_v8, %v452_v2 }
  0xce   : > { %669 = vst.msk [vmem:[#allocation3 + $0xa8] sm:$0xff] %vm342_vm1, %v637_v6 }
  0xcf   : > { %768 = vst.msk [vmem:[%s1214_s9 + $0xa0] sm:$0xff] %vm342_vm1, %v736_v9  ;;  %v708_v13 = vld [vmem:[#allocation3 + $0xe0] sm:$0xff] }
  0xd0   : > { %v744_v14 = vadd.f32 %v1207_v27, %v708_v13  ;;  %677 = vst.msk [vmem:[#allocation3 + $0xe8] sm:$0xff] %vm342_vm1, %v645_v10  ;;  %v553_v16 = vpop.f32.mrf.mxu0 }
  0xd1   : > { %v693_v17 = vld [vmem:[#allocation3 + $0x68] sm:$0xff]  ;;  %662 = vst.msk [vmem:[#allocation3 + $0x70] sm:$0xff] %vm342_vm1, %v630_v11  ;;  %v623_v18 = vadd.f32 %v553_v16, %v430_v12 }
  0xd2   : > { %776 = vst.msk [vmem:[%s1214_s9 + $0xe0] sm:$0xff] %vm342_vm1, %v744_v14  ;;  %v729_v19 = vadd.f32 %v1207_v27, %v693_v17  ;;  %v686_v20 = vld [vmem:[#allocation3 + $0x30] sm:$0xff]  ;;  %v591_v21 = vpop.f32.mrf.mxu2  ;;  %v573_v24 = vpop.f32.mrf.mxu1 }
  0xd3   : > { %v722_v25 = vadd.f32 %v1207_v27, %v686_v20  ;;  %v638_v26 = vadd.f32 %v591_v21, %v445_v15  ;;  %655 = vst.msk [vmem:[#allocation3 + $0x38] sm:$0xff] %vm342_vm1, %v623_v18  ;;  %v631_v31 = vadd.f32 %v573_v24, %v438_v23 }
  0xd4   : > { %761 = vst.msk [vmem:[%s1214_s9 + $0x68] sm:$0xff] %vm342_vm1, %v729_v19  ;;  %v611_v28 = vpop.f32.mrf.mxu3 }
  0xd5   : > { %v701_v29 = vld [vmem:[#allocation3 + $0xa8] sm:$0xff]  ;;  %754 = vst.msk [vmem:[%s1214_s9 + $0x30] sm:$0xff] %vm342_vm1, %v722_v25  ;;  %v646_v30 = vadd.f32 %v611_v28, %v453_v22 }
  0xd6   : > { %v737_v32 = vadd.f32 %v1207_v27, %v701_v29  ;;  %670 = vst.msk [vmem:[#allocation3 + $0xb0] sm:$0xff] %vm342_vm1, %v638_v26 }
  0xd7   : > { %v709_v33 = vld [vmem:[#allocation3 + $0xe8] sm:$0xff]  ;;  %678 = vst.msk [vmem:[#allocation3 + $0xf0] sm:$0xff] %vm342_vm1, %v646_v30 }
  0xd8   : > { %769 = vst.msk [vmem:[%s1214_s9 + $0xa8] sm:$0xff] %vm342_vm1, %v737_v32  ;;  %v745_v34 = vadd.f32 %v1207_v27, %v709_v33  ;;  %v694_v35 = vld [vmem:[#allocation3 + $0x70] sm:$0xff] }
  0xd9   : > { %v730_v37 = vadd.f32 %v1207_v27, %v694_v35  ;;  %663 = vst.msk [vmem:[#allocation3 + $0x78] sm:$0xff] %vm342_vm1, %v631_v31 }
  0xda   : > { %777 = vst.msk [vmem:[%s1214_s9 + $0xe8] sm:$0xff] %vm342_vm1, %v745_v34  ;;  %v687_v38 = vld [vmem:[#allocation3 + $0x38] sm:$0xff]  ;;  %v593_v39 = vpop.f32.mrf.mxu2 }
  0xdb   : > { %762 = vst.msk [vmem:[%s1214_s9 + $0x70] sm:$0xff] %vm342_vm1, %v730_v37  ;;  %v723_v41 = vadd.f32 %v1207_v27, %v687_v38  ;;  %v639_v42 = vadd.f32 %v593_v39, %v446_v36 }
  0xdc   : > { %v613_v43 = vpop.f32.mrf.mxu3 }
  0xdd   : > { %v702_v44 = vld [vmem:[#allocation3 + $0xb0] sm:$0xff]  ;;  %755 = vst.msk [vmem:[%s1214_s9 + $0x38] sm:$0xff] %vm342_vm1, %v723_v41  ;;  %v647_v45 = vadd.f32 %v613_v43, %v454_v40 }
  0xde   : > { %v738_v46 = vadd.f32 %v1207_v27, %v702_v44  ;;  %v710_v47 = vld [vmem:[#allocation3 + $0xf0] sm:$0xff]  ;;  %671 = vst.msk [vmem:[#allocation3 + $0xb8] sm:$0xff] %vm342_vm1, %v639_v42 }
  0xdf   : > { %v746_v48 = vadd.f32 %v1207_v27, %v710_v47  ;;  %679 = vst.msk [vmem:[#allocation3 + $0xf8] sm:$0xff] %vm342_vm1, %v647_v45 }
  0xe0   : > { %770 = vst.msk [vmem:[%s1214_s9 + $0xb0] sm:$0xff] %vm342_vm1, %v738_v46  ;;  %v695_v49 = vld [vmem:[#allocation3 + $0x78] sm:$0xff] }
  0xe1   : > { %778 = vst.msk [vmem:[%s1214_s9 + $0xf0] sm:$0xff] %vm342_vm1, %v746_v48  ;;  %v731_v50 = vadd.f32 %v1207_v27, %v695_v49 }
  0xe3   : > { %763 = vst.msk [vmem:[%s1214_s9 + $0x78] sm:$0xff] %vm342_vm1, %v731_v50 }
  0xe5   : > { %v703_v51 = vld [vmem:[#allocation3 + $0xb8] sm:$0xff] }
  0xe6   : > { %v739_v52 = vadd.f32 %v1207_v27, %v703_v51  ;;  %v711_v53 = vld [vmem:[#allocation3 + $0xf8] sm:$0xff] }
  0xe7   : > { %v747_v54 = vadd.f32 %v1207_v27, %v711_v53 }
  0xe8   : > { %771 = vst.msk [vmem:[%s1214_s9 + $0xb8] sm:$0xff] %vm342_vm1, %v739_v52 }
  0xe9   : > { %779 = vst.msk [vmem:[%s1214_s9 + $0xf8] sm:$0xff] %vm342_vm1, %v747_v54 }
  0xea PF: > { %s15_s20 = sadd.s32 1, %s988_s20   ;;  %s1357_s18 = smov %s984_s19 }
  0xeb   : > { %p12_p5 = scmp.ge.s32.totalorder %s15_s20, 4   ;;  %s1358_s19 = smov %s1360_s1 }
  0xed   :  { %14 = sbr.rel (!%p12_p5) target bundleno = 2 (0x2), region = 76 }

// kernel: tile.13
= control target key start
LH: loop header
LB: loop body
LE: loop exit
PB: predicated region body
PF: predicated region fallthrough
CT: control target
= control target key end

     0   :  { %s22_s0 = inlined_call_operand.vmem [shape: f32[64], index: 0, kind: input, shape index: {}]   ;;  %s23_s1 = inlined_call_operand.vmem [shape: f32[4,64], index: 1, kind: output, shape index: {}]  }
   0x1   :  { %v4_v0 = vld [vmem:[%s22_s0] ss:$0 sm:$0xff] }
   0x2   :  { %5 = vst [vmem:[%s23_s1] sm:$0xf] %v4_v0 }

// kernel: tile.18
= control target key start
LH: loop header
LB: loop body
LE: loop exit
PB: predicated region body
PF: predicated region fallthrough
CT: control target
= control target key end

     0   :  { %s6_s8 = smov 3  ;;  %vm8_vm0 = vcmask 523264   ;;  %s31_s9 = smov 64   ;;  %vm15_vm1 = vcmask 1048064   ;;  %s51_s0 = inlined_call_operand.vmem [shape: f32[4,64], index: 0, kind: input, shape index: {}]   ;;  %s52_s1 = inlined_call_operand.vmem [shape: f32[1,256], index: 1, kind: output, shape index: {}]  }
   0x1   :  { %v4_v0 = vld [vmem:[%s51_s0] sm:$0xf]  ;;  %s11_s0 = smov 3 }
   0x2   :  { %5 = vst [vmem:[#allocation1] sm:$0xf] %v4_v0 }
   0x9   :  { %v12_v1 = vld [vmem:[#allocation1 + $0x1] ss:$2 sm:%s11_s0]   ;;  %v7_v2 = vld [vmem:[#allocation1] ss:$2 sm:%s6_s8]  }
   0xa   :  { %13 = vrot.lane.b32.xlu0 %v12_v1, %s31_s9  ;;  %9 = vst.msk [vmem:[#allocation0] ss:$8 sm:$0x3] %vm8_vm0, %v7_v2  }
  0x7c   :  { %v14_v3 = vpop.permute.xlu0 %13  }
  0x7d   :  { %16 = vst.msk [vmem:[#allocation0] ss:$8 sm:$0x3] %vm15_vm1, %v14_v3  }
  0x84   :  { %v19_v4 = vld [vmem:[#allocation0] sm:$0x1]  ;;  %v24_v5 = vld [vmem:[#allocation0 + $0x8] sm:$0x1] }
  0x85   :  { %22 = vst [vmem:[%s52_s1] sm:$0x1] %v19_v4 }
  0x86   :  { %29 = vst [vmem:[%s52_s1 + $0x1] sm:$0x1] %v24_v5 }

// kernel: discriminator_forward.6
= control target key start
LH: loop header
LB: loop body
LE: loop exit
PB: predicated region body
PF: predicated region fallthrough
CT: control target
= control target key end

     0   :  { %s1367_s18 = smov 0   ;;  %s1369_s19 = smov 0   ;;  %s1658_s0 = inlined_call_operand.vmem [shape: f32[2,81,128], index: 0, kind: input, shape index: {}]   ;;  %s1659_s1 = inlined_call_operand.vmem [shape: f32[1,128], index: 1, kind: input, shape index: {}]   ;;  %s1660_s2 = inlined_call_operand.vmem [shape: f32[1,128], index: 2, kind: input, shape index: {}]   ;;  %s1661_s3 = inlined_call_operand.vmem [shape: bf16[2,2,128,64], index: 3, kind: input, shape index: {}]   ;;  %s1662_s4 = inlined_call_operand.vmem [shape: f32[1,64], index: 4, kind: input, shape index: {}]   ;;  %s1663_s5 = inlined_call_operand.vmem [shape: f32[2,72,64], index: 5, kind: output, shape index: {}]  }
   0x1   :  { %s1371_s20 = smov 0  }
   0x2 LB: > { %s27_s21 = sadd.s32 1, %s1330_s19  ;;  %p1069_p0 = scmp.ge.s32.totalorder %s1334_s20, 1  ;;  %s1334_s20 = sphi %s1371_s20, %s15_s20   ;;  %s1330_s19 = sphi %s1369_s19, %s1665_s19   ;;  %s1326_s18 = sphi %s1367_s18, %s1664_s18  }
   0x3   : > { %p29_p1 = scmp.ge.s32.totalorder %s27_s21, 2  ;;  %p218_p2 = scmp.lt.s32.totalorder %s1334_s20, 3 }
   0x5   : > { %s1667_s21 = smov (%p29_p1, %s27_s21), 0  ;;  %p219_p3 = pnand %p1069_p0, %p218_p2 }
   0x6   : > { %p256_p4 = scmp.lt.s32.totalorder (!%p219_p3), %s1326_s18, 1 }
   0x7   : > { %222 = sbr.rel (%p219_p3) target bundleno = 278 (0x116), region = 40 }
   0xc   : > { %v1257_v0 = vld [vmem:[%s1661_s3 + $0x38] sm:$0xff]  ;;  %v1256_v3 = vld [vmem:[%s1661_s3 + $0x30] sm:$0xff]  ;;  %s1669_s18 = smov (!%p256_p4, %s1326_s18), 1  ;;  %v1255_v7 = vld [vmem:[%s1661_s3 + $0x28] sm:$0xff]  ;;  %vm361_vm11 = vcmask 523264   ;;  %vm508_vm12 = vcmask 522240  }
   0xd   : > { %v1265_v1 = vld [vmem:[%s1661_s3 + $0x78] sm:$0xff]  ;;  %458 = vmatpush.bf16.msra.mxu0 %v1257_v0  ;;  %v1264_v4 = vld [vmem:[%s1661_s3 + $0x70] sm:$0xff]  ;;  %s1282_s11 = smul.u32 88, %s1669_s18  ;;  %v1263_v8 = vld [vmem:[%s1661_s3 + $0x68] sm:$0xff] }
   0xe   : > { %v1273_v2 = vld [vmem:[%s1661_s3 + $0xb8] sm:$0xff]  ;;  %598 = vmatpush.bf16.msra.mxu1 %v1265_v1  ;;  %v1272_v5 = vld [vmem:[%s1661_s3 + $0xb0] sm:$0xff]  ;;  %v1271_v9 = vld [vmem:[%s1661_s3 + $0xa8] sm:$0xff] }
   0xf   : > { %737 = vmatpush.bf16.msra.mxu2 %v1273_v2  ;;  %v1281_v6 = vld [vmem:[%s1661_s3 + $0xf8] sm:$0xff]  ;;  %s1418_s22 = scalar_lea.vmem %s1658_s0, %s1282_s11  ;;  %v1280_v10 = vld [vmem:[%s1661_s3 + $0xf0] sm:$0xff]  ;;  %v1254_v11 = vld [vmem:[%s1661_s3 + $0x20] sm:$0xff] }
  0x10   : > { %876 = vmatpush.bf16.msra.mxu3 %v1281_v6  ;;  %v1262_v12 = vld [vmem:[%s1661_s3 + $0x60] sm:$0xff]  ;;  %v277_v14 = vld [vmem:[%s1418_s22 + $0x8] sm:$0xff]  ;;  %v278_v19 = vld [vmem:[%s1418_s22 + $0x10] sm:$0xff] }
  0x11   : > { %459 = vmatpush.bf16.msra.mxu0 %v1256_v3  ;;  %v276_v13 = vld [vmem:[%s1418_s22] sm:$0xff]  ;;  %v1279_v18 = vld [vmem:[%s1661_s3 + $0xe8] sm:$0xff]  ;;  %v279_v23 = vld [vmem:[%s1418_s22 + $0x18] sm:$0xff] }
  0x12   : > { %599 = vmatpush.bf16.msra.mxu1 %v1264_v4  ;;  %v1437_v15 = vld [vmem:[%s1659_s1] ss:$0 sm:$0xff]  ;;  %v281_v26 = vld [vmem:[%s1418_s22 + $0x28] sm:$0xff]  ;;  %v1253_v27 = vld [vmem:[%s1661_s3 + $0x18] sm:$0xff] }
  0x13   : > { %738 = vmatpush.bf16.msra.mxu2 %v1272_v5  ;;  %v1442_v16 = vld [vmem:[%s1660_s2] ss:$0 sm:$0xff]  ;;  %v291_v20 = vmul.f32 %v1437_v15, %v276_v13  ;;  %v292_v21 = vmul.f32 %v1437_v15, %v277_v14  ;;  %v293_v22 = vmul.f32 %v1437_v15, %v278_v19  ;;  %v294_v24 = vmul.f32 %v1437_v15, %v279_v23  ;;  %v1261_v28 = vld [vmem:[%s1661_s3 + $0x58] sm:$0xff]  ;;  %v1252_v41 = vld [vmem:[%s1661_s3 + $0x10] sm:$0xff] }
  0x14   : > { %v1270_v17 = vld [vmem:[%s1661_s3 + $0xa0] sm:$0xff]  ;;  %877 = vmatpush.bf16.msra.mxu3 %v1280_v10  ;;  %v1269_v32 = vld [vmem:[%s1661_s3 + $0x98] sm:$0xff]  ;;  %v296_v36 = vmul.f32 %v1437_v15, %v281_v26  ;;  %v1260_v42 = vld [vmem:[%s1661_s3 + $0x50] sm:$0xff] }
  0x15   : > { %460 = vmatpush.bf16.msra.mxu0 %v1255_v7  ;;  %v280_v25 = vld [vmem:[%s1418_s22 + $0x20] sm:$0xff]  ;;  %v306_v29 = vadd.f32 %v1442_v16, %v291_v20  ;;  %v307_v30 = vadd.f32 %v1442_v16, %v292_v21  ;;  %v308_v31 = vadd.f32 %v1442_v16, %v293_v22  ;;  %v309_v34 = vadd.f32 %v1442_v16, %v294_v24  ;;  %v282_v46 = vld [vmem:[%s1418_s22 + $0x30] sm:$0xff]  ;;  %v1277_v48 = vld [vmem:[%s1661_s3 + $0xd8] sm:$0xff] }
  0x16   : > { %600 = vmatpush.bf16.msra.mxu1 %v1263_v8  ;;  %v1278_v33 = vld [vmem:[%s1661_s3 + $0xe0] sm:$0xff]  ;;  %v295_v35 = vmul.f32 %v1437_v15, %v280_v25  ;;  %v1268_v47 = vld [vmem:[%s1661_s3 + $0x90] sm:$0xff]  ;;  %v311_v52 = vadd.f32 %v1442_v16, %v296_v36  ;;  %v297_v53 = vmul.f32 %v1437_v15, %v282_v46  ;;  %v283_v54 = vld [vmem:[%s1418_s22 + $0x38] sm:$0xff] }
  0x17   : > { %739 = vmatpush.bf16.msra.mxu2 %v1271_v9  ;;  %vm317_vm0 = vcmp.ge.f32.partialorder %v306_v29, 0.0  ;;  %vm318_vm1 = vcmp.ge.f32.partialorder %v307_v30, 0.0  ;;  %v328_v37 = vmul.f32 0.2, %v306_v29  ;;  %v329_v38 = vmul.f32 0.2, %v307_v30 }
  0x18   : > { %878 = vmatpush.bf16.msra.mxu3 %v1279_v18  ;;  %vm319_vm2 = vcmp.ge.f32.partialorder %v308_v31, 0.0  ;;  %v330_v39 = vmul.f32 0.2, %v308_v31  ;;  %vm320_vm3 = vcmp.ge.f32.partialorder %v309_v34, 0.0  ;;  %v331_v40 = vmul.f32 0.2, %v309_v34 }
  0x19   : > { %461 = vmatpush.bf16.msra.mxu0 %v1254_v11  ;;  %v1482_v43 = vsel %vm317_vm0, %v306_v29, %v328_v37  ;;  %v1484_v44 = vsel %vm318_vm1, %v307_v30, %v329_v38  ;;  %v310_v45 = vadd.f32 %v1442_v16, %v295_v35  ;;  %v1251_v55 = vld [vmem:[%s1661_s3 + $0x8] sm:$0xff]  ;;  %vm322_vm5 = vcmp.ge.f32.partialorder %v311_v52, 0.0  ;;  %v1276_v61 = vld [vmem:[%s1661_s3 + $0xd0] sm:$0xff]  ;;  %v1250_v2 = vld [vmem:[%s1661_s3] sm:$0xff] }
  0x1a   : > { %601 = vmatpush.bf16.msra.mxu1 %v1262_v12  ;;  %350 = vst [vmem:[#allocation2] sm:$0xff] %v1482_v43  ;;  %v1496_v49 = vsel %vm319_vm2, %v308_v31, %v330_v39  ;;  %v1499_v50 = vsel %vm320_vm3, %v309_v34, %v331_v40  ;;  %v1259_v56 = vld [vmem:[%s1661_s3 + $0x48] sm:$0xff]  ;;  %v333_v58 = vmul.f32 0.2, %v311_v52  ;;  %v298_v59 = vmul.f32 %v1437_v15, %v283_v54  ;;  %v1258_v3 = vld [vmem:[%s1661_s3 + $0x40] sm:$0xff] }
  0x1b   : > { %740 = vmatpush.bf16.msra.mxu2 %v1270_v17  ;;  %351 = vst [vmem:[#allocation2 + $0x8] sm:$0xff] %v1484_v44  ;;  %vm321_vm4 = vcmp.ge.f32.partialorder %v310_v45, 0.0  ;;  %v332_v51 = vmul.f32 0.2, %v310_v45  ;;  %v1267_v60 = vld [vmem:[%s1661_s3 + $0x88] sm:$0xff]  ;;  %v312_v62 = vadd.f32 %v1442_v16, %v297_v53  ;;  %v1266_v6 = vld [vmem:[%s1661_s3 + $0x80] sm:$0xff]  ;;  %v380_v11 = vpack.c.bf16 %v1484_v44, %v1482_v43 }
  0x1c   : > { %879 = vmatpush.bf16.msra.mxu3 %v1278_v33  ;;  %352 = vst [vmem:[#allocation2 + $0x10] sm:$0xff] %v1496_v49  ;;  %v1524_v63 = vsel %vm322_vm5, %v311_v52, %v333_v58  ;;  %v313_v0 = vadd.f32 %v1442_v16, %v298_v59  ;;  %v1275_v7 = vld [vmem:[%s1661_s3 + $0xc8] sm:$0xff]  ;;  %v1274_v17 = vld [vmem:[%s1661_s3 + $0xc0] sm:$0xff]  ;;  %v381_v33 = vpack.c.bf16 %v1499_v50, %v1496_v49  ;;  %v286_v46 = vld [vmem:[%s1418_s22 + $0x50] sm:$0x1]  ;;  %v1336_v52 = vmov 0.0  }
  0x1d   : > { %462 = vmatpush.bf16.msra.mxu0 %v1253_v27  ;;  %353 = vst [vmem:[#allocation2 + $0x18] sm:$0xff] %v1499_v50  ;;  %v1513_v57 = vsel %vm321_vm4, %v310_v45, %v332_v51  ;;  %vm323_vm6 = vcmp.ge.f32.partialorder %v312_v62, 0.0  ;;  %v334_v1 = vmul.f32 0.2, %v312_v62  ;;  %v284_v20 = vld [vmem:[%s1418_s22 + $0x40] sm:$0xff]  ;;  %v285_v24 = vld [vmem:[%s1418_s22 + $0x48] sm:$0xff] }
  0x1e   : > { %602 = vmatpush.bf16.msra.mxu1 %v1261_v28  ;;  %354 = vst [vmem:[#allocation2 + $0x20] sm:$0xff] %v1513_v57  ;;  %v335_v4 = vmul.f32 0.2, %v313_v0  ;;  %vm324_vm7 = vcmp.ge.f32.partialorder %v313_v0, 0.0  ;;  %v299_v22 = vmul.f32 %v1437_v15, %v284_v20  ;;  %v300_v26 = vmul.f32 %v1437_v15, %v285_v24  ;;  %s1283_s22 = smul.u32 72, %s1669_s18 }
  0x1f   : > { %741 = vmatpush.bf16.msra.mxu2 %v1269_v32  ;;  %355 = vst [vmem:[#allocation2 + $0x28] sm:$0xff] %v1524_v63  ;;  %v1540_v8 = vsel %vm323_vm6, %v312_v62, %v334_v1 }
  0x20   : > { %880 = vmatpush.bf16.msra.mxu3 %v1277_v48  ;;  %356 = vst [vmem:[#allocation2 + $0x30] sm:$0xff] %v1540_v8  ;;  %v1543_v10 = vsel %vm324_vm7, %v313_v0, %v335_v4  ;;  %v314_v23 = vadd.f32 %v1442_v16, %v299_v22  ;;  %v315_v28 = vadd.f32 %v1442_v16, %v300_v26  ;;  %s1597_s12 = scalar_lea.vmem %s1663_s5, %s1283_s22 }
  0x21   : > { %463 = vmatpush.bf16.msra.mxu0 %v1252_v41  ;;  %357 = vst [vmem:[#allocation2 + $0x38] sm:$0xff] %v1543_v10  ;;  %v382_v41 = vpack.c.bf16 %v1524_v63, %v1513_v57 }
  0x22   : > { %603 = vmatpush.bf16.msra.mxu1 %v1260_v42  ;;  %v510_v5 = vld [vmem:[#allocation2 + $0x1] sm:$0xff]  ;;  %v336_v25 = vmul.f32 0.2, %v314_v23  ;;  %vm325_vm8 = vcmp.ge.f32.partialorder %v314_v23, 0.0  ;;  %v337_v30 = vmul.f32 0.2, %v315_v28 }
  0x23   : > { %742 = vmatpush.bf16.msra.mxu2 %v1268_v47  ;;  %v511_v9 = vld [vmem:[#allocation2 + $0x9] sm:$0xff]  ;;  %vm326_vm9 = vcmp.ge.f32.partialorder %v315_v28, 0.0  ;;  %v301_v47 = vmul.f32 %v1437_v15, %v286_v46  ;;  %362 = vst.msk [vmem:[#allocation3] sm:$0xff] %vm361_vm11, %v1336_v52 }
  0x24   : > { %881 = vmatpush.bf16.msra.mxu3 %v1276_v61  ;;  %v519_v12 = vpack.c.bf16 %v511_v9, %v510_v5  ;;  %v650_v13 = vld [vmem:[#allocation2 + $0x11] sm:$0xff]  ;;  %v347_v27 = vsel %vm325_vm8, %v314_v23, %v336_v25  ;;  %v348_v32 = vsel %vm326_vm9, %v315_v28, %v337_v30  ;;  %363 = vst.msk [vmem:[#allocation3 + $0x8] sm:$0xff] %vm361_vm11, %v1336_v52 }
  0x25   : > { %464 = vmatpush.bf16.msra.mxu0 %v1251_v55  ;;  %v658_v14 = vpack.c.bf16 %v650_v13, %v511_v9  ;;  %v788_v18 = vld [vmem:[#allocation2 + $0xa] sm:$0xff]  ;;  %v789_v19 = vld [vmem:[#allocation2 + $0x12] sm:$0xff]  ;;  %358 = vst [vmem:[#allocation2 + $0x40] sm:$0xff] %v347_v27  ;;  %v790_v36 = vld [vmem:[#allocation2 + $0x1a] sm:$0xff]  ;;  %v316_v49 = vadd.f32 %v1442_v16, %v301_v47  ;;  %v383_v16 = vpack.c.bf16 %v1543_v10, %v1540_v8 }
  0x26   : > { %604 = vmatpush.bf16.msra.mxu1 %v1259_v56  ;;  %v797_v21 = vpack.c.bf16 %v789_v19, %v788_v18  ;;  %v513_v29 = vld [vmem:[#allocation2 + $0x19] sm:$0xff]  ;;  %v652_v31 = vld [vmem:[#allocation2 + $0x21] sm:$0xff]  ;;  %359 = vst [vmem:[#allocation2 + $0x48] sm:$0xff] %v348_v32 }
  0x27   : > { %743 = vmatpush.bf16.msra.mxu2 %v1267_v60  ;;  %v520_v34 = vpack.c.bf16 %v513_v29, %v650_v13  ;;  %v659_v35 = vpack.c.bf16 %v652_v31, %v513_v29  ;;  %v791_v37 = vld [vmem:[#allocation2 + $0x22] sm:$0xff]  ;;  %v792_v44 = vld [vmem:[#allocation2 + $0x2a] sm:$0xff]  ;;  %vm327_vm10 = vcmp.ge.f32.partialorder %v316_v49, 0.0  ;;  %v338_v50 = vmul.f32 0.2, %v316_v49  ;;  %364 = vst.msk [vmem:[#allocation3 + $0x10] sm:$0xff] %vm361_vm11, %v1336_v52 }
  0x28   : > { %882 = vmatpush.bf16.msra.mxu3 %v1275_v7  ;;  %v798_v38 = vpack.c.bf16 %v791_v37, %v790_v36  ;;  %v515_v39 = vld [vmem:[#allocation2 + $0x29] sm:$0xff]  ;;  %v654_v40 = vld [vmem:[#allocation2 + $0x31] sm:$0xff]  ;;  %365 = vst.msk [vmem:[#allocation3 + $0x18] sm:$0xff] %vm361_vm11, %v1336_v52 }
  0x29   : > { %465 = vmatpush.bf16.msra.mxu0 %v1250_v2  ;;  %v521_v42 = vpack.c.bf16 %v515_v39, %v652_v31  ;;  %v660_v43 = vpack.c.bf16 %v654_v40, %v515_v39  ;;  %v793_v45 = vld [vmem:[#allocation2 + $0x32] sm:$0xff]  ;;  %v349_v51 = vsel %vm327_vm10, %v316_v49, %v338_v50  ;;  %366 = vst.msk [vmem:[#allocation3 + $0x20] sm:$0xff] %vm361_vm11, %v1336_v52 }
  0x2a   : > { %605 = vmatpush.bf16.msra.mxu1 %v1258_v3  ;;  %v799_v48 = vpack.c.bf16 %v793_v45, %v792_v44  ;;  %360 = vst [vmem:[#allocation2 + $0x50] sm:$0x1] %v349_v51  ;;  %v385_v3 = vld [vmem:[#allocation3] sm:$0xff] }
  0x2b   : > { %744 = vmatpush.bf16.msra.mxu2 %v1266_v6  ;;  %367 = vst.msk [vmem:[#allocation3 + $0x28] sm:$0xff] %vm361_vm11, %v1336_v52  ;;  %v386_v7 = vld [vmem:[#allocation3 + $0x8] sm:$0xff] }
  0x2c   : > { %466 = vmatmul.bf16.vlgmr.msra.gmra.mxu0 %v380_v11  ;;  %883 = vmatpush.bf16.msra.mxu3 %v1274_v17  ;;  %v517_v53 = vld [vmem:[#allocation2 + $0x39] sm:$0xff]  ;;  %368 = vst.msk [vmem:[#allocation3 + $0x30] sm:$0xff] %vm361_vm11, %v1336_v52  ;;  %v518_v60 = vld [vmem:[#allocation2 + $0x41] sm:$0x7f] }
  0x2d   : > { %606 = vmatmul.bf16.vlgmr.msra.gmra.mxu1 %v519_v12  ;;  %v656_v15 = vld [vmem:[#allocation2 + $0x41] sm:$0xff]  ;;  %v522_v54 = vpack.c.bf16 %v517_v53, %v654_v40  ;;  %369 = vst.msk [vmem:[#allocation3 + $0x38] sm:$0xff] %vm361_vm11, %v1336_v52  ;;  %v657_v61 = vld [vmem:[#allocation2 + $0x49] sm:$0x7f]  ;;  %v523_v63 = vpack.c.bf16 %v518_v60, %v518_v60 }
  0x2e   : > { %745 = vmatmul.bf16.vlgmr.msra.gmra.mxu2 %v658_v14  ;;  %v661_v55 = vpack.c.bf16 %v656_v15, %v517_v53  ;;  %v794_v56 = vld [vmem:[#allocation2 + $0x3a] sm:$0xff]  ;;  %v795_v57 = vld [vmem:[#allocation2 + $0x42] sm:$0xff]  ;;  %370 = vst.msk [vmem:[#allocation3 + $0x40] sm:$0xff] %vm361_vm11, %v1336_v52  ;;  %v662_v0 = vpack.c.bf16 %v657_v61, %v657_v61 }
  0x2f   : > { %884 = vmatmul.bf16.vlgmr.msra.gmra.mxu3 %v797_v21  ;;  %v800_v58 = vpack.c.bf16 %v795_v57, %v794_v56  ;;  %v379_v59 = vld [vmem:[#allocation2 + $0x40] sm:$0x7f]  ;;  %v387_v17 = vld [vmem:[#allocation3 + $0x10] sm:$0xff]  ;;  %v388_v27 = vld [vmem:[#allocation3 + $0x18] sm:$0xff] }
  0x30   : > { %v384_v62 = vpack.c.bf16 %v379_v59, %v379_v59 }
  0x31   : > { %v796_v1 = vld [vmem:[#allocation2 + $0x4a] sm:$0x7f] }
  0x32   : > { %v801_v2 = vpack.c.bf16 %v796_v1, %v796_v1  ;;  %v390_v51 = vld [vmem:[#allocation3 + $0x28] sm:$0xff] }
  0x3c   : > { %471 = vmatmul.bf16.gmra.mxu0 %v381_v33 }
  0x3d   : > { %611 = vmatmul.bf16.gmra.mxu1 %v520_v34 }
  0x3e   : > { %750 = vmatmul.bf16.gmra.mxu2 %v659_v35 }
  0x3f   : > { %889 = vmatmul.bf16.gmra.mxu3 %v798_v38  ;;  %v389_v38 = vld [vmem:[#allocation3 + $0x20] sm:$0xff] }
  0x4c   : > { %476 = vmatmul.bf16.gmra.mxu0 %v382_v41 }
  0x4d   : > { %616 = vmatmul.bf16.gmra.mxu1 %v521_v42 }
  0x4e   : > { %755 = vmatmul.bf16.gmra.mxu2 %v660_v43 }
  0x4f   : > { %894 = vmatmul.bf16.gmra.mxu3 %v799_v48  ;;  %v1590_v48 = vld [vmem:[%s1662_s4] ss:$0 sm:$0xff] }
  0x5c   : > { %481 = vmatmul.bf16.gmra.mxu0 %v383_v16 }
  0x5d   : > { %621 = vmatmul.bf16.gmra.mxu1 %v522_v54 }
  0x5e   : > { %760 = vmatmul.bf16.gmra.mxu2 %v661_v55 }
  0x5f   : > { %899 = vmatmul.bf16.gmra.mxu3 %v800_v58 }
  0x6c   : > { %486 = vmatmul.bf16.gmra.mxu0 %v384_v62 }
  0x6d   : > { %626 = vmatmul.bf16.gmra.mxu1 %v523_v63  ;;  %v391_v63 = vld [vmem:[#allocation3 + $0x30] sm:$0xff] }
  0x6e   : > { %765 = vmatmul.bf16.gmra.mxu2 %v662_v0 }
  0x6f   : > { %904 = vmatmul.bf16.gmra.mxu3 %v801_v2 }
  0xa9   : > { %v467_v4 = vpop.f32.mrf.mxu0 }
  0xaa   : > { %v607_v5 = vpop.f32.mrf.mxu1  ;;  %v491_v6 = vadd.f32 %v467_v4, %v385_v3 }
  0xac   : > { %500 = vst.msk [vmem:[#allocation3] sm:$0xff] %vm361_vm11, %v491_v6 }
  0xb1   : > { %v746_v8 = vpop.f32.mrf.mxu2  ;;  %v469_v9 = vpop.f32.mrf.mxu0 }
  0xb2   : > { %v609_v10 = vpop.f32.mrf.mxu1  ;;  %v492_v11 = vadd.f32 %v469_v9, %v386_v7  ;;  %v885_v14 = vpop.f32.mrf.mxu3 }
  0xb3   : > { %v524_v12 = vld [vmem:[#allocation3] sm:$0xff] }
  0xb4   : > { %v631_v13 = vadd.f32 %v607_v5, %v524_v12  ;;  %501 = vst.msk [vmem:[#allocation3 + $0x8] sm:$0xff] %vm361_vm11, %v492_v11 }
  0xb6   : > { %640 = vst.msk [vmem:[#allocation3] sm:$0xff] %vm361_vm11, %v631_v13  ;;  %v392_v13 = vld [vmem:[#allocation3 + $0x38] sm:$0xff] }
  0xb9   : > { %v748_v18 = vpop.f32.mrf.mxu2  ;;  %v472_v19 = vpop.f32.mrf.mxu0 }
  0xba   : > { %v612_v20 = vpop.f32.mrf.mxu1  ;;  %v493_v21 = vadd.f32 %v472_v19, %v387_v17  ;;  %v887_v24 = vpop.f32.mrf.mxu3 }
  0xbb   : > { %v525_v22 = vld [vmem:[#allocation3 + $0x8] sm:$0xff] }
  0xbc   : > { %v632_v23 = vadd.f32 %v609_v10, %v525_v22  ;;  %502 = vst.msk [vmem:[#allocation3 + $0x10] sm:$0xff] %vm361_vm11, %v493_v21 }
  0xbd   : > { %v663_v25 = vld [vmem:[#allocation3] sm:$0xff] }
  0xbe   : > { %641 = vst.msk [vmem:[#allocation3 + $0x8] sm:$0xff] %vm361_vm11, %v632_v23  ;;  %v770_v26 = vadd.f32 %v746_v8, %v663_v25 }
  0xc0   : > { %779 = vst.msk [vmem:[#allocation3] sm:$0xff] %vm361_vm11, %v770_v26 }
  0xc1   : > { %v751_v28 = vpop.f32.mrf.mxu2  ;;  %v474_v29 = vpop.f32.mrf.mxu0 }
  0xc2   : > { %v614_v30 = vpop.f32.mrf.mxu1  ;;  %v494_v31 = vadd.f32 %v474_v29, %v388_v27  ;;  %v890_v34 = vpop.f32.mrf.mxu3  ;;  %v393_v29 = vld [vmem:[#allocation3 + $0x40] sm:$0x7f] }
  0xc3   : > { %v526_v32 = vld [vmem:[#allocation3 + $0x10] sm:$0xff] }
  0xc4   : > { %v633_v33 = vadd.f32 %v612_v20, %v526_v32  ;;  %503 = vst.msk [vmem:[#allocation3 + $0x18] sm:$0xff] %vm361_vm11, %v494_v31 }
  0xc5   : > { %v664_v35 = vld [vmem:[#allocation3 + $0x8] sm:$0xff] }
  0xc6   : > { %642 = vst.msk [vmem:[#allocation3 + $0x10] sm:$0xff] %vm361_vm11, %v633_v33  ;;  %v771_v36 = vadd.f32 %v748_v18, %v664_v35 }
  0xc7   : > { %v802_v37 = vld [vmem:[#allocation3] sm:$0xff] }
  0xc8   : > { %780 = vst.msk [vmem:[#allocation3 + $0x8] sm:$0xff] %vm361_vm11, %v771_v36  ;;  %v909_v39 = vadd.f32 %v885_v14, %v802_v37 }
  0xc9   : > { %v753_v40 = vpop.f32.mrf.mxu2  ;;  %v477_v41 = vpop.f32.mrf.mxu0 }
  0xca   : > { %v617_v42 = vpop.f32.mrf.mxu1  ;;  %918 = vst.msk [vmem:[#allocation3] sm:$0xff] %vm361_vm11, %v909_v39  ;;  %v495_v43 = vadd.f32 %v477_v41, %v389_v38  ;;  %v892_v46 = vpop.f32.mrf.mxu3 }
  0xcb   : > { %v527_v44 = vld [vmem:[#allocation3 + $0x18] sm:$0xff] }
  0xcc   : > { %v634_v45 = vadd.f32 %v614_v30, %v527_v44  ;;  %504 = vst.msk [vmem:[#allocation3 + $0x20] sm:$0xff] %vm361_vm11, %v495_v43 }
  0xcd   : > { %v665_v47 = vld [vmem:[#allocation3 + $0x10] sm:$0xff] }
  0xce   : > { %643 = vst.msk [vmem:[#allocation3 + $0x18] sm:$0xff] %vm361_vm11, %v634_v45  ;;  %v772_v49 = vadd.f32 %v751_v28, %v665_v47 }
  0xcf   : > { %v803_v50 = vld [vmem:[#allocation3 + $0x8] sm:$0xff] }
  0xd0   : > { %781 = vst.msk [vmem:[#allocation3 + $0x10] sm:$0xff] %vm361_vm11, %v772_v49  ;;  %v910_v52 = vadd.f32 %v887_v24, %v803_v50 }
  0xd1   : > { %v756_v53 = vpop.f32.mrf.mxu2  ;;  %v927_v15 = vld [vmem:[#allocation3] sm:$0xff]  ;;  %v479_v16 = vpop.f32.mrf.mxu0 }
  0xd2   : > { %v619_v54 = vpop.f32.mrf.mxu1  ;;  %v940_v55 = vadd.f32 %v1590_v48, %v927_v15  ;;  %919 = vst.msk [vmem:[#allocation3 + $0x8] sm:$0xff] %vm361_vm11, %v910_v52  ;;  %v496_v56 = vadd.f32 %v479_v16, %v390_v51  ;;  %v895_v59 = vpop.f32.mrf.mxu3 }
  0xd3   : > { %v528_v57 = vld [vmem:[#allocation3 + $0x20] sm:$0xff] }
  0xd4   : > { %949 = vst.msk [vmem:[%s1597_s12] sm:$0xff] %vm361_vm11, %v940_v55  ;;  %v635_v58 = vadd.f32 %v617_v42, %v528_v57 }
  0xd5   : > { %v666_v60 = vld [vmem:[#allocation3 + $0x18] sm:$0xff]  ;;  %505 = vst.msk [vmem:[#allocation3 + $0x28] sm:$0xff] %vm361_vm11, %v496_v56 }
  0xd6   : > { %644 = vst.msk [vmem:[#allocation3 + $0x20] sm:$0xff] %vm361_vm11, %v635_v58  ;;  %v773_v61 = vadd.f32 %v753_v40, %v666_v60 }
  0xd7   : > { %v804_v62 = vld [vmem:[#allocation3 + $0x10] sm:$0xff] }
  0xd8   : > { %782 = vst.msk [vmem:[#allocation3 + $0x18] sm:$0xff] %vm361_vm11, %v773_v61  ;;  %v911_v0 = vadd.f32 %v890_v34, %v804_v62 }
  0xd9   : > { %v758_v1 = vpop.f32.mrf.mxu2  ;;  %v928_v2 = vld [vmem:[#allocation3 + $0x8] sm:$0xff]  ;;  %v482_v3 = vpop.f32.mrf.mxu0 }
  0xda   : > { %v622_v4 = vpop.f32.mrf.mxu1  ;;  %v941_v5 = vadd.f32 %v1590_v48, %v928_v2  ;;  %920 = vst.msk [vmem:[#allocation3 + $0x10] sm:$0xff] %vm361_vm11, %v911_v0  ;;  %v497_v6 = vadd.f32 %v482_v3, %v391_v63  ;;  %v897_v8 = vpop.f32.mrf.mxu3 }
  0xdc   : > { %950 = vst.msk [vmem:[%s1597_s12 + $0x8] sm:$0xff] %vm361_vm11, %v941_v5  ;;  %v529_v7 = vld [vmem:[#allocation3 + $0x28] sm:$0xff] }
  0xdd   : > { %v636_v9 = vadd.f32 %v619_v54, %v529_v7  ;;  %v667_v10 = vld [vmem:[#allocation3 + $0x20] sm:$0xff]  ;;  %506 = vst.msk [vmem:[#allocation3 + $0x30] sm:$0xff] %vm361_vm11, %v497_v6 }
  0xde   : > { %v774_v11 = vadd.f32 %v756_v53, %v667_v10 }
  0xdf   : > { %645 = vst.msk [vmem:[#allocation3 + $0x28] sm:$0xff] %vm361_vm11, %v636_v9  ;;  %v805_v12 = vld [vmem:[#allocation3 + $0x18] sm:$0xff] }
  0xe0   : > { %783 = vst.msk [vmem:[#allocation3 + $0x20] sm:$0xff] %vm361_vm11, %v774_v11  ;;  %v912_v14 = vadd.f32 %v892_v46, %v805_v12 }
  0xe1   : > { %v761_v17 = vpop.f32.mrf.mxu2  ;;  %v929_v18 = vld [vmem:[#allocation3 + $0x10] sm:$0xff]  ;;  %v484_v19 = vpop.f32.mrf.mxu0 }
  0xe2   : > { %v624_v20 = vpop.f32.mrf.mxu1  ;;  %v942_v21 = vadd.f32 %v1590_v48, %v929_v18  ;;  %921 = vst.msk [vmem:[#allocation3 + $0x18] sm:$0xff] %vm361_vm11, %v912_v14  ;;  %v498_v22 = vadd.f32 %v484_v19, %v392_v13  ;;  %v900_v24 = vpop.f32.mrf.mxu3 }
  0xe4   : > { %951 = vst.msk [vmem:[%s1597_s12 + $0x10] sm:$0xff] %vm361_vm11, %v942_v21  ;;  %v530_v23 = vld [vmem:[#allocation3 + $0x30] sm:$0xff] }
  0xe5   : > { %v637_v25 = vadd.f32 %v622_v4, %v530_v23  ;;  %507 = vst.msk [vmem:[#allocation3 + $0x38] sm:$0xff] %vm361_vm11, %v498_v22 }
  0xe6   : > { %v668_v26 = vld [vmem:[#allocation3 + $0x28] sm:$0xff] }
  0xe7   : > { %646 = vst.msk [vmem:[#allocation3 + $0x30] sm:$0xff] %vm361_vm11, %v637_v25  ;;  %v775_v27 = vadd.f32 %v758_v1, %v668_v26  ;;  %v806_v28 = vld [vmem:[#allocation3 + $0x20] sm:$0xff] }
  0xe8   : > { %v913_v30 = vadd.f32 %v895_v59, %v806_v28 }
  0xe9   : > { %v763_v31 = vpop.f32.mrf.mxu2  ;;  %v930_v32 = vld [vmem:[#allocation3 + $0x18] sm:$0xff]  ;;  %784 = vst.msk [vmem:[#allocation3 + $0x28] sm:$0xff] %vm361_vm11, %v775_v27  ;;  %v487_v33 = vpop.f32.mrf.mxu0 }
  0xea   : > { %v627_v34 = vpop.f32.mrf.mxu1  ;;  %v943_v35 = vadd.f32 %v1590_v48, %v930_v32  ;;  %922 = vst.msk [vmem:[#allocation3 + $0x20] sm:$0xff] %vm361_vm11, %v913_v30  ;;  %v499_v36 = vadd.f32 %v487_v33, %v393_v29  ;;  %v902_v38 = vpop.f32.mrf.mxu3 }
  0xec   : > { %952 = vst.msk [vmem:[%s1597_s12 + $0x18] sm:$0xff] %vm361_vm11, %v943_v35  ;;  %v531_v37 = vld [vmem:[#allocation3 + $0x38] sm:$0xff] }
  0xed   : > { %v638_v39 = vadd.f32 %v624_v20, %v531_v37  ;;  %509 = vst.msk [vmem:[#allocation3 + $0x40] sm:$0x7f] %vm508_vm12, %v499_v36 }
  0xee   : > { %v669_v40 = vld [vmem:[#allocation3 + $0x30] sm:$0xff] }
  0xef   : > { %647 = vst.msk [vmem:[#allocation3 + $0x38] sm:$0xff] %vm361_vm11, %v638_v39  ;;  %v776_v41 = vadd.f32 %v761_v17, %v669_v40 }
  0xf0   : > { %v807_v42 = vld [vmem:[#allocation3 + $0x28] sm:$0xff] }
  0xf1   : > { %v766_v43 = vpop.f32.mrf.mxu2  ;;  %v931_v44 = vld [vmem:[#allocation3 + $0x20] sm:$0xff]  ;;  %785 = vst.msk [vmem:[#allocation3 + $0x30] sm:$0xff] %vm361_vm11, %v776_v41  ;;  %v914_v45 = vadd.f32 %v897_v8, %v807_v42  ;;  %v489_v46 = vpop.f32.mrf.mxu0 }
  0xf2   : > { %v629_v47 = vpop.f32.mrf.mxu1  ;;  %v944_v49 = vadd.f32 %v1590_v48, %v931_v44  ;;  %v905_v51 = vpop.f32.mrf.mxu3 }
  0xf3   : > { %923 = vst.msk [vmem:[#allocation3 + $0x28] sm:$0xff] %vm361_vm11, %v914_v45 }
  0xf4   : > { %953 = vst.msk [vmem:[%s1597_s12 + $0x20] sm:$0xff] %vm361_vm11, %v944_v49  ;;  %v532_v50 = vld [vmem:[#allocation3 + $0x40] sm:$0x7f] }
  0xf5   : > { %v639_v52 = vadd.f32 %v627_v34, %v532_v50 }
  0xf6   : > { %v670_v53 = vld [vmem:[#allocation3 + $0x38] sm:$0xff] }
  0xf7   : > { %648 = vst.msk [vmem:[#allocation3 + $0x40] sm:$0x7f] %vm508_vm12, %v639_v52  ;;  %v777_v15 = vadd.f32 %v763_v31, %v670_v53 }
  0xf8   : > { %v808_v16 = vld [vmem:[#allocation3 + $0x30] sm:$0xff] }
  0xf9   : > { %v768_v54 = vpop.f32.mrf.mxu2  ;;  %786 = vst.msk [vmem:[#allocation3 + $0x38] sm:$0xff] %vm361_vm11, %v777_v15  ;;  %v915_v55 = vadd.f32 %v900_v24, %v808_v16 }
  0xfa   : > { %v932_v56 = vld [vmem:[#allocation3 + $0x28] sm:$0xff]  ;;  %v907_v58 = vpop.f32.mrf.mxu3 }
  0xfb   : > { %v945_v57 = vadd.f32 %v1590_v48, %v932_v56  ;;  %924 = vst.msk [vmem:[#allocation3 + $0x30] sm:$0xff] %vm361_vm11, %v915_v55 }
  0xfd   : > { %954 = vst.msk [vmem:[%s1597_s12 + $0x28] sm:$0xff] %vm361_vm11, %v945_v57 }
  0xfe   : > { %v671_v59 = vld [vmem:[#allocation3 + $0x40] sm:$0x7f] }
  0xff   : > { %v778_v60 = vadd.f32 %v766_v43, %v671_v59 }
 0x100   : > { %v809_v61 = vld [vmem:[#allocation3 + $0x38] sm:$0xff] }
 0x101   : > { %787 = vst.msk [vmem:[#allocation3 + $0x40] sm:$0x7f] %vm508_vm12, %v778_v60  ;;  %v916_v62 = vadd.f32 %v902_v38, %v809_v61 }
 0x102   : > { %v933_v63 = vld [vmem:[#allocation3 + $0x30] sm:$0xff] }
 0x103   : > { %v946_v0 = vadd.f32 %v1590_v48, %v933_v63  ;;  %925 = vst.msk [vmem:[#allocation3 + $0x38] sm:$0xff] %vm361_vm11, %v916_v62 }
 0x105   : > { %955 = vst.msk [vmem:[%s1597_s12 + $0x30] sm:$0xff] %vm361_vm11, %v946_v0 }
 0x108   : > { %v810_v1 = vld [vmem:[#allocation3 + $0x40] sm:$0x7f] }
 0x109   : > { %v917_v2 = vadd.f32 %v905_v51, %v810_v1 }
 0x10a   : > { %v934_v3 = vld [vmem:[#allocation3 + $0x38] sm:$0xff] }
 0x10b   : > { %v947_v4 = vadd.f32 %v1590_v48, %v934_v3  ;;  %926 = vst.msk [vmem:[#allocation3 + $0x40] sm:$0x7f] %vm508_vm12, %v917_v2 }
 0x10d   : > { %956 = vst.msk [vmem:[%s1597_s12 + $0x38] sm:$0xff] %vm361_vm11, %v947_v4 }
 0x112   : > { %v935_v5 = vld [vmem:[#allocation3 + $0x40] sm:$0xff] }
 0x113   : > { %v948_v6 = vadd.f32 %v1590_v48, %v935_v5 }
 0x115   : > { %957 = vst.msk [vmem:[%s1597_s12 + $0x40] sm:$0xff] %vm361_vm11, %v948_v6 }
 0x116 PF: > { %s15_s20 = sadd.s32 1, %s1334_s20   ;;  %s1664_s18 = smov %s1330_s19 }
 0x117   : > { %p12_p5 = scmp.ge.s32.totalorder %s15_s20, 4   ;;  %s1665_s19 = smov %s1667_s21 }
 0x119   :  { %14 = sbr.rel (!%p12_p5) target bundleno = 2 (0x2), region = 79 }

// kernel: discriminator_forward.7
= control target key start
LH: loop header
LB: loop body
LE: loop exit
PB: predicated region body
PF: predicated region fallthrough
CT: control target
= control target key end

     0   :  { %s1802_s18 = smov 0   ;;  %s1804_s19 = smov 0   ;;  %s2113_s0 = inlined_call_operand.vmem [shape: f32[2,25,256], index: 0, kind: input, shape index: {}]   ;;  %s2114_s1 = inlined_call_operand.vmem [shape: f32[1,256], index: 1, kind: input, shape index: {}]   ;;  %s2115_s2 = inlined_call_operand.vmem [shape: f32[1,256], index: 2, kind: input, shape index: {}]   ;;  %s2116_s3 = inlined_call_operand.vmem [shape: bf16[2,2,256,128], index: 3, kind: input, shape index: {}]   ;;  %s2117_s4 = inlined_call_operand.vmem [shape: f32[1,128], index: 4, kind: input, shape index: {}]   ;;  %s2118_s5 = inlined_call_operand.vmem [shape: f32[2,20,128], index: 5, kind: output, shape index: {}]  }
   0x1   :  { %s1806_s20 = smov 0  }
   0x2 LB: > { %s27_s21 = sadd.s32 1, %s1765_s19  ;;  %p1297_p0 = scmp.ge.s32.totalorder %s1769_s20, 1  ;;  %s1769_s20 = sphi %s1806_s20, %s15_s20   ;;  %s1765_s19 = sphi %s1804_s19, %s2120_s19   ;;  %s1761_s18 = sphi %s1802_s18, %s2119_s18  }
   0x3   : > { %p29_p1 = scmp.ge.s32.totalorder %s27_s21, 2  ;;  %p218_p2 = scmp.lt.s32.totalorder %s1769_s20, 3 }
   0x5   : > { %s2122_s21 = smov (%p29_p1, %s27_s21), 0  ;;  %p219_p3 = pnand %p1297_p0, %p218_p2 }
   0x6   : > { %p256_p4 = scmp.lt.s32.totalorder (!%p219_p3), %s1761_s18, 1 }
   0x7   : > { %222 = sbr.rel (%p219_p3) target bundleno = 244 (0xf4), region = 40 }
   0xc   : > { %v1663_v0 = vld [vmem:[%s2116_s3 + $0x38] sm:$0xff]  ;;  %v1662_v4 = vld [vmem:[%s2116_s3 + $0x30] sm:$0xff]  ;;  %s2124_s18 = smov (!%p256_p4, %s1761_s18), 1  ;;  %v1661_v8 = vld [vmem:[%s2116_s3 + $0x28] sm:$0xff]  ;;  %vm576_vm7 = vsmask.f32 7424 }
   0xd   : > { %v1671_v1 = vld [vmem:[%s2116_s3 + $0x78] sm:$0xff]  ;;  %488 = vmatpush.bf16.msra.mxu0 %v1663_v0  ;;  %v1670_v5 = vld [vmem:[%s2116_s3 + $0x70] sm:$0xff]  ;;  %s1655_s13 = sshll.u32 %s2124_s18, 6  ;;  %v1669_v9 = vld [vmem:[%s2116_s3 + $0x68] sm:$0xff]  ;;  %vm795_vm9 = vsmask.f32 5376 }
   0xe   : > { %v1679_v2 = vld [vmem:[%s2116_s3 + $0xb8] sm:$0xff]  ;;  %506 = vmatpush.bf16.msra.mxu1 %v1671_v1  ;;  %v1678_v6 = vld [vmem:[%s2116_s3 + $0xb0] sm:$0xff]  ;;  %v1677_v10 = vld [vmem:[%s2116_s3 + $0xa8] sm:$0xff]  ;;  %s1862_s28 = scalar_lea.vmem %s2113_s0, %s1655_s13  ;;  %vm1024_vm10 = vcmask 1044480   ;;  %s1720_s9 = smul.u32 24, %s2124_s18 }
   0xf   : > { %v1687_v3 = vld [vmem:[%s2116_s3 + $0xf8] sm:$0xff]  ;;  %707 = vmatpush.bf16.msra.mxu2 %v1679_v2  ;;  %v1686_v7 = vld [vmem:[%s2116_s3 + $0xf0] sm:$0xff]  ;;  %v1685_v11 = vld [vmem:[%s2116_s3 + $0xe8] sm:$0xff] }
  0x10   : > { %725 = vmatpush.bf16.msra.mxu3 %v1687_v3  ;;  %v1660_v12 = vld [vmem:[%s2116_s3 + $0x20] sm:$0xff]  ;;  %v278_v17 = vld [vmem:[%s1862_s28 + $0x10] sm:$0xff]  ;;  %v277_v22 = vld [vmem:[%s1862_s28 + $0x8] sm:$0xff]  ;;  %s275_s13 = scalar_lea.vmem %s2118_s5, %s1720_s9 }
  0x11   : > { %489 = vmatpush.bf16.msra.mxu0 %v1662_v4  ;;  %v1668_v13 = vld [vmem:[%s2116_s3 + $0x60] sm:$0xff]  ;;  %v279_v23 = vld [vmem:[%s1862_s28 + $0x18] sm:$0xff]  ;;  %v281_v27 = vld [vmem:[%s1862_s28 + $0x28] sm:$0xff] }
  0x12   : > { %507 = vmatpush.bf16.msra.mxu1 %v1670_v5  ;;  %v1676_v14 = vld [vmem:[%s2116_s3 + $0xa0] sm:$0xff]  ;;  %v1659_v28 = vld [vmem:[%s2116_s3 + $0x18] sm:$0xff]  ;;  %v1658_v41 = vld [vmem:[%s2116_s3 + $0x10] sm:$0xff] }
  0x13   : > { %708 = vmatpush.bf16.msra.mxu2 %v1678_v6  ;;  %v1684_v15 = vld [vmem:[%s2116_s3 + $0xe0] sm:$0xff]  ;;  %v1667_v29 = vld [vmem:[%s2116_s3 + $0x58] sm:$0xff]  ;;  %v1666_v42 = vld [vmem:[%s2116_s3 + $0x50] sm:$0xff] }
  0x14   : > { %726 = vmatpush.bf16.msra.mxu3 %v1686_v7  ;;  %v276_v16 = vld [vmem:[%s1862_s28] sm:$0xff]  ;;  %v1675_v33 = vld [vmem:[%s2116_s3 + $0x98] sm:$0xff]  ;;  %v1674_v43 = vld [vmem:[%s2116_s3 + $0x90] sm:$0xff] }
  0x15   : > { %490 = vmatpush.bf16.msra.mxu0 %v1661_v8  ;;  %v284_v18 = vld [vmem:[%s2114_s1] sm:$0x3]  ;;  %v1683_v34 = vld [vmem:[%s2116_s3 + $0xd8] sm:$0xff]  ;;  %v1682_v49 = vld [vmem:[%s2116_s3 + $0xd0] sm:$0xff] }
  0x16   : > { %508 = vmatpush.bf16.msra.mxu1 %v1669_v9  ;;  %v298_v19 = vld [vmem:[%s2115_s2] sm:$0x3]  ;;  %v1884_v20 = vperm.slane %v284_v18, 0  ;;  %v1890_v24 = vperm.slane %v284_v18, 1  ;;  %v1657_v54 = vld [vmem:[%s2116_s3 + $0x8] sm:$0xff]  ;;  %v1719_v18 = vld [vmem:[%s2116_s3 + $0x1f8] sm:$0xff] }
  0x17   : > { %709 = vmatpush.bf16.msra.mxu2 %v1677_v10  ;;  %v1886_v21 = vperm.slane %v298_v19, 0  ;;  %v1892_v25 = vperm.slane %v298_v19, 1  ;;  %v280_v26 = vld [vmem:[%s1862_s28 + $0x20] sm:$0xff]  ;;  %v282_v57 = vld [vmem:[%s1862_s28 + $0x30] sm:$0x1]  ;;  %v1665_v58 = vld [vmem:[%s2116_s3 + $0x48] sm:$0xff] }
  0x18   : > { %727 = vmatpush.bf16.msra.mxu3 %v1685_v11  ;;  %v290_v30 = vmul.f32 %v1884_v20, %v276_v16  ;;  %v292_v31 = vmul.f32 %v1884_v20, %v278_v17  ;;  %v291_v32 = vmul.f32 %v1890_v24, %v277_v22  ;;  %v293_v35 = vmul.f32 %v1890_v24, %v279_v23  ;;  %v1673_v61 = vld [vmem:[%s2116_s3 + $0x88] sm:$0xff]  ;;  %v1656_v3 = vld [vmem:[%s2116_s3] sm:$0xff]  ;;  %v283_v8 = vld [vmem:[%s1862_s28 + $0x38] sm:$0x1] }
  0x19   : > { %491 = vmatpush.bf16.msra.mxu0 %v1660_v12  ;;  %v294_v36 = vmul.f32 %v1884_v20, %v280_v26  ;;  %v295_v37 = vmul.f32 %v1890_v24, %v281_v27  ;;  %v1681_v62 = vld [vmem:[%s2116_s3 + $0xc8] sm:$0xff]  ;;  %v296_v0 = vmul.f32 %v1884_v20, %v282_v57  ;;  %v1664_v4 = vld [vmem:[%s2116_s3 + $0x40] sm:$0xff]  ;;  %v1695_v10 = vld [vmem:[%s2116_s3 + $0x138] sm:$0xff]  ;;  %v297_v19 = vmul.f32 %v1890_v24, %v283_v8 }
  0x1a   : > { %509 = vmatpush.bf16.msra.mxu1 %v1668_v13  ;;  %v304_v38 = vadd.f32 %v1886_v21, %v290_v30  ;;  %v306_v39 = vadd.f32 %v1886_v21, %v292_v31  ;;  %v305_v40 = vadd.f32 %v1892_v25, %v291_v32  ;;  %v307_v44 = vadd.f32 %v1892_v25, %v293_v35  ;;  %v1672_v5 = vld [vmem:[%s2116_s3 + $0x80] sm:$0xff]  ;;  %v1703_v11 = vld [vmem:[%s2116_s3 + $0x178] sm:$0xff]  ;;  %v1694_v26 = vld [vmem:[%s2116_s3 + $0x130] sm:$0xff] }
  0x1b   : > { %710 = vmatpush.bf16.msra.mxu2 %v1676_v14  ;;  %v308_v45 = vadd.f32 %v1886_v21, %v294_v36  ;;  %v309_v46 = vadd.f32 %v1892_v25, %v295_v37  ;;  %v310_v2 = vadd.f32 %v1886_v21, %v296_v0  ;;  %v1680_v6 = vld [vmem:[%s2116_s3 + $0xc0] sm:$0xff]  ;;  %v1711_v17 = vld [vmem:[%s2116_s3 + $0x1b8] sm:$0xff]  ;;  %v1702_v27 = vld [vmem:[%s2116_s3 + $0x170] sm:$0xff]  ;;  %v311_v35 = vadd.f32 %v1892_v25, %v297_v19 }
  0x1c   : > { %728 = vmatpush.bf16.msra.mxu3 %v1684_v15  ;;  %vm312_vm0 = vcmp.ge.f32.partialorder %v304_v38, 0.0  ;;  %vm314_vm1 = vcmp.ge.f32.partialorder %v306_v39, 0.0  ;;  %v320_v47 = vmul.f32 0.2, %v304_v38  ;;  %v322_v48 = vmul.f32 0.2, %v306_v39 }
  0x1d   : > { %492 = vmatpush.bf16.msra.mxu0 %v1659_v28  ;;  %vm313_vm2 = vcmp.ge.f32.partialorder %v305_v40, 0.0  ;;  %v321_v50 = vmul.f32 0.2, %v305_v40  ;;  %v323_v51 = vmul.f32 0.2, %v307_v44  ;;  %vm315_vm3 = vcmp.ge.f32.partialorder %v307_v44, 0.0 }
  0x1e   : > { %510 = vmatpush.bf16.msra.mxu1 %v1667_v29  ;;  %v328_v52 = vsel %vm312_vm0, %v304_v38, %v320_v47  ;;  %vm316_vm4 = vcmp.ge.f32.partialorder %v308_v45, 0.0  ;;  %v324_v53 = vmul.f32 0.2, %v308_v45  ;;  %v1935_v55 = vsel %vm314_vm1, %v306_v39, %v322_v48 }
  0x1f   : > { %711 = vmatpush.bf16.msra.mxu2 %v1675_v33  ;;  %336 = vst [vmem:[#allocation2 + $0x30] sm:$0xff] %v328_v52  ;;  %v329_v56 = vsel %vm313_vm2, %v305_v40, %v321_v50  ;;  %vm317_vm5 = vcmp.ge.f32.partialorder %v309_v46, 0.0  ;;  %v325_v60 = vmul.f32 0.2, %v309_v46  ;;  %v1950_v63 = vsel %vm315_vm3, %v307_v44, %v323_v51  ;;  %v1710_v33 = vld [vmem:[%s2116_s3 + $0x1b0] sm:$0xff]  ;;  %v1693_v40 = vld [vmem:[%s2116_s3 + $0x128] sm:$0xff] }
  0x20   : > { %729 = vmatpush.bf16.msra.mxu3 %v1683_v34  ;;  %v1941_v59 = vsel %vm316_vm4, %v308_v45, %v324_v53  ;;  %337 = vst [vmem:[#allocation2] sm:$0xff] %v329_v56  ;;  %vm318_vm6 = vcmp.ge.f32.partialorder %v310_v2, 0.0  ;;  %v326_v7 = vmul.f32 0.2, %v310_v2  ;;  %v353_v12 = vpack.c.bf16 %v1935_v55, %v328_v52  ;;  %v1718_v34 = vld [vmem:[%s2116_s3 + $0x1f0] sm:$0xff]  ;;  %v1709_v44 = vld [vmem:[%s2116_s3 + $0x1a8] sm:$0xff] }
  0x21   : > { %493 = vmatpush.bf16.msra.mxu0 %v1658_v41  ;;  %v1953_v1 = vsel %vm317_vm5, %v309_v46, %v325_v60  ;;  %340 = vst [vmem:[#allocation2 + $0x8] sm:$0xff] %v1941_v59  ;;  %v354_v13 = vpack.c.bf16 %v1950_v63, %v329_v56  ;;  %v1717_v45 = vld [vmem:[%s2116_s3 + $0x1e8] sm:$0xff]  ;;  %v327_v46 = vmul.f32 0.2, %v311_v35  ;;  %vm319_vm8 = vcmp.ge.f32.partialorder %v311_v35, 0.0  ;;  %v1700_v50 = vld [vmem:[%s2116_s3 + $0x160] sm:$0xff] }
  0x22   : > { %511 = vmatpush.bf16.msra.mxu1 %v1666_v42  ;;  %341 = vst [vmem:[#allocation2 + $0x20] sm:$0xff] %v1953_v1  ;;  %v334_v15 = vsel %vm318_vm6, %v310_v2, %v326_v7  ;;  %v1708_v51 = vld [vmem:[%s2116_s3 + $0x1a0] sm:$0xff]  ;;  %v1691_v60 = vld [vmem:[%s2116_s3 + $0x118] sm:$0xff]  ;;  %v757_v2 = vpack.c.bf16 %v1941_v59, %v1941_v59 }
  0x23   : > { %712 = vmatpush.bf16.msra.mxu2 %v1674_v43  ;;  %342 = vst [vmem:[#allocation2 + $0x28] sm:$0x1] %v334_v15  ;;  %v1701_v43 = vld [vmem:[%s2116_s3 + $0x168] sm:$0xff]  ;;  %v1716_v53 = vld [vmem:[%s2116_s3 + $0x1e0] sm:$0xff]  ;;  %v335_v57 = vsel %vm319_vm8, %v311_v35, %v327_v46  ;;  %v1715_v7 = vld [vmem:[%s2116_s3 + $0x1d8] sm:$0xff] }
  0x24   : > { %730 = vmatpush.bf16.msra.mxu3 %v1682_v49  ;;  %v1692_v49 = vld [vmem:[%s2116_s3 + $0x120] sm:$0xff]  ;;  %343 = vst [vmem:[#allocation2 + $0x38] sm:$0x1] %v335_v57  ;;  %v1698_v15 = vld [vmem:[%s2116_s3 + $0x150] sm:$0xff] }
  0x25   : > { %494 = vmatpush.bf16.msra.mxu0 %v1657_v54 }
  0x26   : > { %512 = vmatpush.bf16.msra.mxu1 %v1665_v58  ;;  %v530_v9 = vld [vmem:[#allocation2 + $0x30] sm:$0xfe] }
  0x27   : > { %713 = vmatpush.bf16.msra.mxu2 %v1673_v61  ;;  %v536_v14 = vpack.c.bf16 %v1935_v55, %v530_v9  ;;  %v531_v16 = vld [vmem:[#allocation2] sm:$0xfe]  ;;  %v749_v52 = vld [vmem:[#allocation2 + $0x30] sm:$0xe0] }
  0x28   : > { %731 = vmatpush.bf16.msra.mxu3 %v1681_v62  ;;  %v537_v22 = vpack.c.bf16 %v1950_v63, %v531_v16  ;;  %v534_v23 = vld [vmem:[#allocation2 + $0x8] sm:$0xf]  ;;  %v750_v58 = vld [vmem:[#allocation2] sm:$0xe0]  ;;  %v755_v61 = vpack.c.bf16 %v1935_v55, %v749_v52  ;;  %v1690_v9 = vld [vmem:[%s2116_s3 + $0x110] sm:$0xff] }
  0x29   : > { %495 = vmatpush.bf16.msra.mxu0 %v1656_v3  ;;  %v578_v20 = vshrl.u32 %v536_v14, 16  ;;  %v580_v21 = vshll.u32 %v536_v14, 16  ;;  %v1994_v24 = vpack.c.bf16 %v534_v23, %v534_v23  ;;  %v535_v29 = vld [vmem:[#allocation2 + $0x20] sm:$0xf]  ;;  %v351_v54 = vld [vmem:[#allocation2 + $0x8] sm:$0x7] }
  0x2a   : > { %513 = vmatpush.bf16.msra.mxu1 %v1664_v4  ;;  %v590_v30 = vshrl.u32 %v537_v22, 16  ;;  %v592_v31 = vshll.u32 %v537_v22, 16  ;;  %v1996_v32 = vpack.c.bf16 %v535_v29, %v535_v29  ;;  %v352_v56 = vld [vmem:[#allocation2 + $0x20] sm:$0x7]  ;;  %v355_v62 = vpack.c.bf16 %v351_v54, %v351_v54  ;;  %v1699_v3 = vld [vmem:[%s2116_s3 + $0x158] sm:$0xff]  ;;  %v1706_v16 = vld [vmem:[%s2116_s3 + $0x190] sm:$0xff] }
  0x2b   : > { %714 = vmatpush.bf16.msra.mxu2 %v1672_v5  ;;  %v582_v28 = vrot.slane %v580_v21, 1  ;;  %v585_v37 = vshll.u32 %v1994_v24, 16  ;;  %v356_v0 = vpack.c.bf16 %v352_v56, %v352_v56  ;;  %v1707_v4 = vld [vmem:[%s2116_s3 + $0x198] sm:$0xff]  ;;  %v756_v5 = vpack.c.bf16 %v1950_v63, %v750_v58  ;;  %v1714_v21 = vld [vmem:[%s2116_s3 + $0x1d0] sm:$0xff]  ;;  %v1689_v23 = vld [vmem:[%s2116_s3 + $0x108] sm:$0xff] }
  0x2c   : > { %732 = vmatpush.bf16.msra.mxu3 %v1680_v6  ;;  %496 = vmatmul.bf16.vlgmr.msra.gmra.mxu0 %v353_v12  ;;  %v594_v38 = vrot.slane %v592_v31, 1  ;;  %v597_v39 = vshll.u32 %v1996_v32, 16  ;;  %v758_v6 = vpack.c.bf16 %v1953_v1, %v1953_v1  ;;  %v601_v8 = vshrl.u32 %v1994_v24, 16  ;;  %v1705_v31 = vld [vmem:[%s2116_s3 + $0x188] sm:$0xff]  ;;  %v973_v46 = vld [vmem:[#allocation2] sm:$0xc0] }
  0x2d   : > { %930 = vmatpush.bf16.msrb.mxu0 %v1695_v10  ;;  %514 = vmatmul.bf16.vlgmr.msra.gmra.mxu1 %v354_v13  ;;  %v583_v36 = vor.u32 %v582_v28, %v578_v20  ;;  %v587_v41 = vrot.slane %v585_v37, 1  ;;  %v797_v10 = vshrl.u32 %v755_v61, 16  ;;  %v800_v12 = vshll.u32 %v755_v61, 16  ;;  %v1688_v37 = vld [vmem:[%s2116_s3 + $0x100] sm:$0xff] }
  0x2e   : > { %948 = vmatpush.bf16.msrb.mxu1 %v1703_v11  ;;  %v595_v42 = vor.u32 %v594_v38, %v590_v30  ;;  %v2013_v25 = vrot.slane %v597_v39, 1  ;;  %v604_v11 = vshrl.u32 %v1996_v32, 16  ;;  %v805_v13 = vshrl.u32 %v757_v2, 16  ;;  %v1697_v30 = vld [vmem:[%s2116_s3 + $0x148] sm:$0xff]  ;;  %v1696_v38 = vld [vmem:[%s2116_s3 + $0x140] sm:$0xff] }
  0x2f   : > { %1131 = vmatpush.bf16.msrb.mxu2 %v1711_v17  ;;  %v588_v47 = vsel %vm576_vm7, %v583_v36, %v587_v41  ;;  %v808_v14 = vshll.u32 %v757_v2, 16  ;;  %v814_v17 = vshrl.u32 %v756_v5, 16  ;;  %v822_v19 = vshrl.u32 %v758_v6, 16  ;;  %v1713_v36 = vld [vmem:[%s2116_s3 + $0x1c8] sm:$0xff]  ;;  %v1704_v39 = vld [vmem:[%s2116_s3 + $0x180] sm:$0xff] }
  0x30   : > { %1149 = vmatpush.bf16.msrb.mxu3 %v1719_v18  ;;  %715 = vmatmul.bf16.vlgmr.msra.gmra.mxu2 %v588_v47  ;;  %v600_v48 = vsel %vm576_vm7, %v595_v42, %v2013_v25  ;;  %v817_v18 = vshll.u32 %v756_v5, 16  ;;  %v825_v20 = vshll.u32 %v758_v6, 16  ;;  %v603_v22 = vor.u32 %v601_v8, %v587_v41  ;;  %v979_v47 = vld [vmem:[#allocation2 + $0x38] sm:$0x1] }
  0x31   : > { %931 = vmatpush.bf16.msrb.mxu0 %v1694_v26  ;;  %733 = vmatmul.bf16.vlgmr.msra.gmra.mxu3 %v600_v48  ;;  %v799_v26 = vrot.slane %v797_v10, 2  ;;  %v802_v24 = vrot.slane %v800_v12, 3  ;;  %v807_v28 = vrot.slane %v805_v13, 2  ;;  %v810_v29 = vrot.slane %v808_v14, 3 }
  0x32   : > { %949 = vmatpush.bf16.msrb.mxu1 %v1702_v27  ;;  %v606_v27 = vor.u32 %v604_v11, %v2013_v25  ;;  %v816_v32 = vrot.slane %v814_v17, 2  ;;  %v827_v35 = vrot.slane %v825_v20, 3  ;;  %v972_v25 = vld [vmem:[#allocation2 + $0x30] sm:$0xc0]  ;;  %v981_v52 = vpack.c.bf16 %v1950_v63, %v973_v46 }
  0x33   : > { %1132 = vmatpush.bf16.msrb.mxu2 %v1710_v33  ;;  %v819_v33 = vrot.slane %v817_v18, 3  ;;  %v811_v41 = vor.u32 %v810_v29, %v807_v28 }
  0x34   : > { %1150 = vmatpush.bf16.msrb.mxu3 %v1718_v34  ;;  %v824_v34 = vrot.slane %v822_v19, 2  ;;  %v1028_v57 = vrot.slane %v981_v52, 3 }
  0x35   : > { %932 = vmatpush.bf16.msrb.mxu0 %v1693_v40  ;;  %v803_v40 = vor.u32 %v802_v24, %v799_v26  ;;  %v820_v42 = vor.u32 %v819_v33, %v816_v32  ;;  %v1746_v33 = vld [vmem:[%s2117_s4] ss:$0 sm:$0xff] }
  0x36   : > { %950 = vmatpush.bf16.msrb.mxu1 %v1701_v43  ;;  %v828_v43 = vor.u32 %v827_v35, %v824_v34 }
  0x37   : > { %1133 = vmatpush.bf16.msrb.mxu2 %v1709_v44  ;;  %v978_v44 = vld [vmem:[#allocation2 + $0x28] sm:$0x1]  ;;  %v812_v48 = vsel %vm795_vm9, %v803_v40, %v811_v41 }
  0x38   : > { %1151 = vmatpush.bf16.msrb.mxu3 %v1717_v45  ;;  %v1712_v45 = vld [vmem:[%s2116_s3 + $0x1c0] sm:$0xff] }
  0x39   : > { %933 = vmatpush.bf16.msrb.mxu0 %v1692_v49  ;;  %v980_v49 = vpack.c.bf16 %v1935_v55, %v972_v25  ;;  %v1771_v55 = vmov 0.0  }
  0x3a   : > { %951 = vmatpush.bf16.msrb.mxu1 %v1700_v50  ;;  %v982_v50 = vpack.c.bf16 %v978_v44, %v1941_v59  ;;  %346 = vst [vmem:[#allocation3 + $0x10] sm:$0xf] %v1771_v55 }
  0x3b   : > { %1134 = vmatpush.bf16.msrb.mxu2 %v1708_v51  ;;  %v829_v51 = vsel %vm795_vm9, %v820_v42, %v828_v43  ;;  %v1025_v54 = vrot.slane %v980_v49, 3 }
  0x3c   : > { %1152 = vmatpush.bf16.msrb.mxu3 %v1716_v53  ;;  %501 = vmatmul.bf16.gmra.mxu0 %v355_v62  ;;  %v983_v53 = vpack.c.bf16 %v979_v47, %v1953_v1  ;;  %v1026_v56 = vrot.slane %v982_v50, 3 }
  0x3d   : > { %934 = vmatpush.bf16.msrb.mxu0 %v1691_v60  ;;  %519 = vmatmul.bf16.gmra.mxu1 %v356_v0 }
  0x3e   : > { %952 = vmatpush.bf16.msrb.mxu1 %v1699_v3  ;;  %v1029_v58 = vrot.slane %v983_v53, 3  ;;  %v1027_v60 = vsel %vm1024_vm10, %v1025_v54, %v1026_v56 }
  0x3f   : > { %1135 = vmatpush.bf16.msrb.mxu2 %v1707_v4 }
  0x40   : > { %1153 = vmatpush.bf16.msrb.mxu3 %v1715_v7  ;;  %720 = vmatmul.bf16.gmra.mxu2 %v603_v22  ;;  %v1030_v61 = vsel %vm1024_vm10, %v1028_v57, %v1029_v58 }
  0x41   : > { %935 = vmatpush.bf16.msrb.mxu0 %v1690_v9  ;;  %738 = vmatmul.bf16.gmra.mxu3 %v606_v27  ;;  %v359_v4 = vld [vmem:[#allocation3 + $0x10] sm:$0x7] }
  0x42   : > { %953 = vmatpush.bf16.msrb.mxu1 %v1698_v15 }
  0x43   : > { %1136 = vmatpush.bf16.msrb.mxu2 %v1706_v16 }
  0x44   : > { %1154 = vmatpush.bf16.msrb.mxu3 %v1714_v21 }
  0x45   : > { %936 = vmatpush.bf16.msrb.mxu0 %v1689_v23 }
  0x46   : > { %954 = vmatpush.bf16.msrb.mxu1 %v1697_v30 }
  0x47   : > { %1137 = vmatpush.bf16.msrb.mxu2 %v1705_v31 }
  0x48   : > { %1155 = vmatpush.bf16.msrb.mxu3 %v1713_v36 }
  0x49   : > { %937 = vmatpush.bf16.msrb.mxu0 %v1688_v37 }
  0x4a   : > { %955 = vmatpush.bf16.msrb.mxu1 %v1696_v38 }
  0x4b   : > { %1138 = vmatpush.bf16.msrb.mxu2 %v1704_v39 }
  0x4c   : > { %1156 = vmatpush.bf16.msrb.mxu3 %v1712_v45  ;;  %938 = vmatmul.bf16.vlgmr.msrb.gmra.mxu0 %v812_v48 }
  0x4d   : > { %956 = vmatmul.bf16.vlgmr.msrb.gmra.mxu1 %v829_v51 }
  0x50   : > { %1139 = vmatmul.bf16.vlgmr.msrb.gmra.mxu2 %v1027_v60 }
  0x51   : > { %1157 = vmatmul.bf16.vlgmr.msrb.gmra.mxu3 %v1030_v61 }
  0x5c   : > { %943 = vmatmul.bf16.gmra.mxu0 %v811_v41 }
  0x5d   : > { %961 = vmatmul.bf16.gmra.mxu1 %v828_v43 }
  0x60   : > { %1144 = vmatmul.bf16.gmra.mxu2 %v1026_v56 }
  0x61   : > { %1162 = vmatmul.bf16.gmra.mxu3 %v1029_v58 }
  0xa9   : > { %v497_v59 = vpop.f32.mrf.mxu0 }
  0xaa   : > { %v515_v63 = vpop.f32.mrf.mxu1 }
  0xab   : > { %v516_v21 = vadd.f32 %v515_v63, %v497_v59 }
  0xb1   : > { %v499_v1 = vpop.f32.mrf.mxu0 }
  0xb2   : > { %v517_v62 = vpop.f32.mrf.mxu1 }
  0xb3   : > { %v716_v0 = vpop.f32.mrf.mxu2  ;;  %v518_v30 = vadd.f32 %v517_v62, %v499_v1 }
  0xb4   : > { %v734_v2 = vpop.f32.mrf.mxu3 }
  0xb5   : > { %v735_v26 = vadd.f32 %v734_v2, %v716_v0 }
  0xb7   : > { %v743_v24 = vadd.f32 %v735_v26, %v516_v21 }
  0xb9   : > { %v502_v3 = vpop.f32.mrf.mxu0 }
  0xba   : > { %v520_v5 = vpop.f32.mrf.mxu1 }
  0xbb   : > { %v521_v6 = vadd.f32 %v520_v5, %v502_v3  ;;  %v718_v8 = vpop.f32.mrf.mxu2 }
  0xbc   : > { %v736_v9 = vpop.f32.mrf.mxu3 }
  0xbd   : > { %v526_v7 = vadd.f32 %v521_v6, %v359_v4  ;;  %v737_v36 = vadd.f32 %v736_v9, %v718_v8 }
  0xbf   : > { %529 = vst [vmem:[#allocation3 + $0x10] sm:$0x7] %v526_v7  ;;  %v744_v43 = vadd.f32 %v737_v36, %v518_v30 }
  0xc1   : > { %v504_v10 = vpop.f32.mrf.mxu0 }
  0xc2   : > { %v522_v11 = vpop.f32.mrf.mxu1 }
  0xc3   : > { %v721_v12 = vpop.f32.mrf.mxu2 }
  0xc4   : > { %v739_v14 = vpop.f32.mrf.mxu3 }
  0xc5   : > { %v740_v15 = vadd.f32 %v739_v14, %v721_v12 }
  0xc6   : > { %v542_v13 = vld [vmem:[#allocation3 + $0x10] sm:$0x7] }
  0xc7   : > { %v745_v18 = vadd.f32 %v740_v15, %v542_v13 }
  0xc9   : > { %v939_v16 = vpop.f32.mrf.mxu0  ;;  %748 = vst [vmem:[#allocation3 + $0x10] sm:$0x7] %v745_v18 }
  0xca   : > { %v957_v17 = vpop.f32.mrf.mxu1 }
  0xcb   : > { %v723_v19 = vpop.f32.mrf.mxu2  ;;  %v958_v27 = vadd.f32 %v957_v17, %v939_v16 }
  0xcc   : > { %v741_v20 = vpop.f32.mrf.mxu3 }
  0xcd   : > { %v966_v31 = vadd.f32 %v958_v27, %v743_v24 }
  0xd0   : > { %v761_v39 = vld [vmem:[#allocation3 + $0x10] sm:$0x7] }
  0xd1   : > { %v941_v22 = vpop.f32.mrf.mxu0 }
  0xd2   : > { %v959_v23 = vpop.f32.mrf.mxu1 }
  0xd3   : > { %v1140_v28 = vpop.f32.mrf.mxu2  ;;  %v960_v41 = vadd.f32 %v959_v23, %v941_v22 }
  0xd4   : > { %v1158_v29 = vpop.f32.mrf.mxu3 }
  0xd5   : > { %v1159_v32 = vadd.f32 %v1158_v29, %v1140_v28  ;;  %v967_v45 = vadd.f32 %v960_v41, %v744_v43 }
  0xd7   : > { %v1167_v37 = vadd.f32 %v1159_v32, %v966_v31 }
  0xd9   : > { %v944_v34 = vpop.f32.mrf.mxu0  ;;  %v1180_v40 = vadd.f32 %v1746_v33, %v1167_v37 }
  0xda   : > { %v962_v35 = vpop.f32.mrf.mxu1 }
  0xdb   : > { %v963_v38 = vadd.f32 %v962_v35, %v944_v34  ;;  %1183 = vst [vmem:[%s275_s13] sm:$0xff] %v1180_v40  ;;  %v1142_v25 = vpop.f32.mrf.mxu2 }
  0xdc   : > { %v1160_v44 = vpop.f32.mrf.mxu3 }
  0xdd   : > { %v968_v42 = vadd.f32 %v963_v38, %v761_v39  ;;  %v1161_v46 = vadd.f32 %v1160_v44, %v1142_v25 }
  0xdf   : > { %971 = vst [vmem:[#allocation3 + $0x10] sm:$0x7] %v968_v42  ;;  %v1168_v49 = vadd.f32 %v1161_v46, %v967_v45 }
  0xe1   : > { %v946_v47 = vpop.f32.mrf.mxu0  ;;  %v1181_v50 = vadd.f32 %v1746_v33, %v1168_v49 }
  0xe2   : > { %v964_v48 = vpop.f32.mrf.mxu1 }
  0xe3   : > { %1184 = vst [vmem:[%s275_s13 + $0x8] sm:$0xff] %v1181_v50  ;;  %v1145_v51 = vpop.f32.mrf.mxu2 }
  0xe4   : > { %v1163_v53 = vpop.f32.mrf.mxu3 }
  0xe5   : > { %v1164_v54 = vadd.f32 %v1163_v53, %v1145_v51 }
  0xe6   : > { %v986_v52 = vld [vmem:[#allocation3 + $0x10] sm:$0x7] }
  0xe7   : > { %v1169_v56 = vadd.f32 %v1164_v54, %v986_v52 }
  0xe9   : > { %1172 = vst [vmem:[#allocation3 + $0x10] sm:$0x7] %v1169_v56 }
  0xeb   : > { %v1147_v57 = vpop.f32.mrf.mxu2 }
  0xec   : > { %v1165_v58 = vpop.f32.mrf.mxu3 }
  0xf0   : > { %v1175_v60 = vld [vmem:[#allocation3 + $0x10] sm:$0xf] }
  0xf1   : > { %v1182_v61 = vadd.f32 %v1746_v33, %v1175_v60 }
  0xf3   : > { %1185 = vst [vmem:[%s275_s13 + $0x10] sm:$0xf] %v1182_v61 }
  0xf4 PF: > { %s15_s20 = sadd.s32 1, %s1769_s20   ;;  %s2119_s18 = smov %s1765_s19 }
  0xf5   : > { %p12_p5 = scmp.ge.s32.totalorder %s15_s20, 4   ;;  %s2120_s19 = smov %s2122_s21 }
  0xf7   :  { %14 = sbr.rel (!%p12_p5) target bundleno = 2 (0x2), region = 79 }

// kernel: discriminator_forward.8
= control target key start
LH: loop header
LB: loop body
LE: loop exit
PB: predicated region body
PF: predicated region fallthrough
CT: control target
= control target key end

     0   :  { %s4326_s18 = smov 0   ;;  %s4328_s19 = smov 0   ;;  %s5962_s0 = inlined_call_operand.vmem [shape: f32[2,36,128], index: 0, kind: input, shape index: {}]   ;;  %s5963_s1 = inlined_call_operand.vmem [shape: f32[1,128], index: 1, kind: input, shape index: {}]   ;;  %s5964_s2 = inlined_call_operand.vmem [shape: f32[1,128], index: 2, kind: input, shape index: {}]   ;;  %s5965_s3 = inlined_call_operand.vmem [shape: bf16[4,4,128,256], index: 3, kind: input, shape index: {}]   ;;  %s5966_s4 = inlined_call_operand.vmem [shape: f32[1,256], index: 4, kind: input, shape index: {}]   ;;  %s5967_s5 = inlined_call_operand.vmem [shape: f32[2,18,256], index: 5, kind: output, shape index: {}]  }
   0x1   :  { %s4330_s20 = smov 0  }
   0x2 LB: > { %s27_s21 = sadd.s32 1, %s4289_s19  ;;  %p2715_p0 = scmp.ge.s32.totalorder %s4293_s20, 1  ;;  %s4293_s20 = sphi %s4330_s20, %s15_s20   ;;  %s4289_s19 = sphi %s4328_s19, %s5969_s19   ;;  %s4285_s18 = sphi %s4326_s18, %s5968_s18  }
   0x3   : > { %p29_p1 = scmp.ge.s32.totalorder %s27_s21, 2  ;;  %p222_p2 = scmp.lt.s32.totalorder %s4293_s20, 3 }
   0x5   : > { %s5971_s21 = smov (%p29_p1, %s27_s21), 0  ;;  %p223_p3 = pnand %p2715_p0, %p222_p2 }
   0x6   : > { %p263_p4 = scmp.lt.s32.totalorder (!%p223_p3), %s4285_s18, 1 }
   0x7   : > { %226 = sbr.rel (%p223_p3) target bundleno = 430 (0x1ae), region = 40 }
   0xc   : > { %v2776_v0 = vld [vmem:[%s5965_s3 + $0x70] sm:$0xf]  ;;  %v3999_v1 = vld [vmem:[%s5965_s3 + $0x74] sm:$0xf0]  ;;  %v3998_v2 = vld [vmem:[%s5965_s3 + $0x74] sm:$0xf] }
   0xd   : > { %v2777_v3 = vor.u32 %v3999_v1, %v2776_v0  ;;  %v2778_v4 = vld [vmem:[%s5965_s3 + $0x78] sm:$0xf0]  ;;  %v2856_v5 = vld [vmem:[%s5965_s3 + $0xf0] sm:$0xf]  ;;  %v4015_v6 = vld [vmem:[%s5965_s3 + $0xf4] sm:$0xf0] }
   0xe   : > { %v2781_v7 = vor.u32 %v3998_v2, %v2778_v4  ;;  %v2857_v8 = vor.u32 %v4015_v6, %v2856_v5  ;;  %v4014_v9 = vld [vmem:[%s5965_s3 + $0xf4] sm:$0xf]  ;;  %v2858_v10 = vld [vmem:[%s5965_s3 + $0xf8] sm:$0xf0]  ;;  %v2768_v11 = vld [vmem:[%s5965_s3 + $0x60] sm:$0xf] }
   0xf   : > { %441 = vmatpush.bf16.msra.mxu0 %v2777_v3  ;;  %v2861_v12 = vor.u32 %v4014_v9, %v2858_v10  ;;  %v3997_v13 = vld [vmem:[%s5965_s3 + $0x64] sm:$0xf0]  ;;  %v3996_v14 = vld [vmem:[%s5965_s3 + $0x64] sm:$0xf]  ;;  %v2770_v15 = vld [vmem:[%s5965_s3 + $0x68] sm:$0xf0] }
  0x10   : > { %455 = vmatpush.bf16.msra.mxu1 %v2781_v7  ;;  %581 = vmatpush.bf16.msra.mxu2 %v2857_v8  ;;  %v2769_v16 = vor.u32 %v3997_v13, %v2768_v11  ;;  %v2773_v17 = vor.u32 %v3996_v14, %v2770_v15  ;;  %v2848_v18 = vld [vmem:[%s5965_s3 + $0xe0] sm:$0xf]  ;;  %v4013_v19 = vld [vmem:[%s5965_s3 + $0xe4] sm:$0xf0]  ;;  %v4012_v20 = vld [vmem:[%s5965_s3 + $0xe4] sm:$0xf] }
  0x11   : > { %595 = vmatpush.bf16.msra.mxu3 %v2861_v12  ;;  %v2849_v21 = vor.u32 %v4013_v19, %v2848_v18  ;;  %v2850_v22 = vld [vmem:[%s5965_s3 + $0xe8] sm:$0xf0]  ;;  %v2760_v23 = vld [vmem:[%s5965_s3 + $0x50] sm:$0xf]  ;;  %v3995_v24 = vld [vmem:[%s5965_s3 + $0x54] sm:$0xf0] }
  0x12   : > { %v2853_v25 = vor.u32 %v4012_v20, %v2850_v22  ;;  %v3994_v26 = vld [vmem:[%s5965_s3 + $0x54] sm:$0xf]  ;;  %v2762_v27 = vld [vmem:[%s5965_s3 + $0x58] sm:$0xf0]  ;;  %v2840_v28 = vld [vmem:[%s5965_s3 + $0xd0] sm:$0xf]  ;;  %v2761_v29 = vor.u32 %v3995_v24, %v2760_v23 }
  0x13   : > { %442 = vmatpush.bf16.msra.mxu0 %v2769_v16  ;;  %v4011_v30 = vld [vmem:[%s5965_s3 + $0xd4] sm:$0xf0]  ;;  %v4010_v31 = vld [vmem:[%s5965_s3 + $0xd4] sm:$0xf]  ;;  %v2842_v32 = vld [vmem:[%s5965_s3 + $0xd8] sm:$0xf0]  ;;  %v2765_v33 = vor.u32 %v3994_v26, %v2762_v27 }
  0x14   : > { %456 = vmatpush.bf16.msra.mxu1 %v2773_v17  ;;  %582 = vmatpush.bf16.msra.mxu2 %v2849_v21  ;;  %v2841_v34 = vor.u32 %v4011_v30, %v2840_v28  ;;  %v2752_v35 = vld [vmem:[%s5965_s3 + $0x40] sm:$0xf]  ;;  %v3993_v36 = vld [vmem:[%s5965_s3 + $0x44] sm:$0xf0]  ;;  %v3992_v37 = vld [vmem:[%s5965_s3 + $0x44] sm:$0xf]  ;;  %v2845_v38 = vor.u32 %v4010_v31, %v2842_v32 }
  0x15   : > { %596 = vmatpush.bf16.msra.mxu3 %v2853_v25  ;;  %v2754_v39 = vld [vmem:[%s5965_s3 + $0x48] sm:$0xf0]  ;;  %v2832_v40 = vld [vmem:[%s5965_s3 + $0xc0] sm:$0xf]  ;;  %v4009_v41 = vld [vmem:[%s5965_s3 + $0xc4] sm:$0xf0]  ;;  %v2753_v44 = vor.u32 %v3993_v36, %v2752_v35 }
  0x16   : > { %v4008_v42 = vld [vmem:[%s5965_s3 + $0xc4] sm:$0xf]  ;;  %v2834_v43 = vld [vmem:[%s5965_s3 + $0xc8] sm:$0xf0]  ;;  %v2757_v45 = vor.u32 %v3992_v37, %v2754_v39  ;;  %v2833_v46 = vor.u32 %v4009_v41, %v2832_v40  ;;  %v2744_v47 = vld [vmem:[%s5965_s3 + $0x30] sm:$0xf] }
  0x17   : > { %443 = vmatpush.bf16.msra.mxu0 %v2761_v29  ;;  %v3991_v48 = vld [vmem:[%s5965_s3 + $0x34] sm:$0xf0]  ;;  %v3990_v49 = vld [vmem:[%s5965_s3 + $0x34] sm:$0xf]  ;;  %v2837_v50 = vor.u32 %v4008_v42, %v2834_v43  ;;  %v2746_v51 = vld [vmem:[%s5965_s3 + $0x38] sm:$0xf0] }
  0x18   : > { %457 = vmatpush.bf16.msra.mxu1 %v2765_v33  ;;  %583 = vmatpush.bf16.msra.mxu2 %v2841_v34  ;;  %v2824_v52 = vld [vmem:[%s5965_s3 + $0xb0] sm:$0xf]  ;;  %v4007_v53 = vld [vmem:[%s5965_s3 + $0xb4] sm:$0xf0]  ;;  %v4006_v54 = vld [vmem:[%s5965_s3 + $0xb4] sm:$0xf]  ;;  %v2745_v56 = vor.u32 %v3991_v48, %v2744_v47  ;;  %v2749_v57 = vor.u32 %v3990_v49, %v2746_v51 }
  0x19   : > { %597 = vmatpush.bf16.msra.mxu3 %v2845_v38  ;;  %v2826_v55 = vld [vmem:[%s5965_s3 + $0xb8] sm:$0xf0]  ;;  %v2825_v58 = vor.u32 %v4007_v53, %v2824_v52  ;;  %v2736_v59 = vld [vmem:[%s5965_s3 + $0x20] sm:$0xf]  ;;  %v3989_v60 = vld [vmem:[%s5965_s3 + $0x24] sm:$0xf0] }
  0x1a   : > { %v3988_v61 = vld [vmem:[%s5965_s3 + $0x24] sm:$0xf]  ;;  %v2829_v62 = vor.u32 %v4006_v54, %v2826_v55  ;;  %v2738_v63 = vld [vmem:[%s5965_s3 + $0x28] sm:$0xf0]  ;;  %v2816_v0 = vld [vmem:[%s5965_s3 + $0xa0] sm:$0xf]  ;;  %v2737_v4 = vor.u32 %v3989_v60, %v2736_v59 }
  0x1b   : > { %444 = vmatpush.bf16.msra.mxu0 %v2753_v44  ;;  %v4005_v1 = vld [vmem:[%s5965_s3 + $0xa4] sm:$0xf0]  ;;  %v4004_v2 = vld [vmem:[%s5965_s3 + $0xa4] sm:$0xf]  ;;  %v2818_v3 = vld [vmem:[%s5965_s3 + $0xa8] sm:$0xf0]  ;;  %v2741_v5 = vor.u32 %v3988_v61, %v2738_v63 }
  0x1c   : > { %458 = vmatpush.bf16.msra.mxu1 %v2757_v45  ;;  %584 = vmatpush.bf16.msra.mxu2 %v2833_v46  ;;  %v2817_v6 = vor.u32 %v4005_v1, %v2816_v0  ;;  %v2728_v7 = vld [vmem:[%s5965_s3 + $0x10] sm:$0xf]  ;;  %v3987_v8 = vld [vmem:[%s5965_s3 + $0x14] sm:$0xf0]  ;;  %v3986_v9 = vld [vmem:[%s5965_s3 + $0x14] sm:$0xf]  ;;  %v2821_v10 = vor.u32 %v4004_v2, %v2818_v3 }
  0x1d   : > { %598 = vmatpush.bf16.msra.mxu3 %v2837_v50  ;;  %v2730_v11 = vld [vmem:[%s5965_s3 + $0x18] sm:$0xf0]  ;;  %v2808_v12 = vld [vmem:[%s5965_s3 + $0x90] sm:$0xf]  ;;  %v4003_v13 = vld [vmem:[%s5965_s3 + $0x94] sm:$0xf0]  ;;  %v2729_v16 = vor.u32 %v3987_v8, %v2728_v7 }
  0x1e   : > { %v4002_v14 = vld [vmem:[%s5965_s3 + $0x94] sm:$0xf]  ;;  %v2810_v15 = vld [vmem:[%s5965_s3 + $0x98] sm:$0xf0]  ;;  %v2720_v17 = vld [vmem:[%s5965_s3] sm:$0xf]  ;;  %v2733_v19 = vor.u32 %v3986_v9, %v2730_v11  ;;  %v2809_v20 = vor.u32 %v4003_v13, %v2808_v12 }
  0x1f   : > { %445 = vmatpush.bf16.msra.mxu0 %v2745_v56  ;;  %v3985_v18 = vld [vmem:[%s5965_s3 + $0x4] sm:$0xf0]  ;;  %v3984_v21 = vld [vmem:[%s5965_s3 + $0x4] sm:$0xf]  ;;  %v2722_v22 = vld [vmem:[%s5965_s3 + $0x8] sm:$0xf0]  ;;  %v2813_v24 = vor.u32 %v4002_v14, %v2810_v15 }
  0x20   : > { %459 = vmatpush.bf16.msra.mxu1 %v2749_v57  ;;  %585 = vmatpush.bf16.msra.mxu2 %v2825_v58  ;;  %v2800_v23 = vld [vmem:[%s5965_s3 + $0x80] sm:$0xf]  ;;  %v4001_v25 = vld [vmem:[%s5965_s3 + $0x84] sm:$0xf0]  ;;  %v4000_v26 = vld [vmem:[%s5965_s3 + $0x84] sm:$0xf]  ;;  %v2721_v31 = vor.u32 %v3985_v18, %v2720_v17  ;;  %v2725_v35 = vor.u32 %v3984_v21, %v2722_v22 }
  0x21   : > { %599 = vmatpush.bf16.msra.mxu3 %v2829_v62  ;;  %v2802_v27 = vld [vmem:[%s5965_s3 + $0x88] sm:$0xf0]  ;;  %v2936_v28 = vld [vmem:[%s5965_s3 + $0x170] sm:$0xf]  ;;  %v4031_v29 = vld [vmem:[%s5965_s3 + $0x174] sm:$0xf0]  ;;  %v2801_v36 = vor.u32 %v4001_v25, %v2800_v23 }
  0x22   : > { %v4030_v30 = vld [vmem:[%s5965_s3 + $0x174] sm:$0xf]  ;;  %v2938_v32 = vld [vmem:[%s5965_s3 + $0x178] sm:$0xf0]  ;;  %v3016_v33 = vld [vmem:[%s5965_s3 + $0x1f0] sm:$0xf]  ;;  %v2805_v39 = vor.u32 %v4000_v26, %v2802_v27  ;;  %v2937_v40 = vor.u32 %v4031_v29, %v2936_v28 }
  0x23   : > { %446 = vmatpush.bf16.msra.mxu0 %v2737_v4  ;;  %v4047_v34 = vld [vmem:[%s5965_s3 + $0x1f4] sm:$0xf0]  ;;  %v4046_v37 = vld [vmem:[%s5965_s3 + $0x1f4] sm:$0xf]  ;;  %v3018_v38 = vld [vmem:[%s5965_s3 + $0x1f8] sm:$0xf0]  ;;  %v2941_v41 = vor.u32 %v4030_v30, %v2938_v32 }
  0x24   : > { %460 = vmatpush.bf16.msra.mxu1 %v2741_v5  ;;  %586 = vmatpush.bf16.msra.mxu2 %v2817_v6  ;;  %v3017_v42 = vor.u32 %v4047_v34, %v3016_v33  ;;  %v2928_v43 = vld [vmem:[%s5965_s3 + $0x160] sm:$0xf]  ;;  %v4029_v44 = vld [vmem:[%s5965_s3 + $0x164] sm:$0xf0]  ;;  %v4028_v45 = vld [vmem:[%s5965_s3 + $0x164] sm:$0xf]  ;;  %v3021_v46 = vor.u32 %v4046_v37, %v3018_v38 }
  0x25   : > { %600 = vmatpush.bf16.msra.mxu3 %v2821_v10  ;;  %v2930_v47 = vld [vmem:[%s5965_s3 + $0x168] sm:$0xf0]  ;;  %v3008_v48 = vld [vmem:[%s5965_s3 + $0x1e0] sm:$0xf]  ;;  %v4045_v49 = vld [vmem:[%s5965_s3 + $0x1e4] sm:$0xf0]  ;;  %v2929_v52 = vor.u32 %v4029_v44, %v2928_v43 }
  0x26   : > { %v4044_v50 = vld [vmem:[%s5965_s3 + $0x1e4] sm:$0xf]  ;;  %v3010_v51 = vld [vmem:[%s5965_s3 + $0x1e8] sm:$0xf0]  ;;  %v2933_v53 = vor.u32 %v4028_v45, %v2930_v47  ;;  %v3009_v54 = vor.u32 %v4045_v49, %v3008_v48  ;;  %v2920_v55 = vld [vmem:[%s5965_s3 + $0x150] sm:$0xf] }
  0x27   : > { %447 = vmatpush.bf16.msra.mxu0 %v2729_v16  ;;  %v4027_v56 = vld [vmem:[%s5965_s3 + $0x154] sm:$0xf0]  ;;  %v4026_v57 = vld [vmem:[%s5965_s3 + $0x154] sm:$0xf]  ;;  %v3013_v58 = vor.u32 %v4044_v50, %v3010_v51  ;;  %v2922_v59 = vld [vmem:[%s5965_s3 + $0x158] sm:$0xf0] }
  0x28   : > { %461 = vmatpush.bf16.msra.mxu1 %v2733_v19  ;;  %587 = vmatpush.bf16.msra.mxu2 %v2809_v20  ;;  %v3000_v60 = vld [vmem:[%s5965_s3 + $0x1d0] sm:$0xf]  ;;  %v4043_v61 = vld [vmem:[%s5965_s3 + $0x1d4] sm:$0xf0]  ;;  %v4042_v62 = vld [vmem:[%s5965_s3 + $0x1d4] sm:$0xf]  ;;  %v2921_v1 = vor.u32 %v4027_v56, %v2920_v55  ;;  %v2925_v3 = vor.u32 %v4026_v57, %v2922_v59 }
  0x29   : > { %601 = vmatpush.bf16.msra.mxu3 %v2813_v24  ;;  %v3002_v63 = vld [vmem:[%s5965_s3 + $0x1d8] sm:$0xf0]  ;;  %v2912_v0 = vld [vmem:[%s5965_s3 + $0x140] sm:$0xf]  ;;  %v4025_v2 = vld [vmem:[%s5965_s3 + $0x144] sm:$0xf0]  ;;  %v3001_v4 = vor.u32 %v4043_v61, %v3000_v60 }
  0x2a   : > { %v4024_v5 = vld [vmem:[%s5965_s3 + $0x144] sm:$0xf]  ;;  %v2914_v6 = vld [vmem:[%s5965_s3 + $0x148] sm:$0xf0]  ;;  %v3005_v7 = vor.u32 %v4042_v62, %v3002_v63  ;;  %v2992_v8 = vld [vmem:[%s5965_s3 + $0x1c0] sm:$0xf]  ;;  %v2913_v13 = vor.u32 %v4025_v2, %v2912_v0 }
  0x2b   : > { %448 = vmatpush.bf16.msra.mxu0 %v2721_v31  ;;  %v4041_v9 = vld [vmem:[%s5965_s3 + $0x1c4] sm:$0xf0]  ;;  %s5973_s18 = smov (!%p263_p4, %s4285_s18), 1  ;;  %v4040_v10 = vld [vmem:[%s5965_s3 + $0x1c4] sm:$0xf]  ;;  %v2917_v16 = vor.u32 %v4024_v5, %v2914_v6 }
  0x2c   : > { %462 = vmatpush.bf16.msra.mxu1 %v2725_v35  ;;  %588 = vmatpush.bf16.msra.mxu2 %v2801_v36  ;;  %v2994_v11 = vld [vmem:[%s5965_s3 + $0x1c8] sm:$0xf0]  ;;  %v2904_v12 = vld [vmem:[%s5965_s3 + $0x130] sm:$0xf]  ;;  %v4023_v14 = vld [vmem:[%s5965_s3 + $0x134] sm:$0xf0]  ;;  %v2993_v17 = vor.u32 %v4041_v9, %v2992_v8 }
  0x2d   : > { %602 = vmatpush.bf16.msra.mxu3 %v2805_v39  ;;  %s4240_s29 = smul.u32 40, %s5973_s18  ;;  %v4648_v15 = vld [vmem:[%s5963_s1] ss:$0 sm:$0xff]  ;;  %v4022_v18 = vld [vmem:[%s5965_s3 + $0x134] sm:$0xf]  ;;  %v2997_v21 = vor.u32 %v4040_v10, %v2994_v11  ;;  %v2905_v28 = vor.u32 %v4023_v14, %v2904_v12 }
  0x2e   : > { %v2906_v19 = vld [vmem:[%s5965_s3 + $0x138] sm:$0xf0]  ;;  %v2984_v20 = vld [vmem:[%s5965_s3 + $0x1b0] sm:$0xf]  ;;  %v4039_v22 = vld [vmem:[%s5965_s3 + $0x1b4] sm:$0xf0] }
  0x2f   : > { %721 = vmatpush.bf16.msrb.mxu0 %v2937_v40  ;;  %v4038_v23 = vld [vmem:[%s5965_s3 + $0x1b4] sm:$0xf]  ;;  %s4668_s23 = scalar_lea.vmem %s5962_s0, %s4240_s29  ;;  %v4673_v24 = vld [vmem:[%s5964_s2] ss:$0 sm:$0xff]  ;;  %v2986_v25 = vld [vmem:[%s5965_s3 + $0x1b8] sm:$0xf0]  ;;  %v2909_v33 = vor.u32 %v4022_v18, %v2906_v19  ;;  %v2985_v34 = vor.u32 %v4039_v22, %v2984_v20 }
  0x30   : > { %735 = vmatpush.bf16.msrb.mxu1 %v2941_v41  ;;  %861 = vmatpush.bf16.msrb.mxu2 %v3017_v42  ;;  %v289_v26 = vld [vmem:[%s4668_s23] sm:$0xff]  ;;  %v290_v27 = vld [vmem:[%s4668_s23 + $0x8] sm:$0xff]  ;;  %v2989_v36 = vor.u32 %v4038_v23, %v2986_v25  ;;  %v2888_v49 = vld [vmem:[%s5965_s3 + $0x110] sm:$0xf]  ;;  %s4241_s13 = smul.u32 48, %s5973_s18 }
  0x31   : > { %875 = vmatpush.bf16.msrb.mxu3 %v3021_v46  ;;  %v2896_v29 = vld [vmem:[%s5965_s3 + $0x120] sm:$0xf]  ;;  %v4021_v30 = vld [vmem:[%s5965_s3 + $0x124] sm:$0xf0]  ;;  %v298_v31 = vmul.f32 %v4648_v15, %v289_v26  ;;  %v299_v32 = vmul.f32 %v4648_v15, %v290_v27  ;;  %v4020_v35 = vld [vmem:[%s5965_s3 + $0x124] sm:$0xf] }
  0x32   : > { %v2898_v37 = vld [vmem:[%s5965_s3 + $0x128] sm:$0xf0]  ;;  %v2976_v38 = vld [vmem:[%s5965_s3 + $0x1a0] sm:$0xf]  ;;  %v4037_v39 = vld [vmem:[%s5965_s3 + $0x1a4] sm:$0xf0]  ;;  %v2897_v42 = vor.u32 %v4021_v30, %v2896_v29  ;;  %s5943_s16 = scalar_lea.vmem %s5967_s5, %s4241_s13 }
  0x33   : > { %722 = vmatpush.bf16.msrb.mxu0 %v2929_v52  ;;  %v307_v40 = vadd.f32 %v4673_v24, %v298_v31  ;;  %v308_v41 = vadd.f32 %v4673_v24, %v299_v32  ;;  %v4036_v43 = vld [vmem:[%s5965_s3 + $0x1a4] sm:$0xf]  ;;  %v2978_v44 = vld [vmem:[%s5965_s3 + $0x1a8] sm:$0xf0]  ;;  %v2901_v47 = vor.u32 %v4020_v35, %v2898_v37  ;;  %v2977_v48 = vor.u32 %v4037_v39, %v2976_v38  ;;  %v4019_v50 = vld [vmem:[%s5965_s3 + $0x114] sm:$0xf0] }
  0x34   : > { %736 = vmatpush.bf16.msrb.mxu1 %v2933_v53  ;;  %862 = vmatpush.bf16.msrb.mxu2 %v3009_v54  ;;  %v4018_v51 = vld [vmem:[%s5965_s3 + $0x114] sm:$0xf]  ;;  %v2981_v52 = vor.u32 %v4036_v43, %v2978_v44  ;;  %v2890_v55 = vld [vmem:[%s5965_s3 + $0x118] sm:$0xf0]  ;;  %v2968_v56 = vld [vmem:[%s5965_s3 + $0x190] sm:$0xf]  ;;  %v2889_v61 = vor.u32 %v4019_v50, %v2888_v49 }
  0x35   : > { %876 = vmatpush.bf16.msrb.mxu3 %v3013_v58  ;;  %vm312_vm0 = vcmp.ge.f32.partialorder %v307_v40, 0.0  ;;  %vm313_vm1 = vcmp.ge.f32.partialorder %v308_v41, 0.0  ;;  %v317_v45 = vmul.f32 0.2, %v307_v40  ;;  %v318_v46 = vmul.f32 0.2, %v308_v41 }
  0x36   : > { %v4035_v57 = vld [vmem:[%s5965_s3 + $0x194] sm:$0xf0]  ;;  %v4034_v58 = vld [vmem:[%s5965_s3 + $0x194] sm:$0xf]  ;;  %v2970_v59 = vld [vmem:[%s5965_s3 + $0x198] sm:$0xf0]  ;;  %v2893_v63 = vor.u32 %v4018_v51, %v2890_v55 }
  0x37   : > { %723 = vmatpush.bf16.msrb.mxu0 %v2921_v1  ;;  %v322_v53 = vsel %vm312_vm0, %v307_v40, %v317_v45  ;;  %v4717_v54 = vsel %vm313_vm1, %v308_v41, %v318_v46  ;;  %v291_v60 = vld [vmem:[%s4668_s23 + $0x10] sm:$0xff]  ;;  %v2969_v0 = vor.u32 %v4035_v57, %v2968_v56  ;;  %v2880_v1 = vld [vmem:[%s5965_s3 + $0x100] sm:$0xf]  ;;  %v4017_v2 = vld [vmem:[%s5965_s3 + $0x104] sm:$0xf0] }
  0x38   : > { %737 = vmatpush.bf16.msrb.mxu1 %v2925_v3  ;;  %863 = vmatpush.bf16.msrb.mxu2 %v3001_v4  ;;  %327 = vst [vmem:[#allocation2] sm:$0xff] %v322_v53  ;;  %v300_v62 = vmul.f32 %v4648_v15, %v291_v60  ;;  %v4016_v3 = vld [vmem:[%s5965_s3 + $0x104] sm:$0xf]  ;;  %v2973_v4 = vor.u32 %v4034_v58, %v2970_v59  ;;  %v2882_v5 = vld [vmem:[%s5965_s3 + $0x108] sm:$0xf0] }
  0x39   : > { %877 = vmatpush.bf16.msrb.mxu3 %v3005_v7  ;;  %328 = vst [vmem:[#allocation2 + $0x8] sm:$0xff] %v4717_v54  ;;  %v2960_v6 = vld [vmem:[%s5965_s3 + $0x180] sm:$0xf]  ;;  %v4033_v7 = vld [vmem:[%s5965_s3 + $0x184] sm:$0xf0]  ;;  %v2881_v12 = vor.u32 %v4017_v2, %v2880_v1 }
  0x3a   : > { %v309_v8 = vadd.f32 %v4673_v24, %v300_v62  ;;  %v4032_v9 = vld [vmem:[%s5965_s3 + $0x184] sm:$0xf]  ;;  %v2962_v10 = vld [vmem:[%s5965_s3 + $0x188] sm:$0xf0]  ;;  %v3096_v11 = vld [vmem:[%s5965_s3 + $0x270] sm:$0xf] }
  0x3b   : > { %724 = vmatpush.bf16.msrb.mxu0 %v2913_v13  ;;  %v4063_v13 = vld [vmem:[%s5965_s3 + $0x274] sm:$0xf0]  ;;  %v4062_v18 = vld [vmem:[%s5965_s3 + $0x274] sm:$0xf]  ;;  %v3098_v19 = vld [vmem:[%s5965_s3 + $0x278] sm:$0xf0]  ;;  %v2965_v31 = vor.u32 %v4032_v9, %v2962_v10 }
  0x3c   : > { %738 = vmatpush.bf16.msrb.mxu1 %v2917_v16  ;;  %864 = vmatpush.bf16.msrb.mxu2 %v2993_v17  ;;  %vm314_vm2 = vcmp.ge.f32.partialorder %v309_v8, 0.0  ;;  %v319_v14 = vmul.f32 0.2, %v309_v8  ;;  %v2885_v16 = vor.u32 %v4016_v3, %v2882_v5  ;;  %v2961_v17 = vor.u32 %v4033_v7, %v2960_v6  ;;  %v3176_v20 = vld [vmem:[%s5965_s3 + $0x2f0] sm:$0xf] }
  0x3d   : > { %878 = vmatpush.bf16.msrb.mxu3 %v2997_v21  ;;  %v4079_v21 = vld [vmem:[%s5965_s3 + $0x2f4] sm:$0xf0]  ;;  %v4078_v22 = vld [vmem:[%s5965_s3 + $0x2f4] sm:$0xf]  ;;  %v3178_v23 = vld [vmem:[%s5965_s3 + $0x2f8] sm:$0xf0]  ;;  %v3097_v32 = vor.u32 %v4063_v13, %v3096_v11 }
  0x3e   : > { %v324_v25 = vsel %vm314_vm2, %v309_v8, %v319_v14  ;;  %v3088_v35 = vld [vmem:[%s5965_s3 + $0x260] sm:$0xf]  ;;  %v4060_v37 = vld [vmem:[%s5965_s3 + $0x264] sm:$0xf]  ;;  %v3181_v38 = vor.u32 %v4078_v22, %v3178_v23  ;;  %v3090_v39 = vld [vmem:[%s5965_s3 + $0x268] sm:$0xf0] }
  0x3f   : > { %725 = vmatpush.bf16.msrb.mxu0 %v2905_v28  ;;  %329 = vst [vmem:[#allocation2 + $0x10] sm:$0xff] %v324_v25  ;;  %v3168_v40 = vld [vmem:[%s5965_s3 + $0x2e0] sm:$0xf]  ;;  %v4077_v41 = vld [vmem:[%s5965_s3 + $0x2e4] sm:$0xf0]  ;;  %v3093_v45 = vor.u32 %v4060_v37, %v3090_v39 }
  0x40   : > { %739 = vmatpush.bf16.msrb.mxu1 %v2909_v33  ;;  %865 = vmatpush.bf16.msrb.mxu2 %v2985_v34  ;;  %v339_v26 = vld [vmem:[#allocation2 + $0x8] sm:$0x7f]  ;;  %v3101_v33 = vor.u32 %v4062_v18, %v3098_v19  ;;  %v3177_v34 = vor.u32 %v4079_v21, %v3176_v20  ;;  %v3169_v46 = vor.u32 %v4077_v41, %v3168_v40  ;;  %v4058_v49 = vld [vmem:[%s5965_s3 + $0x254] sm:$0xf]  ;;  %v3082_v51 = vld [vmem:[%s5965_s3 + $0x258] sm:$0xf0] }
  0x41   : > { %879 = vmatpush.bf16.msrb.mxu3 %v2989_v36  ;;  %v477_v27 = vld [vmem:[#allocation2 + $0x1] sm:$0xff]  ;;  %v478_v28 = vld [vmem:[#allocation2 + $0x9] sm:$0x7f]  ;;  %v340_v29 = vpack.c.bf16 %v339_v26, %v322_v53  ;;  %v4075_v53 = vld [vmem:[%s5965_s3 + $0x2d4] sm:$0xf0]  ;;  %v3085_v58 = vor.u32 %v4058_v49, %v3082_v51 }
  0x42   : > { %v479_v30 = vpack.c.bf16 %v478_v28, %v477_v27  ;;  %v4061_v36 = vld [vmem:[%s5965_s3 + $0x264] sm:$0xf0]  ;;  %v3170_v43 = vld [vmem:[%s5965_s3 + $0x2e8] sm:$0xf0]  ;;  %v4074_v55 = vld [vmem:[%s5965_s3 + $0x2d4] sm:$0xf] }
  0x43   : > { %726 = vmatpush.bf16.msrb.mxu0 %v2897_v42  ;;  %463 = vmatmul.bf16.vlgmr.msra.gmra.mxu1 %v340_v29  ;;  %v4076_v42 = vld [vmem:[%s5965_s3 + $0x2e4] sm:$0xf]  ;;  %v3089_v44 = vor.u32 %v4061_v36, %v3088_v35  ;;  %v3162_v56 = vld [vmem:[%s5965_s3 + $0x2d8] sm:$0xf0]  ;;  %v3072_v60 = vld [vmem:[%s5965_s3 + $0x240] sm:$0xf] }
  0x44   : > { %740 = vmatpush.bf16.msrb.mxu1 %v2901_v47  ;;  %866 = vmatpush.bf16.msrb.mxu2 %v2977_v48  ;;  %v3080_v47 = vld [vmem:[%s5965_s3 + $0x250] sm:$0xf]  ;;  %v4059_v48 = vld [vmem:[%s5965_s3 + $0x254] sm:$0xf0]  ;;  %v3173_v50 = vor.u32 %v4076_v42, %v3170_v43  ;;  %v4056_v62 = vld [vmem:[%s5965_s3 + $0x244] sm:$0xf] }
  0x45   : > { %880 = vmatpush.bf16.msrb.mxu3 %v2981_v52  ;;  %449 = vmatmul.bf16.vlgmr.msra.gmra.mxu0 %v340_v29  ;;  %v3160_v52 = vld [vmem:[%s5965_s3 + $0x2d0] sm:$0xf]  ;;  %v3081_v57 = vor.u32 %v4059_v48, %v3080_v47  ;;  %v3152_v1 = vld [vmem:[%s5965_s3 + $0x2c0] sm:$0xf]  ;;  %v4073_v2 = vld [vmem:[%s5965_s3 + $0x2c4] sm:$0xf0] }
  0x46   : > { %589 = vmatmul.bf16.vlgmr.msra.gmra.mxu2 %v479_v30  ;;  %603 = vmatmul.bf16.vlgmr.msra.gmra.mxu3 %v479_v30  ;;  %v3161_v59 = vor.u32 %v4075_v53, %v3160_v52  ;;  %v617_v3 = vld [vmem:[#allocation2 + $0x2] sm:$0xff]  ;;  %v3154_v7 = vld [vmem:[%s5965_s3 + $0x2c8] sm:$0xf0]  ;;  %v3153_v11 = vor.u32 %v4073_v2, %v3152_v1  ;;  %v4055_v13 = vld [vmem:[%s5965_s3 + $0x234] sm:$0xf0] }
  0x47   : > { %727 = vmatpush.bf16.msrb.mxu0 %v2889_v61  ;;  %v4057_v61 = vld [vmem:[%s5965_s3 + $0x244] sm:$0xf0]  ;;  %v4072_v5 = vld [vmem:[%s5965_s3 + $0x2c4] sm:$0xf]  ;;  %v4054_v14 = vld [vmem:[%s5965_s3 + $0x234] sm:$0xf] }
  0x48   : > { %741 = vmatpush.bf16.msrb.mxu1 %v2893_v63  ;;  %867 = vmatpush.bf16.msrb.mxu2 %v2969_v0  ;;  %v3165_v63 = vor.u32 %v4074_v55, %v3162_v56  ;;  %v3074_v0 = vld [vmem:[%s5965_s3 + $0x248] sm:$0xf0]  ;;  %v3073_v6 = vor.u32 %v4057_v61, %v3072_v60  ;;  %v757_v8 = vld [vmem:[#allocation2 + $0x3] sm:$0xff]  ;;  %v3144_v18 = vld [vmem:[%s5965_s3 + $0x2b0] sm:$0xf]  ;;  %v3157_v20 = vor.u32 %v4072_v5, %v3154_v7 }
  0x49   : > { %881 = vmatpush.bf16.msrb.mxu3 %v2973_v4  ;;  %v618_v4 = vld [vmem:[#allocation2 + $0xa] sm:$0x7f]  ;;  %v3077_v10 = vor.u32 %v4056_v62, %v3074_v0  ;;  %v4071_v19 = vld [vmem:[%s5965_s3 + $0x2b4] sm:$0xf0]  ;;  %v4070_v23 = vld [vmem:[%s5965_s3 + $0x2b4] sm:$0xf] }
  0x4a   : > { %v758_v9 = vld [vmem:[#allocation2 + $0xb] sm:$0x7f]  ;;  %v3146_v25 = vld [vmem:[%s5965_s3 + $0x2b8] sm:$0xf0]  ;;  %v3145_v27 = vor.u32 %v4071_v19, %v3144_v18  ;;  %v3056_v28 = vld [vmem:[%s5965_s3 + $0x220] sm:$0xf] }
  0x4b   : > { %728 = vmatpush.bf16.msrb.mxu0 %v2881_v12  ;;  %v3064_v12 = vld [vmem:[%s5965_s3 + $0x230] sm:$0xf]  ;;  %v759_v21 = vpack.c.bf16 %v758_v9, %v757_v8  ;;  %v4053_v29 = vld [vmem:[%s5965_s3 + $0x224] sm:$0xf0]  ;;  %v4052_v30 = vld [vmem:[%s5965_s3 + $0x224] sm:$0xf] }
  0x4c   : > { %742 = vmatpush.bf16.msrb.mxu1 %v2885_v16  ;;  %868 = vmatpush.bf16.msrb.mxu2 %v2961_v17  ;;  %v619_v16 = vpack.c.bf16 %v618_v4, %v617_v3  ;;  %v3066_v17 = vld [vmem:[%s5965_s3 + $0x238] sm:$0xf0]  ;;  %v3065_v22 = vor.u32 %v4055_v13, %v3064_v12  ;;  %v3057_v35 = vor.u32 %v4053_v29, %v3056_v28  ;;  %v4068_v36 = vld [vmem:[%s5965_s3 + $0x2a4] sm:$0xf]  ;;  %v3138_v37 = vld [vmem:[%s5965_s3 + $0x2a8] sm:$0xf0] }
  0x4d   : > { %882 = vmatpush.bf16.msrb.mxu3 %v2965_v31  ;;  %v3069_v26 = vor.u32 %v4054_v14, %v3066_v17  ;;  %v3058_v31 = vld [vmem:[%s5965_s3 + $0x228] sm:$0xf0]  ;;  %v3048_v40 = vld [vmem:[%s5965_s3 + $0x210] sm:$0xf]  ;;  %v4051_v41 = vld [vmem:[%s5965_s3 + $0x214] sm:$0xf0] }
  0x4e   : > { %v4050_v42 = vld [vmem:[%s5965_s3 + $0x214] sm:$0xf]  ;;  %v3050_v43 = vld [vmem:[%s5965_s3 + $0x218] sm:$0xf0]  ;;  %v3049_v49 = vor.u32 %v4051_v41, %v3048_v40  ;;  %v4049_v51 = vld [vmem:[%s5965_s3 + $0x204] sm:$0xf0] }
  0x4f   : > { %1001 = vmatpush.bf16.msra.mxu0 %v3097_v32  ;;  %v3136_v32 = vld [vmem:[%s5965_s3 + $0x2a0] sm:$0xf]  ;;  %v4066_v47 = vld [vmem:[%s5965_s3 + $0x294] sm:$0xf]  ;;  %v3130_v48 = vld [vmem:[%s5965_s3 + $0x298] sm:$0xf0]  ;;  %v3053_v53 = vor.u32 %v4050_v42, %v3050_v43 }
  0x50   : > { %1015 = vmatpush.bf16.msra.mxu1 %v3101_v33  ;;  %1141 = vmatpush.bf16.msra.mxu2 %v3177_v34  ;;  %v4069_v33 = vld [vmem:[%s5965_s3 + $0x2a4] sm:$0xf0]  ;;  %v3149_v34 = vor.u32 %v4070_v23, %v3146_v25  ;;  %v4048_v52 = vld [vmem:[%s5965_s3 + $0x204] sm:$0xf]  ;;  %v3042_v56 = vld [vmem:[%s5965_s3 + $0x208] sm:$0xf0]  ;;  %v3133_v62 = vor.u32 %v4066_v47, %v3130_v48 }
  0x51   : > { %1155 = vmatpush.bf16.msra.mxu3 %v3181_v38  ;;  %v3061_v38 = vor.u32 %v4052_v30, %v3058_v31  ;;  %v3137_v39 = vor.u32 %v4069_v33, %v3136_v32  ;;  %v3122_v60 = vld [vmem:[%s5965_s3 + $0x288] sm:$0xf0]  ;;  %v3256_v61 = vld [vmem:[%s5965_s3 + $0x370] sm:$0xf]  ;;  %v4094_v0 = vld [vmem:[%s5965_s3 + $0x374] sm:$0xf] }
  0x52   : > { %v3258_v1 = vld [vmem:[%s5965_s3 + $0x378] sm:$0xf0]  ;;  %v3336_v3 = vld [vmem:[%s5965_s3 + $0x3f0] sm:$0xf]  ;;  %v4111_v4 = vld [vmem:[%s5965_s3 + $0x3f4] sm:$0xf0] }
  0x53   : > { %1002 = vmatpush.bf16.msra.mxu0 %v3089_v44  ;;  %743 = vmatmul.bf16.vlgmr.msrb.gmra.mxu1 %v619_v16  ;;  %v3128_v44 = vld [vmem:[%s5965_s3 + $0x290] sm:$0xf]  ;;  %v4110_v5 = vld [vmem:[%s5965_s3 + $0x3f4] sm:$0xf]  ;;  %v3338_v8 = vld [vmem:[%s5965_s3 + $0x3f8] sm:$0xf0]  ;;  %v3261_v12 = vor.u32 %v4094_v0, %v3258_v1  ;;  %v3337_v18 = vor.u32 %v4111_v4, %v3336_v3 }
  0x54   : > { %1016 = vmatpush.bf16.msra.mxu1 %v3093_v45  ;;  %1142 = vmatpush.bf16.msra.mxu2 %v3169_v46  ;;  %v4067_v45 = vld [vmem:[%s5965_s3 + $0x294] sm:$0xf0]  ;;  %v3141_v46 = vor.u32 %v4068_v36, %v3138_v37  ;;  %v897_v9 = vld [vmem:[#allocation2 + $0x6] sm:$0xff]  ;;  %v3248_v13 = vld [vmem:[%s5965_s3 + $0x360] sm:$0xf] }
  0x55   : > { %1156 = vmatpush.bf16.msra.mxu3 %v3173_v50  ;;  %729 = vmatmul.bf16.vlgmr.msrb.gmra.mxu0 %v619_v16  ;;  %v3040_v50 = vld [vmem:[%s5965_s3 + $0x200] sm:$0xf]  ;;  %v3129_v55 = vor.u32 %v4067_v45, %v3128_v44  ;;  %v1037_v14 = vld [vmem:[#allocation2 + $0x7] sm:$0xff]  ;;  %v1038_v16 = vld [vmem:[#allocation2 + $0xf] sm:$0x7f] }
  0x56   : > { %869 = vmatmul.bf16.vlgmr.msrb.gmra.mxu2 %v759_v21  ;;  %883 = vmatmul.bf16.vlgmr.msrb.gmra.mxu3 %v759_v21  ;;  %v3041_v2 = vor.u32 %v4049_v51, %v3040_v50  ;;  %v4093_v19 = vld [vmem:[%s5965_s3 + $0x364] sm:$0xf0]  ;;  %v3250_v21 = vld [vmem:[%s5965_s3 + $0x368] sm:$0xf0]  ;;  %v3328_v25 = vld [vmem:[%s5965_s3 + $0x3e0] sm:$0xf]  ;;  %v1039_v29 = vpack.c.bf16 %v1038_v16, %v1037_v14 }
  0x57   : > { %1003 = vmatpush.bf16.msra.mxu0 %v3081_v57  ;;  %v3120_v57 = vld [vmem:[%s5965_s3 + $0x280] sm:$0xf]  ;;  %v3330_v28 = vld [vmem:[%s5965_s3 + $0x3e8] sm:$0xf0]  ;;  %v3249_v30 = vor.u32 %v4093_v19, %v3248_v13  ;;  %v3240_v32 = vld [vmem:[%s5965_s3 + $0x350] sm:$0xf] }
  0x58   : > { %1017 = vmatpush.bf16.msra.mxu1 %v3085_v58  ;;  %1143 = vmatpush.bf16.msra.mxu2 %v3161_v59  ;;  %v4065_v58 = vld [vmem:[%s5965_s3 + $0x284] sm:$0xf0]  ;;  %v4064_v59 = vld [vmem:[%s5965_s3 + $0x284] sm:$0xf]  ;;  %v3242_v36 = vld [vmem:[%s5965_s3 + $0x358] sm:$0xf0] }
  0x59   : > { %1157 = vmatpush.bf16.msra.mxu3 %v3165_v63  ;;  %v4095_v63 = vld [vmem:[%s5965_s3 + $0x374] sm:$0xf0]  ;;  %v3121_v7 = vor.u32 %v4065_v58, %v3120_v57  ;;  %v3125_v17 = vor.u32 %v4064_v59, %v3122_v60  ;;  %v4106_v40 = vld [vmem:[%s5965_s3 + $0x3d4] sm:$0xf]  ;;  %v3322_v41 = vld [vmem:[%s5965_s3 + $0x3d8] sm:$0xf0] }
  0x5a   : > { %v3232_v44 = vld [vmem:[%s5965_s3 + $0x340] sm:$0xf]  ;;  %v4088_v47 = vld [vmem:[%s5965_s3 + $0x344] sm:$0xf]  ;;  %v3234_v48 = vld [vmem:[%s5965_s3 + $0x348] sm:$0xf0] }
  0x5b   : > { %1004 = vmatpush.bf16.msra.mxu0 %v3073_v6  ;;  %v3045_v6 = vor.u32 %v4048_v52, %v3042_v56  ;;  %v3312_v50 = vld [vmem:[%s5965_s3 + $0x3c0] sm:$0xf]  ;;  %v4105_v51 = vld [vmem:[%s5965_s3 + $0x3c4] sm:$0xf0]  ;;  %v4104_v52 = vld [vmem:[%s5965_s3 + $0x3c4] sm:$0xf]  ;;  %v3237_v56 = vor.u32 %v4088_v47, %v3234_v48 }
  0x5c   : > { %1018 = vmatpush.bf16.msra.mxu1 %v3077_v10  ;;  %1144 = vmatpush.bf16.msra.mxu2 %v3153_v11  ;;  %v898_v10 = vld [vmem:[#allocation2 + $0xe] sm:$0x7f]  ;;  %v3257_v11 = vor.u32 %v4095_v63, %v3256_v61  ;;  %v3313_v58 = vor.u32 %v4105_v51, %v3312_v50  ;;  %v4087_v59 = vld [vmem:[%s5965_s3 + $0x334] sm:$0xf0]  ;;  %v3226_v61 = vld [vmem:[%s5965_s3 + $0x338] sm:$0xf0] }
  0x5d   : > { %1158 = vmatpush.bf16.msra.mxu3 %v3157_v20  ;;  %v4092_v20 = vld [vmem:[%s5965_s3 + $0x364] sm:$0xf]  ;;  %v899_v23 = vpack.c.bf16 %v898_v10, %v897_v9  ;;  %v3224_v57 = vld [vmem:[%s5965_s3 + $0x330] sm:$0xf]  ;;  %v4086_v60 = vld [vmem:[%s5965_s3 + $0x334] sm:$0xf] }
  0x5e   : > { %v3253_v31 = vor.u32 %v4092_v20, %v3250_v21  ;;  %v3304_v63 = vld [vmem:[%s5965_s3 + $0x3b0] sm:$0xf]  ;;  %v4103_v0 = vld [vmem:[%s5965_s3 + $0x3b4] sm:$0xf0]  ;;  %v4102_v1 = vld [vmem:[%s5965_s3 + $0x3b4] sm:$0xf]  ;;  %v3225_v3 = vor.u32 %v4087_v59, %v3224_v57  ;;  %v3229_v4 = vor.u32 %v4086_v60, %v3226_v61 }
  0x5f   : > { %1005 = vmatpush.bf16.msra.mxu0 %v3065_v22  ;;  %v3341_v22 = vor.u32 %v4110_v5, %v3338_v8  ;;  %v3216_v5 = vld [vmem:[%s5965_s3 + $0x320] sm:$0xf]  ;;  %v4084_v8 = vld [vmem:[%s5965_s3 + $0x324] sm:$0xf]  ;;  %v3218_v9 = vld [vmem:[%s5965_s3 + $0x328] sm:$0xf0] }
  0x60   : > { %1019 = vmatpush.bf16.msra.mxu1 %v3069_v26  ;;  %1145 = vmatpush.bf16.msra.mxu2 %v3145_v27  ;;  %v4109_v26 = vld [vmem:[%s5965_s3 + $0x3e4] sm:$0xf0]  ;;  %v4108_v27 = vld [vmem:[%s5965_s3 + $0x3e4] sm:$0xf]  ;;  %v3298_v14 = vld [vmem:[%s5965_s3 + $0x3a8] sm:$0xf0] }
  0x61   : > { %1159 = vmatpush.bf16.msra.mxu3 %v3149_v34  ;;  %v3329_v33 = vor.u32 %v4109_v26, %v3328_v25  ;;  %v4091_v34 = vld [vmem:[%s5965_s3 + $0x354] sm:$0xf0]  ;;  %v3333_v37 = vor.u32 %v4108_v27, %v3330_v28  ;;  %v4100_v13 = vld [vmem:[%s5965_s3 + $0x3a4] sm:$0xf]  ;;  %v4082_v21 = vld [vmem:[%s5965_s3 + $0x314] sm:$0xf] }
  0x62   : > { %v3241_v42 = vor.u32 %v4091_v34, %v3240_v32  ;;  %v4083_v20 = vld [vmem:[%s5965_s3 + $0x314] sm:$0xf0]  ;;  %v3288_v25 = vld [vmem:[%s5965_s3 + $0x390] sm:$0xf]  ;;  %v4098_v27 = vld [vmem:[%s5965_s3 + $0x394] sm:$0xf] }
  0x63   : > { %1006 = vmatpush.bf16.msra.mxu0 %v3057_v35  ;;  %v4090_v35 = vld [vmem:[%s5965_s3 + $0x354] sm:$0xf]  ;;  %v4099_v26 = vld [vmem:[%s5965_s3 + $0x394] sm:$0xf0]  ;;  %v3290_v28 = vld [vmem:[%s5965_s3 + $0x398] sm:$0xf0] }
  0x64   : > { %1020 = vmatpush.bf16.msra.mxu1 %v3061_v38  ;;  %1146 = vmatpush.bf16.msra.mxu2 %v3137_v39  ;;  %v3320_v38 = vld [vmem:[%s5965_s3 + $0x3d0] sm:$0xf]  ;;  %v4107_v39 = vld [vmem:[%s5965_s3 + $0x3d4] sm:$0xf0]  ;;  %v3245_v43 = vor.u32 %v4090_v35, %v3242_v36  ;;  %v3202_v34 = vld [vmem:[%s5965_s3 + $0x308] sm:$0xf0]  ;;  %v3289_v36 = vor.u32 %v4099_v26, %v3288_v25 }
  0x65   : > { %1160 = vmatpush.bf16.msra.mxu3 %v3141_v46  ;;  %v3321_v45 = vor.u32 %v4107_v39, %v3320_v38  ;;  %v4089_v46 = vld [vmem:[%s5965_s3 + $0x344] sm:$0xf0]  ;;  %v3280_v35 = vld [vmem:[%s5965_s3 + $0x380] sm:$0xf]  ;;  %v4096_v38 = vld [vmem:[%s5965_s3 + $0x384] sm:$0xf] }
  0x66   : > { %v3282_v39 = vld [vmem:[%s5965_s3 + $0x388] sm:$0xf0]  ;;  %v3498_v50 = vld [vmem:[%s5965_s3 + $0x4f8] sm:$0xf0]  ;;  %v4125_v60 = vld [vmem:[%s5965_s3 + $0x464] sm:$0xf0] }
  0x67   : > { %1007 = vmatpush.bf16.msra.mxu0 %v3049_v49  ;;  %v3325_v49 = vor.u32 %v4106_v40, %v3322_v41  ;;  %v3293_v40 = vor.u32 %v4098_v27, %v3290_v28  ;;  %v3416_v41 = vld [vmem:[%s5965_s3 + $0x470] sm:$0xf]  ;;  %v292_v51 = vld [vmem:[%s4668_s23 + $0x18] sm:$0xff]  ;;  %v3392_v25 = vld [vmem:[%s5965_s3 + $0x440] sm:$0xf] }
  0x68   : > { %1021 = vmatpush.bf16.msra.mxu1 %v3053_v53  ;;  %1147 = vmatpush.bf16.msra.mxu2 %v3129_v55  ;;  %v3314_v53 = vld [vmem:[%s5965_s3 + $0x3c8] sm:$0xf0]  ;;  %v3233_v55 = vor.u32 %v4089_v46, %v3232_v44  ;;  %v3418_v44 = vld [vmem:[%s5965_s3 + $0x478] sm:$0xf0]  ;;  %v4143_v46 = vld [vmem:[%s5965_s3 + $0x4f4] sm:$0xf0]  ;;  %v301_v57 = vmul.f32 %v4648_v15, %v292_v51 }
  0x69   : > { %1161 = vmatpush.bf16.msra.mxu3 %v3133_v62  ;;  %v3317_v62 = vor.u32 %v4104_v52, %v3314_v53  ;;  %v1317_v61 = vld [vmem:[#allocation2 + $0x9] sm:$0xff]  ;;  %v3488_v15 = vld [vmem:[%s5965_s3 + $0x4e0] sm:$0xf] }
  0x6a   : > { %v4121_v26 = vld [vmem:[%s5965_s3 + $0x444] sm:$0xf0] }
  0x6b   : > { %1008 = vmatpush.bf16.msra.mxu0 %v3041_v2  ;;  %v3306_v2 = vld [vmem:[%s5965_s3 + $0x3b8] sm:$0xf0] }
  0x6c   : > { %1022 = vmatpush.bf16.msra.mxu1 %v3045_v6  ;;  %1148 = vmatpush.bf16.msra.mxu2 %v3121_v7  ;;  %v3305_v6 = vor.u32 %v4103_v0, %v3304_v63  ;;  %v4085_v7 = vld [vmem:[%s5965_s3 + $0x324] sm:$0xf0]  ;;  %v3309_v10 = vor.u32 %v4102_v1, %v3306_v2  ;;  %v4124_v1 = vld [vmem:[%s5965_s3 + $0x464] sm:$0xf]  ;;  %v3410_v2 = vld [vmem:[%s5965_s3 + $0x468] sm:$0xf0] }
  0x6d   : > { %1162 = vmatpush.bf16.msra.mxu3 %v3125_v17  ;;  %v3217_v16 = vor.u32 %v4085_v7, %v3216_v5  ;;  %v3221_v17 = vor.u32 %v4084_v8, %v3218_v9  ;;  %v4141_v5 = vld [vmem:[%s5965_s3 + $0x4e4] sm:$0xf0]  ;;  %v3490_v7 = vld [vmem:[%s5965_s3 + $0x4e8] sm:$0xf0]  ;;  %v3413_v9 = vor.u32 %v4124_v1, %v3410_v2  ;;  %v4114_v2 = vld [vmem:[%s5965_s3 + $0x414] sm:$0xf] }
  0x6e   : > { %1009 = vmatmul.bf16.vlgmr.msra.gmra.mxu0 %v899_v23 }
  0x6f   : > { %1281 = vmatpush.bf16.msrb.mxu0 %v3257_v11  ;;  %1023 = vmatmul.bf16.vlgmr.msra.gmra.mxu1 %v899_v23  ;;  %v3296_v11 = vld [vmem:[%s5965_s3 + $0x3a0] sm:$0xf]  ;;  %v3301_v23 = vor.u32 %v4100_v13, %v3298_v14  ;;  %v4122_v14 = vld [vmem:[%s5965_s3 + $0x454] sm:$0xf] }
  0x70   : > { %1295 = vmatpush.bf16.msrb.mxu1 %v3261_v12  ;;  %1421 = vmatpush.bf16.msrb.mxu2 %v3337_v18  ;;  %v4101_v12 = vld [vmem:[%s5965_s3 + $0x3a4] sm:$0xf0]  ;;  %v3208_v18 = vld [vmem:[%s5965_s3 + $0x310] sm:$0xf] }
  0x71   : > { %1435 = vmatpush.bf16.msrb.mxu3 %v3341_v22  ;;  %1149 = vmatmul.bf16.vlgmr.msra.gmra.mxu2 %v1039_v29  ;;  %v3297_v19 = vor.u32 %v4101_v12, %v3296_v11  ;;  %v3210_v22 = vld [vmem:[%s5965_s3 + $0x318] sm:$0xf0]  ;;  %v3489_v12 = vor.u32 %v4141_v5, %v3488_v15  ;;  %v4130_v5 = vld [vmem:[%s5965_s3 + $0x494] sm:$0xf] }
  0x72   : > { %1163 = vmatmul.bf16.vlgmr.msra.gmra.mxu3 %v1039_v29  ;;  %v3200_v29 = vld [vmem:[%s5965_s3 + $0x300] sm:$0xf]  ;;  %v3213_v32 = vor.u32 %v4082_v21, %v3210_v22  ;;  %v3370_v15 = vld [vmem:[%s5965_s3 + $0x418] sm:$0xf0] }
  0x73   : > { %1282 = vmatpush.bf16.msrb.mxu0 %v3249_v30  ;;  %v4081_v30 = vld [vmem:[%s5965_s3 + $0x304] sm:$0xf0] }
  0x74   : > { %1296 = vmatpush.bf16.msrb.mxu1 %v3253_v31  ;;  %1422 = vmatpush.bf16.msrb.mxu2 %v3329_v33  ;;  %v3209_v31 = vor.u32 %v4083_v20, %v3208_v18  ;;  %v4080_v33 = vld [vmem:[%s5965_s3 + $0x304] sm:$0xf]  ;;  %v3201_v47 = vor.u32 %v4081_v30, %v3200_v29  ;;  %v4139_v18 = vld [vmem:[%s5965_s3 + $0x4d4] sm:$0xf0]  ;;  %v3482_v20 = vld [vmem:[%s5965_s3 + $0x4d8] sm:$0xf0] }
  0x75   : > { %1436 = vmatpush.bf16.msrb.mxu3 %v3333_v37  ;;  %v4097_v37 = vld [vmem:[%s5965_s3 + $0x384] sm:$0xf0]  ;;  %v3205_v48 = vor.u32 %v4080_v33, %v3202_v34  ;;  %v4120_v29 = vld [vmem:[%s5965_s3 + $0x444] sm:$0xf]  ;;  %v3394_v30 = vld [vmem:[%s5965_s3 + $0x448] sm:$0xf0] }
  0x76   : > { %v3281_v52 = vor.u32 %v4097_v37, %v3280_v35  ;;  %v4136_v33 = vld [vmem:[%s5965_s3 + $0x4c4] sm:$0xf]  ;;  %v3474_v34 = vld [vmem:[%s5965_s3 + $0x4c8] sm:$0xf0]  ;;  %v3393_v35 = vor.u32 %v4121_v26, %v3392_v25  ;;  %v3384_v37 = vld [vmem:[%s5965_s3 + $0x430] sm:$0xf] }
  0x77   : > { %1283 = vmatpush.bf16.msrb.mxu0 %v3241_v42  ;;  %v4127_v42 = vld [vmem:[%s5965_s3 + $0x474] sm:$0xf0]  ;;  %v4174_v26 = vld [vmem:[%s5965_s3 + $0x5f4] sm:$0xf] }
  0x78   : > { %1297 = vmatpush.bf16.msrb.mxu1 %v3245_v43  ;;  %1423 = vmatpush.bf16.msrb.mxu2 %v3321_v45  ;;  %v4126_v43 = vld [vmem:[%s5965_s3 + $0x474] sm:$0xf]  ;;  %v3496_v45 = vld [vmem:[%s5965_s3 + $0x4f0] sm:$0xf]  ;;  %v3417_v53 = vor.u32 %v4127_v42, %v3416_v41  ;;  %v3386_v42 = vld [vmem:[%s5965_s3 + $0x438] sm:$0xf0] }
  0x79   : > { %1437 = vmatpush.bf16.msrb.mxu3 %v3325_v49  ;;  %v4142_v49 = vld [vmem:[%s5965_s3 + $0x4f4] sm:$0xf]  ;;  %v3421_v59 = vor.u32 %v4126_v43, %v3418_v44  ;;  %v3497_v63 = vor.u32 %v4143_v46, %v3496_v45  ;;  %v3464_v43 = vld [vmem:[%s5965_s3 + $0x4b0] sm:$0xf]  ;;  %v4135_v44 = vld [vmem:[%s5965_s3 + $0x4b4] sm:$0xf0] }
  0x7a   : > { %v3501_v0 = vor.u32 %v4142_v49, %v3498_v50  ;;  %v4118_v41 = vld [vmem:[%s5965_s3 + $0x434] sm:$0xf]  ;;  %v3466_v46 = vld [vmem:[%s5965_s3 + $0x4b8] sm:$0xf0]  ;;  %v3376_v49 = vld [vmem:[%s5965_s3 + $0x420] sm:$0xf]  ;;  %v3465_v51 = vor.u32 %v4135_v44, %v3464_v43 }
  0x7b   : > { %1284 = vmatpush.bf16.msrb.mxu0 %v3233_v55  ;;  %v1178_v55 = vld [vmem:[#allocation2 + $0x10] sm:$0x7f]  ;;  %v4117_v50 = vld [vmem:[%s5965_s3 + $0x424] sm:$0xf0]  ;;  %v4175_v25 = vld [vmem:[%s5965_s3 + $0x5f4] sm:$0xf0] }
  0x7c   : > { %1298 = vmatpush.bf16.msrb.mxu1 %v3237_v56  ;;  %1424 = vmatpush.bf16.msrb.mxu2 %v3313_v58  ;;  %v3408_v56 = vld [vmem:[%s5965_s3 + $0x460] sm:$0xf]  ;;  %v3285_v58 = vor.u32 %v4096_v38, %v3282_v39  ;;  %v4119_v38 = vld [vmem:[%s5965_s3 + $0x434] sm:$0xf0]  ;;  %v4134_v45 = vld [vmem:[%s5965_s3 + $0x4b4] sm:$0xf] }
  0x7d   : > { %1438 = vmatpush.bf16.msrb.mxu3 %v3317_v62  ;;  %v1318_v62 = vld [vmem:[#allocation2 + $0x11] sm:$0x7f]  ;;  %v3409_v8 = vor.u32 %v4125_v60, %v3408_v56  ;;  %v3456_v56 = vld [vmem:[%s5965_s3 + $0x4a0] sm:$0xf]  ;;  %v3377_v60 = vor.u32 %v4117_v50, %v3376_v49  ;;  %v3570_v43 = vld [vmem:[%s5965_s3 + $0x568] sm:$0xf0] }
  0x7e   : > { %v3648_v44 = vld [vmem:[%s5965_s3 + $0x5e0] sm:$0xf]  ;;  %v3560_v50 = vld [vmem:[%s5965_s3 + $0x550] sm:$0xf] }
  0x7f   : > { %1285 = vmatpush.bf16.msrb.mxu0 %v3225_v3  ;;  %v310_v3 = vadd.f32 %v4673_v24, %v301_v57  ;;  %v1319_v24 = vpack.c.bf16 %v1318_v62, %v1317_v61  ;;  %v4133_v57 = vld [vmem:[%s5965_s3 + $0x4a4] sm:$0xf0]  ;;  %v3368_v62 = vld [vmem:[%s5965_s3 + $0x410] sm:$0xf] }
  0x80   : > { %1299 = vmatpush.bf16.msrb.mxu1 %v3229_v4  ;;  %1425 = vmatpush.bf16.msrb.mxu2 %v3305_v6  ;;  %v1179_v4 = vpack.c.bf16 %v1178_v55, %v4717_v54  ;;  %v4140_v6 = vld [vmem:[%s5965_s3 + $0x4e4] sm:$0xf]  ;;  %v3400_v54 = vld [vmem:[%s5965_s3 + $0x450] sm:$0xf]  ;;  %v3378_v55 = vld [vmem:[%s5965_s3 + $0x428] sm:$0xf0] }
  0x81   : > { %1439 = vmatpush.bf16.msrb.mxu3 %v3309_v10  ;;  %v4123_v10 = vld [vmem:[%s5965_s3 + $0x454] sm:$0xf0]  ;;  %vm315_vm3 = vcmp.ge.f32.partialorder %v310_v3, 0.0  ;;  %v320_v11 = vmul.f32 0.2, %v310_v3  ;;  %v3493_v13 = vor.u32 %v4140_v6, %v3490_v7 }
  0x82   : > { %v3401_v22 = vor.u32 %v4123_v10, %v3400_v54  ;;  %v3450_v6 = vld [vmem:[%s5965_s3 + $0x498] sm:$0xf0]  ;;  %v4112_v54 = vld [vmem:[%s5965_s3 + $0x404] sm:$0xf]  ;;  %v3362_v10 = vld [vmem:[%s5965_s3 + $0x408] sm:$0xf0] }
  0x83   : > { %1286 = vmatpush.bf16.msrb.mxu0 %v3217_v16  ;;  %v3402_v16 = vld [vmem:[%s5965_s3 + $0x458] sm:$0xf0]  ;;  %v325_v21 = vsel %vm315_vm3, %v310_v3, %v320_v11  ;;  %v3448_v3 = vld [vmem:[%s5965_s3 + $0x490] sm:$0xf]  ;;  %v3440_v11 = vld [vmem:[%s5965_s3 + $0x480] sm:$0xf] }
  0x84   : > { %1300 = vmatpush.bf16.msrb.mxu1 %v3221_v17  ;;  %1426 = vmatpush.bf16.msrb.mxu2 %v3297_v19  ;;  %v3480_v17 = vld [vmem:[%s5965_s3 + $0x4d0] sm:$0xf]  ;;  %v4138_v19 = vld [vmem:[%s5965_s3 + $0x4d4] sm:$0xf]  ;;  %330 = vst [vmem:[#allocation2 + $0x18] sm:$0xff] %v325_v21 }
  0x85   : > { %1440 = vmatpush.bf16.msrb.mxu3 %v3301_v23  ;;  %v3405_v23 = vor.u32 %v4122_v14, %v3402_v16  ;;  %v3481_v27 = vor.u32 %v4139_v18, %v3480_v17  ;;  %v3485_v28 = vor.u32 %v4138_v19, %v3482_v20  ;;  %v3453_v14 = vor.u32 %v4130_v5, %v3450_v6  ;;  %v4128_v16 = vld [vmem:[%s5965_s3 + $0x484] sm:$0xf]  ;;  %v3576_v17 = vld [vmem:[%s5965_s3 + $0x570] sm:$0xf]  ;;  %v4159_v18 = vld [vmem:[%s5965_s3 + $0x574] sm:$0xf0] }
  0x86   : > { %v3442_v19 = vld [vmem:[%s5965_s3 + $0x488] sm:$0xf0]  ;;  %v4158_v20 = vld [vmem:[%s5965_s3 + $0x574] sm:$0xf]  ;;  %v3578_v21 = vld [vmem:[%s5965_s3 + $0x578] sm:$0xf0] }
  0x87   : > { %1287 = vmatpush.bf16.msrb.mxu0 %v3209_v31  ;;  %v3472_v31 = vld [vmem:[%s5965_s3 + $0x4c0] sm:$0xf]  ;;  %v3554_v5 = vld [vmem:[%s5965_s3 + $0x548] sm:$0xf0] }
  0x88   : > { %1301 = vmatpush.bf16.msrb.mxu1 %v3213_v32  ;;  %1427 = vmatpush.bf16.msrb.mxu2 %v3289_v36  ;;  %v4137_v32 = vld [vmem:[%s5965_s3 + $0x4c4] sm:$0xf0]  ;;  %v3397_v36 = vor.u32 %v4120_v29, %v3394_v30  ;;  %v3658_v29 = vld [vmem:[%s5965_s3 + $0x5f8] sm:$0xf0]  ;;  %v1457_v30 = vld [vmem:[#allocation2 + $0xc] sm:$0xff] }
  0x89   : > { %1441 = vmatpush.bf16.msrb.mxu3 %v3293_v40  ;;  %v3473_v39 = vor.u32 %v4137_v32, %v3472_v31  ;;  %v3477_v40 = vor.u32 %v4136_v33, %v3474_v34  ;;  %v3445_v33 = vor.u32 %v4128_v16, %v3442_v19  ;;  %v3568_v34 = vld [vmem:[%s5965_s3 + $0x560] sm:$0xf]  ;;  %v3546_v16 = vld [vmem:[%s5965_s3 + $0x538] sm:$0xf0] }
  0x8a   : > { %v3632_v6 = vld [vmem:[%s5965_s3 + $0x5c0] sm:$0xf] }
  0x8b   : > { %1288 = vmatpush.bf16.msrb.mxu0 %v3201_v47  ;;  %v3385_v47 = vor.u32 %v4119_v38, %v3384_v37  ;;  %v1458_v31 = vld [vmem:[#allocation2 + $0x14] sm:$0x7f]  ;;  %v4156_v38 = vld [vmem:[%s5965_s3 + $0x564] sm:$0xf] }
  0x8c   : > { %1302 = vmatpush.bf16.msrb.mxu1 %v3205_v48  ;;  %1428 = vmatpush.bf16.msrb.mxu2 %v3281_v52  ;;  %v3389_v48 = vor.u32 %v4118_v41, %v3386_v42  ;;  %v3469_v52 = vor.u32 %v4134_v45, %v3466_v46  ;;  %v3661_v41 = vor.u32 %v4174_v26, %v3658_v29  ;;  %v4173_v45 = vld [vmem:[%s5965_s3 + $0x5e4] sm:$0xf0]  ;;  %v3538_v29 = vld [vmem:[%s5965_s3 + $0x528] sm:$0xf0] }
  0x8d   : > { %1442 = vmatpush.bf16.msrb.mxu3 %v3285_v58  ;;  %v4132_v58 = vld [vmem:[%s5965_s3 + $0x4a4] sm:$0xf]  ;;  %v1459_v42 = vpack.c.bf16 %v1458_v31, %v1457_v30  ;;  %v3616_v30 = vld [vmem:[%s5965_s3 + $0x5a0] sm:$0xf]  ;;  %v4165_v31 = vld [vmem:[%s5965_s3 + $0x5a4] sm:$0xf0] }
  0x8e   : > { %1289 = vmatmul.bf16.vlgmr.msrb.gmra.mxu0 %v1179_v4 }
  0x8f   : > { %1561 = vmatpush.bf16.msra.mxu0 %v3417_v53  ;;  %1303 = vmatmul.bf16.vlgmr.msrb.gmra.mxu1 %v1179_v4  ;;  %v4116_v53 = vld [vmem:[%s5965_s3 + $0x424] sm:$0xf]  ;;  %v4131_v4 = vld [vmem:[%s5965_s3 + $0x494] sm:$0xf0] }
  0x90   : > { %1575 = vmatpush.bf16.msra.mxu1 %v3421_v59  ;;  %1701 = vmatpush.bf16.msra.mxu2 %v3497_v63  ;;  %v3458_v59 = vld [vmem:[%s5965_s3 + $0x4a8] sm:$0xf0]  ;;  %v3381_v61 = vor.u32 %v4116_v53, %v3378_v55  ;;  %v4115_v63 = vld [vmem:[%s5965_s3 + $0x414] sm:$0xf0]  ;;  %v3649_v53 = vor.u32 %v4173_v45, %v3648_v44  ;;  %v4154_v55 = vld [vmem:[%s5965_s3 + $0x554] sm:$0xf] }
  0x91   : > { %1715 = vmatpush.bf16.msra.mxu3 %v3501_v0  ;;  %1429 = vmatmul.bf16.vlgmr.msrb.gmra.mxu2 %v1319_v24  ;;  %v3457_v0 = vor.u32 %v4133_v57, %v3456_v56  ;;  %v3461_v1 = vor.u32 %v4132_v58, %v3458_v59  ;;  %v3369_v7 = vor.u32 %v4115_v63, %v3368_v62  ;;  %v3562_v56 = vld [vmem:[%s5965_s3 + $0x558] sm:$0xf0]  ;;  %v3640_v58 = vld [vmem:[%s5965_s3 + $0x5d0] sm:$0xf]  ;;  %v4171_v59 = vld [vmem:[%s5965_s3 + $0x5d4] sm:$0xf0] }
  0x92   : > { %1443 = vmatmul.bf16.vlgmr.msrb.gmra.mxu3 %v1319_v24  ;;  %v4113_v24 = vld [vmem:[%s5965_s3 + $0x404] sm:$0xf0]  ;;  %v4170_v62 = vld [vmem:[%s5965_s3 + $0x5d4] sm:$0xf]  ;;  %v3642_v63 = vld [vmem:[%s5965_s3 + $0x5d8] sm:$0xf0] }
  0x93   : > { %1562 = vmatpush.bf16.msra.mxu0 %v3409_v8  ;;  %v3360_v8 = vld [vmem:[%s5965_s3 + $0x400] sm:$0xf]  ;;  %v4162_v44 = vld [vmem:[%s5965_s3 + $0x594] sm:$0xf] }
  0x94   : > { %1576 = vmatpush.bf16.msra.mxu1 %v3413_v9  ;;  %1702 = vmatpush.bf16.msra.mxu2 %v3489_v12  ;;  %v3373_v9 = vor.u32 %v4114_v2, %v3370_v15  ;;  %v4129_v12 = vld [vmem:[%s5965_s3 + $0x484] sm:$0xf0]  ;;  %v3565_v2 = vor.u32 %v4154_v55, %v3562_v56  ;;  %v3641_v15 = vor.u32 %v4171_v59, %v3640_v58  ;;  %v3736_v56 = vld [vmem:[%s5965_s3 + $0x670] sm:$0xf]  ;;  %v4160_v59 = vld [vmem:[%s5965_s3 + $0x584] sm:$0xf] }
  0x95   : > { %1716 = vmatpush.bf16.msra.mxu3 %v3493_v13  ;;  %v3449_v13 = vor.u32 %v4131_v4, %v3448_v3  ;;  %v3441_v32 = vor.u32 %v4129_v12, %v3440_v11  ;;  %v4152_v3 = vld [vmem:[%s5965_s3 + $0x544] sm:$0xf]  ;;  %v3645_v4 = vor.u32 %v4170_v62, %v3642_v63  ;;  %v4161_v55 = vld [vmem:[%s5965_s3 + $0x584] sm:$0xf0]  ;;  %v3738_v63 = vld [vmem:[%s5965_s3 + $0x678] sm:$0xf0] }
  0x96   : > { %v3557_v11 = vor.u32 %v4152_v3, %v3554_v5  ;;  %v4206_v3 = vld [vmem:[%s5965_s3 + $0x6f4] sm:$0xf]  ;;  %v4269_v5 = vld [vmem:[%s5963_s1] ss:$0 sm:$0xff] }
  0x97   : > { %1563 = vmatpush.bf16.msra.mxu0 %v3401_v22  ;;  %v3361_v22 = vor.u32 %v4113_v24, %v3360_v8  ;;  %v4168_v24 = vld [vmem:[%s5965_s3 + $0x5c4] sm:$0xf] }
  0x98   : > { %1577 = vmatpush.bf16.msra.mxu1 %v3405_v23  ;;  %1703 = vmatpush.bf16.msra.mxu2 %v3481_v27  ;;  %v3656_v23 = vld [vmem:[%s5965_s3 + $0x5f0] sm:$0xf]  ;;  %v3365_v27 = vor.u32 %v4112_v54, %v3362_v10  ;;  %v3634_v54 = vld [vmem:[%s5965_s3 + $0x5c8] sm:$0xf0]  ;;  %v4151_v10 = vld [vmem:[%s5965_s3 + $0x534] sm:$0xf0] }
  0x99   : > { %1717 = vmatpush.bf16.msra.mxu3 %v3485_v28  ;;  %v3577_v28 = vor.u32 %v4159_v18, %v3576_v17  ;;  %v3657_v37 = vor.u32 %v4175_v25, %v3656_v23  ;;  %v3624_v17 = vld [vmem:[%s5965_s3 + $0x5b0] sm:$0xf]  ;;  %v4167_v18 = vld [vmem:[%s5965_s3 + $0x5b4] sm:$0xf0]  ;;  %v4149_v23 = vld [vmem:[%s5965_s3 + $0x524] sm:$0xf0] }
  0x9a   : > { %v3625_v26 = vor.u32 %v4167_v18, %v3624_v17  ;;  %v4188_v18 = vld [vmem:[%s5965_s3 + $0x664] sm:$0xf] }
  0x9b   : > { %1564 = vmatpush.bf16.msra.mxu0 %v3393_v35  ;;  %v4157_v35 = vld [vmem:[%s5965_s3 + $0x564] sm:$0xf0] }
  0x9c   : > { %1578 = vmatpush.bf16.msra.mxu1 %v3397_v36  ;;  %1704 = vmatpush.bf16.msra.mxu2 %v3473_v39  ;;  %v3581_v36 = vor.u32 %v4158_v20, %v3578_v21  ;;  %v1597_v39 = vld [vmem:[#allocation2 + $0xd] sm:$0xff]  ;;  %v3569_v46 = vor.u32 %v4157_v35, %v3568_v34  ;;  %v3626_v21 = vld [vmem:[%s5965_s3 + $0x5b8] sm:$0xf0] }
  0x9d   : > { %1718 = vmatpush.bf16.msra.mxu3 %v3477_v40  ;;  %v1598_v40 = vld [vmem:[#allocation2 + $0x15] sm:$0x7f]  ;;  %v3618_v34 = vld [vmem:[%s5965_s3 + $0x5a8] sm:$0xf0]  ;;  %v3528_v35 = vld [vmem:[%s5965_s3 + $0x510] sm:$0xf] }
  0x9e   : > { %v1599_v49 = vpack.c.bf16 %v1598_v40, %v1597_v39  ;;  %v4166_v20 = vld [vmem:[%s5965_s3 + $0x5b4] sm:$0xf]  ;;  %v3530_v40 = vld [vmem:[%s5965_s3 + $0x518] sm:$0xf0] }
  0x9f   : > { %1565 = vmatpush.bf16.msra.mxu0 %v3385_v47  ;;  %v4172_v47 = vld [vmem:[%s5965_s3 + $0x5e4] sm:$0xf]  ;;  %v4146_v39 = vld [vmem:[%s5965_s3 + $0x514] sm:$0xf] }
  0xa0   : > { %1579 = vmatpush.bf16.msra.mxu1 %v3389_v48  ;;  %1705 = vmatpush.bf16.msra.mxu2 %v3465_v51  ;;  %v3650_v48 = vld [vmem:[%s5965_s3 + $0x5e8] sm:$0xf0]  ;;  %v4155_v51 = vld [vmem:[%s5965_s3 + $0x554] sm:$0xf0] }
  0xa1   : > { %1719 = vmatpush.bf16.msra.mxu3 %v3469_v52  ;;  %v3573_v52 = vor.u32 %v4156_v38, %v3570_v43  ;;  %v3653_v57 = vor.u32 %v4172_v47, %v3650_v48  ;;  %v3617_v38 = vor.u32 %v4165_v31, %v3616_v30  ;;  %v4163_v43 = vld [vmem:[%s5965_s3 + $0x594] sm:$0xf0]  ;;  %v3520_v47 = vld [vmem:[%s5965_s3 + $0x500] sm:$0xf]  ;;  %v4145_v48 = vld [vmem:[%s5965_s3 + $0x504] sm:$0xf0] }
  0xa2   : > { %v3521_v62 = vor.u32 %v4145_v48, %v3520_v47  ;;  %v3720_v30 = vld [vmem:[%s5965_s3 + $0x650] sm:$0xf]  ;;  %v4187_v31 = vld [vmem:[%s5965_s3 + $0x654] sm:$0xf0]  ;;  %v3712_v48 = vld [vmem:[%s5965_s3 + $0x640] sm:$0xf] }
  0xa3   : > { %1566 = vmatpush.bf16.msra.mxu0 %v3377_v60  ;;  %v4295_v60 = vmov 0.0  }
  0xa4   : > { %1580 = vmatpush.bf16.msra.mxu1 %v3381_v61  ;;  %1706 = vmatpush.bf16.msra.mxu2 %v3457_v0  ;;  %334 = vst [vmem:[#allocation3 + $0x8] sm:$0xff] %v4295_v60  ;;  %v3561_v61 = vor.u32 %v4155_v51, %v3560_v50  ;;  %v3552_v0 = vld [vmem:[%s5965_s3 + $0x540] sm:$0xf]  ;;  %v3522_v50 = vld [vmem:[%s5965_s3 + $0x508] sm:$0xf0] }
  0xa5   : > { %1720 = vmatpush.bf16.msra.mxu3 %v3461_v1  ;;  %335 = vst [vmem:[#allocation3] sm:$0xff] %v4295_v60  ;;  %v4153_v1 = vld [vmem:[%s5965_s3 + $0x544] sm:$0xf0]  ;;  %v3600_v51 = vld [vmem:[%s5965_s3 + $0x580] sm:$0xf] }
  0xa6   : > { %336 = vst [vmem:[#allocation3 + $0x18] sm:$0x3] %v4295_v60  ;;  %v3553_v8 = vor.u32 %v4153_v1, %v3552_v0  ;;  %v3816_v0 = vld [vmem:[%s5965_s3 + $0x6f0] sm:$0xf]  ;;  %v293_v1 = vld [vmem:[%s4668_s23 + $0x20] sm:$0xf] }
  0xa7   : > { %1567 = vmatpush.bf16.msra.mxu0 %v3369_v7  ;;  %337 = vst [vmem:[#allocation3 + $0x20] sm:$0x3] %v4295_v60  ;;  %v4169_v7 = vld [vmem:[%s5965_s3 + $0x5c4] sm:$0xf0]  ;;  %v3602_v60 = vld [vmem:[%s5965_s3 + $0x588] sm:$0xf0] }
  0xa8   : > { %1581 = vmatpush.bf16.msra.mxu1 %v3373_v9  ;;  %1707 = vmatpush.bf16.msra.mxu2 %v3449_v13  ;;  %v3544_v9 = vld [vmem:[%s5965_s3 + $0x530] sm:$0xf]  ;;  %v3633_v12 = vor.u32 %v4169_v7, %v3632_v6  ;;  %v4150_v13 = vld [vmem:[%s5965_s3 + $0x534] sm:$0xf]  ;;  %v302_v6 = vmul.f32 %v4269_v5, %v293_v1 }
  0xa9   : > { %1721 = vmatpush.bf16.msra.mxu3 %v3453_v14  ;;  %v3637_v14 = vor.u32 %v4168_v24, %v3634_v54  ;;  %v3545_v19 = vor.u32 %v4151_v10, %v3544_v9  ;;  %v3549_v25 = vor.u32 %v4150_v13, %v3546_v16  ;;  %v1737_v24 = vld [vmem:[#allocation2 + $0xe] sm:$0xff]  ;;  %v1738_v54 = vld [vmem:[#allocation2 + $0x16] sm:$0x7f]  ;;  %v3728_v9 = vld [vmem:[%s5965_s3 + $0x660] sm:$0xf]  ;;  %v3605_v10 = vor.u32 %v4160_v59, %v3602_v60 }
  0xaa   : > { %v1877_v13 = vld [vmem:[#allocation2 + $0xf] sm:$0xff] }
  0xab   : > { %1568 = vmatpush.bf16.msra.mxu0 %v3361_v22  ;;  %v3536_v22 = vld [vmem:[%s5965_s3 + $0x520] sm:$0xf]  ;;  %v3704_v59 = vld [vmem:[%s5965_s3 + $0x630] sm:$0xf]  ;;  %v4198_v5 = vld [vmem:[%s5965_s3 + $0x6b4] sm:$0xf] }
  0xac   : > { %1582 = vmatpush.bf16.msra.mxu1 %v3365_v27  ;;  %1708 = vmatpush.bf16.msra.mxu2 %v3441_v32  ;;  %v4148_v27 = vld [vmem:[%s5965_s3 + $0x524] sm:$0xf]  ;;  %v3537_v32 = vor.u32 %v4149_v23, %v3536_v22  ;;  %v1739_v23 = vpack.c.bf16 %v1738_v54, %v1737_v24  ;;  %v343_v60 = vld [vmem:[#allocation3 + $0x8] sm:$0x7f] }
  0xad   : > { %1722 = vmatpush.bf16.msra.mxu3 %v3445_v33  ;;  %v4164_v33 = vld [vmem:[%s5965_s3 + $0x5a4] sm:$0xf] }
  0xae   : > { %1569 = vmatmul.bf16.vlgmr.msra.gmra.mxu0 %v1459_v42 }
  0xaf   : > { %1841 = vmatpush.bf16.msrb.mxu0 %v3577_v28  ;;  %1583 = vmatmul.bf16.vlgmr.msra.gmra.mxu1 %v1459_v42  ;;  %v3629_v28 = vor.u32 %v4166_v20, %v3626_v21  ;;  %v3608_v42 = vld [vmem:[%s5965_s3 + $0x590] sm:$0xf]  ;;  %v3808_v20 = vld [vmem:[%s5965_s3 + $0x6e0] sm:$0xf] }
  0xb0   : > { %1855 = vmatpush.bf16.msrb.mxu1 %v3581_v36  ;;  %1981 = vmatpush.bf16.msrb.mxu2 %v3657_v37  ;;  %v4147_v36 = vld [vmem:[%s5965_s3 + $0x514] sm:$0xf0]  ;;  %v3541_v37 = vor.u32 %v4148_v27, %v3538_v29  ;;  %v4270_v21 = vld [vmem:[%s5964_s2] ss:$0 sm:$0xff]  ;;  %v3810_v27 = vld [vmem:[%s5965_s3 + $0x6e8] sm:$0xf0] }
  0xb1   : > { %1995 = vmatpush.bf16.msrb.mxu3 %v3661_v41  ;;  %1709 = vmatmul.bf16.vlgmr.msra.gmra.mxu2 %v1599_v49  ;;  %v3621_v41 = vor.u32 %v4164_v33, %v3618_v34  ;;  %v3529_v45 = vor.u32 %v4147_v36, %v3528_v35  ;;  %v311_v22 = vadd.f32 %v4270_v21, %v302_v6  ;;  %v3722_v34 = vld [vmem:[%s5965_s3 + $0x658] sm:$0xf0]  ;;  %v3800_v35 = vld [vmem:[%s5965_s3 + $0x6d0] sm:$0xf]  ;;  %v4203_v36 = vld [vmem:[%s5965_s3 + $0x6d4] sm:$0xf0] }
  0xb2   : > { %1723 = vmatmul.bf16.vlgmr.msra.gmra.mxu3 %v1599_v49  ;;  %v4144_v49 = vld [vmem:[%s5965_s3 + $0x504] sm:$0xf]  ;;  %v3786_v6 = vld [vmem:[%s5965_s3 + $0x6b8] sm:$0xf0]  ;;  %v3698_v21 = vld [vmem:[%s5965_s3 + $0x628] sm:$0xf0] }
  0xb3   : > { %1842 = vmatpush.bf16.msrb.mxu0 %v3569_v46  ;;  %v3610_v46 = vld [vmem:[%s5965_s3 + $0x598] sm:$0xf0]  ;;  %v3525_v7 = vor.u32 %v4144_v49, %v3522_v50  ;;  %vm316_vm4 = vcmp.ge.f32.partialorder %v311_v22, 0.0  ;;  %v4185_v49 = vld [vmem:[%s5965_s3 + $0x644] sm:$0xf0] }
  0xb4   : > { %1856 = vmatpush.bf16.msrb.mxu1 %v3573_v52  ;;  %1982 = vmatpush.bf16.msrb.mxu2 %v3649_v53  ;;  %v3533_v52 = vor.u32 %v4146_v39, %v3530_v40  ;;  %v3609_v53 = vor.u32 %v4163_v43, %v3608_v42  ;;  %v3613_v58 = vor.u32 %v4162_v44, %v3610_v46  ;;  %v4202_v39 = vld [vmem:[%s5965_s3 + $0x6d4] sm:$0xf]  ;;  %v3802_v40 = vld [vmem:[%s5965_s3 + $0x6d8] sm:$0xf0]  ;;  %v4184_v50 = vld [vmem:[%s5965_s3 + $0x644] sm:$0xf] }
  0xb5   : > { %1996 = vmatpush.bf16.msrb.mxu3 %v3653_v57  ;;  %v4191_v57 = vld [vmem:[%s5965_s3 + $0x674] sm:$0xf0]  ;;  %v3721_v42 = vor.u32 %v4187_v31, %v3720_v30  ;;  %v3801_v46 = vor.u32 %v4203_v36, %v3800_v35  ;;  %v3805_v47 = vor.u32 %v4202_v39, %v3802_v40  ;;  %v4178_v31 = vld [vmem:[%s5965_s3 + $0x614] sm:$0xf]  ;;  %v3768_v35 = vld [vmem:[%s5965_s3 + $0x690] sm:$0xf] }
  0xb6   : > { %v4179_v30 = vld [vmem:[%s5965_s3 + $0x614] sm:$0xf0]  ;;  %v3680_v39 = vld [vmem:[%s5965_s3 + $0x600] sm:$0xf] }
  0xb7   : > { %1843 = vmatpush.bf16.msrb.mxu0 %v3561_v61  ;;  %v4190_v61 = vld [vmem:[%s5965_s3 + $0x674] sm:$0xf]  ;;  %v4195_v36 = vld [vmem:[%s5965_s3 + $0x694] sm:$0xf0] }
  0xb8   : > { %1857 = vmatpush.bf16.msrb.mxu1 %v3565_v2  ;;  %1983 = vmatpush.bf16.msrb.mxu2 %v3641_v15  ;;  %v3737_v2 = vor.u32 %v4191_v57, %v3736_v56  ;;  %v4207_v15 = vld [vmem:[%s5965_s3 + $0x6f4] sm:$0xf0]  ;;  %v4200_v56 = vld [vmem:[%s5965_s3 + $0x6c4] sm:$0xf]  ;;  %v3794_v57 = vld [vmem:[%s5965_s3 + $0x6c8] sm:$0xf0] }
  0xb9   : > { %1997 = vmatpush.bf16.msrb.mxu3 %v3645_v4  ;;  %v3818_v4 = vld [vmem:[%s5965_s3 + $0x6f8] sm:$0xf0]  ;;  %v3817_v16 = vor.u32 %v4207_v15, %v3816_v0  ;;  %v3797_v1 = vor.u32 %v4200_v56, %v3794_v57  ;;  %v3784_v15 = vld [vmem:[%s5965_s3 + $0x6b0] sm:$0xf] }
  0xba   : > { %v3821_v17 = vor.u32 %v4206_v3, %v3818_v4  ;;  %v4199_v3 = vld [vmem:[%s5965_s3 + $0x6b4] sm:$0xf0]  ;;  %v344_v4 = vld [vmem:[#allocation3] sm:$0x7f] }
  0xbb   : > { %1844 = vmatpush.bf16.msrb.mxu0 %v3553_v8  ;;  %v3601_v8 = vor.u32 %v4161_v55, %v3600_v51  ;;  %v3714_v51 = vld [vmem:[%s5965_s3 + $0x648] sm:$0xf0]  ;;  %v4201_v55 = vld [vmem:[%s5965_s3 + $0x6c4] sm:$0xf0] }
  0xbc   : > { %1858 = vmatpush.bf16.msrb.mxu1 %v3557_v11  ;;  %1984 = vmatpush.bf16.msrb.mxu2 %v3633_v12  ;;  %v3741_v11 = vor.u32 %v4190_v61, %v3738_v63  ;;  %v4189_v12 = vld [vmem:[%s5965_s3 + $0x664] sm:$0xf0]  ;;  %v3717_v61 = vor.u32 %v4184_v50, %v3714_v51  ;;  %v4182_v63 = vld [vmem:[%s5965_s3 + $0x634] sm:$0xf]  ;;  %v3760_v50 = vld [vmem:[%s5965_s3 + $0x680] sm:$0xf] }
  0xbd   : > { %1998 = vmatpush.bf16.msrb.mxu3 %v3637_v14  ;;  %v1878_v14 = vld [vmem:[#allocation2 + $0x17] sm:$0x7f]  ;;  %v4193_v51 = vld [vmem:[%s5965_s3 + $0x684] sm:$0xf0] }
  0xbe   : > { %v1879_v29 = vpack.c.bf16 %v1878_v14, %v1877_v13  ;;  %v3785_v13 = vor.u32 %v4199_v3, %v3784_v15  ;;  %v3696_v14 = vld [vmem:[%s5965_s3 + $0x620] sm:$0xf]  ;;  %v4238_v3 = vld [vmem:[%s5965_s3 + $0x7f4] sm:$0xf] }
  0xbf   : > { %1845 = vmatpush.bf16.msrb.mxu0 %v3545_v19  ;;  %v3730_v19 = vld [vmem:[%s5965_s3 + $0x668] sm:$0xf0] }
  0xc0   : > { %1859 = vmatpush.bf16.msrb.mxu1 %v3549_v25  ;;  %1985 = vmatpush.bf16.msrb.mxu2 %v3625_v26  ;;  %v4205_v25 = vld [vmem:[%s5965_s3 + $0x6e4] sm:$0xf0]  ;;  %v4204_v26 = vld [vmem:[%s5965_s3 + $0x6e4] sm:$0xf]  ;;  %v3733_v33 = vor.u32 %v4188_v18, %v3730_v19  ;;  %v464_v44 = vpop.f32.mrf.mxu1  ;;  %v3789_v19 = vor.u32 %v4198_v5, %v3786_v6 }
  0xc1   : > { %1999 = vmatpush.bf16.msrb.mxu3 %v3629_v28  ;;  %v3729_v28 = vor.u32 %v4189_v12, %v3728_v9 }
  0xc2   : > { %v450_v43 = vpop.f32.mrf.mxu0 }
  0xc3   : > { %1846 = vmatpush.bf16.msrb.mxu0 %v3537_v32  ;;  %v4186_v32 = vld [vmem:[%s5965_s3 + $0x654] sm:$0xf] }
  0xc4   : > { %1860 = vmatpush.bf16.msrb.mxu1 %v3541_v37  ;;  %1986 = vmatpush.bf16.msrb.mxu2 %v3617_v38  ;;  %v3809_v37 = vor.u32 %v4205_v25, %v3808_v20  ;;  %v3813_v38 = vor.u32 %v4204_v26, %v3810_v27  ;;  %v4180_v20 = vld [vmem:[%s5965_s3 + $0x624] sm:$0xf]  ;;  %v3778_v26 = vld [vmem:[%s5965_s3 + $0x6a8] sm:$0xf0] }
  0xc5   : > { %2000 = vmatpush.bf16.msrb.mxu3 %v3621_v41  ;;  %v321_v41 = vmul.f32 0.2, %v311_v22  ;;  %v4196_v25 = vld [vmem:[%s5965_s3 + $0x6a4] sm:$0xf] }
  0xc7   : > { %1847 = vmatpush.bf16.msrb.mxu0 %v3529_v45  ;;  %v3725_v45 = vor.u32 %v4186_v32, %v3722_v34  ;;  %v3690_v34 = vld [vmem:[%s5965_s3 + $0x618] sm:$0xf0] }
  0xc8   : > { %1861 = vmatpush.bf16.msrb.mxu1 %v3533_v52  ;;  %1987 = vmatpush.bf16.msrb.mxu2 %v3609_v53  ;;  %v3792_v52 = vld [vmem:[%s5965_s3 + $0x6c0] sm:$0xf]  ;;  %v326_v53 = vsel %vm316_vm4, %v311_v22, %v321_v41  ;;  %v466_v9 = vpop.f32.mrf.mxu1 }
  0xc9   : > { %2001 = vmatpush.bf16.msrb.mxu3 %v3613_v58  ;;  %v3713_v58 = vor.u32 %v4185_v49, %v3712_v48  ;;  %331 = vst [vmem:[#allocation2 + $0x20] sm:$0xf] %v326_v53  ;;  %v3793_v0 = vor.u32 %v4201_v55, %v3792_v52  ;;  %v472_v18 = vadd.f32 %v466_v9, %v344_v4  ;;  %v3776_v22 = vld [vmem:[%s5965_s3 + $0x6a0] sm:$0xf]  ;;  %v4192_v52 = vld [vmem:[%s5965_s3 + $0x684] sm:$0xf] }
  0xca   : > { %v452_v54 = vpop.f32.mrf.mxu0  ;;  %v3693_v48 = vor.u32 %v4178_v31, %v3690_v34  ;;  %v3769_v49 = vor.u32 %v4195_v36, %v3768_v35  ;;  %v3762_v53 = vld [vmem:[%s5965_s3 + $0x688] sm:$0xf0]  ;;  %v3896_v55 = vld [vmem:[%s5965_s3 + $0x770] sm:$0xf]  ;;  %v3978_v4 = vld [vmem:[%s5965_s3 + $0x7f8] sm:$0xf0]  ;;  %v3761_v9 = vor.u32 %v4193_v51, %v3760_v50 }
  0xcb   : > { %1848 = vmatpush.bf16.msrb.mxu0 %v3521_v62  ;;  %v4183_v62 = vld [vmem:[%s5965_s3 + $0x634] sm:$0xf0]  ;;  %476 = vst [vmem:[#allocation3] sm:$0x7f] %v472_v18  ;;  %v3981_v18 = vor.u32 %v4238_v3, %v3978_v4  ;;  %v3880_v31 = vld [vmem:[%s5965_s3 + $0x750] sm:$0xf] }
  0xcc   : > { %1862 = vmatpush.bf16.msrb.mxu1 %v3525_v7  ;;  %1988 = vmatpush.bf16.msrb.mxu2 %v3601_v8  ;;  %v590_v7 = vpop.f32.mrf.mxu2  ;;  %v604_v8 = vpop.f32.mrf.mxu3  ;;  %v3705_v24 = vor.u32 %v4183_v62, %v3704_v59  ;;  %v4223_v59 = vld [vmem:[%s5965_s3 + $0x774] sm:$0xf0]  ;;  %v4217_v50 = vld [vmem:[%s5965_s3 + $0x744] sm:$0xf0] }
  0xcd   : > { %2002 = vmatpush.bf16.msrb.mxu3 %v3605_v10  ;;  %v609_v10 = vadd.f32 %v590_v7, %v450_v43  ;;  %v4177_v43 = vld [vmem:[%s5965_s3 + $0x604] sm:$0xf0]  ;;  %v3897_v7 = vor.u32 %v4223_v59, %v3896_v55  ;;  %v4216_v55 = vld [vmem:[%s5965_s3 + $0x744] sm:$0xf]  ;;  %v3952_v59 = vld [vmem:[%s5965_s3 + $0x7c0] sm:$0xf] }
  0xce   : > { %1849 = vmatmul.bf16.vlgmr.msrb.gmra.mxu0 %v1739_v23  ;;  %v3681_v15 = vor.u32 %v4177_v43, %v3680_v39 }
  0xcf   : > { %2121 = vmatpush.bf16.msra.mxu0 %v3737_v2  ;;  %1863 = vmatmul.bf16.vlgmr.msrb.gmra.mxu1 %v1739_v23  ;;  %v3706_v2 = vld [vmem:[%s5965_s3 + $0x638] sm:$0xf0]  ;;  %v4197_v23 = vld [vmem:[%s5965_s3 + $0x6a4] sm:$0xf0] }
  0xd0   : > { %2135 = vmatpush.bf16.msra.mxu1 %v3741_v11  ;;  %2261 = vmatpush.bf16.msra.mxu2 %v3817_v16  ;;  %v610_v11 = vadd.f32 %v604_v8, %v464_v44  ;;  %v3709_v12 = vor.u32 %v4182_v63, %v3706_v2  ;;  %v4181_v16 = vld [vmem:[%s5965_s3 + $0x624] sm:$0xf0]  ;;  %v3777_v32 = vor.u32 %v4197_v23, %v3776_v22  ;;  %v4176_v44 = vld [vmem:[%s5965_s3 + $0x604] sm:$0xf]  ;;  %v3976_v63 = vld [vmem:[%s5965_s3 + $0x7f0] sm:$0xf] }
  0xd1   : > { %2275 = vmatpush.bf16.msra.mxu3 %v3821_v17  ;;  %1989 = vmatmul.bf16.vlgmr.msrb.gmra.mxu2 %v1879_v29  ;;  %v471_v17 = vadd.f32 %v452_v54, %v343_v60  ;;  %v3697_v27 = vor.u32 %v4181_v16, %v3696_v14  ;;  %v4222_v60 = vld [vmem:[%s5965_s3 + $0x774] sm:$0xf]  ;;  %v4220_v16 = vld [vmem:[%s5965_s3 + $0x764] sm:$0xf]  ;;  %v3968_v22 = vld [vmem:[%s5965_s3 + $0x7e0] sm:$0xf] }
  0xd2   : > { %2003 = vmatmul.bf16.vlgmr.msrb.gmra.mxu3 %v1879_v29  ;;  %v3701_v29 = vor.u32 %v4180_v20, %v3698_v21  ;;  %v2017_v8 = vld [vmem:[#allocation2 + $0x12] sm:$0xff]  ;;  %v3890_v21 = vld [vmem:[%s5965_s3 + $0x768] sm:$0xf0]  ;;  %v4237_v23 = vld [vmem:[%s5965_s3 + $0x7e4] sm:$0xf0] }
  0xd3   : > { %2122 = vmatpush.bf16.msra.mxu0 %v3729_v28  ;;  %475 = vst [vmem:[#allocation3 + $0x8] sm:$0x7f] %v471_v17  ;;  %v3688_v28 = vld [vmem:[%s5965_s3 + $0x610] sm:$0xf]  ;;  %v2158_v17 = vld [vmem:[#allocation2 + $0x1b] sm:$0x7f]  ;;  %v3893_v35 = vor.u32 %v4220_v16, %v3890_v21  ;;  %v3969_v36 = vor.u32 %v4237_v23, %v3968_v22 }
  0xd4   : > { %2136 = vmatpush.bf16.msra.mxu1 %v3733_v33  ;;  %2262 = vmatpush.bf16.msra.mxu2 %v3809_v37  ;;  %v3781_v33 = vor.u32 %v4196_v25, %v3778_v26  ;;  %v4194_v37 = vld [vmem:[%s5965_s3 + $0x694] sm:$0xf]  ;;  %v592_v40 = vpop.f32.mrf.mxu2  ;;  %v606_v41 = vpop.f32.mrf.mxu3  ;;  %v4213_v16 = vld [vmem:[%s5965_s3 + $0x724] sm:$0xf0]  ;;  %v3858_v21 = vld [vmem:[%s5965_s3 + $0x728] sm:$0xf0] }
  0xd5   : > { %2276 = vmatpush.bf16.msra.mxu3 %v3813_v38  ;;  %v3770_v38 = vld [vmem:[%s5965_s3 + $0x698] sm:$0xf0]  ;;  %v2157_v54 = vld [vmem:[#allocation2 + $0x13] sm:$0xff] }
  0xd7   : > { %2123 = vmatpush.bf16.msra.mxu0 %v3721_v42  ;;  %v3689_v42 = vor.u32 %v4179_v30, %v3688_v28  ;;  %v3970_v28 = vld [vmem:[%s5965_s3 + $0x7e8] sm:$0xf0]  ;;  %v2159_v30 = vpack.c.bf16 %v2158_v17, %v2157_v54  ;;  %v3944_v54 = vld [vmem:[%s5965_s3 + $0x7b0] sm:$0xf] }
  0xd8   : > { %2137 = vmatpush.bf16.msra.mxu1 %v3725_v45  ;;  %2263 = vmatpush.bf16.msra.mxu2 %v3801_v46  ;;  %v3682_v45 = vld [vmem:[%s5965_s3 + $0x608] sm:$0xf0]  ;;  %v730_v46 = vpop.f32.mrf.mxu0 }
  0xd9   : > { %2277 = vmatpush.bf16.msra.mxu3 %v3805_v47  ;;  %v744_v47 = vpop.f32.mrf.mxu1  ;;  %v749_v56 = vadd.f32 %v730_v46, %v609_v10  ;;  %v3685_v6 = vor.u32 %v4176_v44, %v3682_v45  ;;  %v3765_v10 = vor.u32 %v4192_v52, %v3762_v53  ;;  %v4234_v45 = vld [vmem:[%s5965_s3 + $0x7d4] sm:$0xf]  ;;  %v3962_v46 = vld [vmem:[%s5965_s3 + $0x7d8] sm:$0xf0] }
  0xda   : > { %v750_v57 = vadd.f32 %v744_v47, %v610_v11  ;;  %v482_v62 = vld [vmem:[#allocation3 + $0x8] sm:$0x7f]  ;;  %v3888_v11 = vld [vmem:[%s5965_s3 + $0x760] sm:$0xf] }
  0xdb   : > { %2124 = vmatpush.bf16.msra.mxu0 %v3713_v58  ;;  %v3773_v58 = vor.u32 %v4194_v37, %v3770_v38  ;;  %v611_v2 = vadd.f32 %v592_v40, %v482_v62  ;;  %v4218_v37 = vld [vmem:[%s5965_s3 + $0x754] sm:$0xf]  ;;  %v3882_v40 = vld [vmem:[%s5965_s3 + $0x758] sm:$0xf0]  ;;  %v4232_v62 = vld [vmem:[%s5965_s3 + $0x7c4] sm:$0xf] }
  0xdc   : > { %2138 = vmatpush.bf16.msra.mxu1 %v3717_v61  ;;  %2264 = vmatpush.bf16.msra.mxu2 %v3793_v0  ;;  %v3898_v61 = vld [vmem:[%s5965_s3 + $0x778] sm:$0xf0]  ;;  %v4239_v0 = vld [vmem:[%s5965_s3 + $0x7f4] sm:$0xf0]  ;;  %v3885_v52 = vor.u32 %v4218_v37, %v3882_v40 }
  0xdd   : > { %2278 = vmatpush.bf16.msra.mxu3 %v3797_v1  ;;  %v483_v1 = vld [vmem:[#allocation3] sm:$0x7f]  ;;  %615 = vst [vmem:[#allocation3 + $0x8] sm:$0x7f] %v611_v2  ;;  %v3977_v14 = vor.u32 %v4239_v0, %v3976_v63  ;;  %v4215_v2 = vld [vmem:[%s5965_s3 + $0x734] sm:$0xf0] }
  0xde   : > { %v612_v5 = vadd.f32 %v606_v41, %v483_v1  ;;  %v3960_v41 = vld [vmem:[%s5965_s3 + $0x7d0] sm:$0xf]  ;;  %v3954_v63 = vld [vmem:[%s5965_s3 + $0x7c8] sm:$0xf0] }
  0xdf   : > { %2125 = vmatpush.bf16.msra.mxu0 %v3705_v24  ;;  %v2018_v24 = vld [vmem:[#allocation2 + $0x1a] sm:$0x7f]  ;;  %v3864_v1 = vld [vmem:[%s5965_s3 + $0x730] sm:$0xf] }
  0xe0   : > { %2139 = vmatpush.bf16.msra.mxu1 %v3709_v12  ;;  %2265 = vmatpush.bf16.msra.mxu2 %v3785_v13  ;;  %v4221_v12 = vld [vmem:[%s5965_s3 + $0x764] sm:$0xf0]  ;;  %616 = vst [vmem:[#allocation3] sm:$0x7f] %v612_v5  ;;  %v3901_v13 = vor.u32 %v4222_v60, %v3898_v61  ;;  %v2019_v20 = vpack.c.bf16 %v2018_v24, %v2017_v8  ;;  %v4214_v5 = vld [vmem:[%s5965_s3 + $0x734] sm:$0xf] }
  0xe1   : > { %2279 = vmatpush.bf16.msra.mxu3 %v3789_v19  ;;  %v870_v19 = vpop.f32.mrf.mxu2  ;;  %v3889_v26 = vor.u32 %v4221_v12, %v3888_v11  ;;  %v746_v38 = vpop.f32.mrf.mxu1  ;;  %v4233_v60 = vld [vmem:[%s5965_s3 + $0x7c4] sm:$0xf0]  ;;  %v3957_v8 = vor.u32 %v4232_v62, %v3954_v63  ;;  %v3866_v24 = vld [vmem:[%s5965_s3 + $0x738] sm:$0xf0]  ;;  %v3865_v11 = vor.u32 %v4215_v2, %v3864_v1  ;;  %v4230_v12 = vld [vmem:[%s5965_s3 + $0x7b4] sm:$0xf] }
  0xe2   : > { %v5776_v25 = vadd.f32 %v870_v19, %v749_v56  ;;  %v3874_v56 = vld [vmem:[%s5965_s3 + $0x748] sm:$0xf0]  ;;  %v3953_v4 = vor.u32 %v4233_v60, %v3952_v59  ;;  %v4225_v59 = vld [vmem:[%s5965_s3 + $0x784] sm:$0xf0]  ;;  %v4224_v60 = vld [vmem:[%s5965_s3 + $0x784] sm:$0xf] }
  0xe3   : > { %2126 = vmatpush.bf16.msra.mxu0 %v3697_v27  ;;  %v4236_v27 = vld [vmem:[%s5965_s3 + $0x7e4] sm:$0xf]  ;;  %v3877_v3 = vor.u32 %v4216_v55, %v3874_v56  ;;  %v3842_v55 = vld [vmem:[%s5965_s3 + $0x708] sm:$0xf0]  ;;  %v3920_v56 = vld [vmem:[%s5965_s3 + $0x780] sm:$0xf] }
  0xe4   : > { %2140 = vmatpush.bf16.msra.mxu1 %v3701_v29  ;;  %2266 = vmatpush.bf16.msra.mxu2 %v3777_v32  ;;  %v884_v29 = vpop.f32.mrf.mxu3  ;;  %v4219_v32 = vld [vmem:[%s5965_s3 + $0x754] sm:$0xf0]  ;;  %v3973_v39 = vor.u32 %v4236_v27, %v3970_v28  ;;  %v622_v43 = vld [vmem:[#allocation3 + $0x8] sm:$0x7f]  ;;  %v4229_v27 = vld [vmem:[%s5965_s3 + $0x7a4] sm:$0xf0] }
  0xe5   : > { %2280 = vmatpush.bf16.msra.mxu3 %v3781_v33  ;;  %v732_v33 = vpop.f32.mrf.mxu0  ;;  %v890_v34 = vadd.f32 %v884_v29, %v750_v57  ;;  %v3881_v44 = vor.u32 %v4219_v32, %v3880_v31  ;;  %v3965_v57 = vor.u32 %v4234_v45, %v3962_v46  ;;  %v3938_v31 = vld [vmem:[%s5965_s3 + $0x7a8] sm:$0xf0]  ;;  %v4226_v46 = vld [vmem:[%s5965_s3 + $0x794] sm:$0xf]  ;;  %v2298_v1 = vld [vmem:[#allocation2 + $0x1c] sm:$0x7f] }
  0xe7   : > { %2127 = vmatpush.bf16.msra.mxu0 %v3689_v42  ;;  %v4235_v42 = vld [vmem:[%s5965_s3 + $0x7d4] sm:$0xf0]  ;;  %v623_v47 = vld [vmem:[#allocation3] sm:$0x7f] }
  0xe8   : > { %2141 = vmatpush.bf16.msra.mxu1 %v3693_v48  ;;  %2267 = vmatpush.bf16.msra.mxu2 %v3769_v49  ;;  %v751_v48 = vadd.f32 %v732_v33, %v622_v43  ;;  %v3872_v49 = vld [vmem:[%s5965_s3 + $0x740] sm:$0xf]  ;;  %v752_v51 = vadd.f32 %v746_v38, %v623_v47  ;;  %v3961_v53 = vor.u32 %v4235_v42, %v3960_v41  ;;  %v3848_v33 = vld [vmem:[%s5965_s3 + $0x710] sm:$0xf]  ;;  %v4210_v38 = vld [vmem:[%s5965_s3 + $0x714] sm:$0xf] }
  0xe9   : > { %2281 = vmatpush.bf16.msra.mxu3 %v3773_v58  ;;  %v872_v58 = vpop.f32.mrf.mxu2  ;;  %v3873_v61 = vor.u32 %v4217_v50, %v3872_v49  ;;  %v3850_v41 = vld [vmem:[%s5965_s3 + $0x718] sm:$0xf0]  ;;  %v3928_v42 = vld [vmem:[%s5965_s3 + $0x790] sm:$0xf]  ;;  %v4227_v43 = vld [vmem:[%s5965_s3 + $0x794] sm:$0xf0] }
  0xea   : > { %755 = vst [vmem:[#allocation3 + $0x8] sm:$0x7f] %v751_v48  ;;  %v3930_v47 = vld [vmem:[%s5965_s3 + $0x798] sm:$0xf0]  ;;  %v3840_v48 = vld [vmem:[%s5965_s3 + $0x700] sm:$0xf] }
  0xeb   : > { %2128 = vmatpush.bf16.msra.mxu0 %v3681_v15  ;;  %756 = vst [vmem:[#allocation3] sm:$0x7f] %v752_v51  ;;  %v4209_v49 = vld [vmem:[%s5965_s3 + $0x704] sm:$0xf0]  ;;  %v3853_v51 = vor.u32 %v4210_v38, %v3850_v41 }
  0xec   : > { %2142 = vmatpush.bf16.msra.mxu1 %v3685_v6  ;;  %2268 = vmatpush.bf16.msra.mxu2 %v3761_v9  ;;  %v886_v0 = vpop.f32.mrf.mxu3  ;;  %v4231_v9 = vld [vmem:[%s5965_s3 + $0x7b4] sm:$0xf0]  ;;  %v3841_v63 = vor.u32 %v4209_v49, %v3840_v48 }
  0xed   : > { %2282 = vmatpush.bf16.msra.mxu3 %v3765_v10  ;;  %v1010_v15 = vpop.f32.mrf.mxu0  ;;  %v3945_v19 = vor.u32 %v4231_v9, %v3944_v54 }
  0xee   : > { %2129 = vmatmul.bf16.vlgmr.msra.gmra.mxu0 %v2019_v20  ;;  %v1029_v6 = vadd.f32 %v1010_v15, %v5776_v25 }
  0xef   : > { %2401 = vmatpush.bf16.msrb.mxu0 %v3897_v7  ;;  %2143 = vmatmul.bf16.vlgmr.msra.gmra.mxu1 %v2019_v20  ;;  %v1024_v7 = vpop.f32.mrf.mxu1  ;;  %v4212_v20 = vld [vmem:[%s5965_s3 + $0x724] sm:$0xf] }
  0xf0   : > { %2415 = vmatpush.bf16.msrb.mxu1 %v3901_v13  ;;  %2541 = vmatpush.bf16.msrb.mxu2 %v3977_v14  ;;  %v1030_v10 = vadd.f32 %v1024_v7, %v890_v34  ;;  %v3946_v13 = vld [vmem:[%s5965_s3 + $0x7b8] sm:$0xf0]  ;;  %v3856_v14 = vld [vmem:[%s5965_s3 + $0x720] sm:$0xf]  ;;  %v4211_v34 = vld [vmem:[%s5965_s3 + $0x714] sm:$0xf0] }
  0xf1   : > { %2555 = vmatpush.bf16.msrb.mxu3 %v3981_v18  ;;  %2269 = vmatmul.bf16.vlgmr.msra.gmra.mxu2 %v2159_v30  ;;  %v762_v17 = vld [vmem:[#allocation3 + $0x8] sm:$0x7f]  ;;  %v3869_v18 = vor.u32 %v4214_v5, %v3866_v24  ;;  %v3949_v25 = vor.u32 %v4230_v12, %v3946_v13  ;;  %v3857_v29 = vor.u32 %v4213_v16, %v3856_v14  ;;  %v2438_v7 = vld [vmem:[#allocation2 + $0x1d] sm:$0x7f] }
  0xf2   : > { %2283 = vmatmul.bf16.vlgmr.msra.gmra.mxu3 %v2159_v30  ;;  %v763_v22 = vld [vmem:[#allocation3] sm:$0x7f]  ;;  %v891_v23 = vadd.f32 %v872_v58, %v762_v17  ;;  %v4228_v30 = vld [vmem:[%s5965_s3 + $0x7a4] sm:$0xf]  ;;  %v3849_v45 = vor.u32 %v4211_v34, %v3848_v33  ;;  %v3933_v58 = vor.u32 %v4226_v46, %v3930_v47  ;;  %v3921_v5 = vor.u32 %v4225_v59, %v3920_v56 }
  0xf3   : > { %2402 = vmatpush.bf16.msrb.mxu0 %v3889_v26  ;;  %v3936_v26 = vld [vmem:[%s5965_s3 + $0x7a0] sm:$0xf]  ;;  %v892_v28 = vadd.f32 %v886_v0, %v763_v22  ;;  %v2297_v0 = vld [vmem:[#allocation2 + $0x14] sm:$0xff] }
  0xf4   : > { %2416 = vmatpush.bf16.msrb.mxu1 %v3893_v35  ;;  %2542 = vmatpush.bf16.msrb.mxu2 %v3969_v36  ;;  %895 = vst [vmem:[#allocation3 + $0x8] sm:$0x7f] %v891_v23  ;;  %v1150_v32 = vpop.f32.mrf.mxu2  ;;  %v3861_v35 = vor.u32 %v4212_v20, %v3858_v21  ;;  %v3937_v36 = vor.u32 %v4229_v27, %v3936_v26 }
  0xf5   : > { %2556 = vmatpush.bf16.msrb.mxu3 %v3973_v39  ;;  %896 = vst [vmem:[#allocation3] sm:$0x7f] %v892_v28  ;;  %v5887_v37 = vadd.f32 %v1150_v32, %v1029_v6  ;;  %v3941_v39 = vor.u32 %v4228_v30, %v3938_v31  ;;  %v1164_v40 = vpop.f32.mrf.mxu3  ;;  %v1012_v50 = vpop.f32.mrf.mxu0  ;;  %v2437_v6 = vld [vmem:[#allocation2 + $0x15] sm:$0xff]  ;;  %v2299_v24 = vpack.c.bf16 %v2298_v1, %v2297_v0 }
  0xf6   : > { %v2439_v54 = vpack.c.bf16 %v2438_v7, %v2437_v6 }
  0xf7   : > { %2403 = vmatpush.bf16.msrb.mxu0 %v3881_v44  ;;  %v1170_v44 = vadd.f32 %v1164_v40, %v1030_v10 }
  0xf8   : > { %2417 = vmatpush.bf16.msrb.mxu1 %v3885_v52  ;;  %2543 = vmatpush.bf16.msrb.mxu2 %v3961_v53  ;;  %v3929_v52 = vor.u32 %v4227_v43, %v3928_v42  ;;  %v4208_v53 = vld [vmem:[%s5965_s3 + $0x704] sm:$0xf] }
  0xf9   : > { %2557 = vmatpush.bf16.msrb.mxu3 %v3965_v57  ;;  %v1026_v57 = vpop.f32.mrf.mxu1 }
  0xfb   : > { %2404 = vmatpush.bf16.msrb.mxu0 %v3873_v61  ;;  %v3922_v61 = vld [vmem:[%s5965_s3 + $0x788] sm:$0xf0]  ;;  %v902_v62 = vld [vmem:[#allocation3 + $0x8] sm:$0x7f] }
  0xfc   : > { %2418 = vmatpush.bf16.msrb.mxu1 %v3877_v3  ;;  %2544 = vmatpush.bf16.msrb.mxu2 %v3953_v4  ;;  %v1031_v2 = vadd.f32 %v1012_v50, %v902_v62  ;;  %v903_v15 = vld [vmem:[#allocation3] sm:$0x7f]  ;;  %v3845_v4 = vor.u32 %v4208_v53, %v3842_v55  ;;  %v1152_v9 = vpop.f32.mrf.mxu2 }
  0xfd   : > { %2558 = vmatpush.bf16.msrb.mxu3 %v3957_v8  ;;  %v1032_v3 = vadd.f32 %v1026_v57, %v903_v15  ;;  %v3925_v8 = vor.u32 %v4224_v60, %v3922_v61  ;;  %v1166_v10 = vpop.f32.mrf.mxu3 }
  0xfe   : > { %1035 = vst [vmem:[#allocation3 + $0x8] sm:$0x7f] %v1031_v2 }
  0xff   : > { %2405 = vmatpush.bf16.msrb.mxu0 %v3865_v11  ;;  %1036 = vst [vmem:[#allocation3] sm:$0x7f] %v1032_v3 }
 0x100   : > { %2419 = vmatpush.bf16.msrb.mxu1 %v3869_v18  ;;  %2545 = vmatpush.bf16.msrb.mxu2 %v3945_v19 }
 0x101   : > { %2559 = vmatpush.bf16.msrb.mxu3 %v3949_v25 }
 0x103   : > { %2406 = vmatpush.bf16.msrb.mxu0 %v3857_v29 }
 0x104   : > { %2420 = vmatpush.bf16.msrb.mxu1 %v3861_v35  ;;  %2546 = vmatpush.bf16.msrb.mxu2 %v3937_v36 }
 0x105   : > { %2560 = vmatpush.bf16.msrb.mxu3 %v3941_v39  ;;  %v1042_v11 = vld [vmem:[#allocation3 + $0x8] sm:$0x7f] }
 0x106   : > { %v1171_v12 = vadd.f32 %v1152_v9, %v1042_v11  ;;  %v1043_v13 = vld [vmem:[#allocation3] sm:$0x7f]  ;;  %v2581_v9 = vld [vmem:[#allocation3 + $0x18] sm:$0x3] }
 0x107   : > { %2407 = vmatpush.bf16.msrb.mxu0 %v3849_v45  ;;  %v1172_v14 = vadd.f32 %v1166_v10, %v1043_v13  ;;  %v2583_v10 = vld [vmem:[%s5966_s4] sm:$0x3] }
 0x108   : > { %2421 = vmatpush.bf16.msrb.mxu1 %v3853_v51  ;;  %2547 = vmatpush.bf16.msrb.mxu2 %v3929_v52  ;;  %1175 = vst [vmem:[#allocation3 + $0x8] sm:$0x7f] %v1171_v12 }
 0x109   : > { %2561 = vmatpush.bf16.msrb.mxu3 %v3933_v58  ;;  %1176 = vst [vmem:[#allocation3] sm:$0x7f] %v1172_v14  ;;  %v2585_v14 = vperm.slane %v2583_v10, 0 }
 0x10b   : > { %2408 = vmatpush.bf16.msrb.mxu0 %v3841_v63  ;;  %v1290_v16 = vpop.f32.mrf.mxu0 }
 0x10c   : > { %2422 = vmatpush.bf16.msrb.mxu1 %v3845_v4  ;;  %2548 = vmatpush.bf16.msrb.mxu2 %v3921_v5  ;;  %v1304_v17 = vpop.f32.mrf.mxu1  ;;  %v1309_v18 = vadd.f32 %v1290_v16, %v5887_v37 }
 0x10d   : > { %2562 = vmatpush.bf16.msrb.mxu3 %v3925_v8  ;;  %v1310_v19 = vadd.f32 %v1304_v17, %v1170_v44 }
 0x10e   : > { %2409 = vmatmul.bf16.vlgmr.msrb.gmra.mxu0 %v2299_v24 }
 0x10f   : > { %2423 = vmatmul.bf16.vlgmr.msrb.gmra.mxu1 %v2299_v24  ;;  %2549 = vmatmul.bf16.vlgmr.msrb.gmra.mxu2 %v2439_v54  ;;  %v1182_v21 = vld [vmem:[#allocation3 + $0x8] sm:$0x7f] }
 0x110   : > { %2563 = vmatmul.bf16.vlgmr.msrb.gmra.mxu3 %v2439_v54  ;;  %v1183_v23 = vld [vmem:[#allocation3] sm:$0x7f] }
 0x113   : > { %v1292_v22 = vpop.f32.mrf.mxu0 }
 0x114   : > { %v1430_v20 = vpop.f32.mrf.mxu2  ;;  %v1306_v25 = vpop.f32.mrf.mxu1  ;;  %v1311_v27 = vadd.f32 %v1292_v22, %v1182_v21  ;;  %v2586_v21 = vperm.slane %v2583_v10, 1 }
 0x115   : > { %v1449_v26 = vadd.f32 %v1430_v20, %v1309_v18  ;;  %v1312_v28 = vadd.f32 %v1306_v25, %v1183_v23  ;;  %v1444_v29 = vpop.f32.mrf.mxu3  ;;  %v2582_v20 = vld [vmem:[#allocation3 + $0x20] sm:$0x3]  ;;  %v2593_v23 = vadd.f32 %v2585_v14, %v2581_v9 }
 0x116   : > { %v1450_v30 = vadd.f32 %v1444_v29, %v1310_v19  ;;  %1315 = vst [vmem:[#allocation3 + $0x8] sm:$0x7f] %v1311_v27  ;;  %v2594_v25 = vadd.f32 %v2586_v21, %v2582_v20 }
 0x117   : > { %1316 = vst [vmem:[#allocation3] sm:$0x7f] %v1312_v28 }
 0x118   : > { %2599 = vst [vmem:[%s5943_s16 + $0x20] sm:$0x3] %v2593_v23 }
 0x119   : > { %2600 = vst [vmem:[%s5943_s16 + $0x28] sm:$0x3] %v2594_v25 }
 0x11c   : > { %v1432_v31 = vpop.f32.mrf.mxu2 }
 0x11d   : > { %v1446_v32 = vpop.f32.mrf.mxu3  ;;  %v1322_v33 = vld [vmem:[#allocation3 + $0x8] sm:$0x7f] }
 0x11e   : > { %v1451_v34 = vadd.f32 %v1432_v31, %v1322_v33  ;;  %v1323_v35 = vld [vmem:[#allocation3] sm:$0x7f] }
 0x11f   : > { %v1452_v36 = vadd.f32 %v1446_v32, %v1323_v35 }
 0x120   : > { %1455 = vst [vmem:[#allocation3 + $0x8] sm:$0x7f] %v1451_v34 }
 0x121   : > { %1456 = vst [vmem:[#allocation3] sm:$0x7f] %v1452_v36 }
 0x127   : > { %v1462_v41 = vld [vmem:[#allocation3 + $0x8] sm:$0x7f] }
 0x128   : > { %v1463_v45 = vld [vmem:[#allocation3] sm:$0x7f] }
 0x12b   : > { %v1570_v37 = vpop.f32.mrf.mxu0 }
 0x12c   : > { %v1589_v38 = vadd.f32 %v1570_v37, %v1449_v26  ;;  %v1584_v39 = vpop.f32.mrf.mxu1 }
 0x12d   : > { %v1590_v40 = vadd.f32 %v1584_v39, %v1450_v30 }
 0x133   : > { %v1572_v42 = vpop.f32.mrf.mxu0 }
 0x134   : > { %v1710_v43 = vpop.f32.mrf.mxu2  ;;  %v1591_v44 = vadd.f32 %v1572_v42, %v1462_v41  ;;  %v1586_v46 = vpop.f32.mrf.mxu1 }
 0x135   : > { %v5932_v47 = vadd.f32 %v1710_v43, %v1589_v38  ;;  %v1724_v48 = vpop.f32.mrf.mxu3  ;;  %v1592_v49 = vadd.f32 %v1586_v46, %v1463_v45 }
 0x136   : > { %v5934_v50 = vadd.f32 %v1724_v48, %v1590_v40  ;;  %1595 = vst [vmem:[#allocation3 + $0x8] sm:$0x7f] %v1591_v44 }
 0x137   : > { %1596 = vst [vmem:[#allocation3] sm:$0x7f] %v1592_v49 }
 0x13c   : > { %v1712_v51 = vpop.f32.mrf.mxu2 }
 0x13d   : > { %v1726_v52 = vpop.f32.mrf.mxu3  ;;  %v1602_v53 = vld [vmem:[#allocation3 + $0x8] sm:$0x7f] }
 0x13e   : > { %v1731_v55 = vadd.f32 %v1712_v51, %v1602_v53  ;;  %v1603_v56 = vld [vmem:[#allocation3] sm:$0x7f] }
 0x13f   : > { %v1732_v57 = vadd.f32 %v1726_v52, %v1603_v56 }
 0x140   : > { %1735 = vst [vmem:[#allocation3 + $0x8] sm:$0x7f] %v1731_v55 }
 0x141   : > { %1736 = vst [vmem:[#allocation3] sm:$0x7f] %v1732_v57 }
 0x147   : > { %v1742_v61 = vld [vmem:[#allocation3 + $0x8] sm:$0x7f] }
 0x148   : > { %v1743_v63 = vld [vmem:[#allocation3] sm:$0x7f] }
 0x14b   : > { %v1850_v58 = vpop.f32.mrf.mxu0 }
 0x14c   : > { %v1864_v59 = vpop.f32.mrf.mxu1  ;;  %v1869_v32 = vadd.f32 %v1850_v58, %v5932_v47 }
 0x14d   : > { %v1870_v33 = vadd.f32 %v1864_v59, %v5934_v50 }
 0x153   : > { %v1852_v62 = vpop.f32.mrf.mxu0 }
 0x154   : > { %v1990_v60 = vpop.f32.mrf.mxu2  ;;  %v1866_v0 = vpop.f32.mrf.mxu1  ;;  %v1871_v1 = vadd.f32 %v1852_v62, %v1742_v61 }
 0x155   : > { %v1872_v2 = vadd.f32 %v1866_v0, %v1743_v63  ;;  %v2004_v15 = vpop.f32.mrf.mxu3  ;;  %v2009_v35 = vadd.f32 %v1990_v60, %v1869_v32 }
 0x156   : > { %1875 = vst [vmem:[#allocation3 + $0x8] sm:$0x7f] %v1871_v1  ;;  %v2010_v36 = vadd.f32 %v2004_v15, %v1870_v33 }
 0x157   : > { %1876 = vst [vmem:[#allocation3] sm:$0x7f] %v1872_v2 }
 0x15c   : > { %v1992_v3 = vpop.f32.mrf.mxu2 }
 0x15d   : > { %v2006_v4 = vpop.f32.mrf.mxu3  ;;  %v1882_v5 = vld [vmem:[#allocation3 + $0x8] sm:$0x7f] }
 0x15e   : > { %v2011_v6 = vadd.f32 %v1992_v3, %v1882_v5  ;;  %v1883_v7 = vld [vmem:[#allocation3] sm:$0x7f] }
 0x15f   : > { %v2012_v8 = vadd.f32 %v2006_v4, %v1883_v7 }
 0x160   : > { %2015 = vst [vmem:[#allocation3 + $0x8] sm:$0x7f] %v2011_v6 }
 0x161   : > { %2016 = vst [vmem:[#allocation3] sm:$0x7f] %v2012_v8 }
 0x167   : > { %v2022_v11 = vld [vmem:[#allocation3 + $0x8] sm:$0x7f] }
 0x168   : > { %v2023_v17 = vld [vmem:[#allocation3] sm:$0x7f] }
 0x16b   : > { %v2130_v24 = vpop.f32.mrf.mxu0 }
 0x16c   : > { %v2144_v54 = vpop.f32.mrf.mxu1  ;;  %v2149_v38 = vadd.f32 %v2130_v24, %v2009_v35 }
 0x16d   : > { %v2150_v39 = vadd.f32 %v2144_v54, %v2010_v36 }
 0x173   : > { %v2132_v12 = vpop.f32.mrf.mxu0 }
 0x174   : > { %v2270_v13 = vpop.f32.mrf.mxu2  ;;  %v2151_v16 = vadd.f32 %v2132_v12, %v2022_v11  ;;  %v2146_v18 = vpop.f32.mrf.mxu1 }
 0x175   : > { %v2284_v19 = vpop.f32.mrf.mxu3  ;;  %v2152_v22 = vadd.f32 %v2146_v18, %v2023_v17  ;;  %v2289_v40 = vadd.f32 %v2270_v13, %v2149_v38 }
 0x176   : > { %2155 = vst [vmem:[#allocation3 + $0x8] sm:$0x7f] %v2151_v16  ;;  %v2290_v41 = vadd.f32 %v2284_v19, %v2150_v39 }
 0x177   : > { %2156 = vst [vmem:[#allocation3] sm:$0x7f] %v2152_v22 }
 0x17c   : > { %v2272_v26 = vpop.f32.mrf.mxu2 }
 0x17d   : > { %v2286_v27 = vpop.f32.mrf.mxu3  ;;  %v2162_v28 = vld [vmem:[#allocation3 + $0x8] sm:$0x7f] }
 0x17e   : > { %v2291_v29 = vadd.f32 %v2272_v26, %v2162_v28  ;;  %v2163_v30 = vld [vmem:[#allocation3] sm:$0x7f] }
 0x17f   : > { %v2292_v31 = vadd.f32 %v2286_v27, %v2163_v30 }
 0x180   : > { %2295 = vst [vmem:[#allocation3 + $0x8] sm:$0x7f] %v2291_v29 }
 0x181   : > { %2296 = vst [vmem:[#allocation3] sm:$0x7f] %v2292_v31 }
 0x187   : > { %v2302_v47 = vld [vmem:[#allocation3 + $0x8] sm:$0x7f] }
 0x188   : > { %v2303_v53 = vld [vmem:[#allocation3] sm:$0x7f] }
 0x18b   : > { %v2410_v34 = vpop.f32.mrf.mxu0 }
 0x18c   : > { %v2424_v37 = vpop.f32.mrf.mxu1  ;;  %v2429_v42 = vadd.f32 %v2410_v34, %v2289_v40 }
 0x18d   : > { %v2430_v43 = vadd.f32 %v2424_v37, %v2290_v41 }
 0x192   : > { %v2550_v44 = vpop.f32.mrf.mxu2 }
 0x193   : > { %v2412_v45 = vpop.f32.mrf.mxu0  ;;  %v2569_v46 = vadd.f32 %v2550_v44, %v2429_v42  ;;  %v2564_v48 = vpop.f32.mrf.mxu3 }
 0x194   : > { %v2570_v49 = vadd.f32 %v2564_v48, %v2430_v43  ;;  %v2426_v51 = vpop.f32.mrf.mxu1  ;;  %v2431_v52 = vadd.f32 %v2412_v45, %v2302_v47 }
 0x195   : > { %v2589_v50 = vadd.f32 %v2585_v14, %v2569_v46  ;;  %v2432_v56 = vadd.f32 %v2426_v51, %v2303_v53 }
 0x196   : > { %v2590_v55 = vadd.f32 %v2586_v21, %v2570_v49  ;;  %2435 = vst [vmem:[#allocation3 + $0x8] sm:$0x7f] %v2431_v52 }
 0x197   : > { %2595 = vst [vmem:[%s5943_s16] sm:$0xff] %v2589_v50 }
 0x198   : > { %2596 = vst [vmem:[%s5943_s16 + $0x8] sm:$0xff] %v2590_v55 }
 0x199   : > { %2436 = vst [vmem:[#allocation3] sm:$0x7f] %v2432_v56 }
 0x19a   : > { %v2552_v58 = vpop.f32.mrf.mxu2 }
 0x19b   : > { %v2566_v61 = vpop.f32.mrf.mxu3 }
 0x19d   : > { %v2442_v57 = vld [vmem:[#allocation3 + $0x8] sm:$0x7f] }
 0x19e   : > { %v2571_v59 = vadd.f32 %v2552_v58, %v2442_v57 }
 0x1a0   : > { %v2443_v60 = vld [vmem:[#allocation3] sm:$0x7f]  ;;  %2575 = vst [vmem:[#allocation3 + $0x8] sm:$0x7f] %v2571_v59 }
 0x1a1   : > { %v2572_v62 = vadd.f32 %v2566_v61, %v2443_v60 }
 0x1a3   : > { %2576 = vst [vmem:[#allocation3] sm:$0x7f] %v2572_v62 }
 0x1a7   : > { %v2579_v63 = vld [vmem:[#allocation3 + $0x8] sm:$0xff] }
 0x1a8   : > { %v2591_v0 = vadd.f32 %v2585_v14, %v2579_v63 }
 0x1aa   : > { %v2580_v1 = vld [vmem:[#allocation3] sm:$0xff]  ;;  %2597 = vst [vmem:[%s5943_s16 + $0x10] sm:$0xff] %v2591_v0 }
 0x1ab   : > { %v2592_v2 = vadd.f32 %v2586_v21, %v2580_v1 }
 0x1ad   : > { %2598 = vst [vmem:[%s5943_s16 + $0x18] sm:$0xff] %v2592_v2 }
 0x1ae PF: > { %s15_s20 = sadd.s32 1, %s4293_s20   ;;  %s5968_s18 = smov %s4289_s19 }
 0x1af   : > { %p12_p5 = scmp.ge.s32.totalorder %s15_s20, 4   ;;  %s5969_s19 = smov %s5971_s21 }
 0x1b1   :  { %14 = sbr.rel (!%p12_p5) target bundleno = 2 (0x2), region = 91 }

// kernel: discriminator_forward.9
= control target key start
LH: loop header
LB: loop body
LE: loop exit
PB: predicated region body
PF: predicated region fallthrough
CT: control target
= control target key end

     0   :  { %s5100_s18 = smov 0   ;;  %s5102_s19 = smov 0   ;;  %s5960_s0 = inlined_call_operand.vmem [shape: f32[2,25,256], index: 0, kind: input, shape index: {}]   ;;  %s5961_s1 = inlined_call_operand.vmem [shape: f32[1,256], index: 1, kind: input, shape index: {}]   ;;  %s5962_s2 = inlined_call_operand.vmem [shape: f32[1,256], index: 2, kind: input, shape index: {}]   ;;  %s5963_s3 = inlined_call_operand.vmem [shape: bf16[4,4,256,128], index: 3, kind: input, shape index: {}]   ;;  %s5964_s4 = inlined_call_operand.vmem [shape: f32[1,128], index: 4, kind: input, shape index: {}]   ;;  %s5965_s5 = inlined_call_operand.vmem [shape: f32[2,10,128], index: 5, kind: output, shape index: {}]  }
   0x1   :  { %s5104_s20 = smov 0  }
   0x2 LB: > { %s27_s21 = sadd.s32 1, %s5063_s19  ;;  %p3250_p0 = scmp.ge.s32.totalorder %s5067_s20, 1  ;;  %s5067_s20 = sphi %s5104_s20, %s15_s20   ;;  %s5063_s19 = sphi %s5102_s19, %s5967_s19   ;;  %s5059_s18 = sphi %s5100_s18, %s5966_s18  }
   0x3   : > { %p29_p1 = scmp.ge.s32.totalorder %s27_s21, 2  ;;  %p218_p2 = scmp.lt.s32.totalorder %s5067_s20, 3 }
   0x5   : > { %s5969_s21 = smov (%p29_p1, %s27_s21), 0  ;;  %p219_p3 = pnand %p3250_p0, %p218_p2 }
   0x6   : > { %p256_p4 = scmp.lt.s32.totalorder (!%p219_p3), %s5059_s18, 1 }
   0x7   : > { %222 = sbr.rel (%p219_p3) target bundleno = 420 (0x1a4), region = 40 }
   0xc   : > { %v4770_v0 = vld [vmem:[%s5963_s3 + $0x38] sm:$0xff]  ;;  %v4769_v4 = vld [vmem:[%s5963_s3 + $0x30] sm:$0xff]  ;;  %v4768_v8 = vld [vmem:[%s5963_s3 + $0x28] sm:$0xff]  ;;  %s5971_s18 = smov (!%p256_p4, %s5059_s18), 1 }
   0xd   : > { %v4778_v1 = vld [vmem:[%s5963_s3 + $0x78] sm:$0xff]  ;;  %479 = vmatpush.bf16.msra.mxu0 %v4770_v0  ;;  %v4777_v5 = vld [vmem:[%s5963_s3 + $0x70] sm:$0xff]  ;;  %v4776_v9 = vld [vmem:[%s5963_s3 + $0x68] sm:$0xff]  ;;  %s4761_s8 = sshll.u32 %s5971_s18, 6  ;;  %s4762_s7 = sshll.u32 %s5971_s18, 4 }
   0xe   : > { %v4786_v2 = vld [vmem:[%s5963_s3 + $0xb8] sm:$0xff]  ;;  %492 = vmatpush.bf16.msra.mxu1 %v4778_v1  ;;  %v4785_v6 = vld [vmem:[%s5963_s3 + $0xb0] sm:$0xff]  ;;  %v4784_v10 = vld [vmem:[%s5963_s3 + $0xa8] sm:$0xff]  ;;  %s5182_s15 = scalar_lea.vmem %s5960_s0, %s4761_s8  ;;  %s5693_s17 = scalar_lea.vmem %s5965_s5, %s4762_s7 }
   0xf   : > { %v4794_v3 = vld [vmem:[%s5963_s3 + $0xf8] sm:$0xff]  ;;  %657 = vmatpush.bf16.msra.mxu2 %v4786_v2  ;;  %v4793_v7 = vld [vmem:[%s5963_s3 + $0xf0] sm:$0xff]  ;;  %v4792_v11 = vld [vmem:[%s5963_s3 + $0xe8] sm:$0xff] }
  0x10   : > { %670 = vmatpush.bf16.msra.mxu3 %v4794_v3  ;;  %v4767_v12 = vld [vmem:[%s5963_s3 + $0x20] sm:$0xff]  ;;  %v4766_v16 = vld [vmem:[%s5963_s3 + $0x18] sm:$0xff]  ;;  %v4765_v20 = vld [vmem:[%s5963_s3 + $0x10] sm:$0xff] }
  0x11   : > { %480 = vmatpush.bf16.msra.mxu0 %v4769_v4  ;;  %v4775_v13 = vld [vmem:[%s5963_s3 + $0x60] sm:$0xff]  ;;  %v4774_v17 = vld [vmem:[%s5963_s3 + $0x58] sm:$0xff]  ;;  %v4773_v21 = vld [vmem:[%s5963_s3 + $0x50] sm:$0xff] }
  0x12   : > { %493 = vmatpush.bf16.msra.mxu1 %v4777_v5  ;;  %v4783_v14 = vld [vmem:[%s5963_s3 + $0xa0] sm:$0xff]  ;;  %v4782_v18 = vld [vmem:[%s5963_s3 + $0x98] sm:$0xff]  ;;  %v277_v25 = vld [vmem:[%s5182_s15 + $0x8] sm:$0xff] }
  0x13   : > { %658 = vmatpush.bf16.msra.mxu2 %v4785_v6  ;;  %v4791_v15 = vld [vmem:[%s5963_s3 + $0xe0] sm:$0xff]  ;;  %v4790_v19 = vld [vmem:[%s5963_s3 + $0xd8] sm:$0xff]  ;;  %v4781_v26 = vld [vmem:[%s5963_s3 + $0x90] sm:$0xff] }
  0x14   : > { %671 = vmatpush.bf16.msra.mxu3 %v4793_v7  ;;  %v276_v22 = vld [vmem:[%s5182_s15] sm:$0xff]  ;;  %v4789_v27 = vld [vmem:[%s5963_s3 + $0xd0] sm:$0xff]  ;;  %v4764_v34 = vld [vmem:[%s5963_s3 + $0x8] sm:$0xff] }
  0x15   : > { %481 = vmatpush.bf16.msra.mxu0 %v4768_v8  ;;  %v284_v23 = vld [vmem:[%s5961_s1] sm:$0x3]  ;;  %v4772_v35 = vld [vmem:[%s5963_s3 + $0x48] sm:$0xff]  ;;  %v4802_v48 = vld [vmem:[%s5963_s3 + $0x138] sm:$0xff] }
  0x16   : > { %494 = vmatpush.bf16.msra.mxu1 %v4776_v9  ;;  %v298_v24 = vld [vmem:[%s5962_s2] sm:$0x3]  ;;  %v5210_v28 = vperm.slane %v284_v23, 0  ;;  %v5214_v30 = vperm.slane %v284_v23, 1  ;;  %v4780_v36 = vld [vmem:[%s5963_s3 + $0x88] sm:$0xff]  ;;  %v4810_v49 = vld [vmem:[%s5963_s3 + $0x178] sm:$0xff] }
  0x17   : > { %659 = vmatpush.bf16.msra.mxu2 %v4784_v10  ;;  %v5212_v29 = vperm.slane %v298_v24, 0  ;;  %v5216_v31 = vperm.slane %v298_v24, 1  ;;  %v4788_v37 = vld [vmem:[%s5963_s3 + $0xc8] sm:$0xff]  ;;  %v4763_v42 = vld [vmem:[%s5963_s3] sm:$0xff]  ;;  %v4818_v50 = vld [vmem:[%s5963_s3 + $0x1b8] sm:$0xff] }
  0x18   : > { %672 = vmatpush.bf16.msra.mxu3 %v4792_v11  ;;  %v290_v32 = vmul.f32 %v5210_v28, %v276_v22  ;;  %v291_v33 = vmul.f32 %v5214_v30, %v277_v25  ;;  %v4771_v43 = vld [vmem:[%s5963_s3 + $0x40] sm:$0xff]  ;;  %v4826_v51 = vld [vmem:[%s5963_s3 + $0x1f8] sm:$0xff]  ;;  %v278_v52 = vld [vmem:[%s5182_s15 + $0x10] sm:$0xff] }
  0x19   : > { %482 = vmatpush.bf16.msra.mxu0 %v4767_v12  ;;  %v4779_v44 = vld [vmem:[%s5963_s3 + $0x80] sm:$0xff]  ;;  %v279_v53 = vld [vmem:[%s5182_s15 + $0x18] sm:$0xff]  ;;  %v4801_v54 = vld [vmem:[%s5963_s3 + $0x130] sm:$0xff]  ;;  %v292_v56 = vmul.f32 %v5210_v28, %v278_v52 }
  0x1a   : > { %495 = vmatpush.bf16.msra.mxu1 %v4775_v13  ;;  %v304_v38 = vadd.f32 %v5212_v29, %v290_v32  ;;  %v305_v39 = vadd.f32 %v5216_v31, %v291_v33  ;;  %v4787_v45 = vld [vmem:[%s5963_s3 + $0xc0] sm:$0xff]  ;;  %v4809_v55 = vld [vmem:[%s5963_s3 + $0x170] sm:$0xff]  ;;  %v293_v57 = vmul.f32 %v5214_v30, %v279_v53  ;;  %v4800_v60 = vld [vmem:[%s5963_s3 + $0x128] sm:$0xff] }
  0x1b   : > { %660 = vmatpush.bf16.msra.mxu2 %v4783_v14  ;;  %v4817_v58 = vld [vmem:[%s5963_s3 + $0x1b0] sm:$0xff]  ;;  %v306_v61 = vadd.f32 %v5212_v29, %v292_v56  ;;  %v4808_v63 = vld [vmem:[%s5963_s3 + $0x168] sm:$0xff]  ;;  %v4823_v22 = vld [vmem:[%s5963_s3 + $0x1e0] sm:$0xff] }
  0x1c   : > { %673 = vmatpush.bf16.msra.mxu3 %v4791_v15  ;;  %vm312_vm0 = vcmp.ge.f32.partialorder %v304_v38, 0.0  ;;  %v320_v40 = vmul.f32 0.2, %v304_v38  ;;  %vm313_vm1 = vcmp.ge.f32.partialorder %v305_v39, 0.0  ;;  %v321_v41 = vmul.f32 0.2, %v305_v39 }
  0x1d   : > { %483 = vmatpush.bf16.msra.mxu0 %v4766_v16  ;;  %v4825_v59 = vld [vmem:[%s5963_s3 + $0x1f0] sm:$0xff]  ;;  %v307_v62 = vadd.f32 %v5216_v31, %v293_v57  ;;  %v322_v6 = vmul.f32 0.2, %v306_v61  ;;  %v4816_v7 = vld [vmem:[%s5963_s3 + $0x1a8] sm:$0xff]  ;;  %vm314_vm2 = vcmp.ge.f32.partialorder %v306_v61, 0.0  ;;  %v4814_v32 = vld [vmem:[%s5963_s3 + $0x198] sm:$0xff] }
  0x1e   : > { %496 = vmatpush.bf16.msra.mxu1 %v4774_v17  ;;  %v328_v46 = vsel %vm312_vm0, %v304_v38, %v320_v40  ;;  %v329_v47 = vsel %vm313_vm1, %v305_v39, %v321_v41  ;;  %v4824_v8 = vld [vmem:[%s5963_s3 + $0x1e8] sm:$0xff]  ;;  %v4799_v17 = vld [vmem:[%s5963_s3 + $0x120] sm:$0xff]  ;;  %v4822_v33 = vld [vmem:[%s5963_s3 + $0x1d8] sm:$0xff] }
  0x1f   : > { %661 = vmatpush.bf16.msra.mxu2 %v4782_v18  ;;  %336 = vst [vmem:[#allocation2 + $0x30] sm:$0xff] %v328_v46  ;;  %vm315_vm3 = vcmp.ge.f32.partialorder %v307_v62, 0.0  ;;  %v330_v13 = vsel %vm314_vm2, %v306_v61, %v322_v6  ;;  %v323_v14 = vmul.f32 0.2, %v307_v62  ;;  %v4807_v18 = vld [vmem:[%s5963_s3 + $0x160] sm:$0xff]  ;;  %v4813_v40 = vld [vmem:[%s5963_s3 + $0x190] sm:$0xff] }
  0x20   : > { %674 = vmatpush.bf16.msra.mxu3 %v4790_v19  ;;  %337 = vst [vmem:[#allocation2] sm:$0xff] %v329_v47  ;;  %v4821_v41 = vld [vmem:[%s5963_s3 + $0x1d0] sm:$0xff]  ;;  %v4812_v46 = vld [vmem:[%s5963_s3 + $0x188] sm:$0xff]  ;;  %v4795_v56 = vld [vmem:[%s5963_s3 + $0x100] sm:$0xff] }
  0x21   : > { %484 = vmatpush.bf16.msra.mxu0 %v4765_v20  ;;  %338 = vst [vmem:[#allocation2 + $0x18] sm:$0xff] %v330_v13  ;;  %v331_v20 = vsel %vm315_vm3, %v307_v62, %v323_v14  ;;  %v4820_v47 = vld [vmem:[%s5963_s3 + $0x1c8] sm:$0xff]  ;;  %v4803_v57 = vld [vmem:[%s5963_s3 + $0x140] sm:$0xff]  ;;  %v4857_v13 = vld [vmem:[%s5963_s3 + $0x2f0] sm:$0xff] }
  0x22   : > { %497 = vmatpush.bf16.msra.mxu1 %v4773_v21  ;;  %v4815_v21 = vld [vmem:[%s5963_s3 + $0x1a0] sm:$0xff]  ;;  %339 = vst [vmem:[#allocation2 + $0x10] sm:$0xff] %v331_v20  ;;  %v4832_v14 = vld [vmem:[%s5963_s3 + $0x228] sm:$0xff] }
  0x23   : > { %662 = vmatpush.bf16.msra.mxu2 %v4781_v26  ;;  %v4798_v26 = vld [vmem:[%s5963_s3 + $0x118] sm:$0xff]  ;;  %v4819_v61 = vld [vmem:[%s5963_s3 + $0x1c0] sm:$0xff] }
  0x24   : > { %675 = vmatpush.bf16.msra.mxu3 %v4789_v27  ;;  %v4806_v27 = vld [vmem:[%s5963_s3 + $0x158] sm:$0xff]  ;;  %v4847_v20 = vld [vmem:[%s5963_s3 + $0x2a0] sm:$0xff] }
  0x25   : > { %485 = vmatpush.bf16.msra.mxu0 %v4764_v34  ;;  %v4797_v34 = vld [vmem:[%s5963_s3 + $0x110] sm:$0xff] }
  0x26   : > { %498 = vmatpush.bf16.msra.mxu1 %v4772_v35  ;;  %v346_v0 = vld [vmem:[#allocation2 + $0x30] sm:$0x7f] }
  0x27   : > { %663 = vmatpush.bf16.msra.mxu2 %v4780_v36  ;;  %v507_v1 = vld [vmem:[#allocation2 + $0x30] sm:$0xfe]  ;;  %v348_v2 = vpack.c.bf16 %v346_v0, %v346_v0  ;;  %v347_v3 = vld [vmem:[#allocation2] sm:$0x7f] }
  0x28   : > { %676 = vmatpush.bf16.msra.mxu3 %v4788_v37  ;;  %v509_v4 = vpack.c.bf16 %v507_v1, %v507_v1  ;;  %v508_v5 = vld [vmem:[#allocation2] sm:$0xfe]  ;;  %v349_v9 = vpack.c.bf16 %v347_v3, %v347_v3  ;;  %v855_v35 = vld [vmem:[#allocation2 + $0x30] sm:$0xf8]  ;;  %v857_v36 = vld [vmem:[#allocation2 + $0x18] sm:$0x3] }
  0x29   : > { %486 = vmatpush.bf16.msra.mxu0 %v4763_v42  ;;  %v510_v10 = vpack.c.bf16 %v508_v5, %v508_v5  ;;  %v4805_v37 = vld [vmem:[%s5963_s3 + $0x150] sm:$0xff]  ;;  %v856_v38 = vld [vmem:[#allocation2] sm:$0xf8]  ;;  %v859_v42 = vpack.c.bf16 %v857_v36, %v855_v35  ;;  %v4842_v3 = vld [vmem:[%s5963_s3 + $0x278] sm:$0xff] }
  0x2a   : > { %499 = vmatpush.bf16.msra.mxu1 %v4771_v43  ;;  %v546_v11 = vshrl.u32 %v509_v4, 16  ;;  %v548_v12 = vshll.u32 %v509_v4, 16  ;;  %v858_v39 = vld [vmem:[#allocation2 + $0x10] sm:$0x3]  ;;  %v4850_v4 = vld [vmem:[%s5963_s3 + $0x2b8] sm:$0xff] }
  0x2b   : > { %664 = vmatpush.bf16.msra.mxu2 %v4779_v44  ;;  %v553_v15 = vshrl.u32 %v510_v10, 16  ;;  %v555_v16 = vshll.u32 %v510_v10, 16  ;;  %v860_v43 = vpack.c.bf16 %v858_v39, %v856_v38  ;;  %v4796_v44 = vld [vmem:[%s5963_s3 + $0x108] sm:$0xff]  ;;  %v896_v52 = vshrl.u32 %v859_v42, 16  ;;  %v4858_v5 = vld [vmem:[%s5963_s3 + $0x2f8] sm:$0xff]  ;;  %v4833_v10 = vld [vmem:[%s5963_s3 + $0x230] sm:$0xff] }
  0x2c   : > { %677 = vmatpush.bf16.msra.mxu3 %v4787_v45  ;;  %487 = vmatmul.bf16.vlgmr.msra.gmra.mxu0 %v348_v2  ;;  %v550_v19 = vrot.slane %v548_v12, 1  ;;  %v4804_v45 = vld [vmem:[%s5963_s3 + $0x148] sm:$0xff]  ;;  %v899_v53 = vshll.u32 %v859_v42, 16  ;;  %v4834_v2 = vld [vmem:[%s5963_s3 + $0x238] sm:$0xff]  ;;  %v4849_v12 = vld [vmem:[%s5963_s3 + $0x2b0] sm:$0xff] }
  0x2d   : > { %827 = vmatpush.bf16.msrb.mxu0 %v4802_v48  ;;  %500 = vmatmul.bf16.vlgmr.msra.gmra.mxu1 %v349_v9  ;;  %v557_v23 = vrot.slane %v555_v16, 1  ;;  %v685_v48 = vld [vmem:[#allocation2 + $0x30] sm:$0xfc]  ;;  %v898_v62 = vrot.slane %v896_v52, 1  ;;  %v4848_v16 = vld [vmem:[%s5963_s3 + $0x2a8] sm:$0xff]  ;;  %v4827_v52 = vld [vmem:[%s5963_s3 + $0x200] sm:$0xff] }
  0x2e   : > { %840 = vmatpush.bf16.msrb.mxu1 %v4810_v49  ;;  %v551_v24 = vor.u32 %v550_v19, %v546_v11  ;;  %v687_v49 = vld [vmem:[#allocation2 + $0x18] sm:$0x1]  ;;  %v4841_v11 = vld [vmem:[%s5963_s3 + $0x270] sm:$0xff]  ;;  %v4839_v19 = vld [vmem:[%s5963_s3 + $0x260] sm:$0xff] }
  0x2f   : > { %1009 = vmatpush.bf16.msrb.mxu2 %v4818_v50  ;;  %v558_v25 = vor.u32 %v557_v23, %v553_v15  ;;  %v686_v50 = vld [vmem:[#allocation2] sm:$0xfc]  ;;  %v4840_v15 = vld [vmem:[%s5963_s3 + $0x268] sm:$0xff]  ;;  %v4838_v23 = vld [vmem:[%s5963_s3 + $0x258] sm:$0xff] }
  0x30   : > { %1022 = vmatpush.bf16.msrb.mxu3 %v4826_v51  ;;  %665 = vmatmul.bf16.vlgmr.msra.gmra.mxu2 %v551_v24  ;;  %v688_v51 = vld [vmem:[#allocation2 + $0x10] sm:$0x1]  ;;  %v4846_v24 = vld [vmem:[%s5963_s3 + $0x298] sm:$0xff] }
  0x31   : > { %828 = vmatpush.bf16.msrb.mxu0 %v4801_v54  ;;  %678 = vmatmul.bf16.vlgmr.msra.gmra.mxu3 %v558_v25  ;;  %v904_v54 = vshrl.u32 %v860_v43, 16  ;;  %v4854_v25 = vld [vmem:[%s5963_s3 + $0x2d8] sm:$0xff]  ;;  %v4837_v35 = vld [vmem:[%s5963_s3 + $0x250] sm:$0xff] }
  0x32   : > { %841 = vmatpush.bf16.msrb.mxu1 %v4809_v55  ;;  %v907_v55 = vshll.u32 %v860_v43, 16  ;;  %v4845_v38 = vld [vmem:[%s5963_s3 + $0x290] sm:$0xff] }
  0x33   : > { %1010 = vmatpush.bf16.msrb.mxu2 %v4817_v58  ;;  %v689_v58 = vpack.c.bf16 %v687_v49, %v685_v48  ;;  %v906_v0 = vrot.slane %v904_v54, 1  ;;  %v4853_v39 = vld [vmem:[%s5963_s3 + $0x2d0] sm:$0xff]  ;;  %v1221_v49 = vld [vmem:[#allocation2 + $0x18] sm:$0x1f] }
  0x34   : > { %1023 = vmatpush.bf16.msrb.mxu3 %v4825_v59  ;;  %v690_v59 = vpack.c.bf16 %v688_v51, %v686_v50  ;;  %v909_v1 = vrot.slane %v907_v55, 2  ;;  %v1219_v48 = vld [vmem:[#allocation2 + $0x30] sm:$0xc0]  ;;  %v1220_v50 = vld [vmem:[#allocation2] sm:$0xc0] }
  0x35   : > { %829 = vmatpush.bf16.msrb.mxu0 %v4800_v60  ;;  %v4811_v60 = vld [vmem:[%s5963_s3 + $0x180] sm:$0xff]  ;;  %v727_v6 = vrot.slane %v689_v58, 1  ;;  %v1222_v51 = vld [vmem:[#allocation2 + $0x10] sm:$0x1f] }
  0x36   : > { %842 = vmatpush.bf16.msrb.mxu1 %v4808_v63  ;;  %v901_v63 = vrot.slane %v899_v53, 2  ;;  %v910_v9 = vor.u32 %v909_v1, %v906_v0  ;;  %v4835_v53 = vld [vmem:[%s5963_s3 + $0x240] sm:$0xff]  ;;  %v4882_v0 = vld [vmem:[%s5963_s3 + $0x3b8] sm:$0xff] }
  0x37   : > { %1011 = vmatpush.bf16.msrb.mxu2 %v4816_v7  ;;  %v728_v7 = vrot.slane %v690_v59, 1  ;;  %v4843_v58 = vld [vmem:[%s5963_s3 + $0x280] sm:$0xff]  ;;  %v4890_v1 = vld [vmem:[%s5963_s3 + $0x3f8] sm:$0xff] }
  0x38   : > { %1024 = vmatpush.bf16.msrb.mxu3 %v4824_v8  ;;  %v902_v8 = vor.u32 %v901_v63, %v898_v62  ;;  %v4851_v59 = vld [vmem:[%s5963_s3 + $0x2c0] sm:$0xff]  ;;  %v4866_v62 = vld [vmem:[%s5963_s3 + $0x338] sm:$0xff] }
  0x39   : > { %830 = vmatpush.bf16.msrb.mxu0 %v4799_v17  ;;  %v4856_v17 = vld [vmem:[%s5963_s3 + $0x2e8] sm:$0xff]  ;;  %v4874_v63 = vld [vmem:[%s5963_s3 + $0x378] sm:$0xff] }
  0x3a   : > { %843 = vmatpush.bf16.msrb.mxu1 %v4807_v18  ;;  %v4831_v18 = vld [vmem:[%s5963_s3 + $0x220] sm:$0xff] }
  0x3b   : > { %1012 = vmatpush.bf16.msrb.mxu2 %v4815_v21  ;;  %v4855_v21 = vld [vmem:[%s5963_s3 + $0x2e0] sm:$0xff] }
  0x3c   : > { %1025 = vmatpush.bf16.msrb.mxu3 %v4823_v22  ;;  %v4830_v22 = vld [vmem:[%s5963_s3 + $0x218] sm:$0xff] }
  0x3d   : > { %831 = vmatpush.bf16.msrb.mxu0 %v4798_v26  ;;  %v1037_v26 = vld [vmem:[#allocation2 + $0x30] sm:$0xe0] }
  0x3e   : > { %844 = vmatpush.bf16.msrb.mxu1 %v4806_v27  ;;  %v1039_v27 = vld [vmem:[#allocation2 + $0x18] sm:$0xf] }
  0x3f   : > { %1013 = vmatpush.bf16.msrb.mxu2 %v4814_v32  ;;  %v1038_v32 = vld [vmem:[#allocation2] sm:$0xe0]  ;;  %v1041_v36 = vpack.c.bf16 %v1039_v27, %v1037_v26  ;;  %v1391_v27 = vld [vmem:[#allocation2 + $0x18] sm:$0x3f] }
  0x40   : > { %1026 = vmatpush.bf16.msrb.mxu3 %v4822_v33  ;;  %v1040_v33 = vld [vmem:[#allocation2 + $0x10] sm:$0xf] }
  0x41   : > { %832 = vmatpush.bf16.msrb.mxu0 %v4797_v34  ;;  %v4829_v34 = vld [vmem:[%s5963_s3 + $0x210] sm:$0xff]  ;;  %v1078_v42 = vshrl.u32 %v1041_v36, 16  ;;  %v1081_v43 = vshll.u32 %v1041_v36, 16 }
  0x42   : > { %845 = vmatpush.bf16.msrb.mxu1 %v4805_v37  ;;  %v1042_v37 = vpack.c.bf16 %v1040_v33, %v1038_v32  ;;  %v1390_v32 = vld [vmem:[#allocation2] sm:$0x80]  ;;  %v1392_v33 = vld [vmem:[#allocation2 + $0x10] sm:$0x3f] }
  0x43   : > { %1014 = vmatpush.bf16.msrb.mxu2 %v4813_v40  ;;  %v4828_v40 = vld [vmem:[%s5963_s3 + $0x208] sm:$0xff]  ;;  %v1080_v54 = vrot.slane %v1078_v42, 2  ;;  %v1083_v55 = vrot.slane %v1081_v43, 3  ;;  %v4861_v36 = vld [vmem:[%s5963_s3 + $0x310] sm:$0xff] }
  0x44   : > { %1027 = vmatpush.bf16.msrb.mxu3 %v4821_v41  ;;  %v4836_v41 = vld [vmem:[%s5963_s3 + $0x248] sm:$0xff]  ;;  %v4877_v42 = vld [vmem:[%s5963_s3 + $0x390] sm:$0xff] }
  0x45   : > { %833 = vmatpush.bf16.msrb.mxu0 %v4796_v44  ;;  %v1086_v44 = vshrl.u32 %v1042_v37, 16  ;;  %v4885_v43 = vld [vmem:[%s5963_s3 + $0x3d0] sm:$0xff] }
  0x46   : > { %846 = vmatpush.bf16.msrb.mxu1 %v4804_v45  ;;  %v1089_v45 = vshll.u32 %v1042_v37, 16  ;;  %v4869_v37 = vld [vmem:[%s5963_s3 + $0x350] sm:$0xff] }
  0x47   : > { %1015 = vmatpush.bf16.msrb.mxu2 %v4812_v46  ;;  %v4844_v46 = vld [vmem:[%s5963_s3 + $0x288] sm:$0xff] }
  0x48   : > { %1028 = vmatpush.bf16.msrb.mxu3 %v4820_v47  ;;  %v4852_v47 = vld [vmem:[%s5963_s3 + $0x2c8] sm:$0xff] }
  0x49   : > { %834 = vmatpush.bf16.msrb.mxu0 %v4795_v56  ;;  %v1088_v56 = vrot.slane %v1086_v44, 2 }
  0x4a   : > { %847 = vmatpush.bf16.msrb.mxu1 %v4803_v57  ;;  %v1091_v57 = vrot.slane %v1089_v45, 3 }
  0x4b   : > { %1016 = vmatpush.bf16.msrb.mxu2 %v4811_v60  ;;  %v1223_v60 = vpack.c.bf16 %v1221_v49, %v1219_v48 }
  0x4c   : > { %1029 = vmatpush.bf16.msrb.mxu3 %v4819_v61  ;;  %835 = vmatmul.bf16.vlgmr.msrb.gmra.mxu0 %v727_v6  ;;  %v1224_v61 = vpack.c.bf16 %v1222_v51, %v1220_v50  ;;  %v4865_v6 = vld [vmem:[%s5963_s3 + $0x330] sm:$0xff] }
  0x4d   : > { %1191 = vmatpush.bf16.msra.mxu0 %v4834_v2  ;;  %848 = vmatmul.bf16.vlgmr.msrb.gmra.mxu1 %v728_v7  ;;  %v1084_v2 = vor.u32 %v1083_v55, %v1080_v54  ;;  %v4873_v7 = vld [vmem:[%s5963_s3 + $0x370] sm:$0xff]  ;;  %v4859_v54 = vld [vmem:[%s5963_s3 + $0x300] sm:$0xff] }
  0x4e   : > { %1204 = vmatpush.bf16.msra.mxu1 %v4842_v3  ;;  %1017 = vmatmul.bf16.vlgmr.msrb.gmra.mxu2 %v902_v8  ;;  %v1092_v3 = vor.u32 %v1091_v57, %v1088_v56  ;;  %v4881_v8 = vld [vmem:[%s5963_s3 + $0x3b0] sm:$0xff]  ;;  %v4867_v55 = vld [vmem:[%s5963_s3 + $0x340] sm:$0xff] }
  0x4f   : > { %1361 = vmatpush.bf16.msra.mxu2 %v4850_v4  ;;  %1030 = vmatmul.bf16.vlgmr.msrb.gmra.mxu3 %v910_v9  ;;  %v1261_v4 = vrot.slane %v1223_v60, 3  ;;  %v4889_v9 = vld [vmem:[%s5963_s3 + $0x3f0] sm:$0xff]  ;;  %v4875_v60 = vld [vmem:[%s5963_s3 + $0x380] sm:$0xff] }
  0x50   : > { %1374 = vmatpush.bf16.msra.mxu3 %v4858_v5  ;;  %v1262_v5 = vrot.slane %v1224_v61, 3  ;;  %v4883_v61 = vld [vmem:[%s5963_s3 + $0x3c0] sm:$0xff] }
  0x51   : > { %1192 = vmatpush.bf16.msra.mxu0 %v4833_v10  ;;  %v4864_v10 = vld [vmem:[%s5963_s3 + $0x328] sm:$0xff] }
  0x52   : > { %1205 = vmatpush.bf16.msra.mxu1 %v4841_v11  ;;  %v4872_v11 = vld [vmem:[%s5963_s3 + $0x368] sm:$0xff] }
  0x53   : > { %1362 = vmatpush.bf16.msra.mxu2 %v4849_v12  ;;  %v4880_v12 = vld [vmem:[%s5963_s3 + $0x3a8] sm:$0xff] }
  0x54   : > { %1375 = vmatpush.bf16.msra.mxu3 %v4857_v13  ;;  %v4888_v13 = vld [vmem:[%s5963_s3 + $0x3e8] sm:$0xff] }
  0x55   : > { %1193 = vmatpush.bf16.msra.mxu0 %v4832_v14  ;;  %v4863_v14 = vld [vmem:[%s5963_s3 + $0x320] sm:$0xff] }
  0x56   : > { %1206 = vmatpush.bf16.msra.mxu1 %v4840_v15  ;;  %v4871_v15 = vld [vmem:[%s5963_s3 + $0x360] sm:$0xff] }
  0x57   : > { %1363 = vmatpush.bf16.msra.mxu2 %v4848_v16  ;;  %v4879_v16 = vld [vmem:[%s5963_s3 + $0x3a0] sm:$0xff] }
  0x58   : > { %1376 = vmatpush.bf16.msra.mxu3 %v4856_v17  ;;  %v4887_v17 = vld [vmem:[%s5963_s3 + $0x3e0] sm:$0xff] }
  0x59   : > { %1194 = vmatpush.bf16.msra.mxu0 %v4831_v18  ;;  %v4862_v18 = vld [vmem:[%s5963_s3 + $0x318] sm:$0xff] }
  0x5a   : > { %1207 = vmatpush.bf16.msra.mxu1 %v4839_v19  ;;  %v4870_v19 = vld [vmem:[%s5963_s3 + $0x358] sm:$0xff] }
  0x5b   : > { %1364 = vmatpush.bf16.msra.mxu2 %v4847_v20  ;;  %v280_v20 = vld [vmem:[%s5182_s15 + $0x20] sm:$0xff] }
  0x5c   : > { %1377 = vmatpush.bf16.msra.mxu3 %v4855_v21  ;;  %v281_v21 = vld [vmem:[%s5182_s15 + $0x28] sm:$0xff] }
  0x5d   : > { %1195 = vmatpush.bf16.msra.mxu0 %v4830_v22  ;;  %v4878_v22 = vld [vmem:[%s5963_s3 + $0x398] sm:$0xff]  ;;  %v295_v26 = vmul.f32 %v5214_v30, %v281_v21 }
  0x5e   : > { %1208 = vmatpush.bf16.msra.mxu1 %v4838_v23  ;;  %v4886_v23 = vld [vmem:[%s5963_s3 + $0x3d8] sm:$0xff] }
  0x5f   : > { %1365 = vmatpush.bf16.msra.mxu2 %v4846_v24  ;;  %v1389_v24 = vld [vmem:[#allocation2 + $0x30] sm:$0x80]  ;;  %v4902_v21 = vld [vmem:[%s5963_s3 + $0x458] sm:$0xff] }
  0x60   : > { %1378 = vmatpush.bf16.msra.mxu3 %v4854_v25  ;;  %v294_v25 = vmul.f32 %v5210_v28, %v280_v20  ;;  %v4894_v20 = vld [vmem:[%s5963_s3 + $0x418] sm:$0xff] }
  0x61   : > { %1196 = vmatpush.bf16.msra.mxu0 %v4829_v34 }
  0x62   : > { %1209 = vmatpush.bf16.msra.mxu1 %v4837_v35  ;;  %v308_v34 = vadd.f32 %v5212_v29, %v294_v25  ;;  %v309_v35 = vadd.f32 %v5216_v31, %v295_v26  ;;  %v1904_v26 = vld [vmem:[#allocation2 + $0x10] sm:$0xf8] }
  0x63   : > { %1366 = vmatpush.bf16.msra.mxu2 %v4845_v38  ;;  %v1393_v38 = vpack.c.bf16 %v1391_v27, %v1389_v24  ;;  %v1903_v24 = vld [vmem:[#allocation2 + $0x18] sm:$0xf8] }
  0x64   : > { %1379 = vmatpush.bf16.msra.mxu3 %v4853_v39  ;;  %v1394_v39 = vpack.c.bf16 %v1392_v33, %v1390_v32  ;;  %vm316_vm4 = vcmp.ge.f32.partialorder %v308_v34, 0.0  ;;  %vm317_vm5 = vcmp.ge.f32.partialorder %v309_v35, 0.0  ;;  %v4893_v32 = vld [vmem:[%s5963_s3 + $0x410] sm:$0xff] }
  0x65   : > { %1197 = vmatpush.bf16.msra.mxu0 %v4828_v40  ;;  %v324_v40 = vmul.f32 0.2, %v308_v34  ;;  %v1430_v48 = vshrl.u32 %v1393_v38, 16  ;;  %v1433_v49 = vshll.u32 %v1393_v38, 16  ;;  %v4901_v33 = vld [vmem:[%s5963_s3 + $0x450] sm:$0xff]  ;;  %v4892_v38 = vld [vmem:[%s5963_s3 + $0x408] sm:$0xff] }
  0x66   : > { %1210 = vmatpush.bf16.msra.mxu1 %v4836_v41  ;;  %v325_v41 = vmul.f32 0.2, %v309_v35  ;;  %v1438_v50 = vshrl.u32 %v1394_v39, 16  ;;  %v1441_v51 = vshll.u32 %v1394_v39, 16  ;;  %v4900_v39 = vld [vmem:[%s5963_s3 + $0x448] sm:$0xff] }
  0x67   : > { %1367 = vmatpush.bf16.msra.mxu2 %v4844_v46  ;;  %v332_v44 = vsel %vm316_vm4, %v308_v34, %v324_v40  ;;  %v4860_v46 = vld [vmem:[%s5963_s3 + $0x308] sm:$0xff]  ;;  %v1432_v56 = vrot.slane %v1430_v48, 3  ;;  %v1435_v57 = vrot.slane %v1433_v49, 4  ;;  %v4909_v34 = vld [vmem:[%s5963_s3 + $0x490] sm:$0xff] }
  0x68   : > { %1380 = vmatpush.bf16.msra.mxu3 %v4852_v47  ;;  %v333_v45 = vsel %vm317_vm5, %v309_v35, %v325_v41  ;;  %340 = vst [vmem:[#allocation2 + $0x8] sm:$0xff] %v332_v44  ;;  %v4868_v47 = vld [vmem:[%s5963_s3 + $0x348] sm:$0xff]  ;;  %v4917_v35 = vld [vmem:[%s5963_s3 + $0x4d0] sm:$0xff] }
  0x69   : > { %1198 = vmatpush.bf16.msra.mxu0 %v4827_v52  ;;  %341 = vst [vmem:[#allocation2 + $0x20] sm:$0xff] %v333_v45  ;;  %v4876_v52 = vld [vmem:[%s5963_s3 + $0x388] sm:$0xff]  ;;  %v1734_v44 = vld [vmem:[#allocation2 + $0x10] sm:$0xfc] }
  0x6a   : > { %1211 = vmatpush.bf16.msra.mxu1 %v4835_v53  ;;  %v4884_v53 = vld [vmem:[%s5963_s3 + $0x3c8] sm:$0xff] }
  0x6b   : > { %1368 = vmatpush.bf16.msra.mxu2 %v4843_v58  ;;  %v1440_v58 = vrot.slane %v1438_v50, 3  ;;  %v4908_v40 = vld [vmem:[%s5963_s3 + $0x488] sm:$0xff]  ;;  %v4891_v50 = vld [vmem:[%s5963_s3 + $0x400] sm:$0xff] }
  0x6c   : > { %1381 = vmatpush.bf16.msra.mxu3 %v4851_v59  ;;  %1199 = vmatmul.bf16.vlgmr.msra.gmra.mxu0 %v1084_v2  ;;  %v1443_v59 = vrot.slane %v1441_v51, 4  ;;  %v4914_v2 = vld [vmem:[%s5963_s3 + $0x4b8] sm:$0xff]  ;;  %v4916_v41 = vld [vmem:[%s5963_s3 + $0x4c8] sm:$0xff]  ;;  %v4899_v51 = vld [vmem:[%s5963_s3 + $0x440] sm:$0xff] }
  0x6d   : > { %1543 = vmatpush.bf16.msrb.mxu0 %v4866_v62  ;;  %1212 = vmatmul.bf16.vlgmr.msra.gmra.mxu1 %v1092_v3  ;;  %v4898_v62 = vld [vmem:[%s5963_s3 + $0x438] sm:$0xff] }
  0x6e   : > { %1556 = vmatpush.bf16.msrb.mxu1 %v4874_v63  ;;  %1369 = vmatmul.bf16.vlgmr.msra.gmra.mxu2 %v1261_v4  ;;  %v4906_v63 = vld [vmem:[%s5963_s3 + $0x478] sm:$0xff]  ;;  %v1436_v4 = vor.u32 %v1435_v57, %v1432_v56 }
  0x6f   : > { %1705 = vmatpush.bf16.msrb.mxu2 %v4882_v0  ;;  %1382 = vmatmul.bf16.vlgmr.msra.gmra.mxu3 %v1262_v5  ;;  %v1571_v0 = vld [vmem:[#allocation2 + $0x18] sm:$0x7f]  ;;  %v1444_v5 = vor.u32 %v1443_v59, %v1440_v58  ;;  %v1905_v25 = vld [vmem:[#allocation2 + $0x8] sm:$0x3] }
  0x70   : > { %1718 = vmatpush.bf16.msrb.mxu3 %v4890_v1  ;;  %v1572_v1 = vld [vmem:[#allocation2 + $0x10] sm:$0x7f]  ;;  %v4922_v3 = vld [vmem:[%s5963_s3 + $0x4f8] sm:$0xff]  ;;  %v1906_v27 = vld [vmem:[#allocation2 + $0x20] sm:$0x3] }
  0x71   : > { %1544 = vmatpush.bf16.msrb.mxu0 %v4865_v6  ;;  %v1573_v6 = vpack.c.bf16 %v1571_v0, %v1571_v0  ;;  %v1736_v45 = vld [vmem:[#allocation2 + $0x20] sm:$0x1] }
  0x72   : > { %1557 = vmatpush.bf16.msrb.mxu1 %v4873_v7  ;;  %v1574_v7 = vpack.c.bf16 %v1572_v1, %v1572_v1 }
  0x73   : > { %1706 = vmatpush.bf16.msrb.mxu2 %v4881_v8  ;;  %v4897_v8 = vld [vmem:[%s5963_s3 + $0x430] sm:$0xff] }
  0x74   : > { %1719 = vmatpush.bf16.msrb.mxu3 %v4889_v9  ;;  %v4905_v9 = vld [vmem:[%s5963_s3 + $0x470] sm:$0xff] }
  0x75   : > { %1545 = vmatpush.bf16.msrb.mxu0 %v4864_v10  ;;  %v4913_v10 = vld [vmem:[%s5963_s3 + $0x4b0] sm:$0xff] }
  0x76   : > { %1558 = vmatpush.bf16.msrb.mxu1 %v4872_v11  ;;  %v4921_v11 = vld [vmem:[%s5963_s3 + $0x4f0] sm:$0xff] }
  0x77   : > { %1707 = vmatpush.bf16.msrb.mxu2 %v4880_v12  ;;  %v4896_v12 = vld [vmem:[%s5963_s3 + $0x428] sm:$0xff] }
  0x78   : > { %1720 = vmatpush.bf16.msrb.mxu3 %v4888_v13  ;;  %v4904_v13 = vld [vmem:[%s5963_s3 + $0x468] sm:$0xff] }
  0x79   : > { %1546 = vmatpush.bf16.msrb.mxu0 %v4863_v14  ;;  %v4912_v14 = vld [vmem:[%s5963_s3 + $0x4a8] sm:$0xff] }
  0x7a   : > { %1559 = vmatpush.bf16.msrb.mxu1 %v4871_v15  ;;  %v4920_v15 = vld [vmem:[%s5963_s3 + $0x4e8] sm:$0xff] }
  0x7b   : > { %1708 = vmatpush.bf16.msrb.mxu2 %v4879_v16  ;;  %v4895_v16 = vld [vmem:[%s5963_s3 + $0x420] sm:$0xff] }
  0x7c   : > { %1721 = vmatpush.bf16.msrb.mxu3 %v4887_v17  ;;  %v4903_v17 = vld [vmem:[%s5963_s3 + $0x460] sm:$0xff] }
  0x7d   : > { %1547 = vmatpush.bf16.msrb.mxu0 %v4862_v18  ;;  %v4911_v18 = vld [vmem:[%s5963_s3 + $0x4a0] sm:$0xff] }
  0x7e   : > { %1560 = vmatpush.bf16.msrb.mxu1 %v4870_v19  ;;  %v4919_v19 = vld [vmem:[%s5963_s3 + $0x4e0] sm:$0xff] }
  0x7f   : > { %1709 = vmatpush.bf16.msrb.mxu2 %v4878_v22  ;;  %v4910_v22 = vld [vmem:[%s5963_s3 + $0x498] sm:$0xff] }
  0x80   : > { %1722 = vmatpush.bf16.msrb.mxu3 %v4886_v23  ;;  %v4918_v23 = vld [vmem:[%s5963_s3 + $0x4d8] sm:$0xff] }
  0x81   : > { %1548 = vmatpush.bf16.msrb.mxu0 %v4861_v36  ;;  %v1907_v36 = vpack.c.bf16 %v1905_v25, %v1903_v24  ;;  %v4942_v25 = vld [vmem:[%s5963_s3 + $0x598] sm:$0xff] }
  0x82   : > { %1561 = vmatpush.bf16.msrb.mxu1 %v4869_v37  ;;  %v1908_v37 = vpack.c.bf16 %v1906_v27, %v1904_v26  ;;  %v4950_v26 = vld [vmem:[%s5963_s3 + $0x5d8] sm:$0xff] }
  0x83   : > { %1710 = vmatpush.bf16.msrb.mxu2 %v4877_v42  ;;  %v1733_v42 = vld [vmem:[#allocation2 + $0x18] sm:$0xfc] }
  0x84   : > { %1723 = vmatpush.bf16.msrb.mxu3 %v4885_v43  ;;  %v1735_v43 = vld [vmem:[#allocation2 + $0x8] sm:$0x1]  ;;  %v1952_v48 = vshrl.u32 %v1908_v37, 16  ;;  %v1955_v49 = vshll.u32 %v1908_v37, 16  ;;  %v4925_v37 = vld [vmem:[%s5963_s3 + $0x510] sm:$0xff] }
  0x85   : > { %1549 = vmatpush.bf16.msrb.mxu0 %v4860_v46  ;;  %v1944_v46 = vshrl.u32 %v1907_v36, 16 }
  0x86   : > { %1562 = vmatpush.bf16.msrb.mxu1 %v4868_v47  ;;  %v1947_v47 = vshll.u32 %v1907_v36, 16  ;;  %v1954_v58 = vrot.slane %v1952_v48, 1  ;;  %v1957_v59 = vrot.slane %v1955_v49, 2  ;;  %v2085_v48 = vld [vmem:[#allocation2 + $0x18] sm:$0xf0] }
  0x87   : > { %1711 = vmatpush.bf16.msrb.mxu2 %v4876_v52  ;;  %v1737_v52 = vpack.c.bf16 %v1735_v43, %v1733_v42  ;;  %v1946_v56 = vrot.slane %v1944_v46, 1  ;;  %v4924_v43 = vld [vmem:[%s5963_s3 + $0x508] sm:$0xff] }
  0x88   : > { %1724 = vmatpush.bf16.msrb.mxu3 %v4884_v53  ;;  %v1738_v53 = vpack.c.bf16 %v1736_v45, %v1734_v44  ;;  %v1949_v57 = vrot.slane %v1947_v47, 2  ;;  %v4932_v44 = vld [vmem:[%s5963_s3 + $0x548] sm:$0xff] }
  0x89   : > { %1550 = vmatpush.bf16.msrb.mxu0 %v4859_v54  ;;  %v4907_v54 = vld [vmem:[%s5963_s3 + $0x480] sm:$0xff]  ;;  %v1775_v0 = vrot.slane %v1737_v52, 1  ;;  %v4940_v45 = vld [vmem:[%s5963_s3 + $0x588] sm:$0xff] }
  0x8a   : > { %1563 = vmatpush.bf16.msrb.mxu1 %v4867_v55  ;;  %v4915_v55 = vld [vmem:[%s5963_s3 + $0x4c0] sm:$0xff]  ;;  %v1776_v1 = vrot.slane %v1738_v53, 1  ;;  %v4948_v46 = vld [vmem:[%s5963_s3 + $0x5c8] sm:$0xff] }
  0x8b   : > { %1712 = vmatpush.bf16.msrb.mxu2 %v4875_v60  ;;  %v4930_v60 = vld [vmem:[%s5963_s3 + $0x538] sm:$0xff]  ;;  %v2087_v49 = vld [vmem:[#allocation2 + $0x8] sm:$0x7]  ;;  %v2088_v52 = vld [vmem:[#allocation2 + $0x20] sm:$0x7] }
  0x8c   : > { %1725 = vmatpush.bf16.msrb.mxu3 %v4883_v61  ;;  %1551 = vmatmul.bf16.vlgmr.msrb.gmra.mxu0 %v1436_v4  ;;  %v4938_v61 = vld [vmem:[%s5963_s3 + $0x578] sm:$0xff]  ;;  %v4929_v4 = vld [vmem:[%s5963_s3 + $0x530] sm:$0xff] }
  0x8d   : > { %1875 = vmatpush.bf16.msra.mxu0 %v4898_v62  ;;  %1564 = vmatmul.bf16.vlgmr.msrb.gmra.mxu1 %v1444_v5  ;;  %v4946_v62 = vld [vmem:[%s5963_s3 + $0x5b8] sm:$0xff]  ;;  %v4937_v5 = vld [vmem:[%s5963_s3 + $0x570] sm:$0xff] }
  0x8e   : > { %1888 = vmatpush.bf16.msra.mxu1 %v4906_v63  ;;  %1713 = vmatmul.bf16.vlgmr.msrb.gmra.mxu2 %v1573_v6  ;;  %v4954_v63 = vld [vmem:[%s5963_s3 + $0x5f8] sm:$0xff]  ;;  %v5069_v6 = vmov 0.0  }
  0x8f   : > { %2057 = vmatpush.bf16.msra.mxu2 %v4914_v2  ;;  %1726 = vmatmul.bf16.vlgmr.msrb.gmra.mxu3 %v1574_v7  ;;  %v1950_v2 = vor.u32 %v1949_v57, %v1946_v56  ;;  %344 = vst [vmem:[#allocation3] sm:$0xff] %v5069_v6  ;;  %v4945_v7 = vld [vmem:[%s5963_s3 + $0x5b0] sm:$0xff]  ;;  %v4923_v57 = vld [vmem:[%s5963_s3 + $0x500] sm:$0xff] }
  0x90   : > { %2070 = vmatpush.bf16.msra.mxu3 %v4922_v3  ;;  %v1958_v3 = vor.u32 %v1957_v59, %v1954_v58  ;;  %345 = vst [vmem:[#allocation3 + $0x8] sm:$0x3] %v5069_v6  ;;  %v4931_v58 = vld [vmem:[%s5963_s3 + $0x540] sm:$0xff]  ;;  %v4962_v6 = vld [vmem:[%s5963_s3 + $0x638] sm:$0xff] }
  0x91   : > { %1876 = vmatpush.bf16.msra.mxu0 %v4897_v8  ;;  %v4953_v8 = vld [vmem:[%s5963_s3 + $0x5f0] sm:$0xff]  ;;  %v4939_v59 = vld [vmem:[%s5963_s3 + $0x580] sm:$0xff] }
  0x92   : > { %1889 = vmatpush.bf16.msra.mxu1 %v4905_v9  ;;  %v4928_v9 = vld [vmem:[%s5963_s3 + $0x528] sm:$0xff] }
  0x93   : > { %2058 = vmatpush.bf16.msra.mxu2 %v4913_v10  ;;  %v4936_v10 = vld [vmem:[%s5963_s3 + $0x568] sm:$0xff] }
  0x94   : > { %2071 = vmatpush.bf16.msra.mxu3 %v4921_v11  ;;  %v4944_v11 = vld [vmem:[%s5963_s3 + $0x5a8] sm:$0xff] }
  0x95   : > { %1877 = vmatpush.bf16.msra.mxu0 %v4896_v12  ;;  %v4952_v12 = vld [vmem:[%s5963_s3 + $0x5e8] sm:$0xff] }
  0x96   : > { %1890 = vmatpush.bf16.msra.mxu1 %v4904_v13  ;;  %v5682_v13 = vld [vmem:[%s5964_s4] ss:$0 sm:$0xff] }
  0x97   : > { %2059 = vmatpush.bf16.msra.mxu2 %v4912_v14  ;;  %v4927_v14 = vld [vmem:[%s5963_s3 + $0x520] sm:$0xff] }
  0x98   : > { %2072 = vmatpush.bf16.msra.mxu3 %v4920_v15  ;;  %v4935_v15 = vld [vmem:[%s5963_s3 + $0x560] sm:$0xff] }
  0x99   : > { %1878 = vmatpush.bf16.msra.mxu0 %v4895_v16  ;;  %v3130_v16 = vld [vmem:[#allocation3 + $0x8] sm:$0x3] }
  0x9a   : > { %1891 = vmatpush.bf16.msra.mxu1 %v4903_v17  ;;  %v4943_v17 = vld [vmem:[%s5963_s3 + $0x5a0] sm:$0xff] }
  0x9b   : > { %2060 = vmatpush.bf16.msra.mxu2 %v4911_v18  ;;  %v4951_v18 = vld [vmem:[%s5963_s3 + $0x5e0] sm:$0xff] }
  0x9c   : > { %2073 = vmatpush.bf16.msra.mxu3 %v4919_v19  ;;  %v3136_v19 = vadd.f32 %v5682_v13, %v3130_v16 }
  0x9d   : > { %1879 = vmatpush.bf16.msra.mxu0 %v4894_v20 }
  0x9e   : > { %1892 = vmatpush.bf16.msra.mxu1 %v4902_v21  ;;  %3138 = vst [vmem:[%s5693_s17 + $0x8] sm:$0x3] %v3136_v19  ;;  %v4926_v21 = vld [vmem:[%s5963_s3 + $0x518] sm:$0xff]  ;;  %v4977_v19 = vld [vmem:[%s5963_s3 + $0x6b0] sm:$0xff] }
  0x9f   : > { %2061 = vmatpush.bf16.msra.mxu2 %v4910_v22  ;;  %v4934_v22 = vld [vmem:[%s5963_s3 + $0x558] sm:$0xff] }
  0xa0   : > { %2074 = vmatpush.bf16.msra.mxu3 %v4918_v23  ;;  %v350_v23 = vld [vmem:[#allocation3] sm:$0x7f] }
  0xa1   : > { %1880 = vmatpush.bf16.msra.mxu0 %v4893_v32  ;;  %v2255_v32 = vld [vmem:[#allocation2 + $0x18] sm:$0xe0] }
  0xa2   : > { %1893 = vmatpush.bf16.msra.mxu1 %v4901_v33  ;;  %v2257_v33 = vld [vmem:[#allocation2 + $0x8] sm:$0xf] }
  0xa3   : > { %2062 = vmatpush.bf16.msra.mxu2 %v4909_v34  ;;  %v2256_v34 = vld [vmem:[#allocation2 + $0x10] sm:$0xe0] }
  0xa4   : > { %2075 = vmatpush.bf16.msra.mxu3 %v4917_v35  ;;  %v2258_v35 = vld [vmem:[#allocation2 + $0x20] sm:$0xf] }
  0xa5   : > { %1881 = vmatpush.bf16.msra.mxu0 %v4892_v38  ;;  %v4933_v38 = vld [vmem:[%s5963_s3 + $0x550] sm:$0xff]  ;;  %v2260_v42 = vpack.c.bf16 %v2258_v35, %v2256_v34  ;;  %v4959_v34 = vld [vmem:[%s5963_s3 + $0x620] sm:$0xff] }
  0xa6   : > { %1894 = vmatpush.bf16.msra.mxu1 %v4900_v39  ;;  %v4941_v39 = vld [vmem:[%s5963_s3 + $0x590] sm:$0xff]  ;;  %v4967_v35 = vld [vmem:[%s5963_s3 + $0x660] sm:$0xff] }
  0xa7   : > { %2063 = vmatpush.bf16.msra.mxu2 %v4908_v40  ;;  %v4949_v40 = vld [vmem:[%s5963_s3 + $0x5d0] sm:$0xff]  ;;  %v2307_v56 = vshll.u32 %v2260_v42, 16 }
  0xa8   : > { %2076 = vmatpush.bf16.msra.mxu3 %v4916_v41  ;;  %v2259_v41 = vpack.c.bf16 %v2257_v33, %v2255_v32 }
  0xa9   : > { %1882 = vmatpush.bf16.msra.mxu0 %v4891_v50  ;;  %v488_v20 = vpop.f32.mrf.mxu0  ;;  %v2086_v50 = vld [vmem:[#allocation2 + $0x10] sm:$0xf0] }
  0xaa   : > { %1895 = vmatpush.bf16.msra.mxu1 %v4899_v51  ;;  %v501_v24 = vpop.f32.mrf.mxu1  ;;  %v2296_v53 = vshrl.u32 %v2259_v41, 16 }
  0xab   : > { %2064 = vmatpush.bf16.msra.mxu2 %v4907_v54  ;;  %v502_v27 = vadd.f32 %v501_v24, %v488_v20  ;;  %v2299_v54 = vshll.u32 %v2259_v41, 16  ;;  %v4985_v20 = vld [vmem:[%s5963_s3 + $0x6f0] sm:$0xff]  ;;  %v4968_v24 = vld [vmem:[%s5963_s3 + $0x668] sm:$0xff]  ;;  %v283_v41 = vld [vmem:[%s5182_s15 + $0x38] sm:$0x1] }
  0xac   : > { %2077 = vmatpush.bf16.msra.mxu3 %v4915_v55  ;;  %1883 = vmatmul.bf16.vlgmr.msra.gmra.mxu0 %v1775_v0  ;;  %v2304_v55 = vshrl.u32 %v2260_v42, 16  ;;  %v2298_v0 = vrot.slane %v2296_v53, 2  ;;  %v4958_v42 = vld [vmem:[%s5963_s3 + $0x618] sm:$0xff] }
  0xad   : > { %2227 = vmatpush.bf16.msrb.mxu0 %v4930_v60  ;;  %1896 = vmatmul.bf16.vlgmr.msra.gmra.mxu1 %v1776_v1  ;;  %v505_v36 = vadd.f32 %v502_v27, %v350_v23  ;;  %v4947_v60 = vld [vmem:[%s5963_s3 + $0x5c0] sm:$0xff]  ;;  %v2301_v1 = vrot.slane %v2299_v54, 3  ;;  %v4960_v23 = vld [vmem:[%s5963_s3 + $0x628] sm:$0xff] }
  0xae   : > { %2240 = vmatpush.bf16.msrb.mxu1 %v4938_v61  ;;  %2065 = vmatmul.bf16.vlgmr.msra.gmra.mxu2 %v1950_v2  ;;  %v2089_v61 = vpack.c.bf16 %v2087_v49, %v2085_v48  ;;  %v2306_v2 = vrot.slane %v2304_v55, 2  ;;  %v2439_v48 = vld [vmem:[#allocation2 + $0x8] sm:$0x3f]  ;;  %v4982_v49 = vld [vmem:[%s5963_s3 + $0x6d8] sm:$0xff] }
  0xaf   : > { %2409 = vmatpush.bf16.msrb.mxu2 %v4946_v62  ;;  %2078 = vmatmul.bf16.vlgmr.msra.gmra.mxu3 %v1958_v3  ;;  %506 = vst [vmem:[#allocation3] sm:$0x7f] %v505_v36  ;;  %v2090_v62 = vpack.c.bf16 %v2088_v52, %v2086_v50  ;;  %v2309_v3 = vrot.slane %v2307_v56, 3  ;;  %v2438_v50 = vld [vmem:[#allocation2 + $0x10] sm:$0x80] }
  0xb0   : > { %2422 = vmatpush.bf16.msrb.mxu3 %v4954_v63 }
  0xb1   : > { %2228 = vmatpush.bf16.msrb.mxu0 %v4929_v4  ;;  %v490_v47 = vpop.f32.mrf.mxu0  ;;  %v2310_v16 = vor.u32 %v2309_v3, %v2306_v2  ;;  %v4956_v3 = vld [vmem:[%s5963_s3 + $0x608] sm:$0xff] }
  0xb2   : > { %2241 = vmatpush.bf16.msrb.mxu1 %v4937_v5  ;;  %v503_v51 = vpop.f32.mrf.mxu1  ;;  %v2437_v47 = vld [vmem:[#allocation2 + $0x18] sm:$0x80] }
  0xb3   : > { %2410 = vmatpush.bf16.msrb.mxu2 %v4945_v7  ;;  %v666_v4 = vpop.f32.mrf.mxu2  ;;  %v4970_v7 = vld [vmem:[%s5963_s3 + $0x678] sm:$0xff]  ;;  %v2440_v51 = vld [vmem:[#allocation2 + $0x20] sm:$0x3f] }
  0xb4   : > { %2423 = vmatpush.bf16.msrb.mxu3 %v4953_v8  ;;  %v679_v5 = vpop.f32.mrf.mxu3 }
  0xb5   : > { %2229 = vmatpush.bf16.msrb.mxu0 %v4928_v9  ;;  %v680_v8 = vadd.f32 %v679_v5, %v666_v4  ;;  %v4978_v9 = vld [vmem:[%s5963_s3 + $0x6b8] sm:$0xff]  ;;  %v4964_v4 = vld [vmem:[%s5963_s3 + $0x648] sm:$0xff] }
  0xb6   : > { %2242 = vmatpush.bf16.msrb.mxu1 %v4936_v10  ;;  %v511_v63 = vld [vmem:[#allocation3] sm:$0x7f]  ;;  %v4986_v10 = vld [vmem:[%s5963_s3 + $0x6f8] sm:$0xff] }
  0xb7   : > { %2411 = vmatpush.bf16.msrb.mxu2 %v4944_v11  ;;  %v2127_v11 = vrot.slane %v2089_v61, 2 }
  0xb8   : > { %2424 = vmatpush.bf16.msrb.mxu3 %v4952_v12  ;;  %v2128_v12 = vrot.slane %v2090_v62, 2  ;;  %v4981_v62 = vld [vmem:[%s5963_s3 + $0x6d0] sm:$0xff] }
  0xb9   : > { %2230 = vmatpush.bf16.msrb.mxu0 %v4927_v14  ;;  %v683_v14 = vadd.f32 %v680_v8, %v511_v63 }
  0xba   : > { %2243 = vmatpush.bf16.msrb.mxu1 %v4935_v15  ;;  %v2302_v15 = vor.u32 %v2301_v1, %v2298_v0 }
  0xbb   : > { %2412 = vmatpush.bf16.msrb.mxu2 %v4943_v17  ;;  %v4961_v17 = vld [vmem:[%s5963_s3 + $0x630] sm:$0xff]  ;;  %684 = vst [vmem:[#allocation3] sm:$0x7f] %v683_v14  ;;  %v4955_v14 = vld [vmem:[%s5963_s3 + $0x600] sm:$0xff] }
  0xbc   : > { %2425 = vmatpush.bf16.msrb.mxu3 %v4951_v18  ;;  %v4969_v18 = vld [vmem:[%s5963_s3 + $0x670] sm:$0xff] }
  0xbd   : > { %2231 = vmatpush.bf16.msrb.mxu0 %v4926_v21  ;;  %v668_v21 = vpop.f32.mrf.mxu2 }
  0xbe   : > { %2244 = vmatpush.bf16.msrb.mxu1 %v4934_v22  ;;  %v681_v22 = vpop.f32.mrf.mxu3  ;;  %v4979_v21 = vld [vmem:[%s5963_s3 + $0x6c0] sm:$0xff] }
  0xbf   : > { %2413 = vmatpush.bf16.msrb.mxu2 %v4942_v25  ;;  %v4976_v25 = vld [vmem:[%s5963_s3 + $0x6a8] sm:$0xff]  ;;  %v4994_v22 = vld [vmem:[%s5963_s3 + $0x738] sm:$0xff] }
  0xc0   : > { %2426 = vmatpush.bf16.msrb.mxu3 %v4950_v26  ;;  %v4984_v26 = vld [vmem:[%s5963_s3 + $0x6e8] sm:$0xff] }
  0xc1   : > { %2232 = vmatpush.bf16.msrb.mxu0 %v4925_v37  ;;  %v4975_v37 = vld [vmem:[%s5963_s3 + $0x6a0] sm:$0xff] }
  0xc2   : > { %2245 = vmatpush.bf16.msrb.mxu1 %v4933_v38  ;;  %v691_v27 = vld [vmem:[#allocation3] sm:$0x7f] }
  0xc3   : > { %2414 = vmatpush.bf16.msrb.mxu2 %v4941_v39  ;;  %v4983_v38 = vld [vmem:[%s5963_s3 + $0x6e0] sm:$0xff] }
  0xc4   : > { %2427 = vmatpush.bf16.msrb.mxu3 %v4949_v40  ;;  %v282_v40 = vld [vmem:[%s5182_s15 + $0x30] sm:$0x1] }
  0xc5   : > { %2233 = vmatpush.bf16.msrb.mxu0 %v4924_v43  ;;  %v4966_v43 = vld [vmem:[%s5963_s3 + $0x658] sm:$0xff] }
  0xc6   : > { %2246 = vmatpush.bf16.msrb.mxu1 %v4932_v44  ;;  %v4974_v44 = vld [vmem:[%s5963_s3 + $0x698] sm:$0xff] }
  0xc7   : > { %2415 = vmatpush.bf16.msrb.mxu2 %v4940_v45  ;;  %v296_v45 = vmul.f32 %v5210_v28, %v282_v40  ;;  %v4992_v40 = vld [vmem:[%s5963_s3 + $0x728] sm:$0xff] }
  0xc8   : > { %2428 = vmatpush.bf16.msrb.mxu3 %v4948_v46  ;;  %v297_v46 = vmul.f32 %v5214_v30, %v283_v41  ;;  %v2441_v30 = vpack.c.bf16 %v2439_v48, %v2437_v47  ;;  %v5000_v41 = vld [vmem:[%s5963_s3 + $0x768] sm:$0xff]  ;;  %v4991_v47 = vld [vmem:[%s5963_s3 + $0x720] sm:$0xff] }
  0xc9   : > { %2234 = vmatpush.bf16.msrb.mxu0 %v4923_v57  ;;  %v836_v32 = vpop.f32.mrf.mxu0  ;;  %v310_v52 = vadd.f32 %v5212_v29, %v296_v45  ;;  %v2442_v29 = vpack.c.bf16 %v2440_v51, %v2438_v50  ;;  %v4999_v48 = vld [vmem:[%s5963_s3 + $0x760] sm:$0xff] }
  0xca   : > { %2247 = vmatpush.bf16.msrb.mxu1 %v4931_v58  ;;  %v849_v33 = vpop.f32.mrf.mxu1  ;;  %v311_v53 = vadd.f32 %v5216_v31, %v297_v46  ;;  %v4973_v31 = vld [vmem:[%s5963_s3 + $0x690] sm:$0xff]  ;;  %v2478_v2 = vshrl.u32 %v2441_v30, 16  ;;  %v2481_v5 = vshll.u32 %v2441_v30, 16  ;;  %v5007_v50 = vld [vmem:[%s5963_s3 + $0x7a0] sm:$0xff] }
  0xcb   : > { %2416 = vmatpush.bf16.msrb.mxu2 %v4939_v59  ;;  %v850_v36 = vadd.f32 %v849_v33, %v836_v32  ;;  %v326_v57 = vmul.f32 0.2, %v310_v52  ;;  %v4957_v59 = vld [vmem:[%s5963_s3 + $0x610] sm:$0xff]  ;;  %vm318_vm6 = vcmp.ge.f32.partialorder %v310_v52, 0.0  ;;  %v5015_v51 = vld [vmem:[%s5963_s3 + $0x7e0] sm:$0xff] }
  0xcc   : > { %2429 = vmatpush.bf16.msrb.mxu3 %v4947_v60  ;;  %2235 = vmatmul.bf16.vlgmr.msrb.gmra.mxu0 %v2127_v11  ;;  %v327_v58 = vmul.f32 0.2, %v311_v53  ;;  %v4965_v60 = vld [vmem:[%s5963_s3 + $0x650] sm:$0xff]  ;;  %vm319_vm7 = vcmp.ge.f32.partialorder %v311_v53, 0.0  ;;  %v2782_v30 = vld [vmem:[#allocation2 + $0x20] sm:$0xfe] }
  0xcd   : > { %2591 = vmatpush.bf16.msra.mxu0 %v4962_v6  ;;  %2248 = vmatmul.bf16.vlgmr.msrb.gmra.mxu1 %v2128_v12  ;;  %v853_v39 = vadd.f32 %v850_v36, %v691_v27  ;;  %v334_v63 = vsel %vm318_vm6, %v310_v52, %v326_v57  ;;  %v2486_v6 = vshrl.u32 %v2442_v29, 16  ;;  %v5018_v27 = vld [vmem:[%s5963_s3 + $0x7f8] sm:$0xff]  ;;  %v4993_v36 = vld [vmem:[%s5963_s3 + $0x730] sm:$0xff] }
  0xce   : > { %2604 = vmatpush.bf16.msra.mxu1 %v4970_v7  ;;  %2417 = vmatmul.bf16.vlgmr.msrb.gmra.mxu2 %v2302_v15  ;;  %v335_v0 = vsel %vm319_vm7, %v311_v53, %v327_v58  ;;  %342 = vst [vmem:[#allocation2 + $0x28] sm:$0x1] %v334_v63  ;;  %v2489_v7 = vshll.u32 %v2442_v29, 16  ;;  %v4963_v15 = vld [vmem:[%s5963_s3 + $0x640] sm:$0xff]  ;;  %v4990_v53 = vld [vmem:[%s5963_s3 + $0x718] sm:$0xff] }
  0xcf   : > { %2753 = vmatpush.bf16.msra.mxu2 %v4978_v9  ;;  %2430 = vmatmul.bf16.vlgmr.msrb.gmra.mxu3 %v2310_v16  ;;  %854 = vst [vmem:[#allocation3] sm:$0x7f] %v853_v39  ;;  %v4972_v9 = vld [vmem:[%s5963_s3 + $0x688] sm:$0xff]  ;;  %v2480_v16 = vrot.slane %v2478_v2, 3  ;;  %v5017_v39 = vld [vmem:[%s5963_s3 + $0x7f0] sm:$0xff] }
  0xd0   : > { %2766 = vmatpush.bf16.msra.mxu3 %v4986_v10  ;;  %343 = vst [vmem:[#allocation2 + $0x38] sm:$0x1] %v335_v0  ;;  %v4980_v10 = vld [vmem:[%s5963_s3 + $0x6c8] sm:$0xff]  ;;  %v5005_v0 = vld [vmem:[%s5963_s3 + $0x790] sm:$0xff] }
  0xd1   : > { %2592 = vmatpush.bf16.msra.mxu0 %v4961_v17  ;;  %v1018_v28 = vpop.f32.mrf.mxu2  ;;  %v838_v55 = vpop.f32.mrf.mxu0  ;;  %v2483_v17 = vrot.slane %v2481_v5, 4  ;;  %v4988_v2 = vld [vmem:[%s5963_s3 + $0x708] sm:$0xff] }
  0xd2   : > { %2605 = vmatpush.bf16.msra.mxu1 %v4969_v18  ;;  %v1031_v54 = vpop.f32.mrf.mxu3  ;;  %v851_v56 = vpop.f32.mrf.mxu1  ;;  %v2488_v18 = vrot.slane %v2486_v6, 3  ;;  %v5006_v55 = vld [vmem:[%s5963_s3 + $0x798] sm:$0xff] }
  0xd3   : > { %2754 = vmatpush.bf16.msra.mxu2 %v4977_v19  ;;  %v1032_v61 = vadd.f32 %v1031_v54, %v1018_v28  ;;  %v2491_v19 = vrot.slane %v2489_v7, 4  ;;  %v2484_v32 = vor.u32 %v2483_v17, %v2480_v16  ;;  %v4998_v28 = vld [vmem:[%s5963_s3 + $0x758] sm:$0xff]  ;;  %v2781_v54 = vld [vmem:[#allocation2 + $0x8] sm:$0xfe] }
  0xd4   : > { %2767 = vmatpush.bf16.msra.mxu3 %v4985_v20  ;;  %v4971_v20 = vld [vmem:[%s5963_s3 + $0x680] sm:$0xff]  ;;  %v5014_v56 = vld [vmem:[%s5963_s3 + $0x7d8] sm:$0xff]  ;;  %v5004_v7 = vld [vmem:[%s5963_s3 + $0x788] sm:$0xff] }
  0xd5   : > { %2593 = vmatpush.bf16.msra.mxu0 %v4960_v23  ;;  %v5002_v23 = vld [vmem:[%s5963_s3 + $0x778] sm:$0xff]  ;;  %v2492_v33 = vor.u32 %v2491_v19, %v2488_v18 }
  0xd6   : > { %2606 = vmatpush.bf16.msra.mxu1 %v4968_v24  ;;  %v861_v1 = vld [vmem:[#allocation3] sm:$0x7f]  ;;  %v2619_v24 = vld [vmem:[#allocation2 + $0x8] sm:$0x7f] }
  0xd7   : > { %2755 = vmatpush.bf16.msra.mxu2 %v4976_v25  ;;  %v1035_v8 = vadd.f32 %v1032_v61, %v861_v1  ;;  %v2620_v25 = vld [vmem:[#allocation2 + $0x20] sm:$0x7f]  ;;  %v5013_v1 = vld [vmem:[%s5963_s3 + $0x7d0] sm:$0xff] }
  0xd8   : > { %2768 = vmatpush.bf16.msra.mxu3 %v4984_v26  ;;  %v5010_v26 = vld [vmem:[%s5963_s3 + $0x7b8] sm:$0xff] }
  0xd9   : > { %2594 = vmatpush.bf16.msra.mxu0 %v4959_v34  ;;  %1036 = vst [vmem:[#allocation3] sm:$0x7f] %v1035_v8  ;;  %v1020_v11 = vpop.f32.mrf.mxu2  ;;  %v2621_v34 = vpack.c.bf16 %v2619_v24, %v2619_v24  ;;  %v5012_v8 = vld [vmem:[%s5963_s3 + $0x7c8] sm:$0xff] }
  0xda   : > { %2607 = vmatpush.bf16.msra.mxu1 %v4967_v35  ;;  %v1033_v12 = vpop.f32.mrf.mxu3  ;;  %v2622_v35 = vpack.c.bf16 %v2620_v25, %v2620_v25  ;;  %v2961_v11 = vld [vmem:[#allocation2 + $0x28] sm:$0x1]  ;;  %v5003_v25 = vld [vmem:[%s5963_s3 + $0x780] sm:$0xff] }
  0xdb   : > { %2756 = vmatpush.bf16.msra.mxu2 %v4975_v37  ;;  %v5001_v37 = vld [vmem:[%s5963_s3 + $0x770] sm:$0xff]  ;;  %v2960_v12 = vld [vmem:[#allocation2 + $0x20] sm:$0xfc] }
  0xdc   : > { %2769 = vmatpush.bf16.msra.mxu3 %v4983_v38  ;;  %v5009_v38 = vld [vmem:[%s5963_s3 + $0x7b0] sm:$0xff] }
  0xdd   : > { %2595 = vmatpush.bf16.msra.mxu0 %v4958_v42  ;;  %v5008_v42 = vld [vmem:[%s5963_s3 + $0x7a8] sm:$0xff] }
  0xde   : > { %2608 = vmatpush.bf16.msra.mxu1 %v4966_v43  ;;  %v5016_v43 = vld [vmem:[%s5963_s3 + $0x7e8] sm:$0xff] }
  0xdf   : > { %2757 = vmatpush.bf16.msra.mxu2 %v4974_v44 }
  0xe0   : > { %2770 = vmatpush.bf16.msra.mxu3 %v4982_v49  ;;  %v1043_v45 = vld [vmem:[#allocation3] sm:$0x7f] }
  0xe1   : > { %2596 = vmatpush.bf16.msra.mxu0 %v4957_v59  ;;  %v2783_v59 = vpack.c.bf16 %v2781_v54, %v2781_v54 }
  0xe2   : > { %2609 = vmatpush.bf16.msra.mxu1 %v4965_v60  ;;  %v2784_v60 = vpack.c.bf16 %v2782_v30, %v2782_v30 }
  0xe3   : > { %2758 = vmatpush.bf16.msra.mxu2 %v4973_v31  ;;  %v4989_v31 = vld [vmem:[%s5963_s3 + $0x710] sm:$0xff]  ;;  %v2822_v5 = vshll.u32 %v2783_v59, 16  ;;  %v2820_v17 = vshrl.u32 %v2783_v59, 16 }
  0xe4   : > { %2771 = vmatpush.bf16.msra.mxu3 %v4981_v62  ;;  %v4997_v62 = vld [vmem:[%s5963_s3 + $0x750] sm:$0xff]  ;;  %v2829_v6 = vshll.u32 %v2784_v60, 16  ;;  %v2827_v19 = vshrl.u32 %v2784_v60, 16 }
  0xe5   : > { %2597 = vmatpush.bf16.msra.mxu0 %v4956_v3  ;;  %v4996_v3 = vld [vmem:[%s5963_s3 + $0x748] sm:$0xff]  ;;  %v2824_v18 = vrot.slane %v2822_v5, 1 }
  0xe6   : > { %2610 = vmatpush.bf16.msra.mxu1 %v4964_v4 }
  0xe7   : > { %2759 = vmatpush.bf16.msra.mxu2 %v4972_v9 }
  0xe8   : > { %2772 = vmatpush.bf16.msra.mxu3 %v4980_v10  ;;  %v2959_v10 = vld [vmem:[#allocation2 + $0x8] sm:$0xfc] }
  0xe9   : > { %2598 = vmatpush.bf16.msra.mxu0 %v4955_v14  ;;  %v1200_v44 = vpop.f32.mrf.mxu0  ;;  %v2962_v14 = vld [vmem:[#allocation2 + $0x38] sm:$0x1] }
  0xea   : > { %2611 = vmatpush.bf16.msra.mxu1 %v4963_v15  ;;  %v1213_v46 = vpop.f32.mrf.mxu1  ;;  %v2964_v24 = vpack.c.bf16 %v2962_v14, %v2960_v12 }
  0xeb   : > { %2760 = vmatpush.bf16.msra.mxu2 %v4971_v20  ;;  %v1214_v49 = vadd.f32 %v1213_v46, %v1200_v44  ;;  %v2831_v20 = vrot.slane %v2829_v6, 1 }
  0xec   : > { %2773 = vmatpush.bf16.msra.mxu3 %v4979_v21  ;;  %2599 = vmatmul.bf16.vlgmr.msra.gmra.mxu0 %v2484_v32  ;;  %v4987_v21 = vld [vmem:[%s5963_s3 + $0x700] sm:$0xff] }
  0xed   : > { %2931 = vmatpush.bf16.msrb.mxu0 %v4994_v22  ;;  %2612 = vmatmul.bf16.vlgmr.msra.gmra.mxu1 %v2492_v33  ;;  %v1217_v52 = vadd.f32 %v1214_v49, %v1043_v45  ;;  %v4995_v22 = vld [vmem:[%s5963_s3 + $0x740] sm:$0xff]  ;;  %v2832_v32 = vor.u32 %v2831_v20, %v2827_v19 }
  0xee   : > { %2944 = vmatpush.bf16.msrb.mxu1 %v5002_v23  ;;  %2761 = vmatmul.bf16.vlgmr.msra.gmra.mxu2 %v2621_v34  ;;  %v2963_v23 = vpack.c.bf16 %v2961_v11, %v2959_v10  ;;  %v3002_v34 = vrot.slane %v2964_v24, 1 }
  0xef   : > { %3101 = vmatpush.bf16.msrb.mxu2 %v5010_v26  ;;  %2774 = vmatmul.bf16.vlgmr.msra.gmra.mxu3 %v2622_v35  ;;  %1218 = vst [vmem:[#allocation3] sm:$0x7f] %v1217_v52  ;;  %v5011_v26 = vld [vmem:[%s5963_s3 + $0x7c0] sm:$0xff] }
  0xf0   : > { %3114 = vmatpush.bf16.msrb.mxu3 %v5018_v27  ;;  %v2825_v27 = vor.u32 %v2824_v18, %v2820_v17  ;;  %v3001_v33 = vrot.slane %v2963_v23, 1 }
  0xf1   : > { %2932 = vmatpush.bf16.msrb.mxu0 %v4993_v36  ;;  %v1370_v57 = vpop.f32.mrf.mxu2  ;;  %v1202_v29 = vpop.f32.mrf.mxu0 }
  0xf2   : > { %2945 = vmatpush.bf16.msrb.mxu1 %v5001_v37  ;;  %v1383_v58 = vpop.f32.mrf.mxu3  ;;  %v1215_v61 = vpop.f32.mrf.mxu1 }
  0xf3   : > { %3102 = vmatpush.bf16.msrb.mxu2 %v5009_v38  ;;  %v1384_v63 = vadd.f32 %v1383_v58, %v1370_v57 }
  0xf4   : > { %3115 = vmatpush.bf16.msrb.mxu3 %v5017_v39 }
  0xf5   : > { %2933 = vmatpush.bf16.msrb.mxu0 %v4992_v40 }
  0xf6   : > { %2946 = vmatpush.bf16.msrb.mxu1 %v5000_v41  ;;  %v1225_v4 = vld [vmem:[#allocation3] sm:$0x7f] }
  0xf7   : > { %3103 = vmatpush.bf16.msrb.mxu2 %v5008_v42  ;;  %v1387_v9 = vadd.f32 %v1384_v63, %v1225_v4 }
  0xf8   : > { %3116 = vmatpush.bf16.msrb.mxu3 %v5016_v43 }
  0xf9   : > { %2934 = vmatpush.bf16.msrb.mxu0 %v4991_v47  ;;  %1388 = vst [vmem:[#allocation3] sm:$0x7f] %v1387_v9  ;;  %v1372_v15 = vpop.f32.mrf.mxu2 }
  0xfa   : > { %2947 = vmatpush.bf16.msrb.mxu1 %v4999_v48  ;;  %v1385_v16 = vpop.f32.mrf.mxu3 }
  0xfb   : > { %3104 = vmatpush.bf16.msrb.mxu2 %v5007_v50 }
  0xfc   : > { %3117 = vmatpush.bf16.msrb.mxu3 %v5015_v51 }
  0xfd   : > { %2935 = vmatpush.bf16.msrb.mxu0 %v4990_v53 }
  0xfe   : > { %2948 = vmatpush.bf16.msrb.mxu1 %v4998_v28 }
  0xff   : > { %3105 = vmatpush.bf16.msrb.mxu2 %v5006_v55 }
 0x100   : > { %3118 = vmatpush.bf16.msrb.mxu3 %v5014_v56  ;;  %v1395_v36 = vld [vmem:[#allocation3] sm:$0x7f] }
 0x101   : > { %2936 = vmatpush.bf16.msrb.mxu0 %v4989_v31 }
 0x102   : > { %2949 = vmatpush.bf16.msrb.mxu1 %v4997_v62 }
 0x103   : > { %3106 = vmatpush.bf16.msrb.mxu2 %v5005_v0 }
 0x104   : > { %3119 = vmatpush.bf16.msrb.mxu3 %v5013_v1 }
 0x105   : > { %2937 = vmatpush.bf16.msrb.mxu0 %v4988_v2 }
 0x106   : > { %2950 = vmatpush.bf16.msrb.mxu1 %v4996_v3 }
 0x107   : > { %3107 = vmatpush.bf16.msrb.mxu2 %v5004_v7 }
 0x108   : > { %3120 = vmatpush.bf16.msrb.mxu3 %v5012_v8 }
 0x109   : > { %2938 = vmatpush.bf16.msrb.mxu0 %v4987_v21  ;;  %v1552_v35 = vpop.f32.mrf.mxu0 }
 0x10a   : > { %2951 = vmatpush.bf16.msrb.mxu1 %v4995_v22  ;;  %v1565_v37 = vpop.f32.mrf.mxu1 }
 0x10b   : > { %3108 = vmatpush.bf16.msrb.mxu2 %v5003_v25  ;;  %v1566_v38 = vadd.f32 %v1565_v37, %v1552_v35 }
 0x10c   : > { %3121 = vmatpush.bf16.msrb.mxu3 %v5011_v26  ;;  %2939 = vmatmul.bf16.vlgmr.msrb.gmra.mxu0 %v2825_v27 }
 0x10d   : > { %2952 = vmatmul.bf16.vlgmr.msrb.gmra.mxu1 %v2832_v32  ;;  %v1569_v39 = vadd.f32 %v1566_v38, %v1395_v36 }
 0x10e   : > { %3109 = vmatmul.bf16.vlgmr.msrb.gmra.mxu2 %v3001_v33 }
 0x10f   : > { %3122 = vmatmul.bf16.vlgmr.msrb.gmra.mxu3 %v3002_v34  ;;  %1570 = vst [vmem:[#allocation3] sm:$0x7f] %v1569_v39 }
 0x111   : > { %v1714_v40 = vpop.f32.mrf.mxu2  ;;  %v1554_v42 = vpop.f32.mrf.mxu0 }
 0x112   : > { %v1727_v41 = vpop.f32.mrf.mxu3  ;;  %v1567_v43 = vpop.f32.mrf.mxu1 }
 0x113   : > { %v1728_v44 = vadd.f32 %v1727_v41, %v1714_v40 }
 0x116   : > { %v1575_v45 = vld [vmem:[#allocation3] sm:$0x7f] }
 0x117   : > { %v1731_v46 = vadd.f32 %v1728_v44, %v1575_v45 }
 0x119   : > { %1732 = vst [vmem:[#allocation3] sm:$0x7f] %v1731_v46  ;;  %v1716_v47 = vpop.f32.mrf.mxu2 }
 0x11a   : > { %v1729_v48 = vpop.f32.mrf.mxu3 }
 0x120   : > { %v1739_v52 = vld [vmem:[#allocation3] sm:$0x7f] }
 0x129   : > { %v1884_v49 = vpop.f32.mrf.mxu0 }
 0x12a   : > { %v1897_v50 = vpop.f32.mrf.mxu1 }
 0x12b   : > { %v1898_v51 = vadd.f32 %v1897_v50, %v1884_v49 }
 0x12d   : > { %v1901_v53 = vadd.f32 %v1898_v51, %v1739_v52 }
 0x12f   : > { %1902 = vst [vmem:[#allocation3] sm:$0x7f] %v1901_v53 }
 0x131   : > { %v2066_v28 = vpop.f32.mrf.mxu2  ;;  %v1886_v30 = vpop.f32.mrf.mxu0 }
 0x132   : > { %v2079_v54 = vpop.f32.mrf.mxu3  ;;  %v1899_v55 = vpop.f32.mrf.mxu1 }
 0x133   : > { %v2080_v56 = vadd.f32 %v2079_v54, %v2066_v28 }
 0x136   : > { %v1909_v57 = vld [vmem:[#allocation3] sm:$0x7f] }
 0x137   : > { %v2083_v58 = vadd.f32 %v2080_v56, %v1909_v57 }
 0x139   : > { %2084 = vst [vmem:[#allocation3] sm:$0x7f] %v2083_v58  ;;  %v2068_v59 = vpop.f32.mrf.mxu2 }
 0x13a   : > { %v2081_v60 = vpop.f32.mrf.mxu3 }
 0x140   : > { %v2091_v62 = vld [vmem:[#allocation3] sm:$0x7f] }
 0x149   : > { %v2236_v29 = vpop.f32.mrf.mxu0 }
 0x14a   : > { %v2249_v61 = vpop.f32.mrf.mxu1 }
 0x14b   : > { %v2250_v31 = vadd.f32 %v2249_v61, %v2236_v29 }
 0x14d   : > { %v2253_v63 = vadd.f32 %v2250_v31, %v2091_v62 }
 0x14f   : > { %2254 = vst [vmem:[#allocation3] sm:$0x7f] %v2253_v63 }
 0x151   : > { %v2418_v0 = vpop.f32.mrf.mxu2  ;;  %v2238_v2 = vpop.f32.mrf.mxu0 }
 0x152   : > { %v2431_v1 = vpop.f32.mrf.mxu3  ;;  %v2251_v3 = vpop.f32.mrf.mxu1 }
 0x153   : > { %v2432_v4 = vadd.f32 %v2431_v1, %v2418_v0 }
 0x156   : > { %v2261_v5 = vld [vmem:[#allocation3] sm:$0x7f] }
 0x157   : > { %v2435_v6 = vadd.f32 %v2432_v4, %v2261_v5 }
 0x159   : > { %2436 = vst [vmem:[#allocation3] sm:$0x7f] %v2435_v6  ;;  %v2420_v7 = vpop.f32.mrf.mxu2 }
 0x15a   : > { %v2433_v8 = vpop.f32.mrf.mxu3 }
 0x160   : > { %v2443_v12 = vld [vmem:[#allocation3] sm:$0x7f] }
 0x169   : > { %v2600_v9 = vpop.f32.mrf.mxu0 }
 0x16a   : > { %v2613_v10 = vpop.f32.mrf.mxu1 }
 0x16b   : > { %v2614_v11 = vadd.f32 %v2613_v10, %v2600_v9 }
 0x16d   : > { %v2617_v14 = vadd.f32 %v2614_v11, %v2443_v12 }
 0x16f   : > { %2618 = vst [vmem:[#allocation3] sm:$0x7f] %v2617_v14 }
 0x171   : > { %v2762_v15 = vpop.f32.mrf.mxu2  ;;  %v2602_v17 = vpop.f32.mrf.mxu0 }
 0x172   : > { %v2775_v16 = vpop.f32.mrf.mxu3  ;;  %v2615_v18 = vpop.f32.mrf.mxu1 }
 0x173   : > { %v2776_v19 = vadd.f32 %v2775_v16, %v2762_v15 }
 0x176   : > { %v2623_v20 = vld [vmem:[#allocation3] sm:$0x7f] }
 0x177   : > { %v2779_v21 = vadd.f32 %v2776_v19, %v2623_v20 }
 0x179   : > { %2780 = vst [vmem:[#allocation3] sm:$0x7f] %v2779_v21  ;;  %v2764_v22 = vpop.f32.mrf.mxu2 }
 0x17a   : > { %v2777_v23 = vpop.f32.mrf.mxu3 }
 0x180   : > { %v2785_v27 = vld [vmem:[#allocation3] sm:$0x7f] }
 0x189   : > { %v2940_v24 = vpop.f32.mrf.mxu0 }
 0x18a   : > { %v2953_v25 = vpop.f32.mrf.mxu1 }
 0x18b   : > { %v2954_v26 = vadd.f32 %v2953_v25, %v2940_v24 }
 0x18d   : > { %v2957_v32 = vadd.f32 %v2954_v26, %v2785_v27 }
 0x18f   : > { %2958 = vst [vmem:[#allocation3] sm:$0x7f] %v2957_v32 }
 0x191   : > { %v3110_v33 = vpop.f32.mrf.mxu2  ;;  %v2942_v35 = vpop.f32.mrf.mxu0 }
 0x192   : > { %v3123_v34 = vpop.f32.mrf.mxu3  ;;  %v2955_v36 = vpop.f32.mrf.mxu1 }
 0x193   : > { %v3124_v37 = vadd.f32 %v3123_v34, %v3110_v33 }
 0x196   : > { %v2965_v38 = vld [vmem:[#allocation3] sm:$0x7f] }
 0x197   : > { %v3127_v39 = vadd.f32 %v3124_v37, %v2965_v38 }
 0x199   : > { %3128 = vst [vmem:[#allocation3] sm:$0x7f] %v3127_v39  ;;  %v3112_v40 = vpop.f32.mrf.mxu2 }
 0x19a   : > { %v3125_v41 = vpop.f32.mrf.mxu3 }
 0x1a0   : > { %v3129_v42 = vld [vmem:[#allocation3] sm:$0xff] }
 0x1a1   : > { %v3135_v43 = vadd.f32 %v5682_v13, %v3129_v42 }
 0x1a3   : > { %3137 = vst [vmem:[%s5693_s17] sm:$0xff] %v3135_v43 }
 0x1a4 PF: > { %s15_s20 = sadd.s32 1, %s5067_s20   ;;  %s5966_s18 = smov %s5063_s19 }
 0x1a5   : > { %p12_p5 = scmp.ge.s32.totalorder %s15_s20, 4   ;;  %s5967_s19 = smov %s5969_s21 }
 0x1a7   :  { %14 = sbr.rel (!%p12_p5) target bundleno = 2 (0x2), region = 91 }

</bundles_post_ra>
